<compile_context>
chip_gen: v6e
topology: v6e:2x2x1
jax: 0.10.0
libtpu: 0.0.40
codegen_flags: <defaults>
</compile_context>

<pallas_src>
import functools
import numpy as np
import jax
import jax.numpy as jnp
from jax.experimental import pallas as pl
from jax.experimental.pallas import tpu as pltpu

BN_EPS = 1e-5
LEAKY_SLOPE = 0.1

# conv1: padded input flattened with row width 30 -> tap offsets.
_CONV1_OFFS = tuple(dy * 30 + dx for dy in range(3) for dx in range(3))
# conv2: 4 phase buffers of 256 lanes each (16x16), window row width 16.
_CONV2_STARTS = tuple(
    ((dy % 2) * 2 + (dx % 2)) * 256 + (dy // 2) * 16 + (dx // 2)
    for dy in range(3) for dx in range(3))
# conv3: 4 phase buffers of 72 lanes each (9x8), window row width 8.
_CONV3_STARTS = tuple(
    ((dy % 2) * 2 + (dx % 2)) * 72 + (dy // 2) * 8 + (dx // 2)
    for dy in range(3) for dx in range(3))


# ------------------------------ Pallas kernels -------------------------------
def _conv_stack_kernel(x_ref, w1_ref, b1_ref, s2_ref, w2_ref, t2_ref,
                       s3_ref, w3_ref, t3_ref, o_ref, p2_ref, p3_ref, *, slope):
    """conv1+LReLU -> conv2+BN+LReLU -> conv3+BN+LReLU for one image (channel-major).

    x_ref : (1, 1, 930)   padded 28x28 input, row-flattened (row width 30)
    w1_ref: (32, 9)       conv1 weights, channel-major per tap
    b1_ref: (32, 1)       conv1 bias
    s2_ref: (840, 1024)   0/1 selection: conv1 spatial -> 4 conv2 phase buffers
    w2_ref: (9, 64, 32)   conv2 weights (BN scale folded), channel-major per tap
    t2_ref: (64, 1)       conv2 folded shift
    s3_ref: (224, 288)    0/1 selection: conv2 spatial -> 4 conv3 phase buffers
    w3_ref: (9, 128, 64)  conv3 weights (BN scale folded), channel-major per tap
    t3_ref: (128, 1)      conv3 folded shift
    o_ref : (1, 128, 56)  conv3 output, channel-major (spatial row width 8, col 7 junk)
    p2_ref, p3_ref        VMEM scratch phase buffers
    """
    # ---- conv1: Cin=1 -> 9 VPU broadcast multiply-adds, (32, 840) accumulator ----
    w1 = w1_ref[...]
    acc1 = jnp.zeros((32, 840), jnp.float32)
    for k, off in enumerate(_CONV1_OFFS):
        win = x_ref[0, :, off:off + 840]                       # (1, 840) unit-stride window
        acc1 = acc1 + w1[:, k:k + 1] * win
    a1 = acc1 + b1_ref[...]
    a1 = jnp.maximum(a1, slope * a1)

    # ---- space-to-depth for conv2 via one selection matmul (exact 0/1 gather) ----
    p2_ref[...] = jnp.dot(a1.astype(jnp.bfloat16), s2_ref[...],
                          preferred_element_type=jnp.float32).astype(jnp.bfloat16)

    # ---- conv2: 9 accumulating MXU matmuls (64,32)@(32,224) ----
    acc2 = jnp.zeros((64, 224), jnp.float32)
    for k, start in enumerate(_CONV2_STARTS):
        acc2 = acc2 + jnp.dot(w2_ref[k], p2_ref[:, start:start + 224],
                              preferred_element_type=jnp.float32)
    a2 = acc2 + t2_ref[...]
    a2 = jnp.maximum(a2, slope * a2)

    # ---- space-to-depth for conv3 ----
    p3_ref[...] = jnp.dot(a2.astype(jnp.bfloat16), s3_ref[...],
                          preferred_element_type=jnp.float32).astype(jnp.bfloat16)

    # ---- conv3: 9 accumulating MXU matmuls (128,64)@(64,56) ----
    acc3 = jnp.zeros((128, 56), jnp.float32)
    for k, start in enumerate(_CONV3_STARTS):
        acc3 = acc3 + jnp.dot(w3_ref[k], p3_ref[:, start:start + 56],
                              preferred_element_type=jnp.float32)
    a3 = acc3 + t3_ref[...]
    a3 = jnp.maximum(a3, slope * a3)
    o_ref[0] = a3.astype(o_ref.dtype)


def _linear_kernel(x_ref, w_ref, b_ref, o_ref):
    acc = jnp.dot(x_ref[...], w_ref[...], preferred_element_type=jnp.float32)
    o_ref[...] = (acc + b_ref[...]).astype(o_ref.dtype)


# ------------------------------ kernel wrappers -------------------------------
def encoder_convs(xrow, q):
    """Fused conv1/conv2/conv3 for a batch; returns (B, 128, 56) bf16 channel-major."""
    B = xrow.shape[0]
    kernel = functools.partial(_conv_stack_kernel, slope=LEAKY_SLOPE)
    return pl.pallas_call(
        kernel,
        out_shape=jax.ShapeDtypeStruct((B, 128, 56), jnp.bfloat16),
        grid=(B,),
        in_specs=[
            pl.BlockSpec((1, 1, 930), lambda b: (b, 0, 0)),       # padded input row
            pl.BlockSpec((32, 9), lambda b: (0, 0)),              # w1
            pl.BlockSpec((32, 1), lambda b: (0, 0)),              # b1
            pl.BlockSpec((840, 1024), lambda b: (0, 0)),          # S2
            pl.BlockSpec((9, 64, 32), lambda b: (0, 0, 0)),       # w2
            pl.BlockSpec((64, 1), lambda b: (0, 0)),              # t2
            pl.BlockSpec((224, 288), lambda b: (0, 0)),           # S3
            pl.BlockSpec((9, 128, 64), lambda b: (0, 0, 0)),      # w3
            pl.BlockSpec((128, 1), lambda b: (0, 0)),             # t3
        ],
        out_specs=pl.BlockSpec((1, 128, 56), lambda b: (b, 0, 0)),
        scratch_shapes=[
            pltpu.VMEM((32, 1024), jnp.bfloat16),                 # conv2 phase buffers
            pltpu.VMEM((64, 288), jnp.bfloat16),                  # conv3 phase buffers
        ],
        compiler_params=pltpu.CompilerParams(dimension_semantics=("parallel",)),
    )(xrow, q["w1"], q["b1"], q["S2"], q["w2"], q["t2"], q["S3"], q["w3"], q["t3"])


def linear(x, w, b):
    M, K = x.shape
    N = w.shape[1]
    return pl.pallas_call(
        _linear_kernel,
        out_shape=jax.ShapeDtypeStruct((M, N), jnp.float32),
        grid=(1,),
        in_specs=[
            pl.BlockSpec((M, K), lambda i: (0, 0)),
            pl.BlockSpec((K, N), lambda i: (0, 0)),
            pl.BlockSpec((1, N), lambda i: (0, 0)),
        ],
        out_specs=pl.BlockSpec((M, N), lambda i: (0, 0)),
        compiler_params=pltpu.CompilerParams(dimension_semantics=("arbitrary",)),
    )(x, w, b)


# ------------------------------- parameters ----------------------------------
def init_params(key, z_dim=20):
    ks = jax.random.split(key, 16)
    p = {}
    p["w1"] = jax.random.normal(ks[0], (3, 3, 1, 32), jnp.float32) * 0.2
    p["b1"] = jax.random.normal(ks[1], (32,), jnp.float32) * 0.05
    p["w2"] = jax.random.normal(ks[2], (3, 3, 32, 64), jnp.float32) * 0.05
    p["b2"] = jax.random.normal(ks[3], (64,), jnp.float32) * 0.05
    p["w3"] = jax.random.normal(ks[4], (3, 3, 64, 128), jnp.float32) * 0.05
    p["b3"] = jax.random.normal(ks[5], (128,), jnp.float32) * 0.05
    p["bn2_gamma"] = 1.0 + 0.1 * jax.random.normal(ks[6], (64,), jnp.float32)
    p["bn2_beta"] = 0.1 * jax.random.normal(ks[7], (64,), jnp.float32)
    p["bn2_mean"] = 0.05 * jax.random.normal(ks[8], (64,), jnp.float32)
    p["bn2_var"] = 1.0 + 0.1 * jax.random.uniform(ks[9], (64,), jnp.float32)
    p["bn3_gamma"] = 1.0 + 0.1 * jax.random.normal(ks[10], (128,), jnp.float32)
    p["bn3_beta"] = 0.1 * jax.random.normal(ks[11], (128,), jnp.float32)
    p["bn3_mean"] = 0.05 * jax.random.normal(ks[12], (128,), jnp.float32)
    p["bn3_var"] = 1.0 + 0.1 * jax.random.uniform(ks[13], (128,), jnp.float32)
    # Linear: PyTorch weight is (out, in); out = x @ W.T + b, NCHW flatten order.
    p["wl"] = jax.random.normal(ks[14], (z_dim, 128 * 7 * 7), jnp.float32) * 0.01
    p["bl"] = jax.random.normal(ks[15], (z_dim,), jnp.float32) * 0.05
    return p


def _fold_bn(gamma, beta, mean, var, conv_bias):
    # y = gamma * (conv + bias - mean) / sqrt(var+eps) + beta = conv*s + t
    s = gamma / jnp.sqrt(var + BN_EPS)
    t = (conv_bias - mean) * s + beta
    return s, t


def _build_selection_matrices():
    # S2: conv1 output lane m = h*30 + w (h,w in [0,28); w>=28 junk)  ->
    #     4 space-to-depth phases of pad(out1,1), phase (py,px) is 16x16 (256 lanes).
    s2 = np.zeros((840, 4, 16, 16), np.float32)
    for py in range(2):
        for px in range(2):
            for u in range(16):
                for v in range(16):
                    h = 2 * u + py - 1
                    w = 2 * v + px - 1
                    if 0 <= h < 28 and 0 <= w < 28:
                        s2[h * 30 + w, py * 2 + px, u, v] = 1.0
    # S3: conv2 output lane m = i*16 + j (i,j in [0,14); j>=14 junk)  ->
    #     4 phases of pad(out2,1), phase (a,b) is 9x8 (72 lanes; last row stays zero).
    s3 = np.zeros((224, 4, 9, 8), np.float32)
    for a in range(2):
        for b in range(2):
            for u in range(9):
                for v in range(8):
                    i = 2 * u + a - 1
                    j = 2 * v + b - 1
                    if 0 <= i < 14 and 0 <= j < 14:
                        s3[i * 16 + j, a * 2 + b, u, v] = 1.0
    return s2.reshape(840, 1024), s3.reshape(224, 288)


def prepare_params(p, z_dim=20):
    """One-time weight-side preprocessing (all glue hoisted out of the forward path)."""
    q = {}
    # conv1: channel-major (32, 9), f32 (VPU path).
    q["w1"] = jnp.transpose(p["w1"].reshape(9, 32), (1, 0)).astype(jnp.float32)
    q["b1"] = p["b1"].reshape(32, 1).astype(jnp.float32)
    # conv2/conv3: fold BN scale into weights, channel-major (9, Cout, Cin), bf16.
    s2, t2 = _fold_bn(p["bn2_gamma"], p["bn2_beta"], p["bn2_mean"], p["bn2_var"], p["b2"])
    q["w2"] = jnp.transpose((p["w2"] * s2).reshape(9, 32, 64), (0, 2, 1)).astype(jnp.bfloat16)
    q["t2"] = t2.reshape(64, 1).astype(jnp.float32)
    s3, t3 = _fold_bn(p["bn3_gamma"], p["bn3_beta"], p["bn3_mean"], p["bn3_var"], p["b3"])
    q["w3"] = jnp.transpose((p["w3"] * s3).reshape(9, 64, 128), (0, 2, 1)).astype(jnp.bfloat16)
    q["t3"] = t3.reshape(128, 1).astype(jnp.float32)
    # space-to-depth selection matrices (exact 0/1 gathers), bf16 MXU operands.
    sel2, sel3 = _build_selection_matrices()
    q["S2"] = jnp.asarray(sel2, dtype=jnp.bfloat16)
    q["S3"] = jnp.asarray(sel3, dtype=jnp.bfloat16)
    # Linear: (z, 6272) over NCHW flatten -> (7168, z) matching the kernel's
    # channel-major (128, 7, 8) output layout; junk column (j=7) gets zero rows.
    wl = p["wl"].reshape(z_dim, 128, 7, 7)
    wl = jnp.transpose(wl, (1, 2, 3, 0))                       # (128, 7, 7, z)
    wl = jnp.pad(wl, ((0, 0), (0, 0), (0, 1), (0, 0)))         # (128, 7, 8, z)
    q["wl"] = wl.reshape(128 * 56, z_dim).astype(jnp.bfloat16)
    q["bl"] = p["bl"].reshape(1, z_dim).astype(jnp.float32)
    return q


# ------------------------------ forward pass ----------------------------------
@jax.jit
def encoder_forward(x_nchw, q):
    B = x_nchw.shape[0]
    # Only input prep runs in XLA: pad (1 top, 2 bottom, 1 left/right) + row-flatten.
    xp = jnp.pad(x_nchw[:, 0, :, :], ((0, 0), (1, 2), (1, 1)))   # (B, 31, 30)
    xrow = xp.reshape(B, 1, 31 * 30)
    feats = encoder_convs(xrow, q)                               # (B, 128, 56) bf16
    feats = feats.reshape(B, 128 * 56)                           # free dim collapse
    return linear(feats, q["wl"], q["bl"])


# --------------------------- pure-JAX reference -------------------------------
def encoder_reference(x_nchw, p):
    def conv(x, w, stride):
        return jax.lax.conv_general_dilated(
            x, w, (stride, stride), ((1, 1), (1, 1)),
            dimension_numbers=("NHWC", "HWIO", "NHWC"))

    def lrelu(x):
        return jnp.where(x >= 0, x, LEAKY_SLOPE * x)

    x = jnp.transpose(x_nchw, (0, 2, 3, 1))
    x = lrelu(conv(x, p["w1"], 1) + p["b1"])
    y = conv(x, p["w2"], 2) + p["b2"]
    y = (y - p["bn2_mean"]) / jnp.sqrt(p["bn2_var"] + BN_EPS) * p["bn2_gamma"] + p["bn2_beta"]
    x = lrelu(y)
    y = conv(x, p["w3"], 2) + p["b3"]
    y = (y - p["bn3_mean"]) / jnp.sqrt(p["bn3_var"] + BN_EPS) * p["bn3_gamma"] + p["bn3_beta"]
    x = lrelu(y)
    B = x.shape[0]
    x = jnp.transpose(x, (0, 3, 1, 2)).reshape(B, 128 * 7 * 7)
    return x @ p["wl"].T + p["bl"]


if __name__ == "__main__":
    key = jax.random.PRNGKey(0)
    kx, kp = jax.random.split(key)
    # MNIST-like input implied by the 128*7*7 flatten: (B=2, C=1, H=28, W=28)
    x = jax.random.normal(kx, (2, 1, 28, 28), jnp.float32)
    params = init_params(kp, z_dim=20)
    prepped = prepare_params(params, z_dim=20)

    out = jax.block_until_ready(encoder_forward(x, prepped))
    ref = jax.block_until_ready(encoder_reference(x, params))

    assert out.shape == (2, 20), out.shape
    # bf16 matmul operands (f32 accumulation) vs an all-f32 reference -> looser tolerance.
    np.testing.assert_allclose(np.asarray(out), np.asarray(ref), rtol=3e-2, atol=3e-2)
    print("KERNEL_OK")
</pallas_src>

<mosaic_0001>
module attributes {stable_mosaic.version = 11 : i64} {
  func.func @_conv_stack_kernel(%arg0: i32, %arg1: memref<1x1x930xf32, #tpu.memory_space<vmem>>, %arg2: memref<32x9xf32, #tpu.memory_space<vmem>>, %arg3: memref<32x1xf32, #tpu.memory_space<vmem>>, %arg4: memref<840x1024xbf16, #tpu.memory_space<vmem>>, %arg5: memref<9x64x32xbf16, #tpu.memory_space<vmem>>, %arg6: memref<64x1xf32, #tpu.memory_space<vmem>>, %arg7: memref<224x288xbf16, #tpu.memory_space<vmem>>, %arg8: memref<9x128x64xbf16, #tpu.memory_space<vmem>>, %arg9: memref<128x1xf32, #tpu.memory_space<vmem>>, %arg10: memref<1x128x56xbf16, #tpu.memory_space<vmem>>, %arg11: memref<32x1024xbf16, #tpu.memory_space<vmem>>, %arg12: memref<64x288xbf16, #tpu.memory_space<vmem>>) attributes {dimension_semantics = [#tpu.dimension_semantics<parallel>], iteration_bounds = array<i64: 2>, scalar_prefetch = 0 : i64, scratch_operands = 2 : i64, tpu.core_type = #tpu.core_type<tc>, window_params = [{transform_indices = @transform_0, window_bounds = array<i64: 1, 1, 930>}, {pipeline_mode = #tpu.pipeline_mode<synchronous>, transform_indices = @transform_1, window_bounds = array<i64: 32, 9>}, {pipeline_mode = #tpu.pipeline_mode<synchronous>, transform_indices = @transform_2, window_bounds = array<i64: 32, 1>}, {pipeline_mode = #tpu.pipeline_mode<synchronous>, transform_indices = @transform_3, window_bounds = array<i64: 840, 1024>}, {pipeline_mode = #tpu.pipeline_mode<synchronous>, transform_indices = @transform_4, window_bounds = array<i64: 9, 64, 32>}, {pipeline_mode = #tpu.pipeline_mode<synchronous>, transform_indices = @transform_5, window_bounds = array<i64: 64, 1>}, {pipeline_mode = #tpu.pipeline_mode<synchronous>, transform_indices = @transform_6, window_bounds = array<i64: 224, 288>}, {pipeline_mode = #tpu.pipeline_mode<synchronous>, transform_indices = @transform_7, window_bounds = array<i64: 9, 128, 64>}, {pipeline_mode = #tpu.pipeline_mode<synchronous>, transform_indices = @transform_8, window_bounds = array<i64: 128, 1>}, {transform_indices = @transform_9, window_bounds = array<i64: 1, 128, 56>}]} {
    %c0 = arith.constant 0 : index
    %c0_0 = arith.constant 0 : index
    %0 = vector.load %arg2[%c0, %c0_0] : memref<32x9xf32, #tpu.memory_space<vmem>>, vector<32x9xf32>
    %cst = arith.constant 0.000000e+00 : f32
    %1 = vector.broadcast %cst : f32 to vector<32x840xf32>
    %c0_1 = arith.constant 0 : index
    %c0_2 = arith.constant 0 : index
    %c0_3 = arith.constant 0 : index
    %2 = vector.load %arg1[%c0_1, %c0_2, %c0_3] : memref<1x1x930xf32, #tpu.memory_space<vmem>>, vector<1x1x840xf32>
    %3 = vector.shape_cast %2 : vector<1x1x840xf32> to vector<1x840xf32>
    %4 = vector.extract_strided_slice %0 {offsets = [0, 0], sizes = [32, 1], strides = [1, 1]} : vector<32x9xf32> to vector<32x1xf32>
    %5 = vector.broadcast %4 : vector<32x1xf32> to vector<32x840xf32>
    %6 = vector.broadcast %3 : vector<1x840xf32> to vector<32x840xf32>
    %7 = arith.mulf %5, %6 : vector<32x840xf32>
    %8 = arith.addf %1, %7 : vector<32x840xf32>
    %c0_4 = arith.constant 0 : index
    %c0_5 = arith.constant 0 : index
    %c1 = arith.constant 1 : index
    %9 = vector.load %arg1[%c0_4, %c0_5, %c1] : memref<1x1x930xf32, #tpu.memory_space<vmem>>, vector<1x1x840xf32>
    %10 = vector.shape_cast %9 : vector<1x1x840xf32> to vector<1x840xf32>
    %11 = vector.extract_strided_slice %0 {offsets = [0, 1], sizes = [32, 1], strides = [1, 1]} : vector<32x9xf32> to vector<32x1xf32>
    %12 = vector.broadcast %11 : vector<32x1xf32> to vector<32x840xf32>
    %13 = vector.broadcast %10 : vector<1x840xf32> to vector<32x840xf32>
    %14 = arith.mulf %12, %13 : vector<32x840xf32>
    %15 = arith.addf %8, %14 : vector<32x840xf32>
    %c0_6 = arith.constant 0 : index
    %c0_7 = arith.constant 0 : index
    %c2 = arith.constant 2 : index
    %16 = vector.load %arg1[%c0_6, %c0_7, %c2] : memref<1x1x930xf32, #tpu.memory_space<vmem>>, vector<1x1x840xf32>
    %17 = vector.shape_cast %16 : vector<1x1x840xf32> to vector<1x840xf32>
    %18 = vector.extract_strided_slice %0 {offsets = [0, 2], sizes = [32, 1], strides = [1, 1]} : vector<32x9xf32> to vector<32x1xf32>
    %19 = vector.broadcast %18 : vector<32x1xf32> to vector<32x840xf32>
    %20 = vector.broadcast %17 : vector<1x840xf32> to vector<32x840xf32>
    %21 = arith.mulf %19, %20 : vector<32x840xf32>
    %22 = arith.addf %15, %21 : vector<32x840xf32>
    %c0_8 = arith.constant 0 : index
    %c0_9 = arith.constant 0 : index
    %c30 = arith.constant 30 : index
    %23 = vector.load %arg1[%c0_8, %c0_9, %c30] : memref<1x1x930xf32, #tpu.memory_space<vmem>>, vector<1x1x840xf32>
    %24 = vector.shape_cast %23 : vector<1x1x840xf32> to vector<1x840xf32>
    %25 = vector.extract_strided_slice %0 {offsets = [0, 3], sizes = [32, 1], strides = [1, 1]} : vector<32x9xf32> to vector<32x1xf32>
    %26 = vector.broadcast %25 : vector<32x1xf32> to vector<32x840xf32>
    %27 = vector.broadcast %24 : vector<1x840xf32> to vector<32x840xf32>
    %28 = arith.mulf %26, %27 : vector<32x840xf32>
    %29 = arith.addf %22, %28 : vector<32x840xf32>
    %c0_10 = arith.constant 0 : index
    %c0_11 = arith.constant 0 : index
    %c31 = arith.constant 31 : index
    %30 = vector.load %arg1[%c0_10, %c0_11, %c31] : memref<1x1x930xf32, #tpu.memory_space<vmem>>, vector<1x1x840xf32>
    %31 = vector.shape_cast %30 : vector<1x1x840xf32> to vector<1x840xf32>
    %32 = vector.extract_strided_slice %0 {offsets = [0, 4], sizes = [32, 1], strides = [1, 1]} : vector<32x9xf32> to vector<32x1xf32>
    %33 = vector.broadcast %32 : vector<32x1xf32> to vector<32x840xf32>
    %34 = vector.broadcast %31 : vector<1x840xf32> to vector<32x840xf32>
    %35 = arith.mulf %33, %34 : vector<32x840xf32>
    %36 = arith.addf %29, %35 : vector<32x840xf32>
    %c0_12 = arith.constant 0 : index
    %c0_13 = arith.constant 0 : index
    %c32 = arith.constant 32 : index
    %37 = vector.load %arg1[%c0_12, %c0_13, %c32] : memref<1x1x930xf32, #tpu.memory_space<vmem>>, vector<1x1x840xf32>
    %38 = vector.shape_cast %37 : vector<1x1x840xf32> to vector<1x840xf32>
    %39 = vector.extract_strided_slice %0 {offsets = [0, 5], sizes = [32, 1], strides = [1, 1]} : vector<32x9xf32> to vector<32x1xf32>
    %40 = vector.broadcast %39 : vector<32x1xf32> to vector<32x840xf32>
    %41 = vector.broadcast %38 : vector<1x840xf32> to vector<32x840xf32>
    %42 = arith.mulf %40, %41 : vector<32x840xf32>
    %43 = arith.addf %36, %42 : vector<32x840xf32>
    %c0_14 = arith.constant 0 : index
    %c0_15 = arith.constant 0 : index
    %c60 = arith.constant 60 : index
    %44 = vector.load %arg1[%c0_14, %c0_15, %c60] : memref<1x1x930xf32, #tpu.memory_space<vmem>>, vector<1x1x840xf32>
    %45 = vector.shape_cast %44 : vector<1x1x840xf32> to vector<1x840xf32>
    %46 = vector.extract_strided_slice %0 {offsets = [0, 6], sizes = [32, 1], strides = [1, 1]} : vector<32x9xf32> to vector<32x1xf32>
    %47 = vector.broadcast %46 : vector<32x1xf32> to vector<32x840xf32>
    %48 = vector.broadcast %45 : vector<1x840xf32> to vector<32x840xf32>
    %49 = arith.mulf %47, %48 : vector<32x840xf32>
    %50 = arith.addf %43, %49 : vector<32x840xf32>
    %c0_16 = arith.constant 0 : index
    %c0_17 = arith.constant 0 : index
    %c61 = arith.constant 61 : index
    %51 = vector.load %arg1[%c0_16, %c0_17, %c61] : memref<1x1x930xf32, #tpu.memory_space<vmem>>, vector<1x1x840xf32>
    %52 = vector.shape_cast %51 : vector<1x1x840xf32> to vector<1x840xf32>
    %53 = vector.extract_strided_slice %0 {offsets = [0, 7], sizes = [32, 1], strides = [1, 1]} : vector<32x9xf32> to vector<32x1xf32>
    %54 = vector.broadcast %53 : vector<32x1xf32> to vector<32x840xf32>
    %55 = vector.broadcast %52 : vector<1x840xf32> to vector<32x840xf32>
    %56 = arith.mulf %54, %55 : vector<32x840xf32>
    %57 = arith.addf %50, %56 : vector<32x840xf32>
    %c0_18 = arith.constant 0 : index
    %c0_19 = arith.constant 0 : index
    %c62 = arith.constant 62 : index
    %58 = vector.load %arg1[%c0_18, %c0_19, %c62] : memref<1x1x930xf32, #tpu.memory_space<vmem>>, vector<1x1x840xf32>
    %59 = vector.shape_cast %58 : vector<1x1x840xf32> to vector<1x840xf32>
    %60 = vector.extract_strided_slice %0 {offsets = [0, 8], sizes = [32, 1], strides = [1, 1]} : vector<32x9xf32> to vector<32x1xf32>
    %61 = vector.broadcast %60 : vector<32x1xf32> to vector<32x840xf32>
    %62 = vector.broadcast %59 : vector<1x840xf32> to vector<32x840xf32>
    %63 = arith.mulf %61, %62 : vector<32x840xf32>
    %64 = arith.addf %57, %63 : vector<32x840xf32>
    %c0_20 = arith.constant 0 : index
    %c0_21 = arith.constant 0 : index
    %65 = vector.load %arg3[%c0_20, %c0_21] : memref<32x1xf32, #tpu.memory_space<vmem>>, vector<32x1xf32>
    %66 = vector.broadcast %65 : vector<32x1xf32> to vector<32x840xf32>
    %67 = arith.addf %64, %66 : vector<32x840xf32>
    %cst_22 = arith.constant 1.000000e-01 : f32
    %68 = vector.broadcast %cst_22 : f32 to vector<32x840xf32>
    %69 = arith.mulf %68, %67 : vector<32x840xf32>
    %70 = arith.maximumf %67, %69 : vector<32x840xf32>
    %71 = arith.truncf %70 : vector<32x840xf32> to vector<32x840xbf16>
    %c0_23 = arith.constant 0 : index
    %c0_24 = arith.constant 0 : index
    %72 = vector.load %arg4[%c0_23, %c0_24] : memref<840x1024xbf16, #tpu.memory_space<vmem>>, vector<840x1024xbf16>
    %cst_25 = arith.constant dense<0.000000e+00> : vector<32x1024xf32>
    %73 = tpu.matmul %71, %72, %cst_25 {dimension_numbers = #tpu.dot_dimension_numbers<[1], [0], [0], [1], [0, 0, 1, 1], [], []>} : vector<32x840xbf16>, vector<840x1024xbf16>, vector<32x1024xf32> -> vector<32x1024xf32>
    %74 = arith.truncf %73 : vector<32x1024xf32> to vector<32x1024xbf16>
    %c0_26 = arith.constant 0 : index
    %c0_27 = arith.constant 0 : index
    %75 = vector.load %arg11[%c0_26, %c0_27] : memref<32x1024xbf16, #tpu.memory_space<vmem>>, vector<32x1024xbf16>
    tpu.vector_store %arg11[%c0_26, %c0_27], %74 {strides = array<i32>} : memref<32x1024xbf16, #tpu.memory_space<vmem>>, vector<32x1024xbf16>,
    %cst_28 = arith.constant 0.000000e+00 : f32
    %76 = vector.broadcast %cst_28 : f32 to vector<64x224xf32>
    %c0_29 = arith.constant 0 : index
    %c0_30 = arith.constant 0 : index
    %c0_31 = arith.constant 0 : index
    %77 = vector.load %arg5[%c0_29, %c0_30, %c0_31] : memref<9x64x32xbf16, #tpu.memory_space<vmem>>, vector<1x64x32xbf16>
    %78 = vector.shape_cast %77 : vector<1x64x32xbf16> to vector<64x32xbf16>
    %c0_32 = arith.constant 0 : index
    %c0_33 = arith.constant 0 : index
    %79 = vector.load %arg11[%c0_32, %c0_33] : memref<32x1024xbf16, #tpu.memory_space<vmem>>, vector<32x224xbf16>
    %cst_34 = arith.constant dense<0.000000e+00> : vector<64x224xf32>
    %80 = tpu.matmul %78, %79, %cst_34 {dimension_numbers = #tpu.dot_dimension_numbers<[1], [0], [0], [1], [0, 0, 1, 1], [], []>} : vector<64x32xbf16>, vector<32x224xbf16>, vector<64x224xf32> -> vector<64x224xf32>
    %81 = arith.addf %76, %80 : vector<64x224xf32>
    %c1_35 = arith.constant 1 : index
    %c0_36 = arith.constant 0 : index
    %c0_37 = arith.constant 0 : index
    %82 = vector.load %arg5[%c1_35, %c0_36, %c0_37] : memref<9x64x32xbf16, #tpu.memory_space<vmem>>, vector<1x64x32xbf16>
    %83 = vector.shape_cast %82 : vector<1x64x32xbf16> to vector<64x32xbf16>
    %c0_38 = arith.constant 0 : index
    %c256 = arith.constant 256 : index
    %84 = vector.load %arg11[%c0_38, %c256] : memref<32x1024xbf16, #tpu.memory_space<vmem>>, vector<32x224xbf16>
    %cst_39 = arith.constant dense<0.000000e+00> : vector<64x224xf32>
    %85 = tpu.matmul %83, %84, %cst_39 {dimension_numbers = #tpu.dot_dimension_numbers<[1], [0], [0], [1], [0, 0, 1, 1], [], []>} : vector<64x32xbf16>, vector<32x224xbf16>, vector<64x224xf32> -> vector<64x224xf32>
    %86 = arith.addf %81, %85 : vector<64x224xf32>
    %c2_40 = arith.constant 2 : index
    %c0_41 = arith.constant 0 : index
    %c0_42 = arith.constant 0 : index
    %87 = vector.load %arg5[%c2_40, %c0_41, %c0_42] : memref<9x64x32xbf16, #tpu.memory_space<vmem>>, vector<1x64x32xbf16>
    %88 = vector.shape_cast %87 : vector<1x64x32xbf16> to vector<64x32xbf16>
    %c0_43 = arith.constant 0 : index
    %c1_44 = arith.constant 1 : index
    %89 = vector.load %arg11[%c0_43, %c1_44] : memref<32x1024xbf16, #tpu.memory_space<vmem>>, vector<32x224xbf16>
    %cst_45 = arith.constant dense<0.000000e+00> : vector<64x224xf32>
    %90 = tpu.matmul %88, %89, %cst_45 {dimension_numbers = #tpu.dot_dimension_numbers<[1], [0], [0], [1], [0, 0, 1, 1], [], []>} : vector<64x32xbf16>, vector<32x224xbf16>, vector<64x224xf32> -> vector<64x224xf32>
    %91 = arith.addf %86, %90 : vector<64x224xf32>
    %c3 = arith.constant 3 : index
    %c0_46 = arith.constant 0 : index
    %c0_47 = arith.constant 0 : index
    %92 = vector.load %arg5[%c3, %c0_46, %c0_47] : memref<9x64x32xbf16, #tpu.memory_space<vmem>>, vector<1x64x32xbf16>
    %93 = vector.shape_cast %92 : vector<1x64x32xbf16> to vector<64x32xbf16>
    %c0_48 = arith.constant 0 : index
    %c512 = arith.constant 512 : index
    %94 = vector.load %arg11[%c0_48, %c512] : memref<32x1024xbf16, #tpu.memory_space<vmem>>, vector<32x224xbf16>
    %cst_49 = arith.constant dense<0.000000e+00> : vector<64x224xf32>
    %95 = tpu.matmul %93, %94, %cst_49 {dimension_numbers = #tpu.dot_dimension_numbers<[1], [0], [0], [1], [0, 0, 1, 1], [], []>} : vector<64x32xbf16>, vector<32x224xbf16>, vector<64x224xf32> -> vector<64x224xf32>
    %96 = arith.addf %91, %95 : vector<64x224xf32>
    %c4 = arith.constant 4 : index
    %c0_50 = arith.constant 0 : index
    %c0_51 = arith.constant 0 : index
    %97 = vector.load %arg5[%c4, %c0_50, %c0_51] : memref<9x64x32xbf16, #tpu.memory_space<vmem>>, vector<1x64x32xbf16>
    %98 = vector.shape_cast %97 : vector<1x64x32xbf16> to vector<64x32xbf16>
    %c0_52 = arith.constant 0 : index
    %c768 = arith.constant 768 : index
    %99 = vector.load %arg11[%c0_52, %c768] : memref<32x1024xbf16, #tpu.memory_space<vmem>>, vector<32x224xbf16>
    %cst_53 = arith.constant dense<0.000000e+00> : vector<64x224xf32>
    %100 = tpu.matmul %98, %99, %cst_53 {dimension_numbers = #tpu.dot_dimension_numbers<[1], [0], [0], [1], [0, 0, 1, 1], [], []>} : vector<64x32xbf16>, vector<32x224xbf16>, vector<64x224xf32> -> vector<64x224xf32>
    %101 = arith.addf %96, %100 : vector<64x224xf32>
    %c5 = arith.constant 5 : index
    %c0_54 = arith.constant 0 : index
    %c0_55 = arith.constant 0 : index
    %102 = vector.load %arg5[%c5, %c0_54, %c0_55] : memref<9x64x32xbf16, #tpu.memory_space<vmem>>, vector<1x64x32xbf16>
    %103 = vector.shape_cast %102 : vector<1x64x32xbf16> to vector<64x32xbf16>
    %c0_56 = arith.constant 0 : index
    %c513 = arith.constant 513 : index
    %104 = vector.load %arg11[%c0_56, %c513] : memref<32x1024xbf16, #tpu.memory_space<vmem>>, vector<32x224xbf16>
    %cst_57 = arith.constant dense<0.000000e+00> : vector<64x224xf32>
    %105 = tpu.matmul %103, %104, %cst_57 {dimension_numbers = #tpu.dot_dimension_numbers<[1], [0], [0], [1], [0, 0, 1, 1], [], []>} : vector<64x32xbf16>, vector<32x224xbf16>, vector<64x224xf32> -> vector<64x224xf32>
    %106 = arith.addf %101, %105 : vector<64x224xf32>
    %c6 = arith.constant 6 : index
    %c0_58 = arith.constant 0 : index
    %c0_59 = arith.constant 0 : index
    %107 = vector.load %arg5[%c6, %c0_58, %c0_59] : memref<9x64x32xbf16, #tpu.memory_space<vmem>>, vector<1x64x32xbf16>
    %108 = vector.shape_cast %107 : vector<1x64x32xbf16> to vector<64x32xbf16>
    %c0_60 = arith.constant 0 : index
    %c16 = arith.constant 16 : index
    %109 = vector.load %arg11[%c0_60, %c16] : memref<32x1024xbf16, #tpu.memory_space<vmem>>, vector<32x224xbf16>
    %cst_61 = arith.constant dense<0.000000e+00> : vector<64x224xf32>
    %110 = tpu.matmul %108, %109, %cst_61 {dimension_numbers = #tpu.dot_dimension_numbers<[1], [0], [0], [1], [0, 0, 1, 1], [], []>} : vector<64x32xbf16>, vector<32x224xbf16>, vector<64x224xf32> -> vector<64x224xf32>
    %111 = arith.addf %106, %110 : vector<64x224xf32>
    %c7 = arith.constant 7 : index
    %c0_62 = arith.constant 0 : index
    %c0_63 = arith.constant 0 : index
    %112 = vector.load %arg5[%c7, %c0_62, %c0_63] : memref<9x64x32xbf16, #tpu.memory_space<vmem>>, vector<1x64x32xbf16>
    %113 = vector.shape_cast %112 : vector<1x64x32xbf16> to vector<64x32xbf16>
    %c0_64 = arith.constant 0 : index
    %c272 = arith.constant 272 : index
    %114 = vector.load %arg11[%c0_64, %c272] : memref<32x1024xbf16, #tpu.memory_space<vmem>>, vector<32x224xbf16>
    %cst_65 = arith.constant dense<0.000000e+00> : vector<64x224xf32>
    %115 = tpu.matmul %113, %114, %cst_65 {dimension_numbers = #tpu.dot_dimension_numbers<[1], [0], [0], [1], [0, 0, 1, 1], [], []>} : vector<64x32xbf16>, vector<32x224xbf16>, vector<64x224xf32> -> vector<64x224xf32>
    %116 = arith.addf %111, %115 : vector<64x224xf32>
    %c8 = arith.constant 8 : index
    %c0_66 = arith.constant 0 : index
    %c0_67 = arith.constant 0 : index
    %117 = vector.load %arg5[%c8, %c0_66, %c0_67] : memref<9x64x32xbf16, #tpu.memory_space<vmem>>, vector<1x64x32xbf16>
    %118 = vector.shape_cast %117 : vector<1x64x32xbf16> to vector<64x32xbf16>
    %c0_68 = arith.constant 0 : index
    %c17 = arith.constant 17 : index
    %119 = vector.load %arg11[%c0_68, %c17] : memref<32x1024xbf16, #tpu.memory_space<vmem>>, vector<32x224xbf16>
    %cst_69 = arith.constant dense<0.000000e+00> : vector<64x224xf32>
    %120 = tpu.matmul %118, %119, %cst_69 {dimension_numbers = #tpu.dot_dimension_numbers<[1], [0], [0], [1], [0, 0, 1, 1], [], []>} : vector<64x32xbf16>, vector<32x224xbf16>, vector<64x224xf32> -> vector<64x224xf32>
    %121 = arith.addf %116, %120 : vector<64x224xf32>
    %c0_70 = arith.constant 0 : index
    %c0_71 = arith.constant 0 : index
    %122 = vector.load %arg6[%c0_70, %c0_71] : memref<64x1xf32, #tpu.memory_space<vmem>>, vector<64x1xf32>
    %123 = vector.broadcast %122 : vector<64x1xf32> to vector<64x224xf32>
    %124 = arith.addf %121, %123 : vector<64x224xf32>
    %cst_72 = arith.constant 1.000000e-01 : f32
    %125 = vector.broadcast %cst_72 : f32 to vector<64x224xf32>
    %126 = arith.mulf %125, %124 : vector<64x224xf32>
    %127 = arith.maximumf %124, %126 : vector<64x224xf32>
    %128 = arith.truncf %127 : vector<64x224xf32> to vector<64x224xbf16>
    %c0_73 = arith.constant 0 : index
    %c0_74 = arith.constant 0 : index
    %129 = vector.load %arg7[%c0_73, %c0_74] : memref<224x288xbf16, #tpu.memory_space<vmem>>, vector<224x288xbf16>
    %cst_75 = arith.constant dense<0.000000e+00> : vector<64x288xf32>
    %130 = tpu.matmul %128, %129, %cst_75 {dimension_numbers = #tpu.dot_dimension_numbers<[1], [0], [0], [1], [0, 0, 1, 1], [], []>} : vector<64x224xbf16>, vector<224x288xbf16>, vector<64x288xf32> -> vector<64x288xf32>
    %131 = arith.truncf %130 : vector<64x288xf32> to vector<64x288xbf16>
    %c0_76 = arith.constant 0 : index
    %c0_77 = arith.constant 0 : index
    %132 = vector.load %arg12[%c0_76, %c0_77] : memref<64x288xbf16, #tpu.memory_space<vmem>>, vector<64x288xbf16>
    tpu.vector_store %arg12[%c0_76, %c0_77], %131 {strides = array<i32>} : memref<64x288xbf16, #tpu.memory_space<vmem>>, vector<64x288xbf16>,
    %cst_78 = arith.constant 0.000000e+00 : f32
    %133 = vector.broadcast %cst_78 : f32 to vector<128x56xf32>
    %c0_79 = arith.constant 0 : index
    %c0_80 = arith.constant 0 : index
    %c0_81 = arith.constant 0 : index
    %134 = vector.load %arg8[%c0_79, %c0_80, %c0_81] : memref<9x128x64xbf16, #tpu.memory_space<vmem>>, vector<1x128x64xbf16>
    %135 = vector.shape_cast %134 : vector<1x128x64xbf16> to vector<128x64xbf16>
    %c0_82 = arith.constant 0 : index
    %c0_83 = arith.constant 0 : index
    %136 = vector.load %arg12[%c0_82, %c0_83] : memref<64x288xbf16, #tpu.memory_space<vmem>>, vector<64x56xbf16>
    %cst_84 = arith.constant dense<0.000000e+00> : vector<128x56xf32>
    %137 = tpu.matmul %135, %136, %cst_84 {dimension_numbers = #tpu.dot_dimension_numbers<[1], [0], [0], [1], [0, 0, 1, 1], [], []>} : vector<128x64xbf16>, vector<64x56xbf16>, vector<128x56xf32> -> vector<128x56xf32>
    %138 = arith.addf %133, %137 : vector<128x56xf32>
    %c1_85 = arith.constant 1 : index
    %c0_86 = arith.constant 0 : index
    %c0_87 = arith.constant 0 : index
    %139 = vector.load %arg8[%c1_85, %c0_86, %c0_87] : memref<9x128x64xbf16, #tpu.memory_space<vmem>>, vector<1x128x64xbf16>
    %140 = vector.shape_cast %139 : vector<1x128x64xbf16> to vector<128x64xbf16>
    %c0_88 = arith.constant 0 : index
    %c72 = arith.constant 72 : index
    %141 = vector.load %arg12[%c0_88, %c72] : memref<64x288xbf16, #tpu.memory_space<vmem>>, vector<64x56xbf16>
    %cst_89 = arith.constant dense<0.000000e+00> : vector<128x56xf32>
    %142 = tpu.matmul %140, %141, %cst_89 {dimension_numbers = #tpu.dot_dimension_numbers<[1], [0], [0], [1], [0, 0, 1, 1], [], []>} : vector<128x64xbf16>, vector<64x56xbf16>, vector<128x56xf32> -> vector<128x56xf32>
    %143 = arith.addf %138, %142 : vector<128x56xf32>
    %c2_90 = arith.constant 2 : index
    %c0_91 = arith.constant 0 : index
    %c0_92 = arith.constant 0 : index
    %144 = vector.load %arg8[%c2_90, %c0_91, %c0_92] : memref<9x128x64xbf16, #tpu.memory_space<vmem>>, vector<1x128x64xbf16>
    %145 = vector.shape_cast %144 : vector<1x128x64xbf16> to vector<128x64xbf16>
    %c0_93 = arith.constant 0 : index
    %c1_94 = arith.constant 1 : index
    %146 = vector.load %arg12[%c0_93, %c1_94] : memref<64x288xbf16, #tpu.memory_space<vmem>>, vector<64x56xbf16>
    %cst_95 = arith.constant dense<0.000000e+00> : vector<128x56xf32>
    %147 = tpu.matmul %145, %146, %cst_95 {dimension_numbers = #tpu.dot_dimension_numbers<[1], [0], [0], [1], [0, 0, 1, 1], [], []>} : vector<128x64xbf16>, vector<64x56xbf16>, vector<128x56xf32> -> vector<128x56xf32>
    %148 = arith.addf %143, %147 : vector<128x56xf32>
    %c3_96 = arith.constant 3 : index
    %c0_97 = arith.constant 0 : index
    %c0_98 = arith.constant 0 : index
    %149 = vector.load %arg8[%c3_96, %c0_97, %c0_98] : memref<9x128x64xbf16, #tpu.memory_space<vmem>>, vector<1x128x64xbf16>
    %150 = vector.shape_cast %149 : vector<1x128x64xbf16> to vector<128x64xbf16>
    %c0_99 = arith.constant 0 : index
    %c144 = arith.constant 144 : index
    %151 = vector.load %arg12[%c0_99, %c144] : memref<64x288xbf16, #tpu.memory_space<vmem>>, vector<64x56xbf16>
    %cst_100 = arith.constant dense<0.000000e+00> : vector<128x56xf32>
    %152 = tpu.matmul %150, %151, %cst_100 {dimension_numbers = #tpu.dot_dimension_numbers<[1], [0], [0], [1], [0, 0, 1, 1], [], []>} : vector<128x64xbf16>, vector<64x56xbf16>, vector<128x56xf32> -> vector<128x56xf32>
    %153 = arith.addf %148, %152 : vector<128x56xf32>
    %c4_101 = arith.constant 4 : index
    %c0_102 = arith.constant 0 : index
    %c0_103 = arith.constant 0 : index
    %154 = vector.load %arg8[%c4_101, %c0_102, %c0_103] : memref<9x128x64xbf16, #tpu.memory_space<vmem>>, vector<1x128x64xbf16>
    %155 = vector.shape_cast %154 : vector<1x128x64xbf16> to vector<128x64xbf16>
    %c0_104 = arith.constant 0 : index
    %c216 = arith.constant 216 : index
    %156 = vector.load %arg12[%c0_104, %c216] : memref<64x288xbf16, #tpu.memory_space<vmem>>, vector<64x56xbf16>
    %cst_105 = arith.constant dense<0.000000e+00> : vector<128x56xf32>
    %157 = tpu.matmul %155, %156, %cst_105 {dimension_numbers = #tpu.dot_dimension_numbers<[1], [0], [0], [1], [0, 0, 1, 1], [], []>} : vector<128x64xbf16>, vector<64x56xbf16>, vector<128x56xf32> -> vector<128x56xf32>
    %158 = arith.addf %153, %157 : vector<128x56xf32>
    %c5_106 = arith.constant 5 : index
    %c0_107 = arith.constant 0 : index
    %c0_108 = arith.constant 0 : index
    %159 = vector.load %arg8[%c5_106, %c0_107, %c0_108] : memref<9x128x64xbf16, #tpu.memory_space<vmem>>, vector<1x128x64xbf16>
    %160 = vector.shape_cast %159 : vector<1x128x64xbf16> to vector<128x64xbf16>
    %c0_109 = arith.constant 0 : index
    %c145 = arith.constant 145 : index
    %161 = vector.load %arg12[%c0_109, %c145] : memref<64x288xbf16, #tpu.memory_space<vmem>>, vector<64x56xbf16>
    %cst_110 = arith.constant dense<0.000000e+00> : vector<128x56xf32>
    %162 = tpu.matmul %160, %161, %cst_110 {dimension_numbers = #tpu.dot_dimension_numbers<[1], [0], [0], [1], [0, 0, 1, 1], [], []>} : vector<128x64xbf16>, vector<64x56xbf16>, vector<128x56xf32> -> vector<128x56xf32>
    %163 = arith.addf %158, %162 : vector<128x56xf32>
    %c6_111 = arith.constant 6 : index
    %c0_112 = arith.constant 0 : index
    %c0_113 = arith.constant 0 : index
    %164 = vector.load %arg8[%c6_111, %c0_112, %c0_113] : memref<9x128x64xbf16, #tpu.memory_space<vmem>>, vector<1x128x64xbf16>
    %165 = vector.shape_cast %164 : vector<1x128x64xbf16> to vector<128x64xbf16>
    %c0_114 = arith.constant 0 : index
    %c8_115 = arith.constant 8 : index
    %166 = vector.load %arg12[%c0_114, %c8_115] : memref<64x288xbf16, #tpu.memory_space<vmem>>, vector<64x56xbf16>
    %cst_116 = arith.constant dense<0.000000e+00> : vector<128x56xf32>
    %167 = tpu.matmul %165, %166, %cst_116 {dimension_numbers = #tpu.dot_dimension_numbers<[1], [0], [0], [1], [0, 0, 1, 1], [], []>} : vector<128x64xbf16>, vector<64x56xbf16>, vector<128x56xf32> -> vector<128x56xf32>
    %168 = arith.addf %163, %167 : vector<128x56xf32>
    %c7_117 = arith.constant 7 : index
    %c0_118 = arith.constant 0 : index
    %c0_119 = arith.constant 0 : index
    %169 = vector.load %arg8[%c7_117, %c0_118, %c0_119] : memref<9x128x64xbf16, #tpu.memory_space<vmem>>, vector<1x128x64xbf16>
    %170 = vector.shape_cast %169 : vector<1x128x64xbf16> to vector<128x64xbf16>
    %c0_120 = arith.constant 0 : index
    %c80 = arith.constant 80 : index
    %171 = vector.load %arg12[%c0_120, %c80] : memref<64x288xbf16, #tpu.memory_space<vmem>>, vector<64x56xbf16>
    %cst_121 = arith.constant dense<0.000000e+00> : vector<128x56xf32>
    %172 = tpu.matmul %170, %171, %cst_121 {dimension_numbers = #tpu.dot_dimension_numbers<[1], [0], [0], [1], [0, 0, 1, 1], [], []>} : vector<128x64xbf16>, vector<64x56xbf16>, vector<128x56xf32> -> vector<128x56xf32>
    %173 = arith.addf %168, %172 : vector<128x56xf32>
    %c8_122 = arith.constant 8 : index
    %c0_123 = arith.constant 0 : index
    %c0_124 = arith.constant 0 : index
    %174 = vector.load %arg8[%c8_122, %c0_123, %c0_124] : memref<9x128x64xbf16, #tpu.memory_space<vmem>>, vector<1x128x64xbf16>
    %175 = vector.shape_cast %174 : vector<1x128x64xbf16> to vector<128x64xbf16>
    %c0_125 = arith.constant 0 : index
    %c9 = arith.constant 9 : index
    %176 = vector.load %arg12[%c0_125, %c9] : memref<64x288xbf16, #tpu.memory_space<vmem>>, vector<64x56xbf16>
    %cst_126 = arith.constant dense<0.000000e+00> : vector<128x56xf32>
    %177 = tpu.matmul %175, %176, %cst_126 {dimension_numbers = #tpu.dot_dimension_numbers<[1], [0], [0], [1], [0, 0, 1, 1], [], []>} : vector<128x64xbf16>, vector<64x56xbf16>, vector<128x56xf32> -> vector<128x56xf32>
    %178 = arith.addf %173, %177 : vector<128x56xf32>
    %c0_127 = arith.constant 0 : index
    %c0_128 = arith.constant 0 : index
    %179 = vector.load %arg9[%c0_127, %c0_128] : memref<128x1xf32, #tpu.memory_space<vmem>>, vector<128x1xf32>
    %180 = vector.broadcast %179 : vector<128x1xf32> to vector<128x56xf32>
    %181 = arith.addf %178, %180 : vector<128x56xf32>
    %cst_129 = arith.constant 1.000000e-01 : f32
    %182 = vector.broadcast %cst_129 : f32 to vector<128x56xf32>
    %183 = arith.mulf %182, %181 : vector<128x56xf32>
    %184 = arith.maximumf %181, %183 : vector<128x56xf32>
    %185 = arith.truncf %184 : vector<128x56xf32> to vector<128x56xbf16>
    %c0_130 = arith.constant 0 : index
    %c0_131 = arith.constant 0 : index
    %c0_132 = arith.constant 0 : index
    %186 = vector.load %arg10[%c0_130, %c0_131, %c0_132] : memref<1x128x56xbf16, #tpu.memory_space<vmem>>, vector<1x128x56xbf16>
    %187 = vector.shape_cast %186 : vector<1x128x56xbf16> to vector<128x56xbf16>
    %188 = vector.shape_cast %185 : vector<128x56xbf16> to vector<1x128x56xbf16>
    tpu.vector_store %arg10[%c0_130, %c0_131, %c0_132], %188 {strides = array<i32>} : memref<1x128x56xbf16, #tpu.memory_space<vmem>>, vector<1x128x56xbf16>,
    return
  }
  func.func @transform_0(%arg0: i32) -> (i32, i32, i32) {
    %c0_i32 = arith.constant 0 : i32
    %c0_i32_0 = arith.constant 0 : i32
    %c0_i32_1 = arith.constant 0 : i32
    return %arg0, %c0_i32, %c0_i32_0 : i32, i32, i32
  }
  func.func @transform_1(%arg0: i32) -> (i32, i32) {
    %c0_i32 = arith.constant 0 : i32
    %c0_i32_0 = arith.constant 0 : i32
    %c0_i32_1 = arith.constant 0 : i32
    return %c0_i32, %c0_i32_0 : i32, i32
  }
  func.func @transform_2(%arg0: i32) -> (i32, i32) {
    %c0_i32 = arith.constant 0 : i32
    %c0_i32_0 = arith.constant 0 : i32
    %c0_i32_1 = arith.constant 0 : i32
    return %c0_i32, %c0_i32_0 : i32, i32
  }
  func.func @transform_3(%arg0: i32) -> (i32, i32) {
    %c0_i32 = arith.constant 0 : i32
    %c0_i32_0 = arith.constant 0 : i32
    %c0_i32_1 = arith.constant 0 : i32
    return %c0_i32, %c0_i32_0 : i32, i32
  }
  func.func @transform_4(%arg0: i32) -> (i32, i32, i32) {
    %c0_i32 = arith.constant 0 : i32
    %c0_i32_0 = arith.constant 0 : i32
    %c0_i32_1 = arith.constant 0 : i32
    %c0_i32_2 = arith.constant 0 : i32
    return %c0_i32, %c0_i32_0, %c0_i32_1 : i32, i32, i32
  }
  func.func @transform_5(%arg0: i32) -> (i32, i32) {
    %c0_i32 = arith.constant 0 : i32
    %c0_i32_0 = arith.constant 0 : i32
    %c0_i32_1 = arith.constant 0 : i32
    return %c0_i32, %c0_i32_0 : i32, i32
  }
  func.func @transform_6(%arg0: i32) -> (i32, i32) {
    %c0_i32 = arith.constant 0 : i32
    %c0_i32_0 = arith.constant 0 : i32
    %c0_i32_1 = arith.constant 0 : i32
    return %c0_i32, %c0_i32_0 : i32, i32
  }
  func.func @transform_7(%arg0: i32) -> (i32, i32, i32) {
    %c0_i32 = arith.constant 0 : i32
    %c0_i32_0 = arith.constant 0 : i32
    %c0_i32_1 = arith.constant 0 : i32
    %c0_i32_2 = arith.constant 0 : i32
    return %c0_i32, %c0_i32_0, %c0_i32_1 : i32, i32, i32
  }
  func.func @transform_8(%arg0: i32) -> (i32, i32) {
    %c0_i32 = arith.constant 0 : i32
    %c0_i32_0 = arith.constant 0 : i32
    %c0_i32_1 = arith.constant 0 : i32
    return %c0_i32, %c0_i32_0 : i32, i32
  }
  func.func @transform_9(%arg0: i32) -> (i32, i32, i32) {
    %c0_i32 = arith.constant 0 : i32
    %c0_i32_0 = arith.constant 0 : i32
    %c0_i32_1 = arith.constant 0 : i32
    return %arg0, %c0_i32, %c0_i32_0 : i32, i32, i32
  }
}

module attributes {stable_mosaic.version = 11 : i64} {
  func.func @_linear_kernel(%arg0: i32, %arg1: memref<2x7168xbf16, #tpu.memory_space<vmem>>, %arg2: memref<7168x20xbf16, #tpu.memory_space<vmem>>, %arg3: memref<1x20xf32, #tpu.memory_space<vmem>>, %arg4: memref<2x20xf32, #tpu.memory_space<vmem>>) attributes {dimension_semantics = [#tpu.dimension_semantics<arbitrary>], iteration_bounds = array<i64: 1>, scalar_prefetch = 0 : i64, scratch_operands = 0 : i64, tpu.core_type = #tpu.core_type<tc>, window_params = [{pipeline_mode = #tpu.pipeline_mode<synchronous>, transform_indices = @transform_0, window_bounds = array<i64: 2, 7168>}, {pipeline_mode = #tpu.pipeline_mode<synchronous>, transform_indices = @transform_1, window_bounds = array<i64: 7168, 20>}, {pipeline_mode = #tpu.pipeline_mode<synchronous>, transform_indices = @transform_2, window_bounds = array<i64: 1, 20>}, {pipeline_mode = #tpu.pipeline_mode<synchronous>, transform_indices = @transform_3, window_bounds = array<i64: 2, 20>}]} {
    %c0 = arith.constant 0 : index
    %c0_0 = arith.constant 0 : index
    %0 = vector.load %arg1[%c0, %c0_0] : memref<2x7168xbf16, #tpu.memory_space<vmem>>, vector<2x7168xbf16>
    %c0_1 = arith.constant 0 : index
    %c0_2 = arith.constant 0 : index
    %1 = vector.load %arg2[%c0_1, %c0_2] : memref<7168x20xbf16, #tpu.memory_space<vmem>>, vector<7168x20xbf16>
    %cst = arith.constant dense<0.000000e+00> : vector<2x20xf32>
    %2 = tpu.matmul %0, %1, %cst {dimension_numbers = #tpu.dot_dimension_numbers<[1], [0], [0], [1], [0, 0, 1, 1], [], []>} : vector<2x7168xbf16>, vector<7168x20xbf16>, vector<2x20xf32> -> vector<2x20xf32>
    %c0_3 = arith.constant 0 : index
    %c0_4 = arith.constant 0 : index
    %3 = vector.load %arg3[%c0_3, %c0_4] : memref<1x20xf32, #tpu.memory_space<vmem>>, vector<1x20xf32>
    %4 = vector.broadcast %3 : vector<1x20xf32> to vector<2x20xf32>
    %5 = arith.addf %2, %4 : vector<2x20xf32>
    %c0_5 = arith.constant 0 : index
    %c0_6 = arith.constant 0 : index
    %6 = vector.load %arg4[%c0_5, %c0_6] : memref<2x20xf32, #tpu.memory_space<vmem>>, vector<2x20xf32>
    tpu.vector_store %arg4[%c0_5, %c0_6], %5 {strides = array<i32>} : memref<2x20xf32, #tpu.memory_space<vmem>>, vector<2x20xf32>,
    return
  }
  func.func @transform_0(%arg0: i32) -> (i32, i32) {
    %c0_i32 = arith.constant 0 : i32
    %c0_i32_0 = arith.constant 0 : i32
    %c0_i32_1 = arith.constant 0 : i32
    return %c0_i32, %c0_i32_0 : i32, i32
  }
  func.func @transform_1(%arg0: i32) -> (i32, i32) {
    %c0_i32 = arith.constant 0 : i32
    %c0_i32_0 = arith.constant 0 : i32
    %c0_i32_1 = arith.constant 0 : i32
    return %c0_i32, %c0_i32_0 : i32, i32
  }
  func.func @transform_2(%arg0: i32) -> (i32, i32) {
    %c0_i32 = arith.constant 0 : i32
    %c0_i32_0 = arith.constant 0 : i32
    %c0_i32_1 = arith.constant 0 : i32
    return %c0_i32, %c0_i32_0 : i32, i32
  }
  func.func @transform_3(%arg0: i32) -> (i32, i32) {
    %c0_i32 = arith.constant 0 : i32
    %c0_i32_0 = arith.constant 0 : i32
    %c0_i32_1 = arith.constant 0 : i32
    return %c0_i32, %c0_i32_0 : i32, i32
  }
}

</mosaic_0001>

<bundles_post_ra>
// kernel: encoder_forward.3
= control target key start
LH: loop header
LB: loop body
LE: loop exit
PB: predicated region body
PF: predicated region fallthrough
CT: control target
= control target key end

     0   :  { %v937_v28 = vlaneseq  ;;  %v6700_v36 = vmov 1966171168   ;;  %s8190_s0 = inlined_call_operand.vmem [shape: bf16[2,7168], index: 0, kind: input, shape index: {}]   ;;  %s8191_s1 = inlined_call_operand.vmem [shape: bf16[7168,20], index: 1, kind: input, shape index: {}]   ;;  %s8192_s2 = inlined_call_operand.vmem [shape: f32[1,20], index: 2, kind: input, shape index: {}]   ;;  %s8193_s3 = inlined_call_operand.hbm [shape: f32[2,20], index: 3, kind: output, shape index: {}]  }
   0x1   :  { %v6223_v0 = vld [vmem:[%s8191_s1 + $0x78] sm:$0xff]   ;;  %v6227_v4 = vld [vmem:[%s8191_s1 + $0x70] sm:$0xff]   ;;  %v6231_v8 = vld [vmem:[%s8191_s1 + $0x68] sm:$0xff]   ;;  %v935_v37 = vunpack.c.l.s4 %v6700_v36 }
   0x2   :  { %v6224_v1 = vld [vmem:[%s8191_s1 + $0xf8] sm:$0xff]   ;;  %5605 = vmatprep.subr.bf16.mxu0 %v6223_v0  ;;  %v6228_v5 = vld [vmem:[%s8191_s1 + $0xf0] sm:$0xff]   ;;  %v6232_v9 = vld [vmem:[%s8191_s1 + $0xe8] sm:$0xff]   ;;  %v938_v33 = vshrl.u32 %v937_v28, 7 }
   0x3   :  { %v6225_v2 = vld [vmem:[%s8191_s1 + $0x38] sm:$0xff]   ;;  %5627 = vmatprep.subr.bf16.mxu1 %v6224_v1  ;;  %v6229_v6 = vld [vmem:[%s8191_s1 + $0x30] sm:$0xff]   ;;  %v6233_v10 = vld [vmem:[%s8191_s1 + $0x28] sm:$0xff]   ;;  %v936_v40 = vunpack.c.0.s8 %v935_v37 }
   0x4   :  { %v6226_v3 = vld [vmem:[%s8191_s1 + $0xb8] sm:$0xff]   ;;  %5606 = vmatpush3.bf16.msra.mxu0 %v6225_v2  ;;  %v6230_v7 = vld [vmem:[%s8191_s1 + $0xb0] sm:$0xff]   ;;  %v6234_v11 = vld [vmem:[%s8191_s1 + $0xa8] sm:$0xff]  }
   0x5   :  { %5628 = vmatpush3.bf16.msra.mxu1 %v6226_v3  ;;  %5607 = vmatprep.subr.bf16.mxu0 %v6227_v4  ;;  %v6235_v12 = vld [vmem:[%s8191_s1 + $0x60] sm:$0xff]   ;;  %v6239_v16 = vld [vmem:[%s8191_s1 + $0x58] sm:$0xff]   ;;  %v6243_v20 = vld [vmem:[%s8191_s1 + $0x50] sm:$0xff]   ;;  %v6827_v41 = vsub.s32 %v936_v40, %v938_v33 }
   0x6   :  { %5629 = vmatprep.subr.bf16.mxu1 %v6228_v5  ;;  %v6236_v13 = vld [vmem:[%s8191_s1 + $0xe0] sm:$0xff]   ;;  %v6240_v17 = vld [vmem:[%s8191_s1 + $0xd8] sm:$0xff]   ;;  %v6244_v21 = vld [vmem:[%s8191_s1 + $0xd0] sm:$0xff]  }
   0x7   :  { %v6237_v14 = vld [vmem:[%s8191_s1 + $0x20] sm:$0xff]   ;;  %v6241_v18 = vld [vmem:[%s8191_s1 + $0x18] sm:$0xff]   ;;  %v6245_v22 = vld [vmem:[%s8191_s1 + $0x10] sm:$0xff]  }
   0x8   :  { %5608 = vmatpush3.bf16.msra.mxu0 %v6229_v6  ;;  %v6238_v15 = vld [vmem:[%s8191_s1 + $0xa0] sm:$0xff]   ;;  %v6242_v19 = vld [vmem:[%s8191_s1 + $0x98] sm:$0xff]   ;;  %v6246_v23 = vld [vmem:[%s8191_s1 + $0x90] sm:$0xff]  }
   0x9   :  { %5630 = vmatpush3.bf16.msra.mxu1 %v6230_v7  ;;  %5609 = vmatprep.subr.bf16.mxu0 %v6231_v8  ;;  %v6247_v24 = vld [vmem:[%s8191_s1 + $0x48] sm:$0xff]   ;;  %v6251_v29 = vld [vmem:[%s8191_s1 + $0x40] sm:$0xff]   ;;  %v6256_v35 = vld [vmem:[%s8191_s1 + $0x178] sm:$0xff]  }
   0xa   :  { %5631 = vmatprep.subr.bf16.mxu1 %v6232_v9  ;;  %v6248_v25 = vld [vmem:[%s8191_s1 + $0xc8] sm:$0xff]   ;;  %v6252_v30 = vld [vmem:[%s8191_s1 + $0xc0] sm:$0xff]   ;;  %v6257_v38 = vld [vmem:[%s8191_s1 + $0x1f8] sm:$0xff]  }
   0xb   :  { %v6249_v26 = vld [vmem:[%s8191_s1 + $0x8] sm:$0xff]   ;;  %v6253_v31 = vld [vmem:[%s8191_s1] sm:$0xff]   ;;  %v6258_v47 = vld [vmem:[%s8191_s1 + $0x138] sm:$0xff]  }
   0xc   :  { %5610 = vmatpush3.bf16.msra.mxu0 %v6233_v10  ;;  %v6250_v27 = vld [vmem:[%s8191_s1 + $0x88] sm:$0xff]   ;;  %v6254_v32 = vld [vmem:[%s8191_s1 + $0x80] sm:$0xff]   ;;  %v6259_v49 = vld [vmem:[%s8191_s1 + $0x1b8] sm:$0xff]  }
   0xd   :  { %5632 = vmatpush3.bf16.msra.mxu1 %v6234_v11  ;;  %5611 = vmatprep.subr.bf16.mxu0 %v6235_v12  ;;  %v16_v34 = vld [vmem:[%s8190_s0] sm:$0xff]  ;;  %v6260_v52 = vld [vmem:[%s8191_s1 + $0x170] sm:$0xff]   ;;  %v6264_v58 = vld [vmem:[%s8191_s1 + $0x168] sm:$0xff]  }
   0xe   :  { %5633 = vmatprep.subr.bf16.mxu1 %v6236_v13  ;;  %v933_v39 = vcombine.high %v16_v34, %v16_v34  ;;  %v940_v42 = vrot.slane %v16_v34, %v6827_v41  ;;  %v6261_v54 = vld [vmem:[%s8191_s1 + $0x1f0] sm:$0xff]   ;;  %v6265_v59 = vld [vmem:[%s8191_s1 + $0x1e8] sm:$0xff]   ;;  %v6268_v62 = vld [vmem:[%s8191_s1 + $0x160] sm:$0xff]  }
   0xf   :  { %v6262_v55 = vld [vmem:[%s8191_s1 + $0x130] sm:$0xff]   ;;  %v6266_v60 = vld [vmem:[%s8191_s1 + $0x128] sm:$0xff]   ;;  %v6269_v63 = vld [vmem:[%s8191_s1 + $0x1e0] sm:$0xff]  }
  0x10   :  { %5612 = vmatpush3.bf16.msra.mxu0 %v6237_v14  ;;  %v6831_v43 = vrot.slane %v933_v39, %v6827_v41  ;;  %v948_v44 = vcombine.high %v940_v42, %v940_v42  ;;  %v956_v45 = vrot.slane %v940_v42, %v6827_v41  ;;  %v6263_v57 = vld [vmem:[%s8191_s1 + $0x1b0] sm:$0xff]   ;;  %v6267_v61 = vld [vmem:[%s8191_s1 + $0x1a8] sm:$0xff]   ;;  %v6270_v0 = vld [vmem:[%s8191_s1 + $0x120] sm:$0xff]  }
  0x11   :  { %5634 = vmatpush3.bf16.msra.mxu1 %v6238_v15  ;;  %5613 = vmatprep.subr.bf16.mxu0 %v6239_v16  ;;  %v6271_v1 = vld [vmem:[%s8191_s1 + $0x1a0] sm:$0xff]   ;;  %v6272_v2 = vld [vmem:[%s8191_s1 + $0x158] sm:$0xff]   ;;  %v6276_v6 = vld [vmem:[%s8191_s1 + $0x150] sm:$0xff]  }
  0x12   :  { %5635 = vmatprep.subr.bf16.mxu1 %v6240_v17  ;;  %v949_v46 = vcombine.high %v6831_v43, %v6831_v43  ;;  %v970_v48 = vrot.slane %v948_v44, %v6827_v41  ;;  %v978_v51 = vcombine.high %v956_v45, %v956_v45  ;;  %v6273_v3 = vld [vmem:[%s8191_s1 + $0x1d8] sm:$0xff]   ;;  %v6277_v7 = vld [vmem:[%s8191_s1 + $0x1d0] sm:$0xff]   ;;  %v6280_v10 = vld [vmem:[%s8191_s1 + $0x148] sm:$0xff]  }
  0x13   :  { %v6274_v4 = vld [vmem:[%s8191_s1 + $0x118] sm:$0xff]   ;;  %v6278_v8 = vld [vmem:[%s8191_s1 + $0x110] sm:$0xff]   ;;  %v6281_v11 = vld [vmem:[%s8191_s1 + $0x1c8] sm:$0xff]  }
  0x14   :  { %5614 = vmatpush3.bf16.msra.mxu0 %v6241_v18  ;;  %v977_v50 = vrot.slane %v949_v46, %v6827_v41  ;;  %4052 = vmatprep.mubr.bf16.mxu0 %v970_v48  ;;  %v980_v53 = vcombine.high %v970_v48, %v970_v48  ;;  %v6275_v5 = vld [vmem:[%s8191_s1 + $0x198] sm:$0xff]   ;;  %v6279_v9 = vld [vmem:[%s8191_s1 + $0x190] sm:$0xff]   ;;  %v6282_v12 = vld [vmem:[%s8191_s1 + $0x108] sm:$0xff]   ;;  %v963_v18 = vrot.slane %v6831_v43, %v6827_v41 }
  0x15   :  { %5636 = vmatpush3.bf16.msra.mxu1 %v6242_v19  ;;  %5615 = vmatprep.subr.bf16.mxu0 %v6243_v20  ;;  %v6283_v13 = vld [vmem:[%s8191_s1 + $0x188] sm:$0xff]   ;;  %v6284_v14 = vld [vmem:[%s8191_s1 + $0x140] sm:$0xff]   ;;  %v6288_v19 = vld [vmem:[%s8191_s1 + $0x278] sm:$0xff]  }
  0x16   :  { %5637 = vmatprep.subr.bf16.mxu1 %v6244_v21  ;;  %v981_v56 = vcombine.high %v977_v50, %v977_v50  ;;  %4092 = vmatprep.mubr.bf16.mxu1 %v980_v53  ;;  %v6285_v15 = vld [vmem:[%s8191_s1 + $0x1c0] sm:$0xff]   ;;  %v6289_v20 = vld [vmem:[%s8191_s1 + $0x2f8] sm:$0xff]   ;;  %v6296_v28 = vld [vmem:[%s8191_s1 + $0x268] sm:$0xff]  }
  0x17   :  { %v6286_v16 = vld [vmem:[%s8191_s1 + $0x100] sm:$0xff]   ;;  %v6290_v21 = vld [vmem:[%s8191_s1 + $0x238] sm:$0xff]   ;;  %v6308_v40 = vld [vmem:[%s8191_s1 + $0x250] sm:$0xff]  }
  0x18   :  { %5616 = vmatpush3.bf16.msra.mxu0 %v6245_v22  ;;  %v6287_v17 = vld [vmem:[%s8191_s1 + $0x180] sm:$0xff]   ;;  %v6291_v22 = vld [vmem:[%s8191_s1 + $0x2b8] sm:$0xff]   ;;  %v6309_v42 = vld [vmem:[%s8191_s1 + $0x2d0] sm:$0xff]  }
  0x19   :  { %5638 = vmatpush3.bf16.msra.mxu1 %v6246_v23  ;;  %5617 = vmatprep.subr.bf16.mxu0 %v6247_v24  ;;  %v979_v23 = vcombine.high %v963_v18, %v963_v18  ;;  %v6292_v24 = vld [vmem:[%s8191_s1 + $0x270] sm:$0xff]   ;;  %v6301_v33 = vld [vmem:[%s8191_s1 + $0x2e0] sm:$0xff]   ;;  %v6304_v36 = vld [vmem:[%s8191_s1 + $0x258] sm:$0xff]  }
  0x1a   :  { %5639 = vmatprep.subr.bf16.mxu1 %v6248_v25  ;;  %v6293_v25 = vld [vmem:[%s8191_s1 + $0x2f0] sm:$0xff]   ;;  %v6302_v34 = vld [vmem:[%s8191_s1 + $0x220] sm:$0xff]   ;;  %v6305_v37 = vld [vmem:[%s8191_s1 + $0x2d8] sm:$0xff]  }
  0x1b   :  { %v6307_v39 = vld [vmem:[%s8191_s1 + $0x298] sm:$0xff]   ;;  %v6310_v43 = vld [vmem:[%s8191_s1 + $0x210] sm:$0xff]   ;;  %v17_v46 = vld [vmem:[%s8190_s0 + $0x8] sm:$0xff] }
  0x1c   :  { %5618 = vmatpush3.bf16.msra.mxu0 %v6249_v26  ;;  %v6294_v26 = vld [vmem:[%s8191_s1 + $0x230] sm:$0xff]   ;;  %v989_v48 = vrot.slane %v17_v46, %v6827_v41 }
  0x1d   :  { %5640 = vmatpush3.bf16.msra.mxu1 %v6250_v27  ;;  %5619 = vmatprep.subr.bf16.mxu0 %v6251_v29  ;;  %v6295_v27 = vld [vmem:[%s8191_s1 + $0x2b0] sm:$0xff]   ;;  %v6297_v29 = vld [vmem:[%s8191_s1 + $0x2e8] sm:$0xff]  }
  0x1e   :  { %5641 = vmatprep.subr.bf16.mxu1 %v6252_v30  ;;  %v6298_v30 = vld [vmem:[%s8191_s1 + $0x228] sm:$0xff]   ;;  %v6311_v44 = vld [vmem:[%s8191_s1 + $0x290] sm:$0xff]  }
  0x20   :  { %5620 = vmatpush3.bf16.msra.mxu0 %v6253_v31  ;;  %v6299_v31 = vld [vmem:[%s8191_s1 + $0x2a8] sm:$0xff]  }
  0x21   :  { %5642 = vmatpush3.bf16.msra.mxu1 %v6254_v32  ;;  %5649 = vmatprep.subr.bf16.mxu0 %v6256_v35  ;;  %v6300_v32 = vld [vmem:[%s8191_s1 + $0x260] sm:$0xff]  }
  0x22   :  { %5671 = vmatprep.subr.bf16.mxu1 %v6257_v38  ;;  %v6303_v35 = vld [vmem:[%s8191_s1 + $0x2a0] sm:$0xff]   ;;  %v6306_v38 = vld [vmem:[%s8191_s1 + $0x218] sm:$0xff]  }
  0x23   :  { %4053 = vmatmul.mubr.bf16.vlgmr.msra.gmra.mxu0 %v956_v45  ;;  %v6312_v45 = vld [vmem:[%s8191_s1 + $0x248] sm:$0xff]  }
  0x24   :  { %5650 = vmatpush3.bf16.msra.mxu0 %v6258_v47  ;;  %4093 = vmatmul.mubr.bf16.vlgmr.msra.gmra.mxu1 %v978_v51  ;;  %v6313_v47 = vld [vmem:[%s8191_s1 + $0x2c8] sm:$0xff]  }
  0x25   :  { %5651 = vmatprep.subr.bf16.mxu0 %v6260_v52  ;;  %5672 = vmatpush3.bf16.msra.mxu1 %v6259_v49  ;;  %v982_v49 = vcombine.high %v17_v46, %v17_v46  ;;  %v6315_v51 = vld [vmem:[%s8191_s1 + $0x288] sm:$0xff]   ;;  %v997_v52 = vcombine.high %v989_v48, %v989_v48 }
  0x26   :  { %4132 = vmatprep.mubr.bf16.mxu0 %v977_v50  ;;  %5673 = vmatprep.subr.bf16.mxu1 %v6261_v54  ;;  %v6314_v50 = vld [vmem:[%s8191_s1 + $0x208] sm:$0xff]   ;;  %v6316_v54 = vld [vmem:[%s8191_s1 + $0x240] sm:$0xff]  }
  0x27   :  { %4172 = vmatprep.mubr.bf16.mxu1 %v981_v56  ;;  %v7019_v53 = vrot.slane %v982_v49, %v6827_v41  ;;  %v1019_v56 = vrot.slane %v997_v52, %v6827_v41  ;;  %v6363_v46 = vld [vmem:[%s8191_s1 + $0x428] sm:$0xff]   ;;  %v6366_v49 = vld [vmem:[%s8191_s1 + $0x4e0] sm:$0xff]   ;;  %v6369_v52 = vld [vmem:[%s8191_s1 + $0x458] sm:$0xff]  }
  0x28   :  { %5652 = vmatpush3.bf16.msra.mxu0 %v6262_v55  ;;  %v6317_v55 = vld [vmem:[%s8191_s1 + $0x2c0] sm:$0xff]  }
  0x29   :  { %5653 = vmatprep.subr.bf16.mxu0 %v6264_v58  ;;  %5674 = vmatpush3.bf16.msra.mxu1 %v6263_v57  ;;  %v998_v57 = vcombine.high %v7019_v53, %v7019_v53  ;;  %v6318_v58 = vld [vmem:[%s8191_s1 + $0x200] sm:$0xff]  }
  0x2a   :  { %5675 = vmatprep.subr.bf16.mxu1 %v6265_v59  ;;  %v6319_v59 = vld [vmem:[%s8191_s1 + $0x280] sm:$0xff]  }
  0x2c   :  { %5654 = vmatpush3.bf16.msra.mxu0 %v6266_v60  ;;  %v1029_v60 = vcombine.high %v1019_v56, %v1019_v56 }
  0x2d   :  { %5655 = vmatprep.subr.bf16.mxu0 %v6268_v62  ;;  %5676 = vmatpush3.bf16.msra.mxu1 %v6267_v61  ;;  %v1005_v61 = vrot.slane %v989_v48, %v6827_v41  ;;  %v6320_v62 = vld [vmem:[%s8191_s1 + $0x378] sm:$0xff]   ;;  %v6365_v48 = vld [vmem:[%s8191_s1 + $0x460] sm:$0xff]  }
  0x2e   :  { %5677 = vmatprep.subr.bf16.mxu1 %v6269_v63  ;;  %v6321_v63 = vld [vmem:[%s8191_s1 + $0x3f8] sm:$0xff]  }
  0x30   :  { %5656 = vmatpush3.bf16.msra.mxu0 %v6270_v0  ;;  %v1026_v0 = vrot.slane %v998_v57, %v6827_v41  ;;  %v6374_v57 = vld [vmem:[%s8191_s1 + $0x4d0] sm:$0xff]  }
  0x31   :  { %5657 = vmatprep.subr.bf16.mxu0 %v6272_v2  ;;  %5678 = vmatpush3.bf16.msra.mxu1 %v6271_v1  ;;  %v6322_v1 = vld [vmem:[%s8191_s1 + $0x338] sm:$0xff]  }
  0x32   :  { %5679 = vmatprep.subr.bf16.mxu1 %v6273_v3  ;;  %v6323_v2 = vld [vmem:[%s8191_s1 + $0x3b8] sm:$0xff]   ;;  %v1027_v3 = vcombine.high %v1005_v61, %v1005_v61 }
  0x34   :  { %5658 = vmatpush3.bf16.msra.mxu0 %v6274_v4  ;;  %v6324_v4 = vld [vmem:[%s8191_s1 + $0x370] sm:$0xff]  }
  0x35   :  { %5659 = vmatprep.subr.bf16.mxu0 %v6276_v6  ;;  %5680 = vmatpush3.bf16.msra.mxu1 %v6275_v5  ;;  %v6325_v5 = vld [vmem:[%s8191_s1 + $0x3f0] sm:$0xff]   ;;  %v1030_v6 = vcombine.high %v1026_v0, %v1026_v0 }
  0x36   :  { %5681 = vmatprep.subr.bf16.mxu1 %v6277_v7  ;;  %v6326_v7 = vld [vmem:[%s8191_s1 + $0x330] sm:$0xff]  }
  0x38   :  { %5660 = vmatpush3.bf16.msra.mxu0 %v6278_v8  ;;  %v6327_v8 = vld [vmem:[%s8191_s1 + $0x3b0] sm:$0xff]  }
  0x39   :  { %5661 = vmatprep.subr.bf16.mxu0 %v6280_v10  ;;  %5682 = vmatpush3.bf16.msra.mxu1 %v6279_v9  ;;  %v6328_v9 = vld [vmem:[%s8191_s1 + $0x368] sm:$0xff]  }
  0x3a   :  { %5683 = vmatprep.subr.bf16.mxu1 %v6281_v11  ;;  %v6329_v10 = vld [vmem:[%s8191_s1 + $0x3e8] sm:$0xff]  }
  0x3b   :  { %v6330_v11 = vld [vmem:[%s8191_s1 + $0x328] sm:$0xff]  }
  0x3c   :  { %5662 = vmatpush3.bf16.msra.mxu0 %v6282_v12  ;;  %v6331_v12 = vld [vmem:[%s8191_s1 + $0x3a8] sm:$0xff]  }
  0x3d   :  { %5663 = vmatprep.subr.bf16.mxu0 %v6284_v14  ;;  %5684 = vmatpush3.bf16.msra.mxu1 %v6283_v13  ;;  %v6332_v13 = vld [vmem:[%s8191_s1 + $0x360] sm:$0xff]  }
  0x3e   :  { %5685 = vmatprep.subr.bf16.mxu1 %v6285_v15  ;;  %v6333_v14 = vld [vmem:[%s8191_s1 + $0x3e0] sm:$0xff]  }
  0x3f   :  { %v6334_v15 = vld [vmem:[%s8191_s1 + $0x320] sm:$0xff]  }
  0x40   :  { %5664 = vmatpush3.bf16.msra.mxu0 %v6286_v16  ;;  %v6335_v16 = vld [vmem:[%s8191_s1 + $0x3a0] sm:$0xff]  }
  0x41   :  { %5693 = vmatprep.subr.bf16.mxu0 %v6288_v19  ;;  %5686 = vmatpush3.bf16.msra.mxu1 %v6287_v17  ;;  %v6336_v17 = vld [vmem:[%s8191_s1 + $0x358] sm:$0xff]  }
  0x42   :  { %5715 = vmatprep.subr.bf16.mxu1 %v6289_v20  ;;  %v6338_v19 = vld [vmem:[%s8191_s1 + $0x318] sm:$0xff]  }
  0x43   :  { %4133 = vmatmul.mubr.bf16.vlgmr.msra.gmra.mxu0 %v963_v18  ;;  %v6337_v18 = vld [vmem:[%s8191_s1 + $0x3d8] sm:$0xff]  }
  0x44   :  { %5694 = vmatpush3.bf16.msra.mxu0 %v6290_v21  ;;  %4173 = vmatmul.mubr.bf16.vlgmr.msra.gmra.mxu1 %v979_v23  ;;  %v6339_v20 = vld [vmem:[%s8191_s1 + $0x398] sm:$0xff]   ;;  %v6340_v21 = vld [vmem:[%s8191_s1 + $0x350] sm:$0xff]  }
  0x45   :  { %5695 = vmatprep.subr.bf16.mxu0 %v6292_v24  ;;  %5716 = vmatpush3.bf16.msra.mxu1 %v6291_v22  ;;  %v6341_v22 = vld [vmem:[%s8191_s1 + $0x3d0] sm:$0xff]  }
  0x46   :  { %5717 = vmatprep.subr.bf16.mxu1 %v6293_v25  ;;  %4212 = vmatprep.mubr.bf16.mxu0 %v1019_v56  ;;  %v6342_v23 = vld [vmem:[%s8191_s1 + $0x310] sm:$0xff]   ;;  %v6344_v25 = vld [vmem:[%s8191_s1 + $0x348] sm:$0xff]  }
  0x47   :  { %4252 = vmatprep.mubr.bf16.mxu1 %v1029_v60  ;;  %v6343_v24 = vld [vmem:[%s8191_s1 + $0x390] sm:$0xff]   ;;  %v6377_v60 = vld [vmem:[%s8191_s1 + $0x448] sm:$0xff]  }
  0x48   :  { %5696 = vmatpush3.bf16.msra.mxu0 %v6294_v26  ;;  %v6345_v26 = vld [vmem:[%s8191_s1 + $0x3c8] sm:$0xff]   ;;  %v6373_v56 = vld [vmem:[%s8191_s1 + $0x450] sm:$0xff]  }
  0x49   :  { %5697 = vmatprep.subr.bf16.mxu0 %v6296_v28  ;;  %5718 = vmatpush3.bf16.msra.mxu1 %v6295_v27  ;;  %v6346_v27 = vld [vmem:[%s8191_s1 + $0x308] sm:$0xff]  }
  0x4a   :  { %5719 = vmatprep.subr.bf16.mxu1 %v6297_v29  ;;  %v6347_v28 = vld [vmem:[%s8191_s1 + $0x388] sm:$0xff]   ;;  %v6348_v29 = vld [vmem:[%s8191_s1 + $0x340] sm:$0xff]  }
  0x4c   :  { %5698 = vmatpush3.bf16.msra.mxu0 %v6298_v30  ;;  %v6349_v30 = vld [vmem:[%s8191_s1 + $0x3c0] sm:$0xff]  }
  0x4d   :  { %5699 = vmatprep.subr.bf16.mxu0 %v6300_v32  ;;  %5720 = vmatpush3.bf16.msra.mxu1 %v6299_v31  ;;  %v6350_v31 = vld [vmem:[%s8191_s1 + $0x300] sm:$0xff]  }
  0x4e   :  { %5721 = vmatprep.subr.bf16.mxu1 %v6301_v33  ;;  %v6351_v32 = vld [vmem:[%s8191_s1 + $0x380] sm:$0xff]   ;;  %v1012_v33 = vrot.slane %v7019_v53, %v6827_v41  ;;  %v6370_v53 = vld [vmem:[%s8191_s1 + $0x4d8] sm:$0xff]  }
  0x50   :  { %5700 = vmatpush3.bf16.msra.mxu0 %v6302_v34  ;;  %v6353_v34 = vld [vmem:[%s8191_s1 + $0x478] sm:$0xff]  }
  0x51   :  { %5701 = vmatprep.subr.bf16.mxu0 %v6304_v36  ;;  %5722 = vmatpush3.bf16.msra.mxu1 %v6303_v35  ;;  %v6354_v35 = vld [vmem:[%s8191_s1 + $0x4f8] sm:$0xff]  }
  0x52   :  { %5723 = vmatprep.subr.bf16.mxu1 %v6305_v37  ;;  %v6355_v36 = vld [vmem:[%s8191_s1 + $0x438] sm:$0xff]  }
  0x53   :  { %v6356_v37 = vld [vmem:[%s8191_s1 + $0x4b8] sm:$0xff]  }
  0x54   :  { %5702 = vmatpush3.bf16.msra.mxu0 %v6306_v38  ;;  %v1028_v38 = vcombine.high %v1012_v33, %v1012_v33 }
  0x55   :  { %5703 = vmatprep.subr.bf16.mxu0 %v6308_v40  ;;  %5724 = vmatpush3.bf16.msra.mxu1 %v6307_v39  ;;  %v6357_v39 = vld [vmem:[%s8191_s1 + $0x470] sm:$0xff]  }
  0x56   :  { %5725 = vmatprep.subr.bf16.mxu1 %v6309_v42  ;;  %v6358_v40 = vld [vmem:[%s8191_s1 + $0x4f0] sm:$0xff]  }
  0x57   :  { %v6359_v42 = vld [vmem:[%s8191_s1 + $0x430] sm:$0xff]  }
  0x58   :  { %5704 = vmatpush3.bf16.msra.mxu0 %v6310_v43  ;;  %v6360_v43 = vld [vmem:[%s8191_s1 + $0x4b0] sm:$0xff]  }
  0x59   :  { %5705 = vmatprep.subr.bf16.mxu0 %v6312_v45  ;;  %5726 = vmatpush3.bf16.msra.mxu1 %v6311_v44  ;;  %v6361_v44 = vld [vmem:[%s8191_s1 + $0x468] sm:$0xff]  }
  0x5a   :  { %5727 = vmatprep.subr.bf16.mxu1 %v6313_v47  ;;  %v6362_v45 = vld [vmem:[%s8191_s1 + $0x4e8] sm:$0xff]  }
  0x5b   :  { %v6364_v47 = vld [vmem:[%s8191_s1 + $0x4a8] sm:$0xff]  }
  0x5c   :  { %5706 = vmatpush3.bf16.msra.mxu0 %v6314_v50  ;;  %v6367_v50 = vld [vmem:[%s8191_s1 + $0x420] sm:$0xff]  }
  0x5d   :  { %5707 = vmatprep.subr.bf16.mxu0 %v6316_v54  ;;  %5728 = vmatpush3.bf16.msra.mxu1 %v6315_v51  ;;  %v6368_v51 = vld [vmem:[%s8191_s1 + $0x4a0] sm:$0xff]   ;;  %v6371_v54 = vld [vmem:[%s8191_s1 + $0x418] sm:$0xff]  }
  0x5e   :  { %5729 = vmatprep.subr.bf16.mxu1 %v6317_v55  ;;  %v6372_v55 = vld [vmem:[%s8191_s1 + $0x498] sm:$0xff]  }
  0x60   :  { %5708 = vmatpush3.bf16.msra.mxu0 %v6318_v58  ;;  %v6375_v58 = vld [vmem:[%s8191_s1 + $0x410] sm:$0xff]  }
  0x61   :  { %5737 = vmatprep.subr.bf16.mxu0 %v6320_v62  ;;  %5730 = vmatpush3.bf16.msra.mxu1 %v6319_v59  ;;  %v6376_v59 = vld [vmem:[%s8191_s1 + $0x490] sm:$0xff]   ;;  %v6378_v62 = vld [vmem:[%s8191_s1 + $0x4c8] sm:$0xff]  }
  0x62   :  { %5759 = vmatprep.subr.bf16.mxu1 %v6321_v63 }
  0x63   :  { %4213 = vmatmul.mubr.bf16.vlgmr.msra.gmra.mxu0 %v1005_v61  ;;  %v18_v61 = vld [vmem:[%s8190_s0 + $0x10] sm:$0xff] }
  0x64   :  { %5738 = vmatpush3.bf16.msra.mxu0 %v6322_v1  ;;  %4292 = vmatprep.mubr.bf16.mxu0 %v1026_v0  ;;  %v1038_v63 = vrot.slane %v18_v61, %v6827_v41  ;;  %v1031_v0 = vcombine.high %v18_v61, %v18_v61  ;;  %v6379_v1 = vld [vmem:[%s8191_s1 + $0x408] sm:$0xff]  }
  0x65   :  { %4253 = vmatmul.mubr.bf16.vlgmr.msra.gmra.mxu1 %v1027_v3  ;;  %5739 = vmatprep.subr.bf16.mxu0 %v6324_v4  ;;  %v6428_v61 = vld [vmem:[%s8191_s1 + $0x628] sm:$0xff]  }
  0x66   :  { %5760 = vmatpush3.bf16.msra.mxu1 %v6323_v2  ;;  %4332 = vmatprep.mubr.bf16.mxu1 %v1030_v6  ;;  %v6380_v2 = vld [vmem:[%s8191_s1 + $0x488] sm:$0xff]   ;;  %v1046_v3 = vcombine.high %v1038_v63, %v1038_v63  ;;  %v7225_v4 = vrot.slane %v1031_v0, %v6827_v41  ;;  %v6382_v6 = vld [vmem:[%s8191_s1 + $0x4c0] sm:$0xff]  }
  0x67   :  { %5761 = vmatprep.subr.bf16.mxu1 %v6325_v5  ;;  %v6381_v5 = vld [vmem:[%s8191_s1 + $0x440] sm:$0xff]  }
  0x68   :  { %5740 = vmatpush3.bf16.msra.mxu0 %v6326_v7  ;;  %v1068_v7 = vrot.slane %v1046_v3, %v6827_v41  ;;  %v6431_v0 = vld [vmem:[%s8191_s1 + $0x6e0] sm:$0xff]   ;;  %v6434_v3 = vld [vmem:[%s8191_s1 + $0x658] sm:$0xff]  }
  0x69   :  { %5741 = vmatprep.subr.bf16.mxu0 %v6328_v9  ;;  %v6383_v9 = vld [vmem:[%s8191_s1 + $0x400] sm:$0xff]  }
  0x6a   :  { %5762 = vmatpush3.bf16.msra.mxu1 %v6327_v8  ;;  %v1047_v8 = vcombine.high %v7225_v4, %v7225_v4 }
  0x6b   :  { %5763 = vmatprep.subr.bf16.mxu1 %v6329_v10  ;;  %v6384_v10 = vld [vmem:[%s8191_s1 + $0x480] sm:$0xff]  }
  0x6c   :  { %5742 = vmatpush3.bf16.msra.mxu0 %v6330_v11  ;;  %v1078_v11 = vcombine.high %v1068_v7, %v1068_v7 }
  0x6d   :  { %5743 = vmatprep.subr.bf16.mxu0 %v6332_v13  ;;  %v6385_v13 = vld [vmem:[%s8191_s1 + $0x578] sm:$0xff]  }
  0x6e   :  { %5764 = vmatpush3.bf16.msra.mxu1 %v6331_v12  ;;  %v1054_v12 = vrot.slane %v1038_v63, %v6827_v41  ;;  %v6430_v63 = vld [vmem:[%s8191_s1 + $0x660] sm:$0xff]  }
  0x6f   :  { %5765 = vmatprep.subr.bf16.mxu1 %v6333_v14  ;;  %v6386_v14 = vld [vmem:[%s8191_s1 + $0x5f8] sm:$0xff]  }
  0x70   :  { %5744 = vmatpush3.bf16.msra.mxu0 %v6334_v15  ;;  %v1075_v15 = vrot.slane %v1047_v8, %v6827_v41  ;;  %v6439_v8 = vld [vmem:[%s8191_s1 + $0x6d0] sm:$0xff]  }
  0x71   :  { %5745 = vmatprep.subr.bf16.mxu0 %v6336_v17  ;;  %v6388_v17 = vld [vmem:[%s8191_s1 + $0x5b8] sm:$0xff]  }
  0x72   :  { %5766 = vmatpush3.bf16.msra.mxu1 %v6335_v16  ;;  %v6387_v16 = vld [vmem:[%s8191_s1 + $0x538] sm:$0xff]  }
  0x73   :  { %5767 = vmatprep.subr.bf16.mxu1 %v6337_v18  ;;  %v1076_v18 = vcombine.high %v1054_v12, %v1054_v12 }
  0x74   :  { %5746 = vmatpush3.bf16.msra.mxu0 %v6338_v19  ;;  %v6389_v19 = vld [vmem:[%s8191_s1 + $0x570] sm:$0xff]  }
  0x75   :  { %5747 = vmatprep.subr.bf16.mxu0 %v6340_v21  ;;  %v1079_v21 = vcombine.high %v1075_v15, %v1075_v15 }
  0x76   :  { %5768 = vmatpush3.bf16.msra.mxu1 %v6339_v20  ;;  %v6390_v20 = vld [vmem:[%s8191_s1 + $0x5f0] sm:$0xff]  }
  0x77   :  { %5769 = vmatprep.subr.bf16.mxu1 %v6341_v22  ;;  %v6391_v22 = vld [vmem:[%s8191_s1 + $0x530] sm:$0xff]  }
  0x78   :  { %5748 = vmatpush3.bf16.msra.mxu0 %v6342_v23  ;;  %v6392_v23 = vld [vmem:[%s8191_s1 + $0x5b0] sm:$0xff]  }
  0x79   :  { %5749 = vmatprep.subr.bf16.mxu0 %v6344_v25  ;;  %v6394_v25 = vld [vmem:[%s8191_s1 + $0x5e8] sm:$0xff]  }
  0x7a   :  { %5770 = vmatpush3.bf16.msra.mxu1 %v6343_v24  ;;  %v6393_v24 = vld [vmem:[%s8191_s1 + $0x568] sm:$0xff]  }
  0x7b   :  { %5771 = vmatprep.subr.bf16.mxu1 %v6345_v26  ;;  %v6395_v26 = vld [vmem:[%s8191_s1 + $0x528] sm:$0xff]  }
  0x7c   :  { %5750 = vmatpush3.bf16.msra.mxu0 %v6346_v27  ;;  %v6396_v27 = vld [vmem:[%s8191_s1 + $0x5a8] sm:$0xff]  }
  0x7d   :  { %5751 = vmatprep.subr.bf16.mxu0 %v6348_v29  ;;  %v6398_v29 = vld [vmem:[%s8191_s1 + $0x5e0] sm:$0xff]  }
  0x7e   :  { %5772 = vmatpush3.bf16.msra.mxu1 %v6347_v28  ;;  %v6397_v28 = vld [vmem:[%s8191_s1 + $0x560] sm:$0xff]  }
  0x7f   :  { %5773 = vmatprep.subr.bf16.mxu1 %v6349_v30  ;;  %v6399_v30 = vld [vmem:[%s8191_s1 + $0x520] sm:$0xff]  }
  0x80   :  { %5752 = vmatpush3.bf16.msra.mxu0 %v6350_v31  ;;  %v6400_v31 = vld [vmem:[%s8191_s1 + $0x5a0] sm:$0xff]  }
  0x81   :  { %5781 = vmatprep.subr.bf16.mxu0 %v6353_v34  ;;  %v6403_v34 = vld [vmem:[%s8191_s1 + $0x518] sm:$0xff]  }
  0x82   :  { %5774 = vmatpush3.bf16.msra.mxu1 %v6351_v32  ;;  %v6401_v32 = vld [vmem:[%s8191_s1 + $0x558] sm:$0xff]  }
  0x83   :  { %4293 = vmatmul.mubr.bf16.vlgmr.msra.gmra.mxu0 %v1012_v33  ;;  %5803 = vmatprep.subr.bf16.mxu1 %v6354_v35  ;;  %v6402_v33 = vld [vmem:[%s8191_s1 + $0x5d8] sm:$0xff]  }
  0x84   :  { %5782 = vmatpush3.bf16.msra.mxu0 %v6355_v36  ;;  %4372 = vmatprep.mubr.bf16.mxu0 %v1068_v7  ;;  %v6404_v35 = vld [vmem:[%s8191_s1 + $0x598] sm:$0xff]   ;;  %v6405_v36 = vld [vmem:[%s8191_s1 + $0x550] sm:$0xff]  }
  0x85   :  { %4333 = vmatmul.mubr.bf16.vlgmr.msra.gmra.mxu1 %v1028_v38  ;;  %5783 = vmatprep.subr.bf16.mxu0 %v6357_v39  ;;  %v6407_v38 = vld [vmem:[%s8191_s1 + $0x510] sm:$0xff]  }
  0x86   :  { %5804 = vmatpush3.bf16.msra.mxu1 %v6356_v37  ;;  %4412 = vmatprep.mubr.bf16.mxu1 %v1078_v11  ;;  %v6406_v37 = vld [vmem:[%s8191_s1 + $0x5d0] sm:$0xff]   ;;  %v6442_v11 = vld [vmem:[%s8191_s1 + $0x648] sm:$0xff]  }
  0x87   :  { %5805 = vmatprep.subr.bf16.mxu1 %v6358_v40  ;;  %v6408_v39 = vld [vmem:[%s8191_s1 + $0x590] sm:$0xff]   ;;  %v6409_v40 = vld [vmem:[%s8191_s1 + $0x548] sm:$0xff]  }
  0x88   :  { %5784 = vmatpush3.bf16.msra.mxu0 %v6359_v42  ;;  %v6410_v42 = vld [vmem:[%s8191_s1 + $0x5c8] sm:$0xff]   ;;  %v6438_v7 = vld [vmem:[%s8191_s1 + $0x650] sm:$0xff]  }
  0x89   :  { %5785 = vmatprep.subr.bf16.mxu0 %v6361_v44  ;;  %v6412_v44 = vld [vmem:[%s8191_s1 + $0x588] sm:$0xff]  }
  0x8a   :  { %5806 = vmatpush3.bf16.msra.mxu1 %v6360_v43  ;;  %v6411_v43 = vld [vmem:[%s8191_s1 + $0x508] sm:$0xff]  }
  0x8b   :  { %5807 = vmatprep.subr.bf16.mxu1 %v6362_v45  ;;  %v6413_v45 = vld [vmem:[%s8191_s1 + $0x540] sm:$0xff]  }
  0x8c   :  { %5786 = vmatpush3.bf16.msra.mxu0 %v6363_v46  ;;  %v6414_v46 = vld [vmem:[%s8191_s1 + $0x5c0] sm:$0xff]  }
  0x8d   :  { %5787 = vmatprep.subr.bf16.mxu0 %v6365_v48  ;;  %v6416_v48 = vld [vmem:[%s8191_s1 + $0x580] sm:$0xff]  }
  0x8e   :  { %5808 = vmatpush3.bf16.msra.mxu1 %v6364_v47  ;;  %v6415_v47 = vld [vmem:[%s8191_s1 + $0x500] sm:$0xff]  }
  0x8f   :  { %5809 = vmatprep.subr.bf16.mxu1 %v6366_v49  ;;  %v1061_v49 = vrot.slane %v7225_v4, %v6827_v41  ;;  %v6435_v4 = vld [vmem:[%s8191_s1 + $0x6d8] sm:$0xff]  }
  0x90   :  { %5788 = vmatpush3.bf16.msra.mxu0 %v6367_v50  ;;  %v6418_v50 = vld [vmem:[%s8191_s1 + $0x678] sm:$0xff]  }
  0x91   :  { %5789 = vmatprep.subr.bf16.mxu0 %v6369_v52  ;;  %v6420_v52 = vld [vmem:[%s8191_s1 + $0x638] sm:$0xff]  }
  0x92   :  { %5810 = vmatpush3.bf16.msra.mxu1 %v6368_v51  ;;  %v6419_v51 = vld [vmem:[%s8191_s1 + $0x6f8] sm:$0xff]  }
  0x93   :  { %5811 = vmatprep.subr.bf16.mxu1 %v6370_v53  ;;  %v6421_v53 = vld [vmem:[%s8191_s1 + $0x6b8] sm:$0xff]  }
  0x94   :  { %5790 = vmatpush3.bf16.msra.mxu0 %v6371_v54  ;;  %v1077_v54 = vcombine.high %v1061_v49, %v1061_v49 }
  0x95   :  { %5791 = vmatprep.subr.bf16.mxu0 %v6373_v56  ;;  %v6423_v56 = vld [vmem:[%s8191_s1 + $0x6f0] sm:$0xff]  }
  0x96   :  { %5812 = vmatpush3.bf16.msra.mxu1 %v6372_v55  ;;  %v6422_v55 = vld [vmem:[%s8191_s1 + $0x670] sm:$0xff]  }
  0x97   :  { %5813 = vmatprep.subr.bf16.mxu1 %v6374_v57  ;;  %v6424_v57 = vld [vmem:[%s8191_s1 + $0x630] sm:$0xff]  }
  0x98   :  { %5792 = vmatpush3.bf16.msra.mxu0 %v6375_v58  ;;  %v6425_v58 = vld [vmem:[%s8191_s1 + $0x6b0] sm:$0xff]  }
  0x99   :  { %5793 = vmatprep.subr.bf16.mxu0 %v6377_v60  ;;  %v6427_v60 = vld [vmem:[%s8191_s1 + $0x6e8] sm:$0xff]  }
  0x9a   :  { %5814 = vmatpush3.bf16.msra.mxu1 %v6376_v59  ;;  %v6426_v59 = vld [vmem:[%s8191_s1 + $0x668] sm:$0xff]  }
  0x9b   :  { %5815 = vmatprep.subr.bf16.mxu1 %v6378_v62  ;;  %v6429_v62 = vld [vmem:[%s8191_s1 + $0x6a8] sm:$0xff]  }
  0x9c   :  { %5794 = vmatpush3.bf16.msra.mxu0 %v6379_v1  ;;  %v6432_v1 = vld [vmem:[%s8191_s1 + $0x620] sm:$0xff]  }
  0x9d   :  { %5795 = vmatprep.subr.bf16.mxu0 %v6381_v5  ;;  %v6436_v5 = vld [vmem:[%s8191_s1 + $0x618] sm:$0xff]  }
  0x9e   :  { %5816 = vmatpush3.bf16.msra.mxu1 %v6380_v2  ;;  %v6433_v2 = vld [vmem:[%s8191_s1 + $0x6a0] sm:$0xff]  }
  0x9f   :  { %5817 = vmatprep.subr.bf16.mxu1 %v6382_v6  ;;  %v6437_v6 = vld [vmem:[%s8191_s1 + $0x698] sm:$0xff]  }
  0xa0   :  { %5796 = vmatpush3.bf16.msra.mxu0 %v6383_v9  ;;  %v6440_v9 = vld [vmem:[%s8191_s1 + $0x610] sm:$0xff]  }
  0xa1   :  { %5825 = vmatprep.subr.bf16.mxu0 %v6385_v13  ;;  %v6443_v13 = vld [vmem:[%s8191_s1 + $0x6c8] sm:$0xff]  }
  0xa2   :  { %5818 = vmatpush3.bf16.msra.mxu1 %v6384_v10  ;;  %v6441_v10 = vld [vmem:[%s8191_s1 + $0x690] sm:$0xff]  }
  0xa3   :  { %4373 = vmatmul.mubr.bf16.vlgmr.msra.gmra.mxu0 %v1054_v12  ;;  %5847 = vmatprep.subr.bf16.mxu1 %v6386_v14  ;;  %v19_v12 = vld [vmem:[%s8190_s0 + $0x18] sm:$0xff] }
  0xa4   :  { %5826 = vmatpush3.bf16.msra.mxu0 %v6387_v16  ;;  %4452 = vmatprep.mubr.bf16.mxu0 %v1075_v15  ;;  %v1087_v14 = vrot.slane %v19_v12, %v6827_v41  ;;  %v1080_v15 = vcombine.high %v19_v12, %v19_v12  ;;  %v6444_v16 = vld [vmem:[%s8191_s1 + $0x608] sm:$0xff]   ;;  %v6481_v12 = vld [vmem:[%s8191_s1 + $0x780] sm:$0xff]  }
  0xa5   :  { %4413 = vmatmul.mubr.bf16.vlgmr.msra.gmra.mxu1 %v1076_v18  ;;  %5827 = vmatprep.subr.bf16.mxu0 %v6389_v19 }
  0xa6   :  { %5848 = vmatpush3.bf16.msra.mxu1 %v6388_v17  ;;  %4492 = vmatprep.mubr.bf16.mxu1 %v1079_v21  ;;  %v6446_v17 = vld [vmem:[%s8191_s1 + $0x640] sm:$0xff]   ;;  %v1095_v18 = vcombine.high %v1087_v14, %v1087_v14  ;;  %v7431_v19 = vrot.slane %v1080_v15, %v6827_v41  ;;  %v6484_v15 = vld [vmem:[%s8191_s1 + $0x8f8] sm:$0xff]  }
  0xa7   :  { %5849 = vmatprep.subr.bf16.mxu1 %v6390_v20  ;;  %v6445_v20 = vld [vmem:[%s8191_s1 + $0x688] sm:$0xff]   ;;  %v6447_v21 = vld [vmem:[%s8191_s1 + $0x6c0] sm:$0xff]  }
  0xa8   :  { %5828 = vmatpush3.bf16.msra.mxu0 %v6391_v22  ;;  %v6448_v22 = vld [vmem:[%s8191_s1 + $0x600] sm:$0xff]  }
  0xa9   :  { %5829 = vmatprep.subr.bf16.mxu0 %v6393_v24  ;;  %v1096_v24 = vcombine.high %v7431_v19, %v7431_v19 }
  0xaa   :  { %5850 = vmatpush3.bf16.msra.mxu1 %v6392_v23  ;;  %v1117_v23 = vrot.slane %v1095_v18, %v6827_v41 }
  0xab   :  { %5851 = vmatprep.subr.bf16.mxu1 %v6394_v25  ;;  %v6449_v25 = vld [vmem:[%s8191_s1 + $0x680] sm:$0xff]  }
  0xac   :  { %5830 = vmatpush3.bf16.msra.mxu0 %v6395_v26  ;;  %v1127_v26 = vcombine.high %v1117_v23, %v1117_v23 }
  0xad   :  { %5831 = vmatprep.subr.bf16.mxu0 %v6397_v28  ;;  %v6450_v28 = vld [vmem:[%s8191_s1 + $0x778] sm:$0xff]  }
  0xae   :  { %5852 = vmatpush3.bf16.msra.mxu1 %v6396_v27  ;;  %v1103_v27 = vrot.slane %v1087_v14, %v6827_v41  ;;  %v6483_v14 = vld [vmem:[%s8191_s1 + $0x878] sm:$0xff]  }
  0xaf   :  { %5853 = vmatprep.subr.bf16.mxu1 %v6398_v29  ;;  %v6451_v29 = vld [vmem:[%s8191_s1 + $0x7f8] sm:$0xff]  }
  0xb0   :  { %5832 = vmatpush3.bf16.msra.mxu0 %v6399_v30  ;;  %v1124_v30 = vrot.slane %v1096_v24, %v6827_v41 }
  0xb1   :  { %5833 = vmatprep.subr.bf16.mxu0 %v6401_v32  ;;  %v6453_v32 = vld [vmem:[%s8191_s1 + $0x7b8] sm:$0xff]  }
  0xb2   :  { %5854 = vmatpush3.bf16.msra.mxu1 %v6400_v31  ;;  %v6452_v31 = vld [vmem:[%s8191_s1 + $0x738] sm:$0xff]  }
  0xb3   :  { %5855 = vmatprep.subr.bf16.mxu1 %v6402_v33  ;;  %v1125_v33 = vcombine.high %v1103_v27, %v1103_v27 }
  0xb4   :  { %5834 = vmatpush3.bf16.msra.mxu0 %v6403_v34  ;;  %v6454_v34 = vld [vmem:[%s8191_s1 + $0x770] sm:$0xff]  }
  0xb5   :  { %5835 = vmatprep.subr.bf16.mxu0 %v6405_v36  ;;  %v1128_v36 = vcombine.high %v1124_v30, %v1124_v30 }
  0xb6   :  { %5856 = vmatpush3.bf16.msra.mxu1 %v6404_v35  ;;  %v6455_v35 = vld [vmem:[%s8191_s1 + $0x7f0] sm:$0xff]  }
  0xb7   :  { %5857 = vmatprep.subr.bf16.mxu1 %v6406_v37 }
  0xb8   :  { %5836 = vmatpush3.bf16.msra.mxu0 %v6407_v38  ;;  %v5156_v38 = vld [vmem:[%s8192_s2] ss:$0 sm:$0xff] }
  0xb9   :  { %5837 = vmatprep.subr.bf16.mxu0 %v6409_v40  ;;  %v6457_v40 = vld [vmem:[%s8191_s1 + $0x7b0] sm:$0xff]  }
  0xba   :  { %5858 = vmatpush3.bf16.msra.mxu1 %v6408_v39  ;;  %v6456_v39 = vld [vmem:[%s8191_s1 + $0x730] sm:$0xff]  }
  0xbb   :  { %5859 = vmatprep.subr.bf16.mxu1 %v6410_v42 }
  0xbc   :  { %5838 = vmatpush3.bf16.msra.mxu0 %v6411_v43 }
  0xbd   :  { %5839 = vmatprep.subr.bf16.mxu0 %v6413_v45 }
  0xbe   :  { %5860 = vmatpush3.bf16.msra.mxu1 %v6412_v44  ;;  %v6458_v44 = vld [vmem:[%s8191_s1 + $0x768] sm:$0xff]  }
  0xbf   :  { %5861 = vmatprep.subr.bf16.mxu1 %v6414_v46  ;;  %v6459_v46 = vld [vmem:[%s8191_s1 + $0x7e8] sm:$0xff]  }
  0xc0   :  { %5840 = vmatpush3.bf16.msra.mxu0 %v6415_v47 }
  0xc1   :  { %5869 = vmatprep.subr.bf16.mxu0 %v6418_v50 }
  0xc2   :  { %5862 = vmatpush3.bf16.msra.mxu1 %v6416_v48 }
  0xc3   :  { %4453 = vmatmul.mubr.bf16.vlgmr.msra.gmra.mxu0 %v1061_v49  ;;  %5891 = vmatprep.subr.bf16.mxu1 %v6419_v51  ;;  %v6460_v49 = vld [vmem:[%s8191_s1 + $0x728] sm:$0xff]  }
  0xc4   :  { %5870 = vmatpush3.bf16.msra.mxu0 %v6420_v52  ;;  %4532 = vmatprep.mubr.bf16.mxu0 %v1117_v23  ;;  %v6461_v52 = vld [vmem:[%s8191_s1 + $0x7a8] sm:$0xff]   ;;  %v6490_v23 = vld [vmem:[%s8191_s1 + $0x8b0] sm:$0xff]  }
  0xc5   :  { %4493 = vmatmul.mubr.bf16.vlgmr.msra.gmra.mxu1 %v1077_v54  ;;  %5871 = vmatprep.subr.bf16.mxu0 %v6422_v55  ;;  %v6462_v55 = vld [vmem:[%s8191_s1 + $0x760] sm:$0xff]  }
  0xc6   :  { %5892 = vmatpush3.bf16.msra.mxu1 %v6421_v53  ;;  %4572 = vmatprep.mubr.bf16.mxu1 %v1127_v26  ;;  %v6491_v26 = vld [vmem:[%s8191_s1 + $0x868] sm:$0xff]  }
  0xc7   :  { %5893 = vmatprep.subr.bf16.mxu1 %v6423_v56 }
  0xc8   :  { %5872 = vmatpush3.bf16.msra.mxu0 %v6424_v57  ;;  %v6463_v57 = vld [vmem:[%s8191_s1 + $0x7e0] sm:$0xff]  }
  0xc9   :  { %5873 = vmatprep.subr.bf16.mxu0 %v6426_v59  ;;  %v6464_v59 = vld [vmem:[%s8191_s1 + $0x720] sm:$0xff]  }
  0xca   :  { %5894 = vmatpush3.bf16.msra.mxu1 %v6425_v58 }
  0xcb   :  { %5895 = vmatprep.subr.bf16.mxu1 %v6427_v60  ;;  %v6465_v60 = vld [vmem:[%s8191_s1 + $0x7a0] sm:$0xff]  }
  0xcc   :  { %5874 = vmatpush3.bf16.msra.mxu0 %v6428_v61  ;;  %v6466_v61 = vld [vmem:[%s8191_s1 + $0x758] sm:$0xff]  }
  0xcd   :  { %5875 = vmatprep.subr.bf16.mxu0 %v6430_v63  ;;  %v6468_v63 = vld [vmem:[%s8191_s1 + $0x718] sm:$0xff]  }
  0xce   :  { %5896 = vmatpush3.bf16.msra.mxu1 %v6429_v62  ;;  %v6467_v62 = vld [vmem:[%s8191_s1 + $0x7d8] sm:$0xff]  }
  0xcf   :  { %5897 = vmatprep.subr.bf16.mxu1 %v6431_v0  ;;  %v6469_v0 = vld [vmem:[%s8191_s1 + $0x798] sm:$0xff]  }
  0xd0   :  { %5876 = vmatpush3.bf16.msra.mxu0 %v6432_v1  ;;  %v6470_v1 = vld [vmem:[%s8191_s1 + $0x750] sm:$0xff]  }
  0xd1   :  { %5877 = vmatprep.subr.bf16.mxu0 %v6434_v3  ;;  %v6472_v3 = vld [vmem:[%s8191_s1 + $0x710] sm:$0xff]  }
  0xd2   :  { %5898 = vmatpush3.bf16.msra.mxu1 %v6433_v2  ;;  %v6471_v2 = vld [vmem:[%s8191_s1 + $0x7d0] sm:$0xff]  }
  0xd3   :  { %5899 = vmatprep.subr.bf16.mxu1 %v6435_v4  ;;  %v6473_v4 = vld [vmem:[%s8191_s1 + $0x790] sm:$0xff]  }
  0xd4   :  { %5878 = vmatpush3.bf16.msra.mxu0 %v6436_v5  ;;  %v6474_v5 = vld [vmem:[%s8191_s1 + $0x748] sm:$0xff]  }
  0xd5   :  { %5879 = vmatprep.subr.bf16.mxu0 %v6438_v7  ;;  %v6476_v7 = vld [vmem:[%s8191_s1 + $0x708] sm:$0xff]  }
  0xd6   :  { %5900 = vmatpush3.bf16.msra.mxu1 %v6437_v6  ;;  %v6475_v6 = vld [vmem:[%s8191_s1 + $0x7c8] sm:$0xff]  }
  0xd7   :  { %5901 = vmatprep.subr.bf16.mxu1 %v6439_v8  ;;  %v6477_v8 = vld [vmem:[%s8191_s1 + $0x788] sm:$0xff]  }
  0xd8   :  { %5880 = vmatpush3.bf16.msra.mxu0 %v6440_v9  ;;  %v6478_v9 = vld [vmem:[%s8191_s1 + $0x740] sm:$0xff]  }
  0xd9   :  { %5881 = vmatprep.subr.bf16.mxu0 %v6442_v11  ;;  %v6480_v11 = vld [vmem:[%s8191_s1 + $0x700] sm:$0xff]  }
  0xda   :  { %5902 = vmatpush3.bf16.msra.mxu1 %v6441_v10  ;;  %v6479_v10 = vld [vmem:[%s8191_s1 + $0x7c0] sm:$0xff]  }
  0xdb   :  { %5903 = vmatprep.subr.bf16.mxu1 %v6443_v13  ;;  %v1110_v13 = vrot.slane %v7431_v19, %v6827_v41  ;;  %v6487_v19 = vld [vmem:[%s8191_s1 + $0x870] sm:$0xff]  }
  0xdc   :  { %5882 = vmatpush3.bf16.msra.mxu0 %v6444_v16  ;;  %v6485_v16 = vld [vmem:[%s8191_s1 + $0x838] sm:$0xff]  }
  0xdd   :  { %5883 = vmatprep.subr.bf16.mxu0 %v6446_v17  ;;  %v6486_v17 = vld [vmem:[%s8191_s1 + $0x8b8] sm:$0xff]   ;;  %v1126_v18 = vcombine.high %v1110_v13, %v1110_v13 }
  0xde   :  { %5904 = vmatpush3.bf16.msra.mxu1 %v6445_v20  ;;  %v6488_v20 = vld [vmem:[%s8191_s1 + $0x8f0] sm:$0xff]  }
  0xdf   :  { %5905 = vmatprep.subr.bf16.mxu1 %v6447_v21 }
  0xe0   :  { %5884 = vmatpush3.bf16.msra.mxu0 %v6448_v22  ;;  %v6489_v22 = vld [vmem:[%s8191_s1 + $0x830] sm:$0xff]  }
  0xe1   :  { %5913 = vmatprep.subr.bf16.mxu0 %v6450_v28  ;;  %v6492_v28 = vld [vmem:[%s8191_s1 + $0x8e8] sm:$0xff]  }
  0xe2   :  { %5906 = vmatpush3.bf16.msra.mxu1 %v6449_v25 }
  0xe3   :  { %v5621_v37 = vpop.f32.mrf.mxu0  ;;  %4533 = vmatmul.mubr.bf16.vlgmr.msra.gmra.mxu0 %v1103_v27  ;;  %5935 = vmatprep.subr.bf16.mxu1 %v6451_v29 }
  0xe4   :  { %5914 = vmatpush3.bf16.msra.mxu0 %v6452_v31  ;;  %4612 = vmatprep.mubr.bf16.mxu0 %v1124_v30  ;;  %v5643_v42 = vpop.f32.mrf.mxu1  ;;  %v6493_v31 = vld [vmem:[%s8191_s1 + $0x828] sm:$0xff]  }
  0xe5   :  { %4573 = vmatmul.mubr.bf16.vlgmr.msra.gmra.mxu1 %v1125_v33  ;;  %v5622_v43 = vpop.f32.mrf.mxu0  ;;  %5915 = vmatprep.subr.bf16.mxu0 %v6454_v34  ;;  %v6494_v34 = vld [vmem:[%s8191_s1 + $0x8a8] sm:$0xff]  }
  0xe6   :  { %5936 = vmatpush3.bf16.msra.mxu1 %v6453_v32  ;;  %v5623_v45 = vadd.f32 %v5622_v43, %v5621_v37  ;;  %4652 = vmatprep.mubr.bf16.mxu1 %v1128_v36  ;;  %v5644_v47 = vpop.f32.mrf.mxu1  ;;  %v6495_v37 = vld [vmem:[%s8191_s1 + $0x860] sm:$0xff]  }
  0xe7   :  { %v5624_v48 = vpop.f32.mrf.mxu0  ;;  %5937 = vmatprep.subr.bf16.mxu1 %v6455_v35  ;;  %v5645_v51 = vadd.f32 %v5644_v47, %v5643_v42  ;;  %v6497_v42 = vld [vmem:[%s8191_s1 + $0x820] sm:$0xff]   ;;  %v6502_v47 = vld [vmem:[%s8191_s1 + $0x898] sm:$0xff]  }
  0xe8   :  { %v4055_v50 = vadd.f32 %v5623_v45, %v5156_v38  ;;  %5916 = vmatpush3.bf16.msra.mxu0 %v6456_v39  ;;  %v5646_v53 = vpop.f32.mrf.mxu1  ;;  %v6496_v39 = vld [vmem:[%s8191_s1 + $0x8e0] sm:$0xff]   ;;  %v6500_v45 = vld [vmem:[%s8191_s1 + $0x8d8] sm:$0xff]   ;;  %v6503_v48 = vld [vmem:[%s8191_s1 + $0x850] sm:$0xff]  }
  0xe9   :  { %v5625_v54 = vpop.f32.mrf.mxu0  ;;  %5917 = vmatprep.subr.bf16.mxu0 %v6458_v44  ;;  %v6498_v43 = vld [vmem:[%s8191_s1 + $0x8a0] sm:$0xff]   ;;  %v6499_v44 = vld [vmem:[%s8191_s1 + $0x858] sm:$0xff]   ;;  %v6508_v53 = vld [vmem:[%s8191_s1 + $0x8c8] sm:$0xff]  }
  0xea   :  { %v7492_v56 = vadd.f32 %v5645_v51, %v4055_v50  ;;  %5938 = vmatpush3.bf16.msra.mxu1 %v6457_v40  ;;  %v5647_v58 = vpop.f32.mrf.mxu1  ;;  %v6505_v50 = vld [vmem:[%s8191_s1 + $0x810] sm:$0xff]   ;;  %v20_v54 = vld [vmem:[%s8190_s0 + $0x20] sm:$0xff] }
  0xeb   :  { %5939 = vmatprep.subr.bf16.mxu1 %v6459_v46  ;;  %v6501_v46 = vld [vmem:[%s8191_s1 + $0x818] sm:$0xff]   ;;  %v6506_v51 = vld [vmem:[%s8191_s1 + $0x890] sm:$0xff]   ;;  %v6510_v58 = vld [vmem:[%s8191_s1 + $0x888] sm:$0xff]  }
  0xec   :  { %5918 = vmatpush3.bf16.msra.mxu0 %v6460_v49  ;;  %v6504_v49 = vld [vmem:[%s8191_s1 + $0x8d0] sm:$0xff]  }
  0xed   :  { %5919 = vmatprep.subr.bf16.mxu0 %v6462_v55  ;;  %v6509_v55 = vld [vmem:[%s8191_s1 + $0x808] sm:$0xff]  }
  0xee   :  { %5940 = vmatpush3.bf16.msra.mxu1 %v6461_v52  ;;  %v6507_v52 = vld [vmem:[%s8191_s1 + $0x848] sm:$0xff]  }
  0xef   :  { %5941 = vmatprep.subr.bf16.mxu1 %v6463_v57  ;;  %v1129_v57 = vcombine.high %v20_v54, %v20_v54 }
  0xf0   :  { %5920 = vmatpush3.bf16.msra.mxu0 %v6464_v59  ;;  %v6511_v59 = vld [vmem:[%s8191_s1 + $0x840] sm:$0xff]  }
  0xf1   :  { %5921 = vmatprep.subr.bf16.mxu0 %v6466_v61  ;;  %v7648_v61 = vrot.slane %v1129_v57, %v6827_v41  ;;  %v6551_v57 = vld [vmem:[%s8191_s1 + $0xab8] sm:$0xff]  }
  0xf2   :  { %5942 = vmatpush3.bf16.msra.mxu1 %v6465_v60 }
  0xf3   :  { %5943 = vmatprep.subr.bf16.mxu1 %v6467_v62  ;;  %v6512_v62 = vld [vmem:[%s8191_s1 + $0x8c0] sm:$0xff]  }
  0xf4   :  { %5922 = vmatpush3.bf16.msra.mxu0 %v6468_v63  ;;  %v6513_v63 = vld [vmem:[%s8191_s1 + $0x800] sm:$0xff]  }
  0xf5   :  { %5923 = vmatprep.subr.bf16.mxu0 %v6470_v1  ;;  %v1145_v1 = vcombine.high %v7648_v61, %v7648_v61 }
  0xf6   :  { %5944 = vmatpush3.bf16.msra.mxu1 %v6469_v0 }
  0xf7   :  { %5945 = vmatprep.subr.bf16.mxu1 %v6471_v2  ;;  %v6514_v2 = vld [vmem:[%s8191_s1 + $0x880] sm:$0xff]  }
  0xf8   :  { %5924 = vmatpush3.bf16.msra.mxu0 %v6472_v3 }
  0xf9   :  { %5925 = vmatprep.subr.bf16.mxu0 %v6474_v5  ;;  %v6515_v5 = vld [vmem:[%s8191_s1 + $0x978] sm:$0xff]  }
  0xfa   :  { %5946 = vmatpush3.bf16.msra.mxu1 %v6473_v4 }
  0xfb   :  { %5947 = vmatprep.subr.bf16.mxu1 %v6475_v6  ;;  %v6516_v6 = vld [vmem:[%s8191_s1 + $0x9f8] sm:$0xff]  }
  0xfc   :  { %5926 = vmatpush3.bf16.msra.mxu0 %v6476_v7  ;;  %v1173_v7 = vrot.slane %v1145_v1, %v6827_v41 }
  0xfd   :  { %5927 = vmatprep.subr.bf16.mxu0 %v6478_v9  ;;  %v6518_v9 = vld [vmem:[%s8191_s1 + $0x9b8] sm:$0xff]  }
  0xfe   :  { %5948 = vmatpush3.bf16.msra.mxu1 %v6477_v8  ;;  %v6517_v8 = vld [vmem:[%s8191_s1 + $0x938] sm:$0xff]  }
  0xff   :  { %5949 = vmatprep.subr.bf16.mxu1 %v6479_v10 }
 0x100   :  { %5928 = vmatpush3.bf16.msra.mxu0 %v6480_v11  ;;  %v6519_v11 = vld [vmem:[%s8191_s1 + $0x970] sm:$0xff]  }
 0x101   :  { %5957 = vmatprep.subr.bf16.mxu0 %v6483_v14 }
 0x102   :  { %5950 = vmatpush3.bf16.msra.mxu1 %v6481_v12  ;;  %v6520_v12 = vld [vmem:[%s8191_s1 + $0x9f0] sm:$0xff]  }
 0x103   :  { %v5665_v21 = vpop.f32.mrf.mxu0  ;;  %4613 = vmatmul.mubr.bf16.vlgmr.msra.gmra.mxu0 %v1110_v13  ;;  %5979 = vmatprep.subr.bf16.mxu1 %v6484_v15  ;;  %v1177_v13 = vcombine.high %v1173_v7, %v1173_v7  ;;  %v6521_v15 = vld [vmem:[%s8191_s1 + $0x930] sm:$0xff]  }
 0x104   :  { %5958 = vmatpush3.bf16.msra.mxu0 %v6485_v16  ;;  %v5687_v24 = vpop.f32.mrf.mxu1  ;;  %v6522_v16 = vld [vmem:[%s8191_s1 + $0x9b0] sm:$0xff]  }
 0x105   :  { %4653 = vmatmul.mubr.bf16.vlgmr.msra.gmra.mxu1 %v1126_v18  ;;  %v5666_v25 = vpop.f32.mrf.mxu0  ;;  %5959 = vmatprep.subr.bf16.mxu0 %v6487_v19  ;;  %v6523_v19 = vld [vmem:[%s8191_s1 + $0x968] sm:$0xff]  }
 0x106   :  { %5980 = vmatpush3.bf16.msra.mxu1 %v6486_v17  ;;  %v5667_v27 = vadd.f32 %v5666_v25, %v5665_v21  ;;  %v5688_v29 = vpop.f32.mrf.mxu1  ;;  %v6524_v21 = vld [vmem:[%s8191_s1 + $0x9e8] sm:$0xff]  }
 0x107   :  { %v5668_v30 = vpop.f32.mrf.mxu0  ;;  %5981 = vmatprep.subr.bf16.mxu1 %v6488_v20  ;;  %v5689_v33 = vadd.f32 %v5688_v29, %v5687_v24  ;;  %v6525_v24 = vld [vmem:[%s8191_s1 + $0x928] sm:$0xff]  }
 0x108   :  { %v4135_v32 = vadd.f32 %v5667_v27, %v7492_v56  ;;  %5960 = vmatpush3.bf16.msra.mxu0 %v6489_v22  ;;  %v5690_v35 = vpop.f32.mrf.mxu1  ;;  %v1136_v56 = vrot.slane %v20_v54, %v6827_v41  ;;  %v6526_v27 = vld [vmem:[%s8191_s1 + $0x9a8] sm:$0xff]   ;;  %v6527_v30 = vld [vmem:[%s8191_s1 + $0x960] sm:$0xff]   ;;  %v6548_v54 = vld [vmem:[%s8191_s1 + $0xa78] sm:$0xff]  }
 0x109   :  { %v5669_v36 = vpop.f32.mrf.mxu0  ;;  %5961 = vmatprep.subr.bf16.mxu0 %v6491_v26  ;;  %v6530_v35 = vld [vmem:[%s8191_s1 + $0x9a0] sm:$0xff]  }
 0x10a   :  { %v7593_v38 = vadd.f32 %v5689_v33, %v4135_v32  ;;  %5982 = vmatpush3.bf16.msra.mxu1 %v6490_v23  ;;  %v5691_v40 = vpop.f32.mrf.mxu1  ;;  %v1144_v60 = vcombine.high %v1136_v56, %v1136_v56  ;;  %v1152_v4 = vrot.slane %v1136_v56, %v6827_v41  ;;  %v6528_v32 = vld [vmem:[%s8191_s1 + $0x9e0] sm:$0xff]   ;;  %v6531_v36 = vld [vmem:[%s8191_s1 + $0x958] sm:$0xff]  }
 0x10b   :  { %5983 = vmatprep.subr.bf16.mxu1 %v6492_v28  ;;  %v6535_v40 = vld [vmem:[%s8191_s1 + $0x950] sm:$0xff]   ;;  %v6550_v56 = vld [vmem:[%s8191_s1 + $0xa38] sm:$0xff]  }
 0x10c   :  { %5962 = vmatpush3.bf16.msra.mxu0 %v6493_v31  ;;  %v1166_v0 = vrot.slane %v1144_v60, %v6827_v41  ;;  %v1174_v10 = vcombine.high %v1152_v4, %v1152_v4  ;;  %v6553_v60 = vld [vmem:[%s8191_s1 + $0xaf0] sm:$0xff]  }
 0x10d   :  { %5963 = vmatprep.subr.bf16.mxu0 %v6495_v37  ;;  %v6532_v37 = vld [vmem:[%s8191_s1 + $0x9d8] sm:$0xff]  }
 0x10e   :  { %5984 = vmatpush3.bf16.msra.mxu1 %v6494_v34  ;;  %4692 = vmatprep.mubr.bf16.mxu0 %v1166_v0  ;;  %v1176_v3 = vcombine.high %v1166_v0, %v1166_v0  ;;  %v6529_v34 = vld [vmem:[%s8191_s1 + $0x920] sm:$0xff]  }
 0x10f   :  { %5985 = vmatprep.subr.bf16.mxu1 %v6496_v39  ;;  %v6534_v39 = vld [vmem:[%s8191_s1 + $0x998] sm:$0xff]  }
 0x110   :  { %5964 = vmatpush3.bf16.msra.mxu0 %v6497_v42  ;;  %4732 = vmatprep.mubr.bf16.mxu1 %v1176_v3  ;;  %v6536_v42 = vld [vmem:[%s8191_s1 + $0x9d0] sm:$0xff]  }
 0x111   :  { %5965 = vmatprep.subr.bf16.mxu0 %v6499_v44  ;;  %v6538_v44 = vld [vmem:[%s8191_s1 + $0x990] sm:$0xff]  }
 0x112   :  { %5986 = vmatpush3.bf16.msra.mxu1 %v6498_v43  ;;  %v6537_v43 = vld [vmem:[%s8191_s1 + $0x910] sm:$0xff]  }
 0x113   :  { %5987 = vmatprep.subr.bf16.mxu1 %v6500_v45  ;;  %v6539_v45 = vld [vmem:[%s8191_s1 + $0x948] sm:$0xff]  }
 0x114   :  { %5966 = vmatpush3.bf16.msra.mxu0 %v6501_v46  ;;  %v6540_v46 = vld [vmem:[%s8191_s1 + $0x9c8] sm:$0xff]  }
 0x115   :  { %5967 = vmatprep.subr.bf16.mxu0 %v6503_v48  ;;  %v6542_v48 = vld [vmem:[%s8191_s1 + $0x988] sm:$0xff]  }
 0x116   :  { %5988 = vmatpush3.bf16.msra.mxu1 %v6502_v47  ;;  %v6541_v47 = vld [vmem:[%s8191_s1 + $0x908] sm:$0xff]  }
 0x117   :  { %5989 = vmatprep.subr.bf16.mxu1 %v6504_v49  ;;  %v6543_v49 = vld [vmem:[%s8191_s1 + $0x940] sm:$0xff]  }
 0x118   :  { %5968 = vmatpush3.bf16.msra.mxu0 %v6505_v50  ;;  %v6544_v50 = vld [vmem:[%s8191_s1 + $0x9c0] sm:$0xff]  }
 0x119   :  { %5969 = vmatprep.subr.bf16.mxu0 %v6507_v52  ;;  %v6546_v52 = vld [vmem:[%s8191_s1 + $0x980] sm:$0xff]  }
 0x11a   :  { %5990 = vmatpush3.bf16.msra.mxu1 %v6506_v51  ;;  %v6545_v51 = vld [vmem:[%s8191_s1 + $0x900] sm:$0xff]  }
 0x11b   :  { %5991 = vmatprep.subr.bf16.mxu1 %v6508_v53  ;;  %v1159_v53 = vrot.slane %v7648_v61, %v6827_v41 }
 0x11c   :  { %5970 = vmatpush3.bf16.msra.mxu0 %v6509_v55  ;;  %v6549_v55 = vld [vmem:[%s8191_s1 + $0xaf8] sm:$0xff]  }
 0x11d   :  { %5971 = vmatprep.subr.bf16.mxu0 %v6511_v59  ;;  %v6552_v59 = vld [vmem:[%s8191_s1 + $0xa70] sm:$0xff]  }
 0x11e   :  { %5992 = vmatpush3.bf16.msra.mxu1 %v6510_v58  ;;  %v1175_v58 = vcombine.high %v1159_v53, %v1159_v53 }
 0x11f   :  { %5993 = vmatprep.subr.bf16.mxu1 %v6512_v62  ;;  %v6554_v62 = vld [vmem:[%s8191_s1 + $0xa30] sm:$0xff]  }
 0x120   :  { %5972 = vmatpush3.bf16.msra.mxu0 %v6513_v63  ;;  %v6555_v63 = vld [vmem:[%s8191_s1 + $0xab0] sm:$0xff]  }
 0x121   :  { %6001 = vmatprep.subr.bf16.mxu0 %v6515_v5 }
 0x122   :  { %5994 = vmatpush3.bf16.msra.mxu1 %v6514_v2  ;;  %v6556_v2 = vld [vmem:[%s8191_s1 + $0xa68] sm:$0xff]  }
 0x123   :  { %v5709_v14 = vpop.f32.mrf.mxu0  ;;  %4693 = vmatmul.mubr.bf16.vlgmr.msra.gmra.mxu0 %v1152_v4  ;;  %6023 = vmatprep.subr.bf16.mxu1 %v6516_v6  ;;  %v6557_v4 = vld [vmem:[%s8191_s1 + $0xae8] sm:$0xff]  }
 0x124   :  { %6002 = vmatpush3.bf16.msra.mxu0 %v6517_v8  ;;  %4772 = vmatprep.mubr.bf16.mxu0 %v1173_v7  ;;  %v6558_v7 = vld [vmem:[%s8191_s1 + $0xa28] sm:$0xff]  }
 0x125   :  { %v5731_v17 = vpop.f32.mrf.mxu1  ;;  %4733 = vmatmul.mubr.bf16.vlgmr.msra.gmra.mxu1 %v1174_v10  ;;  %v5710_v18 = vpop.f32.mrf.mxu0  ;;  %6003 = vmatprep.subr.bf16.mxu0 %v6519_v11  ;;  %v6559_v10 = vld [vmem:[%s8191_s1 + $0xaa8] sm:$0xff]  }
 0x126   :  { %6024 = vmatpush3.bf16.msra.mxu1 %v6518_v9  ;;  %v5711_v20 = vadd.f32 %v5710_v18, %v5709_v14  ;;  %4812 = vmatprep.mubr.bf16.mxu1 %v1177_v13  ;;  %v6560_v13 = vld [vmem:[%s8191_s1 + $0xa60] sm:$0xff]  }
 0x127   :  { %v5732_v22 = vpop.f32.mrf.mxu1  ;;  %v5712_v23 = vpop.f32.mrf.mxu0  ;;  %6025 = vmatprep.subr.bf16.mxu1 %v6520_v12  ;;  %v6563_v18 = vld [vmem:[%s8191_s1 + $0xaa0] sm:$0xff]  }
 0x128   :  { %v4215_v25 = vadd.f32 %v5711_v20, %v7593_v38  ;;  %v5733_v26 = vadd.f32 %v5732_v22, %v5731_v17  ;;  %6004 = vmatpush3.bf16.msra.mxu0 %v6521_v15  ;;  %v6533_v38 = vld [vmem:[%s8191_s1 + $0x918] sm:$0xff]   ;;  %v6561_v15 = vld [vmem:[%s8191_s1 + $0xae0] sm:$0xff]   ;;  %v6568_v23 = vld [vmem:[%s8191_s1 + $0xa50] sm:$0xff]  }
 0x129   :  { %v5734_v28 = vpop.f32.mrf.mxu1  ;;  %v5713_v29 = vpop.f32.mrf.mxu0  ;;  %6005 = vmatprep.subr.bf16.mxu0 %v6523_v19  ;;  %v6562_v17 = vld [vmem:[%s8191_s1 + $0xa20] sm:$0xff]   ;;  %v6564_v19 = vld [vmem:[%s8191_s1 + $0xa58] sm:$0xff]  }
 0x12a   :  { %v7704_v31 = vadd.f32 %v5733_v26, %v4215_v25  ;;  %6026 = vmatpush3.bf16.msra.mxu1 %v6522_v16  ;;  %v6565_v20 = vld [vmem:[%s8191_s1 + $0xad8] sm:$0xff]   ;;  %v6570_v25 = vld [vmem:[%s8191_s1 + $0xa10] sm:$0xff]   ;;  %v6573_v28 = vld [vmem:[%s8191_s1 + $0xac8] sm:$0xff]  }
 0x12b   :  { %v5735_v33 = vpop.f32.mrf.mxu1  ;;  %6027 = vmatprep.subr.bf16.mxu1 %v6524_v21  ;;  %v6566_v21 = vld [vmem:[%s8191_s1 + $0xa18] sm:$0xff]   ;;  %v6571_v26 = vld [vmem:[%s8191_s1 + $0xa90] sm:$0xff]   ;;  %v21_v29 = vld [vmem:[%s8190_s0 + $0x28] sm:$0xff] }
 0x12c   :  { %6006 = vmatpush3.bf16.msra.mxu0 %v6525_v24  ;;  %v6567_v22 = vld [vmem:[%s8191_s1 + $0xa98] sm:$0xff]   ;;  %v6569_v24 = vld [vmem:[%s8191_s1 + $0xad0] sm:$0xff]   ;;  %v6576_v33 = vld [vmem:[%s8191_s1 + $0xa40] sm:$0xff]  }
 0x12d   :  { %6007 = vmatprep.subr.bf16.mxu0 %v6527_v30  ;;  %v6574_v30 = vld [vmem:[%s8191_s1 + $0xa08] sm:$0xff]  }
 0x12e   :  { %6028 = vmatpush3.bf16.msra.mxu1 %v6526_v27  ;;  %v6572_v27 = vld [vmem:[%s8191_s1 + $0xa48] sm:$0xff]  }
 0x12f   :  { %6029 = vmatprep.subr.bf16.mxu1 %v6528_v32  ;;  %v1178_v32 = vcombine.high %v21_v29, %v21_v29 }
 0x130   :  { %6008 = vmatpush3.bf16.msra.mxu0 %v6529_v34  ;;  %v6575_v34 = vld [vmem:[%s8191_s1 + $0xa88] sm:$0xff]  }
 0x131   :  { %6009 = vmatprep.subr.bf16.mxu0 %v6531_v36  ;;  %v7860_v36 = vrot.slane %v1178_v32, %v6827_v41 }
 0x132   :  { %6030 = vmatpush3.bf16.msra.mxu1 %v6530_v35 }
 0x133   :  { %6031 = vmatprep.subr.bf16.mxu1 %v6532_v37  ;;  %v6577_v37 = vld [vmem:[%s8191_s1 + $0xac0] sm:$0xff]  }
 0x134   :  { %6010 = vmatpush3.bf16.msra.mxu0 %v6533_v38  ;;  %v6578_v38 = vld [vmem:[%s8191_s1 + $0xa00] sm:$0xff]  }
 0x135   :  { %6011 = vmatprep.subr.bf16.mxu0 %v6535_v40  ;;  %v1194_v40 = vcombine.high %v7860_v36, %v7860_v36 }
 0x136   :  { %6032 = vmatpush3.bf16.msra.mxu1 %v6534_v39 }
 0x137   :  { %6033 = vmatprep.subr.bf16.mxu1 %v6536_v42 }
 0x138   :  { %6012 = vmatpush3.bf16.msra.mxu0 %v6537_v43  ;;  %v6580_v43 = vld [vmem:[%s8191_s1 + $0xb78] sm:$0xff]  }
 0x139   :  { %6013 = vmatprep.subr.bf16.mxu0 %v6539_v45 }
 0x13a   :  { %6034 = vmatpush3.bf16.msra.mxu1 %v6538_v44  ;;  %v6579_v44 = vld [vmem:[%s8191_s1 + $0xa80] sm:$0xff]  }
 0x13b   :  { %6035 = vmatprep.subr.bf16.mxu1 %v6540_v46  ;;  %v1222_v46 = vrot.slane %v1194_v40, %v6827_v41  ;;  %v6621_v40 = vld [vmem:[%s8191_s1 + $0xc68] sm:$0xff]  }
 0x13c   :  { %6014 = vmatpush3.bf16.msra.mxu0 %v6541_v47  ;;  %v6581_v47 = vld [vmem:[%s8191_s1 + $0xbf8] sm:$0xff]  }
 0x13d   :  { %6015 = vmatprep.subr.bf16.mxu0 %v6543_v49 }
 0x13e   :  { %6036 = vmatpush3.bf16.msra.mxu1 %v6542_v48  ;;  %v6582_v48 = vld [vmem:[%s8191_s1 + $0xb38] sm:$0xff]  }
 0x13f   :  { %6037 = vmatprep.subr.bf16.mxu1 %v6544_v50  ;;  %v6584_v50 = vld [vmem:[%s8191_s1 + $0xb70] sm:$0xff]  }
 0x140   :  { %6016 = vmatpush3.bf16.msra.mxu0 %v6545_v51  ;;  %v6583_v51 = vld [vmem:[%s8191_s1 + $0xbb8] sm:$0xff]  }
 0x141   :  { %6045 = vmatprep.subr.bf16.mxu0 %v6548_v54  ;;  %v6585_v54 = vld [vmem:[%s8191_s1 + $0xbf0] sm:$0xff]  }
 0x142   :  { %6038 = vmatpush3.bf16.msra.mxu1 %v6546_v52  ;;  %v1226_v52 = vcombine.high %v1222_v46, %v1222_v46 }
 0x143   :  { %v5753_v61 = vpop.f32.mrf.mxu0  ;;  %4773 = vmatmul.mubr.bf16.vlgmr.msra.gmra.mxu0 %v1159_v53  ;;  %6067 = vmatprep.subr.bf16.mxu1 %v6549_v55  ;;  %v6586_v55 = vld [vmem:[%s8191_s1 + $0xb30] sm:$0xff]  }
 0x144   :  { %6046 = vmatpush3.bf16.msra.mxu0 %v6550_v56 }
 0x145   :  { %v5775_v0 = vpop.f32.mrf.mxu1  ;;  %4813 = vmatmul.mubr.bf16.vlgmr.msra.gmra.mxu1 %v1175_v58  ;;  %v5754_v1 = vpop.f32.mrf.mxu0  ;;  %6047 = vmatprep.subr.bf16.mxu0 %v6552_v59  ;;  %v6588_v58 = vld [vmem:[%s8191_s1 + $0xb68] sm:$0xff]  }
 0x146   :  { %6068 = vmatpush3.bf16.msra.mxu1 %v6551_v57  ;;  %v5755_v3 = vadd.f32 %v5754_v1, %v5753_v61 }
 0x147   :  { %v5776_v5 = vpop.f32.mrf.mxu1  ;;  %v5756_v6 = vpop.f32.mrf.mxu0  ;;  %6069 = vmatprep.subr.bf16.mxu1 %v6553_v60  ;;  %v6587_v60 = vld [vmem:[%s8191_s1 + $0xbb0] sm:$0xff]  }
 0x148   :  { %v4295_v8 = vadd.f32 %v5755_v3, %v7704_v31  ;;  %v5777_v9 = vadd.f32 %v5776_v5, %v5775_v0  ;;  %6048 = vmatpush3.bf16.msra.mxu0 %v6554_v62  ;;  %v1185_v31 = vrot.slane %v21_v29, %v6827_v41  ;;  %v6592_v5 = vld [vmem:[%s8191_s1 + $0xb60] sm:$0xff]  }
 0x149   :  { %v5778_v11 = vpop.f32.mrf.mxu1  ;;  %v5757_v12 = vpop.f32.mrf.mxu0  ;;  %6049 = vmatprep.subr.bf16.mxu0 %v6556_v2  ;;  %v6590_v2 = vld [vmem:[%s8191_s1 + $0xb28] sm:$0xff]   ;;  %v6611_v29 = vld [vmem:[%s8191_s1 + $0xb80] sm:$0xff]  }
 0x14a   :  { %v7805_v14 = vadd.f32 %v5777_v9, %v4295_v8  ;;  %6070 = vmatpush3.bf16.msra.mxu1 %v6555_v63  ;;  %v1193_v35 = vcombine.high %v1185_v31, %v1185_v31  ;;  %v1201_v42 = vrot.slane %v1185_v31, %v6827_v41  ;;  %v6589_v63 = vld [vmem:[%s8191_s1 + $0xbe8] sm:$0xff]   ;;  %v6593_v9 = vld [vmem:[%s8191_s1 + $0xbe0] sm:$0xff]   ;;  %v6596_v11 = vld [vmem:[%s8191_s1 + $0xb58] sm:$0xff]  }
 0x14b   :  { %v5779_v16 = vpop.f32.mrf.mxu1  ;;  %6071 = vmatprep.subr.bf16.mxu1 %v6557_v4  ;;  %v6595_v12 = vld [vmem:[%s8191_s1 + $0xba0] sm:$0xff]   ;;  %v6615_v31 = vld [vmem:[%s8191_s1 + $0xc38] sm:$0xff]  }
 0x14c   :  { %6050 = vmatpush3.bf16.msra.mxu0 %v6558_v7  ;;  %v1215_v39 = vrot.slane %v1193_v35, %v6827_v41  ;;  %v1223_v49 = vcombine.high %v1201_v42, %v1201_v42  ;;  %v6591_v7 = vld [vmem:[%s8191_s1 + $0xba8] sm:$0xff]   ;;  %v6599_v16 = vld [vmem:[%s8191_s1 + $0xb98] sm:$0xff]  }
 0x14d   :  { %6051 = vmatprep.subr.bf16.mxu0 %v6560_v13  ;;  %v6597_v13 = vld [vmem:[%s8191_s1 + $0xbd8] sm:$0xff]  }
 0x14e   :  { %6072 = vmatpush3.bf16.msra.mxu1 %v6559_v10  ;;  %4852 = vmatprep.mubr.bf16.mxu0 %v1215_v39  ;;  %v1225_v45 = vcombine.high %v1215_v39, %v1215_v39  ;;  %v6594_v10 = vld [vmem:[%s8191_s1 + $0xb20] sm:$0xff]  }
 0x14f   :  { %6073 = vmatprep.subr.bf16.mxu1 %v6561_v15  ;;  %v6600_v15 = vld [vmem:[%s8191_s1 + $0xb50] sm:$0xff]  }
 0x150   :  { %6052 = vmatpush3.bf16.msra.mxu0 %v6562_v17  ;;  %4892 = vmatprep.mubr.bf16.mxu1 %v1225_v45  ;;  %v6601_v17 = vld [vmem:[%s8191_s1 + $0xbd0] sm:$0xff]  }
 0x151   :  { %6053 = vmatprep.subr.bf16.mxu0 %v6564_v19  ;;  %v6604_v19 = vld [vmem:[%s8191_s1 + $0xb48] sm:$0xff]  }
 0x152   :  { %6074 = vmatpush3.bf16.msra.mxu1 %v6563_v18  ;;  %v6602_v18 = vld [vmem:[%s8191_s1 + $0xb10] sm:$0xff]  }
 0x153   :  { %6075 = vmatprep.subr.bf16.mxu1 %v6565_v20  ;;  %v6603_v20 = vld [vmem:[%s8191_s1 + $0xb90] sm:$0xff]  }
 0x154   :  { %6054 = vmatpush3.bf16.msra.mxu0 %v6566_v21  ;;  %v6605_v21 = vld [vmem:[%s8191_s1 + $0xbc8] sm:$0xff]  }
 0x155   :  { %6055 = vmatprep.subr.bf16.mxu0 %v6568_v23  ;;  %v6608_v23 = vld [vmem:[%s8191_s1 + $0xb40] sm:$0xff]  }
 0x156   :  { %6076 = vmatpush3.bf16.msra.mxu1 %v6567_v22  ;;  %v6606_v22 = vld [vmem:[%s8191_s1 + $0xb08] sm:$0xff]  }
 0x157   :  { %6077 = vmatprep.subr.bf16.mxu1 %v6569_v24  ;;  %v6607_v24 = vld [vmem:[%s8191_s1 + $0xb88] sm:$0xff]  }
 0x158   :  { %6056 = vmatpush3.bf16.msra.mxu0 %v6570_v25  ;;  %v6609_v25 = vld [vmem:[%s8191_s1 + $0xbc0] sm:$0xff]  }
 0x159   :  { %6057 = vmatprep.subr.bf16.mxu0 %v6572_v27  ;;  %v1208_v27 = vrot.slane %v7860_v36, %v6827_v41  ;;  %v6618_v36 = vld [vmem:[%s8191_s1 + $0xcf0] sm:$0xff]  }
 0x15a   :  { %6078 = vmatpush3.bf16.msra.mxu1 %v6571_v26  ;;  %v6610_v26 = vld [vmem:[%s8191_s1 + $0xb00] sm:$0xff]  }
 0x15b   :  { %6079 = vmatprep.subr.bf16.mxu1 %v6573_v28  ;;  %v6613_v28 = vld [vmem:[%s8191_s1 + $0xc78] sm:$0xff]   ;;  %v1224_v32 = vcombine.high %v1208_v27, %v1208_v27 }
 0x15c   :  { %6058 = vmatpush3.bf16.msra.mxu0 %v6574_v30  ;;  %v6614_v30 = vld [vmem:[%s8191_s1 + $0xcf8] sm:$0xff]  }
 0x15d   :  { %6059 = vmatprep.subr.bf16.mxu0 %v6576_v33  ;;  %v6617_v33 = vld [vmem:[%s8191_s1 + $0xc70] sm:$0xff]  }
 0x15e   :  { %6080 = vmatpush3.bf16.msra.mxu1 %v6575_v34  ;;  %v6616_v34 = vld [vmem:[%s8191_s1 + $0xcb8] sm:$0xff]  }
 0x15f   :  { %6081 = vmatprep.subr.bf16.mxu1 %v6577_v37  ;;  %v6619_v37 = vld [vmem:[%s8191_s1 + $0xc30] sm:$0xff]  }
 0x160   :  { %6060 = vmatpush3.bf16.msra.mxu0 %v6578_v38 }
 0x161   :  { %6089 = vmatprep.subr.bf16.mxu0 %v6580_v43  ;;  %v6620_v43 = vld [vmem:[%s8191_s1 + $0xcb0] sm:$0xff]  }
 0x162   :  { %6082 = vmatpush3.bf16.msra.mxu1 %v6579_v44 }
 0x163   :  { %v5797_v53 = vpop.f32.mrf.mxu0  ;;  %4853 = vmatmul.mubr.bf16.vlgmr.msra.gmra.mxu0 %v1201_v42  ;;  %6111 = vmatprep.subr.bf16.mxu1 %v6581_v47 }
 0x164   :  { %6090 = vmatpush3.bf16.msra.mxu0 %v6582_v48  ;;  %4932 = vmatprep.mubr.bf16.mxu0 %v1222_v46  ;;  %v6622_v46 = vld [vmem:[%s8191_s1 + $0xce8] sm:$0xff]  }
 0x165   :  { %v5819_v56 = vpop.f32.mrf.mxu1  ;;  %4893 = vmatmul.mubr.bf16.vlgmr.msra.gmra.mxu1 %v1223_v49  ;;  %v5798_v57 = vpop.f32.mrf.mxu0  ;;  %6091 = vmatprep.subr.bf16.mxu0 %v6584_v50  ;;  %v6623_v49 = vld [vmem:[%s8191_s1 + $0xc28] sm:$0xff]  }
 0x166   :  { %6112 = vmatpush3.bf16.msra.mxu1 %v6583_v51  ;;  %v5799_v59 = vadd.f32 %v5798_v57, %v5797_v53  ;;  %4972 = vmatprep.mubr.bf16.mxu1 %v1226_v52  ;;  %v6625_v52 = vld [vmem:[%s8191_s1 + $0xc60] sm:$0xff]  }
 0x167   :  { %v5820_v61 = vpop.f32.mrf.mxu1  ;;  %v5800_v62 = vpop.f32.mrf.mxu0  ;;  %6113 = vmatprep.subr.bf16.mxu1 %v6585_v54  ;;  %v6624_v54 = vld [vmem:[%s8191_s1 + $0xca8] sm:$0xff]   ;;  %v6627_v57 = vld [vmem:[%s8191_s1 + $0xc20] sm:$0xff]  }
 0x168   :  { %v4375_v0 = vadd.f32 %v5799_v59, %v7805_v14  ;;  %v5821_v1 = vadd.f32 %v5820_v61, %v5819_v56  ;;  %6092 = vmatpush3.bf16.msra.mxu0 %v6586_v55  ;;  %v6598_v14 = vld [vmem:[%s8191_s1 + $0xb18] sm:$0xff]   ;;  %v6626_v56 = vld [vmem:[%s8191_s1 + $0xce0] sm:$0xff]   ;;  %v6633_v62 = vld [vmem:[%s8191_s1 + $0xc50] sm:$0xff]  }
 0x169   :  { %v5822_v3 = vpop.f32.mrf.mxu1  ;;  %v5801_v4 = vpop.f32.mrf.mxu0  ;;  %6093 = vmatprep.subr.bf16.mxu0 %v6588_v58  ;;  %v6629_v58 = vld [vmem:[%s8191_s1 + $0xc58] sm:$0xff]   ;;  %v6628_v59 = vld [vmem:[%s8191_s1 + $0xca0] sm:$0xff]  }
 0x16a   :  { %v7913_v6 = vadd.f32 %v5821_v1, %v4375_v0  ;;  %6114 = vmatpush3.bf16.msra.mxu1 %v6587_v60  ;;  %v6630_v60 = vld [vmem:[%s8191_s1 + $0xcd8] sm:$0xff]   ;;  %v6634_v0 = vld [vmem:[%s8191_s1 + $0xcd0] sm:$0xff]   ;;  %v6638_v4 = vld [vmem:[%s8191_s1 + $0xcc8] sm:$0xff]  }
 0x16b   :  { %v5823_v8 = vpop.f32.mrf.mxu1  ;;  %6115 = vmatprep.subr.bf16.mxu1 %v6589_v63  ;;  %v6631_v61 = vld [vmem:[%s8191_s1 + $0xc18] sm:$0xff]   ;;  %v6635_v1 = vld [vmem:[%s8191_s1 + $0xc10] sm:$0xff]  }
 0x16c   :  { %6094 = vmatpush3.bf16.msra.mxu0 %v6590_v2  ;;  %v6632_v63 = vld [vmem:[%s8191_s1 + $0xc98] sm:$0xff]   ;;  %v6637_v2 = vld [vmem:[%s8191_s1 + $0xc48] sm:$0xff]   ;;  %v6636_v3 = vld [vmem:[%s8191_s1 + $0xc90] sm:$0xff]  }
 0x16d   :  { %6095 = vmatprep.subr.bf16.mxu0 %v6592_v5  ;;  %v22_v5 = vld [vmem:[%s8190_s0 + $0x30] sm:$0xff] }
 0x16e   :  { %6116 = vmatpush3.bf16.msra.mxu1 %v6591_v7  ;;  %v1234_v7 = vrot.slane %v22_v5, %v6827_v41  ;;  %v1227_v8 = vcombine.high %v22_v5, %v22_v5 }
 0x16f   :  { %6117 = vmatprep.subr.bf16.mxu1 %v6593_v9  ;;  %v6641_v9 = vld [vmem:[%s8191_s1 + $0xc40] sm:$0xff]  }
 0x170   :  { %6096 = vmatpush3.bf16.msra.mxu0 %v6594_v10  ;;  %v6640_v10 = vld [vmem:[%s8191_s1 + $0xc88] sm:$0xff]  }
 0x171   :  { %6097 = vmatprep.subr.bf16.mxu0 %v6596_v11  ;;  %v1242_v11 = vcombine.high %v1234_v7, %v1234_v7 }
 0x172   :  { %6118 = vmatpush3.bf16.msra.mxu1 %v6595_v12  ;;  %v8072_v12 = vrot.slane %v1227_v8, %v6827_v41 }
 0x173   :  { %6119 = vmatprep.subr.bf16.mxu1 %v6597_v13  ;;  %v6642_v13 = vld [vmem:[%s8191_s1 + $0xcc0] sm:$0xff]  }
 0x174   :  { %6098 = vmatpush3.bf16.msra.mxu0 %v6598_v14  ;;  %v6643_v14 = vld [vmem:[%s8191_s1 + $0xc00] sm:$0xff]  }
 0x175   :  { %6099 = vmatprep.subr.bf16.mxu0 %v6600_v15  ;;  %v1264_v15 = vrot.slane %v1242_v11, %v6827_v41 }
 0x176   :  { %6120 = vmatpush3.bf16.msra.mxu1 %v6599_v16  ;;  %v1243_v16 = vcombine.high %v8072_v12, %v8072_v12 }
 0x177   :  { %6121 = vmatprep.subr.bf16.mxu1 %v6601_v17  ;;  %v1250_v17 = vrot.slane %v1234_v7, %v6827_v41 }
 0x178   :  { %6100 = vmatpush3.bf16.msra.mxu0 %v6602_v18  ;;  %v6645_v18 = vld [vmem:[%s8191_s1 + $0xd78] sm:$0xff]  }
 0x179   :  { %6101 = vmatprep.subr.bf16.mxu0 %v6604_v19  ;;  %v6644_v19 = vld [vmem:[%s8191_s1 + $0xc80] sm:$0xff]  }
 0x17a   :  { %6122 = vmatpush3.bf16.msra.mxu1 %v6603_v20  ;;  %v1274_v20 = vcombine.high %v1264_v15, %v1264_v15 }
 0x17b   :  { %6123 = vmatprep.subr.bf16.mxu1 %v6605_v21  ;;  %v1271_v21 = vrot.slane %v1243_v16, %v6827_v41 }
 0x17c   :  { %6102 = vmatpush3.bf16.msra.mxu0 %v6606_v22  ;;  %v6646_v22 = vld [vmem:[%s8191_s1 + $0xdf8] sm:$0xff]  }
 0x17d   :  { %6103 = vmatprep.subr.bf16.mxu0 %v6608_v23  ;;  %v6647_v23 = vld [vmem:[%s8191_s1 + $0xd38] sm:$0xff]  }
 0x17e   :  { %6124 = vmatpush3.bf16.msra.mxu1 %v6607_v24  ;;  %v1272_v24 = vcombine.high %v1250_v17, %v1250_v17 }
 0x17f   :  { %6125 = vmatprep.subr.bf16.mxu1 %v6609_v25  ;;  %v6649_v25 = vld [vmem:[%s8191_s1 + $0xd70] sm:$0xff]  }
 0x180   :  { %6104 = vmatpush3.bf16.msra.mxu0 %v6610_v26  ;;  %v6648_v26 = vld [vmem:[%s8191_s1 + $0xdb8] sm:$0xff]  }
 0x181   :  { %6133 = vmatprep.subr.bf16.mxu0 %v6613_v28 }
 0x182   :  { %6126 = vmatpush3.bf16.msra.mxu1 %v6611_v29  ;;  %v6650_v29 = vld [vmem:[%s8191_s1 + $0xdf0] sm:$0xff]  }
 0x183   :  { %v5841_v35 = vpop.f32.mrf.mxu0  ;;  %4933 = vmatmul.mubr.bf16.vlgmr.msra.gmra.mxu0 %v1208_v27  ;;  %6155 = vmatprep.subr.bf16.mxu1 %v6614_v30  ;;  %v1275_v27 = vcombine.high %v1271_v21, %v1271_v21  ;;  %v6651_v30 = vld [vmem:[%s8191_s1 + $0xd30] sm:$0xff]  }
 0x184   :  { %6134 = vmatpush3.bf16.msra.mxu0 %v6615_v31  ;;  %5012 = vmatprep.mubr.bf16.mxu0 %v1264_v15 }
 0x185   :  { %v5863_v38 = vpop.f32.mrf.mxu1  ;;  %4973 = vmatmul.mubr.bf16.vlgmr.msra.gmra.mxu1 %v1224_v32  ;;  %v5842_v39 = vpop.f32.mrf.mxu0  ;;  %6135 = vmatprep.subr.bf16.mxu0 %v6617_v33  ;;  %v6653_v33 = vld [vmem:[%s8191_s1 + $0xd68] sm:$0xff]  }
 0x186   :  { %6156 = vmatpush3.bf16.msra.mxu1 %v6616_v34  ;;  %v5843_v42 = vadd.f32 %v5842_v39, %v5841_v35  ;;  %5052 = vmatprep.mubr.bf16.mxu1 %v1274_v20  ;;  %v6652_v35 = vld [vmem:[%s8191_s1 + $0xdb0] sm:$0xff]  }
 0x187   :  { %v5864_v44 = vpop.f32.mrf.mxu1  ;;  %v5844_v45 = vpop.f32.mrf.mxu0  ;;  %6157 = vmatprep.subr.bf16.mxu1 %v6618_v36 }
 0x188   :  { %v4455_v47 = vadd.f32 %v5843_v42, %v7913_v6  ;;  %v5865_v48 = vadd.f32 %v5864_v44, %v5863_v38  ;;  %6136 = vmatpush3.bf16.msra.mxu0 %v6619_v37  ;;  %v6639_v6 = vld [vmem:[%s8191_s1 + $0xc08] sm:$0xff]   ;;  %v6657_v45 = vld [vmem:[%s8191_s1 + $0xd60] sm:$0xff]  }
 0x189   :  { %v5866_v50 = vpop.f32.mrf.mxu1  ;;  %v5845_v51 = vpop.f32.mrf.mxu0  ;;  %6137 = vmatprep.subr.bf16.mxu0 %v6621_v40  ;;  %v6654_v38 = vld [vmem:[%s8191_s1 + $0xde8] sm:$0xff]  }
 0x18a   :  { %v8014_v53 = vadd.f32 %v5865_v48, %v4455_v47  ;;  %6158 = vmatpush3.bf16.msra.mxu1 %v6620_v43  ;;  %v6655_v42 = vld [vmem:[%s8191_s1 + $0xd28] sm:$0xff]   ;;  %v6659_v50 = vld [vmem:[%s8191_s1 + $0xd20] sm:$0xff]   ;;  %v6661_v51 = vld [vmem:[%s8191_s1 + $0xd58] sm:$0xff]  }
 0x18b   :  { %v5867_v55 = vpop.f32.mrf.mxu1  ;;  %6159 = vmatprep.subr.bf16.mxu1 %v6622_v46  ;;  %v6656_v47 = vld [vmem:[%s8191_s1 + $0xda8] sm:$0xff]  }
 0x18c   :  { %6138 = vmatpush3.bf16.msra.mxu0 %v6623_v49  ;;  %v6658_v49 = vld [vmem:[%s8191_s1 + $0xde0] sm:$0xff]   ;;  %v6665_v55 = vld [vmem:[%s8191_s1 + $0xd50] sm:$0xff]  }
 0x18d   :  { %6139 = vmatprep.subr.bf16.mxu0 %v6625_v52  ;;  %v6660_v52 = vld [vmem:[%s8191_s1 + $0xda0] sm:$0xff]  }
 0x18e   :  { %6160 = vmatpush3.bf16.msra.mxu1 %v6624_v54  ;;  %v6663_v54 = vld [vmem:[%s8191_s1 + $0xd18] sm:$0xff]  }
 0x18f   :  { %6161 = vmatprep.subr.bf16.mxu1 %v6626_v56  ;;  %v6664_v56 = vld [vmem:[%s8191_s1 + $0xd98] sm:$0xff]  }
 0x190   :  { %6140 = vmatpush3.bf16.msra.mxu0 %v6627_v57  ;;  %v6666_v57 = vld [vmem:[%s8191_s1 + $0xdd0] sm:$0xff]  }
 0x191   :  { %6141 = vmatprep.subr.bf16.mxu0 %v6629_v58  ;;  %v6667_v58 = vld [vmem:[%s8191_s1 + $0xd10] sm:$0xff]  }
 0x192   :  { %6162 = vmatpush3.bf16.msra.mxu1 %v6628_v59  ;;  %v6669_v59 = vld [vmem:[%s8191_s1 + $0xd48] sm:$0xff]  }
 0x193   :  { %6163 = vmatprep.subr.bf16.mxu1 %v6630_v60  ;;  %v6668_v60 = vld [vmem:[%s8191_s1 + $0xd90] sm:$0xff]  }
 0x194   :  { %6142 = vmatpush3.bf16.msra.mxu0 %v6631_v61  ;;  %v6670_v61 = vld [vmem:[%s8191_s1 + $0xdc8] sm:$0xff]  }
 0x195   :  { %6143 = vmatprep.subr.bf16.mxu0 %v6633_v62 }
 0x196   :  { %6164 = vmatpush3.bf16.msra.mxu1 %v6632_v63 }
 0x197   :  { %6165 = vmatprep.subr.bf16.mxu1 %v6634_v0 }
 0x198   :  { %6144 = vmatpush3.bf16.msra.mxu0 %v6635_v1 }
 0x199   :  { %6145 = vmatprep.subr.bf16.mxu0 %v6637_v2 }
 0x19a   :  { %6166 = vmatpush3.bf16.msra.mxu1 %v6636_v3 }
 0x19b   :  { %6167 = vmatprep.subr.bf16.mxu1 %v6638_v4 }
 0x19c   :  { %6146 = vmatpush3.bf16.msra.mxu0 %v6639_v6 }
 0x19d   :  { %6147 = vmatprep.subr.bf16.mxu0 %v6641_v9 }
 0x19e   :  { %6168 = vmatpush3.bf16.msra.mxu1 %v6640_v10 }
 0x19f   :  { %6169 = vmatprep.subr.bf16.mxu1 %v6642_v13 }
 0x1a0   :  { %6148 = vmatpush3.bf16.msra.mxu0 %v6643_v14 }
 0x1a1   :  { %6177 = vmatprep.subr.bf16.mxu0 %v6645_v18 }
 0x1a2   :  { %6170 = vmatpush3.bf16.msra.mxu1 %v6644_v19 }
 0x1a3   :  { %v5885_v28 = vpop.f32.mrf.mxu0  ;;  %5013 = vmatmul.mubr.bf16.vlgmr.msra.gmra.mxu0 %v1250_v17  ;;  %6199 = vmatprep.subr.bf16.mxu1 %v6646_v22 }
 0x1a4   :  { %6178 = vmatpush3.bf16.msra.mxu0 %v6647_v23  ;;  %5092 = vmatprep.mubr.bf16.mxu0 %v1271_v21 }
 0x1a5   :  { %v5907_v31 = vpop.f32.mrf.mxu1  ;;  %5053 = vmatmul.mubr.bf16.vlgmr.msra.gmra.mxu1 %v1272_v24  ;;  %v5886_v32 = vpop.f32.mrf.mxu0  ;;  %6179 = vmatprep.subr.bf16.mxu0 %v6649_v25 }
 0x1a6   :  { %6200 = vmatpush3.bf16.msra.mxu1 %v6648_v26  ;;  %v5887_v34 = vadd.f32 %v5886_v32, %v5885_v28  ;;  %5132 = vmatprep.mubr.bf16.mxu1 %v1275_v27 }
 0x1a7   :  { %v5908_v36 = vpop.f32.mrf.mxu1  ;;  %v5888_v37 = vpop.f32.mrf.mxu0  ;;  %6201 = vmatprep.subr.bf16.mxu1 %v6650_v29 }
 0x1a8   :  { %v4535_v39 = vadd.f32 %v5887_v34, %v8014_v53  ;;  %v5909_v40 = vadd.f32 %v5908_v36, %v5907_v31  ;;  %6180 = vmatpush3.bf16.msra.mxu0 %v6651_v30  ;;  %v6662_v53 = vld [vmem:[%s8191_s1 + $0xdd8] sm:$0xff]  }
 0x1a9   :  { %v5910_v43 = vpop.f32.mrf.mxu1  ;;  %v5889_v44 = vpop.f32.mrf.mxu0  ;;  %6181 = vmatprep.subr.bf16.mxu0 %v6653_v33 }
 0x1aa   :  { %v4575_v46 = vadd.f32 %v5909_v40, %v4535_v39  ;;  %6202 = vmatpush3.bf16.msra.mxu1 %v6652_v35 }
 0x1ab   :  { %v5911_v48 = vpop.f32.mrf.mxu1  ;;  %6203 = vmatprep.subr.bf16.mxu1 %v6654_v38 }
 0x1ac   :  { %6182 = vmatpush3.bf16.msra.mxu0 %v6655_v42 }
 0x1ad   :  { %6183 = vmatprep.subr.bf16.mxu0 %v6657_v45 }
 0x1ae   :  { %6204 = vmatpush3.bf16.msra.mxu1 %v6656_v47 }
 0x1af   :  { %6205 = vmatprep.subr.bf16.mxu1 %v6658_v49 }
 0x1b0   :  { %6184 = vmatpush3.bf16.msra.mxu0 %v6659_v50 }
 0x1b1   :  { %6185 = vmatprep.subr.bf16.mxu0 %v6661_v51 }
 0x1b2   :  { %6206 = vmatpush3.bf16.msra.mxu1 %v6660_v52 }
 0x1b3   :  { %6207 = vmatprep.subr.bf16.mxu1 %v6662_v53 }
 0x1b4   :  { %6186 = vmatpush3.bf16.msra.mxu0 %v6663_v54 }
 0x1b5   :  { %6187 = vmatprep.subr.bf16.mxu0 %v6665_v55 }
 0x1b6   :  { %6208 = vmatpush3.bf16.msra.mxu1 %v6664_v56 }
 0x1b7   :  { %6209 = vmatprep.subr.bf16.mxu1 %v6666_v57 }
 0x1b8   :  { %8 = vsyncpa [#allocation3], 0  ;;  %6188 = vmatpush3.bf16.msra.mxu0 %v6667_v58  ;;  %v6671_v62 = vld [vmem:[%s8191_s1 + $0xd08] sm:$0xff]   ;;  %v6673_v63 = vld [vmem:[%s8191_s1 + $0xd40] sm:$0xff]   ;;  %v1257_v3 = vrot.slane %v8072_v12, %v6827_v41  ;;  %vm5140_vm0 = vcmask 156672  }
 0x1b9   :  { %6189 = vmatprep.subr.bf16.mxu0 %v6669_v59  ;;  %v6672_v0 = vld [vmem:[%s8191_s1 + $0xd88] sm:$0xff]   ;;  %v6674_v1 = vld [vmem:[%s8191_s1 + $0xdc0] sm:$0xff]  }
 0x1ba   :  { %6210 = vmatpush3.bf16.msra.mxu1 %v6668_v60  ;;  %v6675_v2 = vld [vmem:[%s8191_s1 + $0xd00] sm:$0xff]   ;;  %v1273_v5 = vcombine.high %v1257_v3, %v1257_v3 }
 0x1bb   :  { %6211 = vmatprep.subr.bf16.mxu1 %v6670_v61  ;;  %v6676_v4 = vld [vmem:[%s8191_s1 + $0xd80] sm:$0xff]   ;;  %s6701_s1 = smov [#allocation2]  }
 0x1bc   :  { %6190 = vmatpush3.bf16.msra.mxu0 %v6671_v62  ;;  %s5148_s14 = sshll.u32 %s6701_s1, 4  ;;  %s5149_s14 = int_to_ptr.vmem [resolvable:$true] %s5148_s14 }
 0x1bd   :  { %6191 = vmatprep.subr.bf16.mxu0 %v6673_v63  ;;  %s6678_s15 = scalar_lea.vmem %s5149_s14, 32  ;;  %p6683_p1 = scmp.lt.s32.totalorder %s5149_s14, %s5149_s14 }
 0x1be   :  { %6212 = vmatpush3.bf16.msra.mxu1 %v6672_v0  ;;  %p6679_p0 = scmp.ne.s32.totalorder %s5149_s14, %s6678_s15  ;;  %p6684_p2 = scmp.lt.s32.totalorder %s6678_s15, %s6678_s15 }
 0x1bf   :  { %6213 = vmatprep.subr.bf16.mxu1 %v6674_v1 }
 0x1c0   :  { %6192 = vmatpush3.bf16.msra.mxu0 %v6675_v2  ;;  %p6685_p3 = por %p6684_p2, %p6683_p1 }
 0x1c2   :  { %6214 = vmatpush3.bf16.msra.mxu1 %v6676_v4  ;;  %p6686_p4 = pnand %p6685_p3, %p6679_p0 }
 0x1c3   :  { %v5929_v6 = vpop.f32.mrf.mxu0  ;;  %5093 = vmatmul.mubr.bf16.vlgmr.msra.gmra.mxu0 %v1257_v3 }
 0x1c5   :  { %v5951_v7 = vpop.f32.mrf.mxu1  ;;  %5133 = vmatmul.mubr.bf16.vlgmr.msra.gmra.mxu1 %v1273_v5  ;;  %v5930_v8 = vpop.f32.mrf.mxu0 }
 0x1c6   :  { %v5931_v9 = vadd.f32 %v5930_v8, %v5929_v6 }
 0x1c7   :  { %v5952_v10 = vpop.f32.mrf.mxu1  ;;  %v5932_v11 = vpop.f32.mrf.mxu0 }
 0x1c8   :  { %v4615_v13 = vadd.f32 %v5931_v9, %v4575_v46  ;;  %v5953_v14 = vadd.f32 %v5952_v10, %v5951_v7 }
 0x1c9   :  { %v5954_v41 = vpop.f32.mrf.mxu1  ;;  %v5933_v12 = vpop.f32.mrf.mxu0 }
 0x1ca   :  { %v4655_v15 = vadd.f32 %v5953_v14, %v4615_v13 }
 0x1cb   :  { %v5955_v16 = vpop.f32.mrf.mxu1 }
 0x1e3   :  { %v5973_v17 = vpop.f32.mrf.mxu0 }
 0x1e5   :  { %v5995_v18 = vpop.f32.mrf.mxu1  ;;  %v5974_v19 = vpop.f32.mrf.mxu0 }
 0x1e6   :  { %v5975_v20 = vadd.f32 %v5974_v19, %v5973_v17 }
 0x1e7   :  { %v5996_v21 = vpop.f32.mrf.mxu1  ;;  %v5976_v22 = vpop.f32.mrf.mxu0 }
 0x1e8   :  { %v4695_v23 = vadd.f32 %v5975_v20, %v4655_v15  ;;  %v5997_v24 = vadd.f32 %v5996_v21, %v5995_v18 }
 0x1e9   :  { %v5998_v25 = vpop.f32.mrf.mxu1  ;;  %v5977_v26 = vpop.f32.mrf.mxu0 }
 0x1ea   :  { %v4735_v27 = vadd.f32 %v5997_v24, %v4695_v23 }
 0x1eb   :  { %v5999_v28 = vpop.f32.mrf.mxu1 }
 0x203   :  { %v6017_v29 = vpop.f32.mrf.mxu0 }
 0x205   :  { %v6039_v30 = vpop.f32.mrf.mxu1  ;;  %v6018_v31 = vpop.f32.mrf.mxu0 }
 0x206   :  { %v6019_v32 = vadd.f32 %v6018_v31, %v6017_v29 }
 0x207   :  { %v6040_v33 = vpop.f32.mrf.mxu1  ;;  %v6020_v34 = vpop.f32.mrf.mxu0 }
 0x208   :  { %v4775_v35 = vadd.f32 %v6019_v32, %v4735_v27  ;;  %v6041_v36 = vadd.f32 %v6040_v33, %v6039_v30 }
 0x209   :  { %v6042_v37 = vpop.f32.mrf.mxu1  ;;  %v6021_v38 = vpop.f32.mrf.mxu0 }
 0x20a   :  { %v4815_v39 = vadd.f32 %v6041_v36, %v4775_v35 }
 0x20b   :  { %v6043_v40 = vpop.f32.mrf.mxu1 }
 0x223   :  { %v6061_v42 = vpop.f32.mrf.mxu0 }
 0x225   :  { %v6083_v43 = vpop.f32.mrf.mxu1  ;;  %v6062_v44 = vpop.f32.mrf.mxu0 }
 0x226   :  { %v6063_v45 = vadd.f32 %v6062_v44, %v6061_v42 }
 0x227   :  { %v6084_v46 = vpop.f32.mrf.mxu1  ;;  %v6064_v47 = vpop.f32.mrf.mxu0 }
 0x228   :  { %v4855_v48 = vadd.f32 %v6063_v45, %v4815_v39  ;;  %v6085_v49 = vadd.f32 %v6084_v46, %v6083_v43 }
 0x229   :  { %v6086_v50 = vpop.f32.mrf.mxu1  ;;  %v6065_v51 = vpop.f32.mrf.mxu0 }
 0x22a   :  { %v4895_v52 = vadd.f32 %v6085_v49, %v4855_v48 }
 0x22b   :  { %v6087_v53 = vpop.f32.mrf.mxu1 }
 0x243   :  { %v6105_v54 = vpop.f32.mrf.mxu0 }
 0x245   :  { %v6127_v55 = vpop.f32.mrf.mxu1  ;;  %v6106_v56 = vpop.f32.mrf.mxu0 }
 0x246   :  { %v6107_v6 = vadd.f32 %v6106_v56, %v6105_v54 }
 0x247   :  { %v6128_v57 = vpop.f32.mrf.mxu1  ;;  %v6108_v58 = vpop.f32.mrf.mxu0 }
 0x248   :  { %v4935_v7 = vadd.f32 %v6107_v6, %v4895_v52  ;;  %v6129_v8 = vadd.f32 %v6128_v57, %v6127_v55 }
 0x249   :  { %v6130_v59 = vpop.f32.mrf.mxu1  ;;  %v6109_v60 = vpop.f32.mrf.mxu0 }
 0x24a   :  { %v4975_v10 = vadd.f32 %v6129_v8, %v4935_v7 }
 0x24b   :  { %v6131_v61 = vpop.f32.mrf.mxu1 }
 0x263   :  { %v6149_v62 = vpop.f32.mrf.mxu0 }
 0x265   :  { %v6171_v63 = vpop.f32.mrf.mxu1  ;;  %v6150_v0 = vpop.f32.mrf.mxu0 }
 0x266   :  { %v6151_v9 = vadd.f32 %v6150_v0, %v6149_v62 }
 0x267   :  { %v6172_v1 = vpop.f32.mrf.mxu1  ;;  %v6152_v2 = vpop.f32.mrf.mxu0 }
 0x268   :  { %v5015_v11 = vadd.f32 %v6151_v9, %v4975_v10  ;;  %v6173_v13 = vadd.f32 %v6172_v1, %v6171_v63 }
 0x269   :  { %v6174_v3 = vpop.f32.mrf.mxu1  ;;  %v6153_v4 = vpop.f32.mrf.mxu0 }
 0x26a   :  { %v5055_v15 = vadd.f32 %v6173_v13, %v5015_v11 }
 0x26b   :  { %v6175_v5 = vpop.f32.mrf.mxu1 }
 0x283   :  { %v6193_v14 = vpop.f32.mrf.mxu0 }
 0x285   :  { %v6215_v41 = vpop.f32.mrf.mxu1  ;;  %v6194_v12 = vpop.f32.mrf.mxu0 }
 0x286   :  { %v6195_v16 = vadd.f32 %v6194_v12, %v6193_v14 }
 0x287   :  { %v6216_v17 = vpop.f32.mrf.mxu1  ;;  %v6196_v18 = vpop.f32.mrf.mxu0 }
 0x288   :  { %v5095_v19 = vadd.f32 %v6195_v16, %v5055_v15  ;;  %v6217_v20 = vadd.f32 %v6216_v17, %v6215_v41 }
 0x289   :  { %v6218_v21 = vpop.f32.mrf.mxu1  ;;  %v6197_v22 = vpop.f32.mrf.mxu0 }
 0x28a   :  { %v5135_v23 = vadd.f32 %v6217_v20, %v5095_v19 }
 0x28b   :  { %v6219_v24 = vpop.f32.mrf.mxu1 }
 0x28c   :  { %5141 = vst.msk [vmem:[#allocation2] sm:$0x3] %vm5140_vm0, %v5135_v23 }
 0x28d   :  { %6689 = shalt.err (!%p6686_p4)
}
 0x28e   :  { %5151 = dma.vmem_to_hbm [thread:$0]  %s5149_s14, 32, %s8193_s3, [#allocation3]  }
 0x28f   :  { %6698 = dma.done.wait [#allocation3], 32  }
 0x290   :  { %6699 = vsyncadd [#allocation3], 4294967264 }
 0x291   :  { %5155 = vsyncpa [#allocation3], 1 }

// kernel: encoder_forward.2
= control target key start
LH: loop header
LB: loop body
LE: loop exit
PB: predicated region body
PF: predicated region fallthrough
CT: control target
= control target key end

     0   :  { %14 = vsyncpa [#allocation5], 0  ;;  %s11845_s30 = smov 0   ;;  %s15814_s0 = inlined_call_operand.vmem [shape: f32[2,1,930], index: 0, kind: input, shape index: {}]   ;;  %s15815_s1 = inlined_call_operand.vmem [shape: f32[32,9], index: 1, kind: input, shape index: {}]   ;;  %s15816_s2 = inlined_call_operand.vmem [shape: f32[32,1], index: 2, kind: input, shape index: {}]   ;;  %s15817_s3 = inlined_call_operand.hbm [shape: bf16[840,1024], index: 3, kind: input, shape index: {}]   ;;  %s15818_s4 = inlined_call_operand.vmem [shape: bf16[9,64,32], index: 4, kind: input, shape index: {}]   ;;  %s15819_s5 = inlined_call_operand.vmem [shape: f32[64,1], index: 5, kind: input, shape index: {}]   ;;  %s15820_s6 = inlined_call_operand.vmem [shape: bf16[224,288], index: 6, kind: input, shape index: {}]   ;;  %s15821_s7 = inlined_call_operand.vmem [shape: bf16[9,128,64], index: 7, kind: input, shape index: {}]   ;;  %s15822_s8 = inlined_call_operand.vmem [shape: f32[128,1], index: 8, kind: input, shape index: {}]   ;;  %s15823_s9 = inlined_call_operand.vmem [shape: bf16[2,128,56], index: 9, kind: output, shape index: {}]  }
   0x1 LB: > { %s11851_s10 = sadd.s32 4294967295, %s11766_s30   ;;  %p10079_p0 = scmp.ge.s32.totalorder %s11766_s30, 1  ;;  %s11766_s30 = sphi %s11845_s30, %s20_s30  }
   0x2   : > { %p245_p1 = scmp.lt.s32.totalorder %s11766_s30, 3  ;;  %s11768_s11 = smov [#allocation4]  }
   0x3   : > { %s263_s12 = sshll.u32 %s11768_s11, 4  ;;  %p11468_p3 = scmp.eq.s32.totalorder %s11851_s10, 0  ;;  %s264_s12 = int_to_ptr.vmem [resolvable:$true] %s263_s12 }
   0x4   : > { %p11855_p2 = pnand %p10079_p0, %p245_p1  ;;  %s11741_s14 = scalar_lea.vmem %s264_s12, 53760 }
   0x5   : > { %p11742_p7 = scmp.ne.s32.totalorder %s264_s12, %s11741_s14  ;;  %p11749_p10 = scmp.lt.s32.totalorder %s264_s12, %s264_s12 }
   0x6   : > { %p11464_p4 = pneg %p11855_p2  ;;  %p11750_p11 = scmp.lt.s32.totalorder %s11741_s14, %s11741_s14 }
   0x8   : > { %p11465_p5 = pnand %p11468_p3, %p11464_p4  ;;  %p11751_p12 = por %p11750_p11, %p11749_p10 }
   0xa   : > { %p11732_p6 = pneg %p11465_p5 }
   0xc   : > { %p11744_p8 = pnand %p11742_p7, %p11732_p6 }
   0xe   : > { %p11745_p9 = pneg %p11744_p8 }
  0x10   : > { %p11752_p13 = pnand %p11751_p12, %p11745_p9 }
  0x12   : > { %11755 = shalt.err (!%p11752_p13)
}
  0x13   : > { %s11769_s15 = smov 512   ;;  %s11770_s16 = smov 32  }
  0x14   : > { %11467 = dma.hbm_to_vmem [thread:$0]  (!%p11465_p5), %s15817_s3, 53760, %s264_s12, [#allocation5], %s11769_s15, %s11769_s15, %s11770_s16  }
  0x15   : > { %301 = sbr.rel (%p11855_p2) target bundleno = 2254 (0x8ce), region = 56 }
  0x1a   : > { %11761 = dma.done.wait (%p11468_p3), [#allocation5], 53760  }
  0x1b   : > { %11763 = vsyncadd (%p11468_p3), [#allocation5], 4294913536  ;;  %v11771_v0 = vmov 3   ;;  %v11772_v1 = vmov 2   ;;  %p336_p0 = scmp.lt.s32.totalorder %s11851_s10, 1  ;;  %v372_v2 = vlaneseq  ;;  %v11889_v5 = vld [vmem:[%s15815_s1] sm:$0xff] }
  0x1c   : > { %11506 = vset.pattern.permute.xlu0 %v11771_v0  ;;  %11505 = vset.pattern.permute.xlu1 %v11772_v1  ;;  %v11905_v15 = vld [vmem:[%s15815_s1 + $0x8] sm:$0xff]  ;;  %v11773_v23 = vmov 6   ;;  %v11774_v27 = vmov 1   ;;  %v11947_v28 = vld [vmem:[%s15815_s1 + $0x18] sm:$0xff]  ;;  %v11775_v29 = vmov 4   ;;  %v11776_v30 = vmov 5  }
  0x1d   : > { %s16507_s10 = smov (!%p336_p0, %s11851_s10), 1  ;;  %v11879_v3 = vshrl.u32 %v372_v2, 7  ;;  %882 = vperm.xlu0 %11506, %v11889_v5   ;;  %673 = vperm.xlu1 %11505, %v11889_v5   ;;  %v11956_v31 = vld [vmem:[%s15815_s1 + $0x10] sm:$0xff]  ;;  %v11777_v32 = vmov 7   ;;  %v11778_v33 = vmov 8   ;;  %v15824_v34 = vmov 0  }
  0x1e   : > { %s10084_s19 = sshll.u32 %s16507_s10, 3  ;;  %s11780_s12 = smov 127   ;;  %vm591_vm0 = vcmask 1039360   ;;  %vm800_vm1 = vcmask 1031168   ;;  %vm1009_vm2 = vcmask 801792   ;;  %vm1218_vm3 = vcmask 793600  }
  0x1f   : > { %s339_s22 = scalar_lea.vmem %s15814_s0, %s10084_s19  ;;  %v386_v4 = vsub.s32 3, %v11879_v3  ;;  %v390_v6 = vsub.s32 4, %v11879_v3  ;;  %v382_v7 = vsub.s32 2, %v11879_v3  ;;  %v398_v8 = vsub.s32 6, %v11879_v3  ;;  %s11781_s13 = smov 126  }
  0x20   : > { %v1556_v9 = vsub.s32 7, %v11879_v3  ;;  %v11897_v10 = vld [vmem:[%s339_s22] sm:$0x7f]  ;;  %v378_v11 = vsub.s32 1, %v11879_v3  ;;  %v374_v12 = vsub.s32 0, %v11879_v3  ;;  %v394_v14 = vsub.s32 5, %v11879_v3 }
  0x21   : > { %v1508_v13 = vld [vmem:[%s339_s22] sm:$0xff]  ;;  %v11928_v21 = vrot.slane %v11897_v10, %v398_v8  ;;  %11510 = vset.pattern.permute.xlu0 %v11773_v23  ;;  %677 = vperm.xlu1 %11505, %v11905_v15   ;;  %v11998_v39 = vrot.slane %v11897_v10, %v386_v4  ;;  %v12003_v40 = vrot.slane %v11897_v10, %v390_v6  ;;  %s11782_s14 = smov 98   ;;  %s11783_s15 = smov 97   ;;  %vm1427_vm4 = vcmask 785408  }
  0x22   : > { %v11909_v16 = vrot.slane %v1508_v13, %v386_v4  ;;  %v11913_v17 = vrot.slane %v1508_v13, %v390_v6  ;;  %v11917_v18 = vrot.slane %v1508_v13, %v382_v7  ;;  %v11921_v19 = vrot.slane %v1508_v13, %v378_v11  ;;  %1510 = vperm.xlu0 %11510, %v11889_v5   ;;  %s11784_s16 = smov 96   ;;  %s11785_s17 = smov 68  }
  0x23   : > { %v11925_v20 = vrot.slane %v1508_v13, %v374_v12  ;;  %16035 = vst [vmem:[#allocation9_spill] sm:$0xff] %v11928_v21  ;;  %v11930_v22 = vrot.slane %v1508_v13, %v1556_v9  ;;  %v11933_v24 = vrot.slane %v1508_v13, %v398_v8  ;;  %v11936_v25 = vrot.slane %v11897_v10, %v394_v14  ;;  %s11786_s18 = smov 67   ;;  %s11787_s23 = smov 66  }
  0x24   : > { %16033 = vst [vmem:[#allocation7_spill] sm:$0xff] %v11921_v19  ;;  %v11938_v26 = vrot.slane %v1508_v13, %v394_v14  ;;  %16044 = vst [vmem:[#allocation18_spill] sm:$0xff] %v11998_v39  ;;  %v12026_v48 = vrot.slane %v11897_v10, %v382_v7  ;;  %v12039_v52 = vrot.slane %v11897_v10, %v378_v11  ;;  %vm1694_vm5 = vcmask 556032   ;;  %s11788_s28 = smov 112   ;;  %s11789_s22 = smov 111  }
  0x25   : > { %16034 = vst [vmem:[#allocation8_spill] sm:$0xff] %v11925_v20  ;;  %16036 = vst [vmem:[#allocation10_spill] sm:$0xff] %v11930_v22  ;;  %11507 = vset.pattern.permute.xlu1 %v11771_v0  ;;  %v12066_v61 = vrot.slane %v11897_v10, %v374_v12  ;;  %vm1923_vm6 = vcmask 547840   ;;  %vm2152_vm7 = vcmask 539648   ;;  %vm4886_vm8 = vcmask 1043456   ;;  %s11790_s25 = smov 56  }
  0x26   : > { %16037 = vst [vmem:[#allocation11_spill] sm:$0xff] %v11933_v24  ;;  %16038 = vst [vmem:[#allocation12_spill] sm:$0xff] %v11936_v25  ;;  %11511 = vset.pattern.permute.xlu0 %v11774_v27  ;;  %886 = vperm.xlu1 %11507, %v11905_v15   ;;  %vm4879_vm9 = vcmask 588800   ;;  %vm5936_vm10 = vcmask 261120   ;;  %vm6781_vm11 = vcmask 916480   ;;  %vm7070_vm12 = vcmask 908288  }
  0x27   : > { %16039 = vst [vmem:[#allocation13_spill] sm:$0xff] %v11938_v26  ;;  %464 = vperm.xlu0 %11511, %v11889_v5   ;;  %16045 = vst [vmem:[#allocation19_spill] sm:$0xff] %v12003_v40  ;;  %vm7793_vm13 = vcmask 257024   ;;  %vm7922_vm14 = vcmask 523264   ;;  %s11791_s29 = smov 40   ;;  %s11792_s24 = smov 120  }
  0x28   : > { %16049 = vst [vmem:[#allocation23_spill] sm:$0xff] %v12026_v48  ;;  %16051 = vst [vmem:[#allocation25_spill] sm:$0xff] %v12039_v52  ;;  %s11794_s11 = smov 119   ;;  %vm8762_vm15 = vcmask 326656  }
  0x29   : > { %16054 = vst [vmem:[#allocation28_spill] sm:$0xff] %v12066_v61 }
  0x2a   : > { %11508 = vset.pattern.permute.xlu1 %v11775_v29 }
  0x2b   : > { %468 = vperm.xlu0 %11511, %v11905_v15   ;;  %1091 = vperm.xlu1 %11508, %v11889_v5  }
  0x2f   : > { %476 = vperm.xlu0 %11511, %v11947_v28   ;;  %11509 = vset.pattern.permute.xlu1 %v11776_v30 }
  0x30   : > { %1300 = vperm.xlu1 %11509, %v11889_v5  }
  0x33   : > { %11515 = vset.pattern.permute.xlu0 %v11772_v1 }
  0x34   : > { %1304 = vperm.xlu1 %11509, %v11905_v15   ;;  %681 = vperm.xlu0 %11515, %v11956_v31  }
  0x38   : > { %11512 = vset.pattern.permute.xlu1 %v11773_v23  ;;  %11516 = vset.pattern.permute.xlu0 %v11775_v29 }
  0x39   : > { %1514 = vperm.xlu1 %11512, %v11905_v15   ;;  %1095 = vperm.xlu0 %11516, %v11905_v15  }
  0x3d   : > { %11513 = vset.pattern.permute.xlu1 %v11774_v27  ;;  %1099 = vperm.xlu0 %11516, %v11956_v31  }
  0x3e   : > { %472 = vperm.xlu1 %11513, %v11956_v31  }
  0x41   : > { %11522 = vset.pattern.permute.xlu0 %v11776_v30 }
  0x42   : > { %11514 = vset.pattern.permute.xlu1 %v11777_v32  ;;  %1312 = vperm.xlu0 %11522, %v11947_v28  }
  0x43   : > { %1780 = vperm.xlu1 %11514, %v11889_v5  }
  0x46   : > { %11524 = vset.pattern.permute.xlu0 %v11777_v32 }
  0x47   : > { %1784 = vperm.xlu1 %11514, %v11905_v15   ;;  %1788 = vperm.xlu0 %11524, %v11956_v31  }
  0x4b   : > { %11517 = vset.pattern.permute.xlu1 %v11772_v1  ;;  %11525 = vset.pattern.permute.xlu0 %v11778_v33 }
  0x4c   : > { %685 = vperm.xlu1 %11517, %v11947_v28   ;;  %2013 = vperm.xlu0 %11525, %v11905_v15  }
  0x50   : > { %11518 = vset.pattern.permute.xlu1 %v11778_v33  ;;  %2021 = vperm.xlu0 %11525, %v11947_v28  }
  0x51   : > { %2009 = vperm.xlu1 %11518, %v11889_v5  }
  0x54   : > { %11529 = vset.pattern.permute.xlu0 %v15824_v34 }
  0x55   : > { %11519 = vset.pattern.permute.xlu1 %v11771_v0 }
  0x56   : > { %890 = vperm.xlu1 %11519, %v11956_v31  }
  0x5a   : > { %894 = vperm.xlu1 %11519, %v11947_v28  }
  0x5e   : > { %11520 = vset.pattern.permute.xlu1 %v11775_v29 }
  0x5f   : > { %1103 = vperm.xlu1 %11520, %v11947_v28  }
  0x63   : > { %11521 = vset.pattern.permute.xlu1 %v11776_v30 }
  0x64   : > { %1308 = vperm.xlu1 %11521, %v11956_v31  }
  0x68   : > { %11523 = vset.pattern.permute.xlu1 %v11773_v23 }
  0x69   : > { %1518 = vperm.xlu1 %11523, %v11956_v31  }
  0x6d   : > { %1522 = vperm.xlu1 %11523, %v11947_v28  }
  0x71   : > { %11526 = vset.pattern.permute.xlu1 %v11777_v32 }
  0x72   : > { %1792 = vperm.xlu1 %11526, %v11947_v28  }
  0x76   : > { %11527 = vset.pattern.permute.xlu1 %v11778_v33 }
  0x77   : > { %2017 = vperm.xlu1 %11527, %v11956_v31  }
  0x7b   : > { %11528 = vset.pattern.permute.xlu1 %v15824_v34 }
  0x7c   : > { %353 = vperm.xlu1 %11528, %v11889_v5  }
  0x80   : > { %358 = vperm.xlu1 %11528, %v11905_v15  }
  0x98   : > { %v11987_v35 = vpop.permute.xlu0 %882  ;;  %v11989_v36 = vpop.permute.xlu1 %673 }
  0x99   : > { %16040 = vst [vmem:[#allocation14_spill] sm:$0xff] %v11987_v35  ;;  %16041 = vst [vmem:[#allocation15_spill] sm:$0xff] %v11989_v36  ;;  %v692_v56 = vmul.f32 %v11989_v36, %v12003_v40  ;;  %v691_v57 = vmul.f32 %v11989_v36, %v11998_v39  ;;  %v690_v1 = vmul.f32 %v11989_v36, %v12026_v48 }
  0x9a   : > { %v689_v4 = vmul.f32 %v11989_v36, %v12039_v52  ;;  %v900_v7 = vmul.f32 %v11987_v35, %v11998_v39  ;;  %v901_v8 = vmul.f32 %v11987_v35, %v12003_v40  ;;  %v688_v13 = vmul.f32 %v11989_v36, %v12066_v61 }
  0x9b   : > { %v899_v15 = vmul.f32 %v11987_v35, %v12026_v48  ;;  %v898_v32 = vmul.f32 %v11987_v35, %v12039_v52 }
  0x9c   : > { %v11993_v38 = vpop.permute.xlu1 %677 }
  0x9d   : > { %v11991_v37 = vpop.permute.xlu0 %1510  ;;  %16043 = vst [vmem:[#allocation17_spill] sm:$0xff] %v11993_v38  ;;  %v699_v59 = vmul.f32 %v11993_v38, %v12003_v40  ;;  %v698_v60 = vmul.f32 %v11993_v38, %v11998_v39  ;;  %v697_v2 = vmul.f32 %v11993_v38, %v12026_v48  ;;  %v696_v5 = vmul.f32 %v11993_v38, %v12039_v52 }
  0x9e   : > { %16042 = vst [vmem:[#allocation16_spill] sm:$0xff] %v11991_v37  ;;  %v695_v12 = vmul.f32 %v11993_v38, %v12066_v61 }
  0xa1   : > { %v12011_v44 = vpop.permute.xlu1 %886 }
  0xa2   : > { %v12005_v41 = vpop.permute.xlu0 %464  ;;  %16047 = vst [vmem:[#allocation21_spill] sm:$0xff] %v12011_v44  ;;  %v908_v9 = vmul.f32 %v12011_v44, %v12003_v40  ;;  %v907_v10 = vmul.f32 %v12011_v44, %v11998_v39  ;;  %v906_v23 = vmul.f32 %v12011_v44, %v12026_v48  ;;  %v905_v33 = vmul.f32 %v12011_v44, %v12039_v52 }
  0xa3   : > { %16046 = vst [vmem:[#allocation20_spill] sm:$0xff] %v12005_v41  ;;  %v482_v42 = vmul.f32 %v12005_v41, %v11998_v39  ;;  %v483_v43 = vmul.f32 %v12005_v41, %v12003_v40  ;;  %v481_v50 = vmul.f32 %v12005_v41, %v12026_v48  ;;  %v480_v53 = vmul.f32 %v12005_v41, %v12039_v52 }
  0xa4   : > { %v479_v0 = vmul.f32 %v12005_v41, %v12066_v61 }
  0xa5   : > { %541 = vrot.lane.b32.xlu0 %v482_v42, %s11780_s12  ;;  %543 = vrot.lane.b32.xlu1 %v483_v43, %s11780_s12 }
  0xa6   : > { %v12015_v45 = vpop.permute.xlu0 %468  ;;  %v12028_v49 = vpop.permute.xlu1 %1091 }
  0xa7   : > { %16048 = vst [vmem:[#allocation22_spill] sm:$0xff] %v12015_v45  ;;  %v489_v46 = vmul.f32 %v12015_v45, %v11998_v39  ;;  %v490_v47 = vmul.f32 %v12015_v45, %v12003_v40  ;;  %16050 = vst [vmem:[#allocation24_spill] sm:$0xff] %v12028_v49  ;;  %v488_v51 = vmul.f32 %v12015_v45, %v12026_v48 }
  0xa8   : > { %v487_v54 = vmul.f32 %v12015_v45, %v12039_v52  ;;  %v486_v63 = vmul.f32 %v12015_v45, %v12066_v61  ;;  %v1110_v43 = vmul.f32 %v12028_v49, %v12003_v40 }
  0xa9   : > { %555 = vrot.lane.b32.xlu0 %v489_v46, %s11780_s12  ;;  %557 = vrot.lane.b32.xlu1 %v490_v47, %s11780_s12 }
  0xaa   : > { %v12122_v29 = vpop.permute.xlu0 %476 }
  0xab   : > { %v12045_v55 = vpop.permute.xlu1 %1300  ;;  %16061 = vst [vmem:[#allocation35_spill] sm:$0xff] %v12122_v29 }
  0xac   : > { %16052 = vst [vmem:[#allocation26_spill] sm:$0xff] %v12045_v55 }
  0xad   : > { %539 = vrot.lane.b32.xlu0 %v481_v50, %s11780_s12  ;;  %553 = vrot.lane.b32.xlu1 %v488_v51, %s11780_s12  ;;  %v904_v51 = vmul.f32 %v12011_v44, %v12066_v61 }
  0xaf   : > { %v12055_v58 = vpop.permute.xlu1 %1304  ;;  %v12126_v30 = vpop.permute.xlu0 %681 }
  0xb0   : > { %16053 = vst [vmem:[#allocation27_spill] sm:$0xff] %v12055_v58  ;;  %16062 = vst [vmem:[#allocation36_spill] sm:$0xff] %v12126_v30 }
  0xb1   : > { %537 = vrot.lane.b32.xlu0 %v480_v53, %s11780_s12  ;;  %551 = vrot.lane.b32.xlu1 %v487_v54, %s11780_s12  ;;  %v897_v53 = vmul.f32 %v11987_v35, %v12066_v61 }
  0xb4   : > { %v12068_v62 = vpop.permute.xlu1 %1514 }
  0xb5   : > { %752 = vrot.lane.b32.xlu1 %v692_v56, %s11781_s13  ;;  %750 = vrot.lane.b32.xlu0 %v691_v57, %s11781_s13  ;;  %16055 = vst [vmem:[#allocation29_spill] sm:$0xff] %v12068_v62  ;;  %v1108_v57 = vmul.f32 %v12028_v49, %v12026_v48 }
  0xb9   : > { %766 = vrot.lane.b32.xlu1 %v699_v59, %s11781_s13  ;;  %764 = vrot.lane.b32.xlu0 %v698_v60, %s11781_s13  ;;  %v12080_v3 = vpop.permute.xlu1 %472 }
  0xba   : > { %16056 = vst [vmem:[#allocation30_spill] sm:$0xff] %v12080_v3 }
  0xbd   : > { %549 = vrot.lane.b32.xlu1 %v486_v63, %s11780_s12  ;;  %535 = vrot.lane.b32.xlu0 %v479_v0, %s11780_s12  ;;  %v1107_v63 = vmul.f32 %v12028_v49, %v12039_v52  ;;  %v1319_v0 = vmul.f32 %v12045_v55, %v12003_v40 }
  0xbe   : > { %v12090_v6 = vpop.permute.xlu1 %1780 }
  0xbf   : > { %16057 = vst [vmem:[#allocation31_spill] sm:$0xff] %v12090_v6  ;;  %v1799_v25 = vmul.f32 %v12090_v6, %v11913_v17 }
  0xc1   : > { %748 = vrot.lane.b32.xlu0 %v690_v1, %s11781_s13  ;;  %762 = vrot.lane.b32.xlu1 %v697_v2, %s11781_s13  ;;  %v1318_v1 = vmul.f32 %v12045_v55, %v11998_v39 }
  0xc2   : > { %v12102_v11 = vpop.permute.xlu1 %1784 }
  0xc3   : > { %16058 = vst [vmem:[#allocation32_spill] sm:$0xff] %v12102_v11 }
  0xc5   : > { %746 = vrot.lane.b32.xlu0 %v689_v4, %s11781_s13  ;;  %760 = vrot.lane.b32.xlu1 %v696_v5, %s11781_s13  ;;  %v1326_v4 = vmul.f32 %v12055_v58, %v12003_v40  ;;  %v1325_v5 = vmul.f32 %v12055_v58, %v11998_v39 }
  0xc7   : > { %v12110_v14 = vpop.permute.xlu1 %685 }
  0xc8   : > { %16059 = vst [vmem:[#allocation33_spill] sm:$0xff] %v12110_v14 }
  0xc9   : > { %959 = vrot.lane.b32.xlu0 %v900_v7, %s11782_s14  ;;  %961 = vrot.lane.b32.xlu1 %v901_v8, %s11782_s14 }
  0xcc   : > { %v12120_v27 = vpop.permute.xlu1 %2009 }
  0xcd   : > { %975 = vrot.lane.b32.xlu1 %v908_v9, %s11782_s14  ;;  %973 = vrot.lane.b32.xlu0 %v907_v10, %s11782_s14  ;;  %16060 = vst [vmem:[#allocation34_spill] sm:$0xff] %v12120_v27  ;;  %v1106_v10 = vmul.f32 %v12028_v49, %v12066_v61 }
  0xd1   : > { %758 = vrot.lane.b32.xlu1 %v695_v12, %s11781_s13  ;;  %744 = vrot.lane.b32.xlu0 %v688_v13, %s11781_s13  ;;  %v12132_v42 = vpop.permute.xlu1 %890  ;;  %v1317_v12 = vmul.f32 %v12045_v55, %v12026_v48  ;;  %v1324_v13 = vmul.f32 %v12055_v58, %v12026_v48 }
  0xd2   : > { %16063 = vst [vmem:[#allocation37_spill] sm:$0xff] %v12132_v42 }
  0xd5   : > { %957 = vrot.lane.b32.xlu0 %v899_v15, %s11782_s14  ;;  %971 = vrot.lane.b32.xlu1 %v906_v23, %s11782_s14  ;;  %v12148_v50 = vpop.permute.xlu1 %894 }
  0xd6   : > { %16065 = vst [vmem:[#allocation39_spill] sm:$0xff] %v12148_v50 }
  0xd9   : > { %363 = vperm.xlu0 %11529, %v11956_v31   ;;  %368 = vperm.xlu1 %11528, %v11947_v28   ;;  %v1109_v28 = vmul.f32 %v12028_v49, %v11998_v39  ;;  %v12140_v31 = vpop.permute.xlu0 %1095 }
  0xda   : > { %16064 = vst [vmem:[#allocation38_spill] sm:$0xff] %v12140_v31  ;;  %v1117_v46 = vmul.f32 %v12140_v31, %v12003_v40  ;;  %v1116_v47 = vmul.f32 %v12140_v31, %v11998_v39  ;;  %v12156_v54 = vpop.permute.xlu1 %1103  ;;  %v1115_v56 = vmul.f32 %v12140_v31, %v12026_v48  ;;  %v1114_v60 = vmul.f32 %v12140_v31, %v12039_v52 }
  0xdb   : > { %16066 = vst [vmem:[#allocation40_spill] sm:$0xff] %v12156_v54  ;;  %v1113_v9 = vmul.f32 %v12140_v31, %v12066_v61 }
  0xdd   : > { %955 = vrot.lane.b32.xlu1 %v898_v32, %s11782_s14  ;;  %969 = vrot.lane.b32.xlu0 %v905_v33, %s11782_s14  ;;  %v12190_v8 = vpop.permute.xlu0 %1099  ;;  %v1316_v32 = vmul.f32 %v12045_v55, %v12039_v52  ;;  %v1323_v33 = vmul.f32 %v12055_v58, %v12039_v52 }
  0xde   : > { %16070 = vst [vmem:[#allocation44_spill] sm:$0xff] %v12190_v8 }
  0xdf   : > { %v12166_v59 = vpop.permute.xlu1 %1308 }
  0xe0   : > { %16067 = vst [vmem:[#allocation41_spill] sm:$0xff] %v12166_v59 }
  0xe1   : > { %1170 = vrot.lane.b32.xlu0 %v1110_v43, %s11783_s15  ;;  %1168 = vrot.lane.b32.xlu1 %v1109_v28, %s11783_s15  ;;  %v12202_v15 = vpop.permute.xlu0 %1312 }
  0xe2   : > { %16071 = vst [vmem:[#allocation45_spill] sm:$0xff] %v12202_v15 }
  0xe4   : > { %v12178_v2 = vpop.permute.xlu1 %1518 }
  0xe5   : > { %1184 = vrot.lane.b32.xlu0 %v1117_v46, %s11783_s15  ;;  %1182 = vrot.lane.b32.xlu1 %v1116_v47, %s11783_s15  ;;  %16068 = vst [vmem:[#allocation42_spill] sm:$0xff] %v12178_v2  ;;  %v12214_v43 = vpop.permute.xlu0 %1788  ;;  %v1569_v46 = vmul.f32 %v11909_v16, %v11991_v37  ;;  %v1570_v47 = vmul.f32 %v11913_v17, %v11991_v37 }
  0xe6   : > { %16073 = vst [vmem:[#allocation47_spill] sm:$0xff] %v12214_v43 }
  0xe8   : > { %v12188_v7 = vpop.permute.xlu1 %1522 }
  0xe9   : > { %967 = vrot.lane.b32.xlu0 %v904_v51, %s11782_s14  ;;  %953 = vrot.lane.b32.xlu1 %v897_v53, %s11782_s14  ;;  %16069 = vst [vmem:[#allocation43_spill] sm:$0xff] %v12188_v7  ;;  %v1578_v51 = vmul.f32 %v11913_v17, %v12068_v62  ;;  %v1577_v53 = vmul.f32 %v11909_v16, %v12068_v62 }
  0xed   : > { %1180 = vrot.lane.b32.xlu0 %v1115_v56, %s11783_s15  ;;  %1166 = vrot.lane.b32.xlu1 %v1108_v57, %s11783_s15  ;;  %v12204_v23 = vpop.permute.xlu1 %1792  ;;  %v12228_v56 = vpop.permute.xlu0 %2013 }
  0xee   : > { %16072 = vst [vmem:[#allocation46_spill] sm:$0xff] %v12204_v23  ;;  %16075 = vst [vmem:[#allocation49_spill] sm:$0xff] %v12228_v56 }
  0xf1   : > { %1178 = vrot.lane.b32.xlu0 %v1114_v60, %s11783_s15  ;;  %1164 = vrot.lane.b32.xlu1 %v1107_v63, %s11783_s15  ;;  %v1322_v60 = vmul.f32 %v12055_v58, %v12066_v61  ;;  %v1315_v63 = vmul.f32 %v12045_v55, %v12066_v61 }
  0xf2   : > { %v12216_v28 = vpop.permute.xlu1 %2017 }
  0xf3   : > { %16074 = vst [vmem:[#allocation48_spill] sm:$0xff] %v12216_v28 }
  0xf5   : > { %1379 = vrot.lane.b32.xlu0 %v1319_v0, %s11784_s16  ;;  %1377 = vrot.lane.b32.xlu1 %v1318_v1, %s11784_s16  ;;  %v12240_v0 = vpop.permute.xlu0 %2021 }
  0xf6   : > { %16077 = vst [vmem:[#allocation51_spill] sm:$0xff] %v12240_v0 }
  0xf7   : > { %v12230_v57 = vpop.permute.xlu1 %353 }
  0xf8   : > { %16076 = vst [vmem:[#allocation50_spill] sm:$0xff] %v12230_v57 }
  0xf9   : > { %1393 = vrot.lane.b32.xlu0 %v1326_v4, %s11784_s16  ;;  %1391 = vrot.lane.b32.xlu1 %v1325_v5, %s11784_s16  ;;  %v1568_v4 = vmul.f32 %v11917_v18, %v11991_v37  ;;  %v1576_v5 = vmul.f32 %v11917_v18, %v12068_v62 }
  0xfb   : > { %v12242_v1 = vpop.permute.xlu1 %358 }
  0xfc   : > { %16078 = vst [vmem:[#allocation52_spill] sm:$0xff] %v12242_v1 }
  0xfd   : > { %1176 = vrot.lane.b32.xlu0 %v1113_v9, %s11783_s15  ;;  %1162 = vrot.lane.b32.xlu1 %v1106_v10, %s11783_s15 }
 0x101   : > { %1375 = vrot.lane.b32.xlu1 %v1317_v12, %s11784_s16  ;;  %1389 = vrot.lane.b32.xlu0 %v1324_v13, %s11784_s16  ;;  %v497_v12 = vmul.f32 %v12080_v3, %v12003_v40  ;;  %v496_v13 = vmul.f32 %v12080_v3, %v11998_v39 }
 0x105   : > { %1373 = vrot.lane.b32.xlu1 %v1316_v32, %s11784_s16  ;;  %1387 = vrot.lane.b32.xlu0 %v1323_v33, %s11784_s16 }
 0x109   : > { %1636 = vrot.lane.b32.xlu1 %v1569_v46, %s11785_s17  ;;  %1638 = vrot.lane.b32.xlu0 %v1570_v47, %s11785_s17  ;;  %v504_v46 = vmul.f32 %v12122_v29, %v12003_v40  ;;  %v503_v47 = vmul.f32 %v12122_v29, %v11998_v39 }
 0x10d   : > { %1654 = vrot.lane.b32.xlu0 %v1578_v51, %s11785_s17  ;;  %1652 = vrot.lane.b32.xlu1 %v1577_v53, %s11785_s17  ;;  %v2543_v51 = vld [vmem:[#allocation4 + $0x5c0] sm:$0xff] }
 0x10e   : > { %v2547_v53 = vld [vmem:[#allocation4 + $0x5e0] sm:$0xff] }
 0x111   : > { %1385 = vrot.lane.b32.xlu0 %v1322_v60, %s11784_s16  ;;  %1371 = vrot.lane.b32.xlu1 %v1315_v63, %s11784_s16 }
 0x115   : > { %1634 = vrot.lane.b32.xlu1 %v1568_v4, %s11785_s17  ;;  %1650 = vrot.lane.b32.xlu0 %v1576_v5, %s11785_s17  ;;  %v1575_v4 = vmul.f32 %v11921_v19, %v12068_v62  ;;  %v1567_v5 = vmul.f32 %v11921_v19, %v11991_v37 }
 0x117   : > { %v12250_v9 = vpop.permute.xlu0 %541  ;;  %v12252_v10 = vpop.permute.xlu1 %543 }
 0x118   : > { %16079 = vst [vmem:[#allocation53_spill] sm:$0xff] %v12252_v10 }
 0x119   : > { %571 = vrot.lane.b32.xlu0 %v497_v12, %s11780_s12  ;;  %569 = vrot.lane.b32.xlu1 %v496_v13, %s11780_s12  ;;  %v10272_v12 = vcombine.high %v2543_v51, %v2547_v53  ;;  %v10271_v13 = vcombine.low %v2543_v51, %v2547_v53  ;;  %v2527_v53 = vld [vmem:[#allocation4 + $0x540] sm:$0xff] }
 0x11b   : > { %v12260_v32 = vpop.permute.xlu0 %555  ;;  %v12262_v33 = vpop.permute.xlu1 %557  ;;  %4964 = vmatprep.subr.bf16.mxu1 %v10272_v12  ;;  %v1807_v12 = vmul.f32 %v12102_v11, %v11913_v17 }
 0x11c   : > { %16080 = vst [vmem:[#allocation54_spill] sm:$0xff] %v12260_v32  ;;  %16081 = vst [vmem:[#allocation55_spill] sm:$0xff] %v12262_v33  ;;  %4965 = vmatpush1.bf16.msra.mxu1 %v10271_v13  ;;  %v2531_v13 = vld [vmem:[#allocation4 + $0x560] sm:$0xff]  ;;  %v502_v33 = vmul.f32 %v12122_v29, %v12026_v48 }
 0x11d   : > { %585 = vrot.lane.b32.xlu0 %v504_v46, %s11780_s12  ;;  %583 = vrot.lane.b32.xlu1 %v503_v47, %s11780_s12  ;;  %v2535_v46 = vld [vmem:[#allocation4 + $0x580] sm:$0xff]  ;;  %v10255_v31 = vcombine.low %v2527_v53, %v2531_v13 }
 0x11e   : > { %v2539_v47 = vld [vmem:[#allocation4 + $0x5a0] sm:$0xff] }
 0x11f   : > { %v12270_v60 = vpop.permute.xlu0 %539  ;;  %v12272_v63 = vpop.permute.xlu1 %553  ;;  %v10263_v51 = vcombine.low %v2535_v46, %v2539_v47 }
 0x120   : > { %16082 = vst [vmem:[#allocation56_spill] sm:$0xff] %v12270_v60  ;;  %16083 = vst [vmem:[#allocation57_spill] sm:$0xff] %v12272_v63  ;;  %v1798_v63 = vmul.f32 %v12090_v6, %v11909_v16  ;;  %v10264_v60 = vcombine.high %v2535_v46, %v2539_v47  ;;  %v2237_v46 = vld [vmem:[%s15816_s2] sm:$0xff] }
 0x121   : > { %1648 = vrot.lane.b32.xlu0 %v1575_v4, %s11785_s17  ;;  %1632 = vrot.lane.b32.xlu1 %v1567_v5, %s11785_s17 }
 0x122   : > { %4966 = vmatprep.subr.bf16.mxu1 %v10264_v60  ;;  %v2523_v60 = vld [vmem:[#allocation4 + $0x520] sm:$0xff] }
 0x123   : > { %v12280_v34 = vpop.permute.xlu0 %537  ;;  %v12282_v26 = vpop.permute.xlu1 %551  ;;  %4967 = vmatpush1.bf16.msra.mxu1 %v10263_v51 }
 0x124   : > { %16084 = vst [vmem:[#allocation58_spill] sm:$0xff] %v12280_v34  ;;  %16085 = vst [vmem:[#allocation59_spill] sm:$0xff] %v12282_v26  ;;  %v1806_v26 = vmul.f32 %v12102_v11, %v11909_v16  ;;  %v10256_v34 = vcombine.high %v2527_v53, %v2531_v13  ;;  %v2511_v53 = vld [vmem:[#allocation4 + $0x4c0] sm:$0xff] }
 0x125   : > { %1867 = vrot.lane.b32.xlu0 %v1799_v25, %s11786_s18  ;;  %1865 = vrot.lane.b32.xlu1 %v1798_v63, %s11786_s18  ;;  %v2519_v25 = vld [vmem:[#allocation4 + $0x500] sm:$0xff]  ;;  %v2238_v63 = vld [vmem:[%s15816_s2 + $0x8] sm:$0xff] }
 0x126   : > { %4968 = vmatprep.subr.bf16.mxu1 %v10256_v34  ;;  %v10248_v47 = vcombine.high %v2519_v25, %v2523_v60  ;;  %v495_v34 = vmul.f32 %v12080_v3, %v12026_v48 }
 0x127   : > { %v12290_v4 = vpop.permute.xlu0 %750  ;;  %v12292_v5 = vpop.permute.xlu1 %752  ;;  %4969 = vmatpush1.bf16.msra.mxu1 %v10255_v31 }
 0x128   : > { %16086 = vst [vmem:[#allocation60_spill] sm:$0xff] %v12292_v5  ;;  %4970 = vmatprep.subr.bf16.mxu1 %v10248_v47 }
 0x129   : > { %1883 = vrot.lane.b32.xlu0 %v1807_v12, %s11786_s18  ;;  %1881 = vrot.lane.b32.xlu1 %v1806_v26, %s11786_s18  ;;  %v10247_v26 = vcombine.low %v2519_v25, %v2523_v60  ;;  %v2515_v12 = vld [vmem:[#allocation4 + $0x4e0] sm:$0xff] }
 0x12a   : > { %v10239_v31 = vcombine.low %v2511_v53, %v2515_v12  ;;  %v2415_v25 = vld [vmem:[#allocation4 + $0x1c0] sm:$0xff] }
 0x12b   : > { %v12306_v51 = vpop.permute.xlu0 %764  ;;  %v12308_v1 = vpop.permute.xlu1 %766  ;;  %4971 = vmatpush1.bf16.msra.mxu1 %v10247_v26  ;;  %v2419_v60 = vld [vmem:[#allocation4 + $0x1e0] sm:$0xff]  ;;  %v1566_v26 = vmul.f32 %v11925_v20, %v11991_v37 }
 0x12c   : > { %16087 = vst [vmem:[#allocation61_spill] sm:$0xff] %v12306_v51  ;;  %16088 = vst [vmem:[#allocation62_spill] sm:$0xff] %v12308_v1  ;;  %v10240_v51 = vcombine.high %v2511_v53, %v2515_v12  ;;  %v2407_v12 = vld [vmem:[#allocation4 + $0x180] sm:$0xff] }
 0x12d   : > { %2248 = vperm.xlu0 %11529, %v2238_v63   ;;  %2243 = vperm.xlu1 %11528, %v2237_v46   ;;  %v2503_v63 = vld [vmem:[#allocation4 + $0x480] sm:$0xff] }
 0x12e   : > { %4972 = vmatprep.subr.bf16.mxu1 %v10240_v51  ;;  %v10143_v51 = vcombine.low %v2415_v25, %v2419_v60  ;;  %v2499_v1 = vld [vmem:[#allocation4 + $0x460] sm:$0xff] }
 0x12f   : > { %v12310_v13 = vpop.permute.xlu0 %535  ;;  %v12312_v32 = vpop.permute.xlu1 %549  ;;  %4973 = vmatpush1.bf16.msra.mxu1 %v10239_v31  ;;  %v1797_v31 = vmul.f32 %v12090_v6, %v11917_v18 }
 0x130   : > { %16089 = vst [vmem:[#allocation63_spill] sm:$0xff] %v12310_v13  ;;  %16090 = vst [vmem:[#allocation64_spill] sm:$0xff] %v12312_v32  ;;  %v1574_v32 = vmul.f32 %v11925_v20, %v12068_v62  ;;  %v10144_v13 = vcombine.high %v2415_v25, %v2419_v60  ;;  %v2399_v60 = vld [vmem:[#allocation4 + $0x140] sm:$0xff] }
 0x131   : > { %581 = vrot.lane.b32.xlu0 %v502_v33, %s11780_s12  ;;  %567 = vrot.lane.b32.xlu1 %v495_v34, %s11780_s12  ;;  %v2507_v33 = vld [vmem:[#allocation4 + $0x4a0] sm:$0xff] }
 0x132   : > { %v10232_v3 = vcombine.high %v2503_v63, %v2507_v33  ;;  %4911 = vmatprep.subr.bf16.mxu0 %v10144_v13  ;;  %v10231_v53 = vcombine.low %v2503_v63, %v2507_v33  ;;  %v2411_v34 = vld [vmem:[#allocation4 + $0x1a0] sm:$0xff]  ;;  %v706_v33 = vmul.f32 %v12126_v30, %v12003_v40 }
 0x133   : > { %v12320_v46 = vpop.permute.xlu0 %748  ;;  %v12322_v47 = vpop.permute.xlu1 %762  ;;  %4912 = vmatpush1.bf16.msra.mxu0 %v10143_v51  ;;  %v10136_v62 = vcombine.high %v2407_v12, %v2411_v34  ;;  %v2403_v63 = vld [vmem:[#allocation4 + $0x160] sm:$0xff]  ;;  %v705_v51 = vmul.f32 %v12126_v30, %v11998_v39 }
 0x134   : > { %16091 = vst [vmem:[#allocation65_spill] sm:$0xff] %v12320_v46  ;;  %16092 = vst [vmem:[#allocation66_spill] sm:$0xff] %v12322_v47  ;;  %4974 = vmatprep.subr.bf16.mxu1 %v10232_v3  ;;  %v2495_v47 = vld [vmem:[#allocation4 + $0x440] sm:$0xff]  ;;  %v1805_v46 = vmul.f32 %v12102_v11, %v11917_v18  ;;  %v10135_v3 = vcombine.low %v2407_v12, %v2411_v34 }
 0x135   : > { %1646 = vrot.lane.b32.xlu0 %v1574_v32, %s11785_s17  ;;  %1630 = vrot.lane.b32.xlu1 %v1566_v26, %s11785_s17  ;;  %v10224_v13 = vcombine.high %v2495_v47, %v2499_v1  ;;  %v10223_v25 = vcombine.low %v2495_v47, %v2499_v1  ;;  %v2487_v26 = vld [vmem:[#allocation4 + $0x400] sm:$0xff] }
 0x136   : > { %4975 = vmatpush1.bf16.msra.mxu1 %v10231_v53  ;;  %4913 = vmatprep.subr.bf16.mxu0 %v10136_v62  ;;  %v10128_v53 = vcombine.high %v2399_v60, %v2403_v63  ;;  %v10127_v62 = vcombine.low %v2399_v60, %v2403_v63  ;;  %v2391_v34 = vld [vmem:[#allocation4 + $0x100] sm:$0xff] }
 0x137   : > { %v12334_v61 = vpop.permute.xlu0 %746  ;;  %v12336_v32 = vpop.permute.xlu1 %760  ;;  %4976 = vmatprep.subr.bf16.mxu1 %v10224_v13  ;;  %4914 = vmatpush1.bf16.msra.mxu0 %v10135_v3  ;;  %v2607_v13 = vld [vmem:[#allocation4 + $0x7c0] sm:$0xff]  ;;  %v713_v3 = vmul.f32 %v12110_v14, %v12003_v40 }
 0x138   : > { %16093 = vst [vmem:[#allocation67_spill] sm:$0xff] %v12334_v61  ;;  %16094 = vst [vmem:[#allocation68_spill] sm:$0xff] %v12336_v32  ;;  %v2491_v32 = vld [vmem:[#allocation4 + $0x420] sm:$0xff]  ;;  %4915 = vmatprep.subr.bf16.mxu0 %v10128_v53  ;;  %v1804_v61 = vmul.f32 %v12102_v11, %v11921_v19 }
 0x139   : > { %1879 = vrot.lane.b32.xlu0 %v1805_v46, %s11786_s18  ;;  %1863 = vrot.lane.b32.xlu1 %v1797_v31, %s11786_s18  ;;  %v10216_v46 = vcombine.high %v2487_v26, %v2491_v32  ;;  %v10215_v1 = vcombine.low %v2487_v26, %v2491_v32  ;;  %v2395_v31 = vld [vmem:[#allocation4 + $0x120] sm:$0xff] }
 0x13a   : > { %4977 = vmatpush1.bf16.msra.mxu1 %v10223_v25  ;;  %v712_v25 = vmul.f32 %v12110_v14, %v11998_v39  ;;  %v10119_v60 = vcombine.low %v2391_v34, %v2395_v31  ;;  %v2383_v26 = vld [vmem:[#allocation4 + $0xc0] sm:$0xff] }
 0x13b   : > { %v12346_v47 = vpop.permute.xlu0 %959  ;;  %v12348_v12 = vpop.permute.xlu1 %961  ;;  %4978 = vmatprep.subr.bf16.mxu1 %v10216_v46  ;;  %4916 = vmatpush1.bf16.msra.mxu0 %v10127_v62  ;;  %v2387_v53 = vld [vmem:[#allocation4 + $0xe0] sm:$0xff]  ;;  %v1796_v62 = vmul.f32 %v12090_v6, %v11921_v19 }
 0x13c   : > { %16095 = vst [vmem:[#allocation69_spill] sm:$0xff] %v12346_v47  ;;  %16096 = vst [vmem:[#allocation70_spill] sm:$0xff] %v12348_v12  ;;  %v2599_v46 = vld [vmem:[#allocation4 + $0x780] sm:$0xff] }
 0x13d   : > { %780 = vrot.lane.b32.xlu0 %v706_v33, %s11781_s13  ;;  %778 = vrot.lane.b32.xlu1 %v705_v51, %s11781_s13  ;;  %v10120_v33 = vcombine.high %v2391_v34, %v2395_v31  ;;  %v2611_v51 = vld [vmem:[#allocation4 + $0x7e0] sm:$0xff]  ;;  %v10111_v31 = vcombine.low %v2383_v26, %v2387_v53 }
 0x13e   : > { %4979 = vmatpush1.bf16.msra.mxu1 %v10215_v1  ;;  %v10336_v32 = vcombine.high %v2607_v13, %v2611_v51  ;;  %v10335_v63 = vcombine.low %v2607_v13, %v2611_v51  ;;  %v10112_v1 = vcombine.high %v2383_v26, %v2387_v53  ;;  %v2603_v47 = vld [vmem:[#allocation4 + $0x7a0] sm:$0xff] }
 0x13f   : > { %4917 = vmatprep.subr.bf16.mxu0 %v10120_v33  ;;  %v12360_v12 = vpop.permute.xlu0 %973  ;;  %v10328_v34 = vcombine.high %v2599_v46, %v2603_v47  ;;  %v10327_v13 = vcombine.low %v2599_v46, %v2603_v47  ;;  %v2027_v33 = vmul.f32 %v12120_v27, %v11909_v16  ;;  %v2375_v51 = vld [vmem:[#allocation4 + $0x80] sm:$0xff] }
 0x140   : > { %4980 = vmatprep.subr.bf16.mxu1 %v10336_v32  ;;  %4918 = vmatpush1.bf16.msra.mxu0 %v10119_v60  ;;  %16097 = vst [vmem:[#allocation71_spill] sm:$0xff] %v12360_v12  ;;  %v2379_v32 = vld [vmem:[#allocation4 + $0xa0] sm:$0xff] }
 0x141   : > { %794 = vrot.lane.b32.xlu0 %v713_v3, %s11781_s13  ;;  %792 = vrot.lane.b32.xlu1 %v712_v25, %s11781_s13  ;;  %v12362_v3 = vpop.permute.xlu1 %975  ;;  %v2028_v25 = vmul.f32 %v12120_v27, %v11913_v17  ;;  %v2591_v60 = vld [vmem:[#allocation4 + $0x740] sm:$0xff]  ;;  %v10103_v53 = vcombine.low %v2375_v51, %v2379_v32 }
 0x142   : > { %16098 = vst [vmem:[#allocation72_spill] sm:$0xff] %v12362_v3  ;;  %4981 = vmatpush2.bf16.msra.mxu1 %v10335_v63  ;;  %4919 = vmatprep.subr.bf16.mxu0 %v10112_v1  ;;  %v10104_v63 = vcombine.high %v2375_v51, %v2379_v32  ;;  %v2595_v12 = vld [vmem:[#allocation4 + $0x760] sm:$0xff]  ;;  %v2035_v1 = vmul.f32 %v12228_v56, %v11909_v16 }
 0x143   : > { %4982 = vmatprep.subr.bf16.mxu1 %v10328_v34  ;;  %v12372_v47 = vpop.permute.xlu0 %744  ;;  %v10319_v46 = vcombine.low %v2591_v60, %v2595_v12  ;;  %v2367_v34 = vld [vmem:[#allocation4 + $0x40] sm:$0xff] }
 0x144   : > { %4920 = vmatpush1.bf16.msra.mxu0 %v10111_v31  ;;  %16099 = vst [vmem:[#allocation73_spill] sm:$0xff] %v12372_v47  ;;  %v2371_v31 = vld [vmem:[#allocation4 + $0x60] sm:$0xff] }
 0x145   : > { %1877 = vrot.lane.b32.xlu0 %v1804_v61, %s11786_s18  ;;  %1861 = vrot.lane.b32.xlu1 %v1796_v62, %s11786_s18  ;;  %v10320_v61 = vcombine.high %v2591_v60, %v2595_v12  ;;  %v12374_v26 = vpop.permute.xlu1 %758  ;;  %v2036_v62 = vmul.f32 %v12228_v56, %v11913_v17  ;;  %v10095_v12 = vcombine.low %v2367_v34, %v2371_v31 }
 0x146   : > { %4983 = vmatpush2.bf16.msra.mxu1 %v10327_v13  ;;  %16100 = vst [vmem:[#allocation74_spill] sm:$0xff] %v12374_v26  ;;  %4921 = vmatprep.subr.bf16.mxu0 %v10104_v63  ;;  %v2583_v13 = vld [vmem:[#allocation4 + $0x700] sm:$0xff]  ;;  %v711_v60 = vmul.f32 %v12110_v14, %v12026_v48  ;;  %v704_v63 = vmul.f32 %v12126_v30, %v12026_v48 }
 0x147   : > { %4984 = vmatprep.subr.bf16.mxu1 %v10320_v61  ;;  %v2359_v61 = vld [vmem:[#allocation4] sm:$0xff]  ;;  %v12386_v26 = vpop.permute.xlu0 %957  ;;  %v1803_v14 = vmul.f32 %v12102_v11, %v11925_v20 }
 0x148   : > { %4922 = vmatpush1.bf16.msra.mxu0 %v10103_v53  ;;  %v2363_v53 = vld [vmem:[#allocation4 + $0x20] sm:$0xff]  ;;  %16101 = vst [vmem:[#allocation75_spill] sm:$0xff] %v12386_v26 }
 0x149   : > { %2096 = vrot.lane.b32.xlu0 %v2028_v25, %s11787_s23  ;;  %2094 = vrot.lane.b32.xlu1 %v2027_v33, %s11787_s23  ;;  %v10096_v25 = vcombine.high %v2367_v34, %v2371_v31  ;;  %v2587_v33 = vld [vmem:[#allocation4 + $0x720] sm:$0xff]  ;;  %v12388_v47 = vpop.permute.xlu1 %971  ;;  %v10087_v31 = vcombine.low %v2359_v61, %v2363_v53 }
 0x14a   : > { %4985 = vmatpush2.bf16.msra.mxu1 %v10319_v46  ;;  %v10312_v51 = vcombine.high %v2583_v13, %v2587_v33  ;;  %v10311_v32 = vcombine.low %v2583_v13, %v2587_v33  ;;  %v2575_v46 = vld [vmem:[#allocation4 + $0x6c0] sm:$0xff]  ;;  %16102 = vst [vmem:[#allocation76_spill] sm:$0xff] %v12388_v47 }
 0x14b   : > { %4923 = vmatprep.subr.bf16.mxu0 %v10096_v25  ;;  %v2479_v25 = vld [vmem:[#allocation4 + $0x3c0] sm:$0xff] }
 0x14c   : > { %4986 = vmatprep.subr.bf16.mxu1 %v10312_v51  ;;  %4924 = vmatpush1.bf16.msra.mxu0 %v10095_v12  ;;  %v2483_v33 = vld [vmem:[#allocation4 + $0x3e0] sm:$0xff]  ;;  %v1795_v12 = vmul.f32 %v12090_v6, %v11925_v20 }
 0x14d   : > { %2112 = vrot.lane.b32.xlu0 %v2036_v62, %s11787_s23  ;;  %2110 = vrot.lane.b32.xlu1 %v2035_v1, %s11787_s23  ;;  %v10088_v62 = vcombine.high %v2359_v61, %v2363_v53  ;;  %v2579_v1 = vld [vmem:[#allocation4 + $0x6e0] sm:$0xff]  ;;  %v10207_v61 = vcombine.low %v2479_v25, %v2483_v33 }
 0x14e   : > { %4987 = vmatpush2.bf16.msra.mxu1 %v10311_v32  ;;  %v10304_v34 = vcombine.high %v2575_v46, %v2579_v1  ;;  %v10303_v13 = vcombine.low %v2575_v46, %v2579_v1  ;;  %v2567_v51 = vld [vmem:[#allocation4 + $0x680] sm:$0xff]  ;;  %v10208_v32 = vcombine.high %v2479_v25, %v2483_v33  ;;  %v2034_v46 = vmul.f32 %v12228_v56, %v11917_v18 }
 0x14f   : > { %4925 = vmatprep.subr.bf16.mxu0 %v10088_v62  ;;  %v2571_v47 = vld [vmem:[#allocation4 + $0x6a0] sm:$0xff]  ;;  %v2026_v62 = vmul.f32 %v12120_v27, %v11917_v18 }
 0x150   : > { %4988 = vmatprep.subr.bf16.mxu1 %v10304_v34  ;;  %4926 = vmatpush1.bf16.msra.mxu0 %v10087_v31  ;;  %v10295_v53 = vcombine.low %v2567_v51, %v2571_v47  ;;  %v2471_v1 = vld [vmem:[#allocation4 + $0x380] sm:$0xff] }
 0x151   : > { %790 = vrot.lane.b32.xlu0 %v711_v60, %s11781_s13  ;;  %776 = vrot.lane.b32.xlu1 %v704_v63, %s11781_s13  ;;  %v10296_v63 = vcombine.high %v2567_v51, %v2571_v47  ;;  %v2475_v34 = vld [vmem:[#allocation4 + $0x3a0] sm:$0xff]  ;;  %v915_v51 = vmul.f32 %v12132_v42, %v12003_v40 }
 0x152   : > { %4989 = vmatpush2.bf16.msra.mxu1 %v10303_v13  ;;  %4927 = vmatprep.subr.bf16.mxu0 %v10208_v32  ;;  %v10199_v25 = vcombine.low %v2471_v1, %v2475_v34  ;;  %v914_v32 = vmul.f32 %v12132_v42, %v11998_v39 }
 0x153   : > { %4990 = vmatprep.subr.bf16.mxu1 %v10296_v63  ;;  %v2463_v63 = vld [vmem:[#allocation4 + $0x340] sm:$0xff] }
 0x154   : > { %v12396_v26 = vpop.permute.xlu0 %363  ;;  %v12398_v60 = vpop.permute.xlu1 %368  ;;  %4928 = vmatpush2.bf16.msra.mxu0 %v10207_v61  ;;  %v2467_v61 = vld [vmem:[#allocation4 + $0x360] sm:$0xff] }
 0x155   : > { %16103 = vst [vmem:[#allocation77_spill] sm:$0xff] %v12396_v26  ;;  %16104 = vst [vmem:[#allocation78_spill] sm:$0xff] %v12398_v60  ;;  %1875 = vrot.lane.b32.xlu0 %v1803_v14, %s11786_s18  ;;  %1859 = vrot.lane.b32.xlu1 %v1795_v12, %s11786_s18  ;;  %v2559_v60 = vld [vmem:[#allocation4 + $0x640] sm:$0xff]  ;;  %v10200_v14 = vcombine.high %v2471_v1, %v2475_v34  ;;  %v10191_v1 = vcombine.low %v2463_v63, %v2467_v61 }
 0x156   : > { %4991 = vmatpush2.bf16.msra.mxu1 %v10295_v53  ;;  %v2563_v12 = vld [vmem:[#allocation4 + $0x660] sm:$0xff] }
 0x157   : > { %v10288_v47 = vcombine.high %v2559_v60, %v2563_v12  ;;  %4929 = vmatprep.subr.bf16.mxu0 %v10200_v14  ;;  %v10287_v33 = vcombine.low %v2559_v60, %v2563_v12  ;;  %v2551_v53 = vld [vmem:[#allocation4 + $0x600] sm:$0xff] }
 0x158   : > { %v12406_v31 = vpop.permute.xlu0 %969  ;;  %v12408_v13 = vpop.permute.xlu1 %955  ;;  %4930 = vmatpush2.bf16.msra.mxu0 %v10199_v25  ;;  %v2455_v14 = vld [vmem:[#allocation4 + $0x300] sm:$0xff] }
 0x159   : > { %16105 = vst [vmem:[#allocation79_spill] sm:$0xff] %v12406_v31  ;;  %16106 = vst [vmem:[#allocation80_spill] sm:$0xff] %v12408_v13  ;;  %2108 = vrot.lane.b32.xlu0 %v2034_v46, %s11787_s23  ;;  %2092 = vrot.lane.b32.xlu1 %v2026_v62, %s11787_s23  ;;  %v10192_v46 = vcombine.high %v2463_v63, %v2467_v61  ;;  %v2555_v62 = vld [vmem:[#allocation4 + $0x620] sm:$0xff]  ;;  %v921_v31 = vmul.f32 %v12148_v50, %v11998_v39 }
 0x15a   : > { %4992 = vmatprep.subr.bf16.mxu1 %v10288_v47  ;;  %v10280_v60 = vcombine.high %v2551_v53, %v2555_v62  ;;  %v10279_v34 = vcombine.low %v2551_v53, %v2555_v62  ;;  %v2459_v12 = vld [vmem:[#allocation4 + $0x320] sm:$0xff]  ;;  %v922_v47 = vmul.f32 %v12148_v50, %v12003_v40  ;;  %v2025_v63 = vmul.f32 %v12120_v27, %v11921_v19 }
 0x15b   : > { %4993 = vmatpush2.bf16.msra.mxu1 %v10287_v33  ;;  %4931 = vmatprep.subr.bf16.mxu0 %v10192_v46  ;;  %v10184_v25 = vcombine.high %v2455_v14, %v2459_v12  ;;  %v2447_v61 = vld [vmem:[#allocation4 + $0x2c0] sm:$0xff] }
 0x15c   : > { %v12416_v26 = vpop.permute.xlu0 %1170  ;;  %v12418_v13 = vpop.permute.xlu1 %1168  ;;  %4994 = vmatprep.subr.bf16.mxu1 %v10280_v60  ;;  %4932 = vmatpush2.bf16.msra.mxu0 %v10191_v1  ;;  %v2451_v53 = vld [vmem:[#allocation4 + $0x2e0] sm:$0xff]  ;;  %v920_v1 = vmul.f32 %v12148_v50, %v12026_v48 }
 0x15d   : > { %16107 = vst [vmem:[#allocation81_spill] sm:$0xff] %v12416_v26  ;;  %989 = vrot.lane.b32.xlu0 %v915_v51, %s11782_s14  ;;  %987 = vrot.lane.b32.xlu1 %v914_v32, %s11782_s14  ;;  %v10183_v51 = vcombine.low %v2455_v14, %v2459_v12  ;;  %v2033_v32 = vmul.f32 %v12228_v56, %v11921_v19  ;;  %v2439_v14 = vld [vmem:[#allocation4 + $0x280] sm:$0xff] }
 0x15e   : > { %4933 = vmatprep.subr.bf16.mxu0 %v10184_v25  ;;  %v10176_v60 = vcombine.high %v2447_v61, %v2451_v53  ;;  %v2443_v12 = vld [vmem:[#allocation4 + $0x2a0] sm:$0xff] }
 0x15f   : > { %4995 = vmatpush2.bf16.msra.mxu1 %v10279_v34  ;;  %v913_v34 = vmul.f32 %v12132_v42, %v12026_v48 }
 0x160   : > { %v12426_v33 = vpop.permute.xlu0 %1184  ;;  %v12428_v11 = vpop.permute.xlu1 %1182  ;;  %4934 = vmatpush2.bf16.msra.mxu0 %v10183_v51  ;;  %v10168_v51 = vcombine.high %v2439_v14, %v2443_v12 }
 0x161   : > { %16108 = vst [vmem:[#allocation82_spill] sm:$0xff] %v12426_v33  ;;  %1003 = vrot.lane.b32.xlu0 %v922_v47, %s11782_s14  ;;  %1001 = vrot.lane.b32.xlu1 %v921_v31, %s11782_s14  ;;  %v10175_v31 = vcombine.low %v2447_v61, %v2451_v53  ;;  %v2024_v61 = vmul.f32 %v12120_v27, %v11925_v20  ;;  %v2431_v53 = vld [vmem:[#allocation4 + $0x240] sm:$0xff] }
 0x162   : > { %4935 = vmatprep.subr.bf16.mxu0 %v10176_v60  ;;  %v2435_v60 = vld [vmem:[#allocation4 + $0x260] sm:$0xff] }
 0x164   : > { %v12436_v46 = vpop.permute.xlu0 %967  ;;  %v12438_v62 = vpop.permute.xlu1 %953  ;;  %4936 = vmatpush2.bf16.msra.mxu0 %v10175_v31  ;;  %v10160_v31 = vcombine.high %v2431_v53, %v2435_v60 }
 0x165   : > { %16109 = vst [vmem:[#allocation83_spill] sm:$0xff] %v12436_v46  ;;  %16110 = vst [vmem:[#allocation84_spill] sm:$0xff] %v12438_v62  ;;  %2106 = vrot.lane.b32.xlu0 %v2033_v32, %s11787_s23  ;;  %2090 = vrot.lane.b32.xlu1 %v2025_v63, %s11787_s23  ;;  %v10167_v32 = vcombine.low %v2439_v14, %v2443_v12  ;;  %v2032_v63 = vmul.f32 %v12228_v56, %v11925_v20  ;;  %v2423_v12 = vld [vmem:[#allocation4 + $0x200] sm:$0xff]  ;;  %v16140_v62 = vld [vmem:[#allocation28_spill] sm:$0xff] }
 0x166   : > { %4937 = vmatprep.subr.bf16.mxu0 %v10168_v51  ;;  %v1123_v14 = vmul.f32 %v12190_v8, %v11998_v39  ;;  %v2427_v51 = vld [vmem:[#allocation4 + $0x220] sm:$0xff] }
 0x168   : > { %v12446_v47 = vpop.permute.xlu0 %1180  ;;  %v12448_v25 = vpop.permute.xlu1 %1166  ;;  %4938 = vmatpush2.bf16.msra.mxu0 %v10167_v32  ;;  %v10152_v32 = vcombine.high %v2423_v12, %v2427_v51 }
 0x169   : > { %999 = vrot.lane.b32.xlu0 %v920_v1, %s11782_s14  ;;  %985 = vrot.lane.b32.xlu1 %v913_v34, %s11782_s14  ;;  %v10159_v1 = vcombine.low %v2431_v53, %v2435_v60  ;;  %v1124_v34 = vmul.f32 %v12190_v8, %v12003_v40  ;;  %v1130_v53 = vmul.f32 %v12156_v54, %v11998_v39 }
 0x16a   : > { %4939 = vmatprep.subr.bf16.mxu0 %v10160_v31 }
 0x16c   : > { %v12456_v19 = vpop.permute.xlu0 %1178  ;;  %v12458_v42 = vpop.permute.xlu1 %1164  ;;  %4940 = vmatpush2.bf16.msra.mxu0 %v10159_v1  ;;  %v1129_v1 = vmul.f32 %v12156_v54, %v12026_v48 }
 0x16d   : > { %16111 = vst [vmem:[#allocation85_spill] sm:$0xff] %v12456_v19  ;;  %16112 = vst [vmem:[#allocation86_spill] sm:$0xff] %v12458_v42  ;;  %2104 = vrot.lane.b32.xlu0 %v2032_v63, %s11787_s23  ;;  %2088 = vrot.lane.b32.xlu1 %v2024_v61, %s11787_s23  ;;  %v10151_v63 = vcombine.low %v2423_v12, %v2427_v51  ;;  %v1131_v61 = vmul.f32 %v12156_v54, %v12003_v40  ;;  %v16143_v42 = vld [vmem:[#allocation54_spill] sm:$0xff]  ;;  %v16145_v19 = vld [vmem:[#allocation69_spill] sm:$0xff] }
 0x16e   : > { %4941 = vmatprep.subr.bf16.mxu0 %v10152_v32  ;;  %v1333_v51 = vmul.f32 %v12166_v59, %v12003_v40  ;;  %v1332_v32 = vmul.f32 %v12166_v59, %v11998_v39  ;;  %v1338_v54 = vmul.f32 %v12202_v15, %v12026_v48 }
 0x170   : > { %v12466_v20 = vpop.permute.xlu0 %1379  ;;  %v12468_v50 = vpop.permute.xlu1 %1377  ;;  %4942 = vmatpush2.bf16.msra.mxu0 %v10151_v63 }
 0x171   : > { %16113 = vst [vmem:[#allocation87_spill] sm:$0xff] %v12466_v20  ;;  %1198 = vrot.lane.b32.xlu0 %v1124_v34, %s11783_s15  ;;  %1196 = vrot.lane.b32.xlu1 %v1123_v14, %s11783_s15  ;;  %v1122_v34 = vmul.f32 %v12190_v8, %v12026_v48 }
 0x174   : > { %v12476_v60 = vpop.permute.xlu0 %1393  ;;  %v12478_v31 = vpop.permute.xlu1 %1391 }
 0x175   : > { %16114 = vst [vmem:[#allocation88_spill] sm:$0xff] %v12476_v60  ;;  %1212 = vrot.lane.b32.xlu0 %v1131_v61, %s11783_s15  ;;  %1210 = vrot.lane.b32.xlu1 %v1130_v53, %s11783_s15  ;;  %v1340_v53 = vmul.f32 %v12202_v15, %v12003_v40 }
 0x178   : > { %v12486_v14 = vpop.permute.xlu0 %1176  ;;  %v12488_v12 = vpop.permute.xlu1 %1162 }
 0x179   : > { %16115 = vst [vmem:[#allocation89_spill] sm:$0xff] %v12486_v14  ;;  %16116 = vst [vmem:[#allocation90_spill] sm:$0xff] %v12488_v12  ;;  %1208 = vrot.lane.b32.xlu0 %v1129_v1, %s11783_s15  ;;  %1194 = vrot.lane.b32.xlu1 %v1122_v34, %s11783_s15  ;;  %v1339_v1 = vmul.f32 %v12202_v15, %v11998_v39  ;;  %v492_v12 = vmul.f32 %v12015_v45, %v11928_v21 }
 0x17c   : > { %v12496_v63 = vpop.permute.xlu0 %1389  ;;  %v12498_v61 = vpop.permute.xlu1 %1375 }
 0x17d   : > { %1407 = vrot.lane.b32.xlu0 %v1333_v51, %s11784_s16  ;;  %1405 = vrot.lane.b32.xlu1 %v1332_v32, %s11784_s16  ;;  %v1331_v51 = vmul.f32 %v12166_v59, %v12026_v48  ;;  %v1586_v59 = vmul.f32 %v11913_v17, %v12178_v2 }
 0x180   : > { %v12506_v34 = vpop.permute.xlu0 %1387  ;;  %v12508_v8 = vpop.permute.xlu1 %1373 }
 0x181   : > { %16117 = vst [vmem:[#allocation91_spill] sm:$0xff] %v12506_v34  ;;  %16118 = vst [vmem:[#allocation92_spill] sm:$0xff] %v12508_v8  ;;  %1421 = vrot.lane.b32.xlu0 %v1340_v53, %s11784_s16  ;;  %1419 = vrot.lane.b32.xlu1 %v1339_v1, %s11784_s16  ;;  %v485_v53 = vmul.f32 %v12005_v41, %v11928_v21  ;;  %v1594_v41 = vmul.f32 %v11913_v17, %v12188_v7 }
 0x182   : > { %v701_v8 = vmul.f32 %v11993_v38, %v11928_v21  ;;  %v1821_v38 = vmul.f32 %v12204_v23, %v11917_v18 }
 0x184   : > { %v12516_v32 = vpop.permute.xlu0 %1638  ;;  %v12518_v40 = vpop.permute.xlu1 %1636 }
 0x185   : > { %16119 = vst [vmem:[#allocation93_spill] sm:$0xff] %v12516_v32  ;;  %1417 = vrot.lane.b32.xlu0 %v1338_v54, %s11784_s16  ;;  %1403 = vrot.lane.b32.xlu1 %v1331_v51, %s11784_s16  ;;  %v1585_v54 = vmul.f32 %v11909_v16, %v12178_v2 }
 0x188   : > { %v12526_v1 = vpop.permute.xlu0 %1654  ;;  %v12528_v15 = vpop.permute.xlu1 %1652 }
 0x189   : > { %16120 = vst [vmem:[#allocation94_spill] sm:$0xff] %v12526_v1  ;;  %561 = vrot.lane.b32.xlu0 %v492_v12, %s11780_s12  ;;  %547 = vrot.lane.b32.xlu1 %v485_v53, %s11780_s12  ;;  %v1593_v12 = vmul.f32 %v11909_v16, %v12188_v7 }
 0x18c   : > { %v12536_v51 = vpop.permute.xlu0 %1385  ;;  %v12538_v45 = vpop.permute.xlu1 %1371 }
 0x18d   : > { %16121 = vst [vmem:[#allocation95_spill] sm:$0xff] %v12536_v51  ;;  %16122 = vst [vmem:[#allocation96_spill] sm:$0xff] %v12538_v45  ;;  %1670 = vrot.lane.b32.xlu0 %v1586_v59, %s11785_s17  ;;  %1668 = vrot.lane.b32.xlu1 %v1585_v54, %s11785_s17  ;;  %v1592_v45 = vmul.f32 %v11917_v18, %v12188_v7  ;;  %v1584_v59 = vmul.f32 %v11917_v18, %v12178_v2 }
 0x190   : > { %v12546_v53 = vpop.permute.xlu0 %1650  ;;  %v12548_v14 = vpop.permute.xlu1 %1634 }
 0x191   : > { %1686 = vrot.lane.b32.xlu0 %v1594_v41, %s11785_s17  ;;  %1684 = vrot.lane.b32.xlu1 %v1593_v12, %s11785_s17  ;;  %v694_v41 = vmul.f32 %v11989_v36, %v11928_v21 }
 0x194   : > { %v12556_v54 = vpop.permute.xlu0 %571  ;;  %v12558_v51 = vpop.permute.xlu1 %569 }
 0x195   : > { %16123 = vst [vmem:[#allocation97_spill] sm:$0xff] %v12556_v54  ;;  %16124 = vst [vmem:[#allocation98_spill] sm:$0xff] %v12558_v51  ;;  %1682 = vrot.lane.b32.xlu0 %v1592_v45, %s11785_s17  ;;  %1666 = vrot.lane.b32.xlu1 %v1584_v59, %s11785_s17  ;;  %v1815_v51 = vmul.f32 %v12214_v43, %v11913_v17  ;;  %v1814_v45 = vmul.f32 %v12214_v43, %v11909_v16 }
 0x198   : > { %v12566_v12 = vpop.permute.xlu0 %585  ;;  %v12568_v7 = vpop.permute.xlu1 %583 }
 0x199   : > { %16125 = vst [vmem:[#allocation99_spill] sm:$0xff] %v12566_v12  ;;  %16126 = vst [vmem:[#allocation100_spill] sm:$0xff] %v12568_v7  ;;  %770 = vrot.lane.b32.xlu0 %v701_v8, %s11781_s13  ;;  %756 = vrot.lane.b32.xlu1 %v694_v41, %s11781_s13  ;;  %v1823_v7 = vmul.f32 %v12204_v23, %v11913_v17  ;;  %v1822_v8 = vmul.f32 %v12204_v23, %v11909_v16 }
 0x19c   : > { %v12576_v59 = vpop.permute.xlu0 %1648  ;;  %v12578_v54 = vpop.permute.xlu1 %1632 }
 0x19d   : > { %16127 = vst [vmem:[#allocation101_spill] sm:$0xff] %v12576_v59  ;;  %16128 = vst [vmem:[#allocation102_spill] sm:$0xff] %v12578_v54  ;;  %1899 = vrot.lane.b32.xlu0 %v1815_v51, %s11786_s18  ;;  %1897 = vrot.lane.b32.xlu1 %v1814_v45, %s11786_s18  ;;  %v2240_v51 = vld [vmem:[%s15816_s2 + $0x18] sm:$0xff]  ;;  %v2239_v45 = vld [vmem:[%s15816_s2 + $0x10] sm:$0xff]  ;;  %v910_v59 = vmul.f32 %v12011_v44, %v11928_v21 }
 0x1a0   : > { %v12586_v41 = vpop.permute.xlu0 %1867  ;;  %v12588_v12 = vpop.permute.xlu1 %1865 }
 0x1a1   : > { %16129 = vst [vmem:[#allocation103_spill] sm:$0xff] %v12586_v41  ;;  %1915 = vrot.lane.b32.xlu0 %v1823_v7, %s11786_s18  ;;  %1913 = vrot.lane.b32.xlu1 %v1822_v8, %s11786_s18  ;;  %v1813_v7 = vmul.f32 %v12214_v43, %v11917_v18  ;;  %v2044_v43 = vmul.f32 %v12216_v28, %v11913_v17 }
 0x1a4   : > { %v12598_v2 = vpop.permute.xlu0 %1883  ;;  %v12600_v36 = vpop.permute.xlu1 %1881 }
 0x1a5   : > { %16130 = vst [vmem:[#allocation104_spill] sm:$0xff] %v12598_v2  ;;  %2258 = vperm.xlu0 %11529, %v2240_v51   ;;  %2253 = vperm.xlu1 %11528, %v2239_v45   ;;  %v903_v51 = vmul.f32 %v11987_v35, %v11928_v21 }
 0x1a8   : > { %v12606_v8 = vpop.permute.xlu0 %2248  ;;  %v12608_v54 = vpop.permute.xlu1 %2243 }
 0x1a9   : > { %16131 = vst [vmem:[#allocation105_spill] sm:$0xff] %v12606_v8  ;;  %16132 = vst [vmem:[#allocation106_spill] sm:$0xff] %v12608_v54  ;;  %1911 = vrot.lane.b32.xlu0 %v1821_v38, %s11786_s18  ;;  %1895 = vrot.lane.b32.xlu1 %v1813_v7, %s11786_s18  ;;  %v2043_v38 = vmul.f32 %v12216_v28, %v11909_v16 }
 0x1ac   : > { %v12616_v45 = vpop.permute.xlu0 %581  ;;  %v12618_v23 = vpop.permute.xlu1 %567 }
 0x1ad   : > { %16133 = vst [vmem:[#allocation107_spill] sm:$0xff] %v12616_v45  ;;  %16134 = vst [vmem:[#allocation108_spill] sm:$0xff] %v12618_v23  ;;  %979 = vrot.lane.b32.xlu0 %v910_v59, %s11782_s14  ;;  %965 = vrot.lane.b32.xlu1 %v903_v51, %s11782_s14  ;;  %v2052_v59 = vmul.f32 %v12240_v0, %v11913_v17  ;;  %v2051_v51 = vmul.f32 %v12240_v0, %v11909_v16 }
 0x1ae   : > { %v410_v23 = vmul.f32 %v11998_v39, %v12230_v57  ;;  %v12649_v17 = vmul.f32 %v11930_v22, %v11991_v37  ;;  %v1112_v16 = vmul.f32 %v12028_v49, %v11928_v21  ;;  %v1321_v49 = vmul.f32 %v12045_v55, %v11928_v21  ;;  %v16148_v55 = vld [vmem:[#allocation38_spill] sm:$0xff] }
 0x1b0   : > { %v12626_v7 = vpop.permute.xlu0 %1646  ;;  %v12628_v44 = vpop.permute.xlu1 %1630 }
 0x1b1   : > { %16135 = vst [vmem:[#allocation109_spill] sm:$0xff] %v12626_v7  ;;  %16136 = vst [vmem:[#allocation110_spill] sm:$0xff] %v12628_v44  ;;  %2128 = vrot.lane.b32.xlu0 %v2044_v43, %s11787_s23  ;;  %2126 = vrot.lane.b32.xlu1 %v2043_v38, %s11787_s23  ;;  %v595_v43 = vsel %vm591_vm0, %v12250_v9, %v12252_v10  ;;  %v12655_v38 = vmul.f32 %v11933_v24, %v11991_v37 }
 0x1b2   : > { %v12659_v44 = vmul.f32 %v12122_v29, %v12039_v52  ;;  %v2042_v10 = vmul.f32 %v12216_v28, %v11917_v18  ;;  %v647_v7 = vadd.f32 %v595_v43, %v410_v23  ;;  %v16144_v28 = vld [vmem:[#allocation70_spill] sm:$0xff]  ;;  %v12690_v43 = vmul.f32 %v12126_v30, %v12039_v52 }
 0x1b3   : > { %v1013_v23 = vsel %vm1009_vm2, %v16145_v19, %v16144_v28 }
 0x1b4   : > { %v12638_v45 = vpop.permute.xlu0 %1879  ;;  %v12640_v35 = vpop.permute.xlu1 %1863  ;;  %16137 = vst [vmem:[#allocation111_spill] sm:$0xff] %v12659_v44  ;;  %v1328_v44 = vmul.f32 %v12055_v58, %v11928_v21  ;;  %16146 = vst [vmem:[#allocation54_spill] sm:$0xff] %v12690_v43  ;;  %v16149_v58 = vld [vmem:[#allocation62_spill] sm:$0xff] }
 0x1b5   : > { %2144 = vrot.lane.b32.xlu0 %v2052_v59, %s11787_s23  ;;  %2142 = vrot.lane.b32.xlu1 %v2051_v51, %s11787_s23  ;;  %v804_v59 = vsel %vm800_vm1, %v12290_v4, %v12292_v5  ;;  %v2050_v51 = vmul.f32 %v12240_v0, %v11917_v18  ;;  %v12678_v5 = vmul.f32 %v12122_v29, %v16140_v62  ;;  %v16142_v0 = vld [vmem:[#allocation55_spill] sm:$0xff] }
 0x1b6   : > { %v601_v18 = vsel %vm591_vm0, %v16143_v42, %v16142_v0  ;;  %v1119_v0 = vmul.f32 %v16148_v55, %v11928_v21 }
 0x1b7   : > { %16141 = vst [vmem:[#allocation114_spill] sm:$0xff] %v12678_v5  ;;  %v16150_v5 = vld [vmem:[#allocation61_spill] sm:$0xff] }
 0x1b8   : > { %v12670_v37 = vpop.permute.xlu0 %780  ;;  %v12672_v34 = vpop.permute.xlu1 %778  ;;  %v810_v28 = vsel %vm800_vm1, %v16150_v5, %v16149_v58  ;;  %v16154_v58 = vld [vmem:[#allocation30_spill] sm:$0xff] }
 0x1b9   : > { %16138 = vst [vmem:[#allocation112_spill] sm:$0xff] %v12670_v37  ;;  %16139 = vst [vmem:[#allocation113_spill] sm:$0xff] %v12672_v34  ;;  %2140 = vrot.lane.b32.xlu0 %v2050_v51, %s11787_s23  ;;  %2124 = vrot.lane.b32.xlu1 %v2042_v10, %s11787_s23  ;;  %v16147_v34 = vld [vmem:[#allocation52_spill] sm:$0xff]  ;;  %v856_v37 = vadd.f32 %v804_v59, %v647_v7  ;;  %v1222_v10 = vsel %vm1218_vm3, %v12418_v13, %v12416_v26  ;;  %v16151_v51 = vld [vmem:[#allocation29_spill] sm:$0xff] }
 0x1ba   : > { %v417_v29 = vmul.f32 %v11998_v39, %v16147_v34  ;;  %v12704_v30 = vmul.f32 %v11930_v22, %v16151_v51  ;;  %v12708_v39 = vmul.f32 %v11933_v24, %v16151_v51  ;;  %v12716_v43 = vmul.f32 %v16154_v58, %v12039_v52  ;;  %v16155_v26 = vld [vmem:[#allocation71_spill] sm:$0xff] }
 0x1bb   : > { %v1065_v59 = vadd.f32 %v1013_v23, %v856_v37  ;;  %v1019_v46 = vsel %vm1009_vm2, %v16155_v26, %v12362_v3  ;;  %v1431_v51 = vsel %vm1427_vm4, %v12468_v50, %v12466_v20  ;;  %v12728_v37 = vmul.f32 %v12090_v6, %v11930_v22 }
 0x1bc   : > { %v654_v7 = vadd.f32 %v601_v18, %v417_v29  ;;  %v12710_v21 = vpop.permute.xlu0 %794  ;;  %v12712_v55 = vpop.permute.xlu1 %792  ;;  %v12732_v23 = vmul.f32 %v12090_v6, %v11933_v24  ;;  %v1228_v3 = vsel %vm1218_vm3, %v12428_v11, %v12426_v33  ;;  %v12754_v33 = vmul.f32 %v12228_v56, %v11930_v22 }
 0x1bd   : > { %16152 = vst [vmem:[#allocation69_spill] sm:$0xff] %v12710_v21  ;;  %16153 = vst [vmem:[#allocation61_spill] sm:$0xff] %v12712_v55  ;;  %1188 = vrot.lane.b32.xlu0 %v1119_v0, %s11783_s15  ;;  %1174 = vrot.lane.b32.xlu1 %v1112_v16, %s11783_s15  ;;  %v1274_v18 = vadd.f32 %v1222_v10, %v1065_v59  ;;  %v1698_v0 = vsel %vm1694_vm5, %v12518_v40, %v12516_v32  ;;  %v16156_v16 = vld [vmem:[#allocation32_spill] sm:$0xff] }
 0x1be   : > { %v863_v29 = vadd.f32 %v810_v28, %v654_v7  ;;  %v12742_v20 = vmul.f32 %v16156_v16, %v11930_v22  ;;  %v12746_v28 = vmul.f32 %v16156_v16, %v11933_v24  ;;  %v12758_v32 = vmul.f32 %v12228_v56, %v11933_v24 }
 0x1bf   : > { %v1483_v7 = vadd.f32 %v1431_v51, %v1274_v18  ;;  %v1437_v55 = vsel %vm1427_vm4, %v12478_v31, %v12476_v60  ;;  %v12770_v51 = vmul.f32 %v12120_v27, %v11930_v22  ;;  %v12774_v56 = vmul.f32 %v12120_v27, %v11933_v24 }
 0x1c0   : > { %v1072_v10 = vadd.f32 %v1019_v46, %v863_v29  ;;  %v12748_v59 = vpop.permute.xlu0 %1877  ;;  %v12750_v6 = vpop.permute.xlu1 %1861  ;;  %v1927_v46 = vsel %vm1923_vm6, %v12588_v12, %v12586_v41  ;;  %v409_v60 = vmul.f32 %v12026_v48, %v12230_v57  ;;  %v408_v41 = vmul.f32 %v12039_v52, %v12230_v57 }
 0x1c1   : > { %1397 = vrot.lane.b32.xlu0 %v1328_v44, %s11784_s16  ;;  %1383 = vrot.lane.b32.xlu1 %v1321_v49, %s11784_s16  ;;  %v1754_v18 = vadd.f32 %v1698_v0, %v1483_v7  ;;  %v12782_v44 = vmul.f32 %v16140_v62, %v12230_v57  ;;  %v1705_v49 = vsel %vm1694_vm5, %v12528_v15, %v12526_v1  ;;  %v16159_v57 = vld [vmem:[#allocation57_spill] sm:$0xff] }
 0x1c2   : > { %v1281_v29 = vadd.f32 %v1228_v3, %v1072_v10  ;;  %v16157_v3 = vld [vmem:[#allocation56_spill] sm:$0xff]  ;;  %v416_v10 = vmul.f32 %v12026_v48, %v16147_v34  ;;  %v600_v16 = vsel %vm591_vm0, %v16159_v57, %v16143_v42  ;;  %v1934_v1 = vsel %vm1923_vm6, %v12600_v36, %v12598_v2  ;;  %v16160_v2 = vld [vmem:[#allocation58_spill] sm:$0xff] }
 0x1c3   : > { %v594_v0 = vsel %vm591_vm0, %v16157_v3, %v12250_v9  ;;  %v1983_v24 = vadd.f32 %v1927_v46, %v1754_v18  ;;  %v414_v42 = vmul.f32 %v16140_v62, %v16147_v34  ;;  %v593_v21 = vsel %vm591_vm0, %v16160_v2, %v16157_v3  ;;  %v16162_v48 = vld [vmem:[#allocation66_spill] sm:$0xff]  ;;  %v16165_v3 = vld [vmem:[#allocation75_spill] sm:$0xff] }
 0x1c4   : > { %v1490_v7 = vadd.f32 %v1437_v55, %v1281_v29  ;;  %v12792_v22 = vpop.permute.xlu0 %2096  ;;  %v12794_v27 = vpop.permute.xlu1 %2094  ;;  %v415_v55 = vmul.f32 %v12039_v52, %v16147_v34  ;;  %v646_v18 = vadd.f32 %v594_v0, %v409_v60  ;;  %v653_v58 = vadd.f32 %v600_v16, %v416_v10  ;;  %v16163_v52 = vld [vmem:[#allocation59_spill] sm:$0xff] }
 0x1c5   : > { %16158 = vst [vmem:[#allocation71_spill] sm:$0xff] %v12792_v22  ;;  %v2156_v9 = vsel %vm2152_vm7, %v12794_v27, %v12792_v22  ;;  %1644 = vrot.lane.b32.xlu0 %v12649_v17, %s11785_s17  ;;  %1642 = vrot.lane.b32.xlu1 %v12655_v38, %s11785_s17  ;;  %v16161_v22 = vld [vmem:[#allocation65_spill] sm:$0xff]  ;;  %v809_v38 = vsel %vm800_vm1, %v16162_v48, %v16150_v5 }
 0x1c6   : > { %v1761_v46 = vadd.f32 %v1705_v49, %v1490_v7  ;;  %v2212_v29 = vadd.f32 %v2156_v9, %v1983_v24  ;;  %v803_v17 = vsel %vm800_vm1, %v16161_v22, %v12290_v4  ;;  %v599_v34 = vsel %vm591_vm0, %v16163_v52, %v16159_v57  ;;  %v16166_v7 = vld [vmem:[#allocation76_spill] sm:$0xff] }
 0x1c7   : > { %v1012_v4 = vsel %vm1009_vm2, %v16165_v3, %v16145_v19  ;;  %v1018_v5 = vsel %vm1009_vm2, %v16166_v7, %v16155_v26  ;;  %v645_v57 = vadd.f32 %v593_v21, %v408_v41  ;;  %v862_v10 = vadd.f32 %v809_v38, %v653_v58 }
 0x1c8   : > { %v1990_v49 = vadd.f32 %v1934_v1, %v1761_v46  ;;  %v2264_v24 = vadd.f32 %v12608_v54, %v2212_v29  ;;  %v12826_v60 = vpop.permute.xlu0 %2112  ;;  %v12828_v0 = vpop.permute.xlu1 %2110  ;;  %v855_v1 = vadd.f32 %v803_v17, %v646_v18  ;;  %v12843_v46 = vld [vmem:[#allocation4 + $0xd00] sm:$0xff]  ;;  %v1227_v19 = vsel %vm1218_vm3, %v12446_v47, %v12428_v11 }
 0x1c9   : > { %16164 = vst [vmem:[#allocation56_spill] sm:$0xff] %v12826_v60  ;;  %v2163_v16 = vsel %vm2152_vm7, %v12828_v0, %v12826_v60  ;;  %1660 = vrot.lane.b32.xlu0 %v12704_v30, %s11785_s17  ;;  %1658 = vrot.lane.b32.xlu1 %v12708_v39, %s11785_s17  ;;  %v1221_v26 = vsel %vm1218_vm3, %v12448_v25, %v12418_v13  ;;  %v16167_v17 = vld [vmem:[#allocation63_spill] sm:$0xff] }
 0x1ca   : > { %v2219_v9 = vadd.f32 %v2163_v16, %v1990_v49  ;;  %v10504_v30 = vcombine.high %v12843_v46, %v12843_v46  ;;  %v1064_v29 = vadd.f32 %v1012_v4, %v855_v1  ;;  %v1071_v39 = vadd.f32 %v1018_v5, %v862_v10  ;;  %v16168_v49 = vld [vmem:[#allocation64_spill] sm:$0xff] }
 0x1cb   : > { %v2292_v21 = vmul.f32 0.1, %v2264_v24  ;;  %v592_v11 = vsel %vm591_vm0, %v16167_v17, %v16160_v2  ;;  %v1436_v13 = vsel %vm1427_vm4, %v12496_v63, %v12478_v31  ;;  %v1430_v38 = vsel %vm1427_vm4, %v12498_v61, %v12468_v50  ;;  %v16169_v31 = vld [vmem:[#allocation67_spill] sm:$0xff]  ;;  %v16170_v50 = vld [vmem:[#allocation68_spill] sm:$0xff] }
 0x1cc   : > { %v2271_v58 = vadd.f32 %v12606_v8, %v2219_v9  ;;  %v12854_v41 = vpop.permute.xlu0 %790  ;;  %v12856_v18 = vpop.permute.xlu1 %776  ;;  %v598_v4 = vsel %vm591_vm0, %v16168_v49, %v16163_v52  ;;  %v1280_v5 = vadd.f32 %v1227_v19, %v1071_v39  ;;  %v1273_v2 = vadd.f32 %v1221_v26, %v1064_v29  ;;  %10511 = vmatprep.subr.msk.bf16.mxu1 %vm4886_vm8, %v10504_v30 }
 0x1cd   : > { %1873 = vrot.lane.b32.xlu0 %v12728_v37, %s11786_s18  ;;  %1871 = vrot.lane.b32.xlu1 %v12732_v23, %s11786_s18  ;;  %v802_v1 = vsel %vm800_vm1, %v16169_v31, %v16161_v22  ;;  %v808_v37 = vsel %vm800_vm1, %v16170_v50, %v16162_v48  ;;  %v1704_v23 = vsel %vm1694_vm5, %v12546_v53, %v12528_v15 }
 0x1ce   : > { %v2299_v16 = vmul.f32 0.1, %v2271_v58  ;;  %v1697_v52 = vsel %vm1694_vm5, %v12548_v14, %v12518_v40  ;;  %v1489_v10 = vadd.f32 %v1436_v13, %v1280_v5  ;;  %v1482_v9 = vadd.f32 %v1430_v38, %v1273_v2  ;;  %v16174_v13 = vld [vmem:[#allocation79_spill] sm:$0xff] }
 0x1cf   : > { %v2320_v19 = vmax.f32 %v2264_v24, %v2292_v21  ;;  %v652_v22 = vadd.f32 %v599_v34, %v415_v55  ;;  %v1933_v48 = vsel %vm1923_vm6, %v12638_v45, %v12600_v36  ;;  %v1926_v15 = vsel %vm1923_vm6, %v12640_v35, %v12588_v12  ;;  %v16172_v36 = vld [vmem:[#allocation73_spill] sm:$0xff]  ;;  %v16173_v12 = vld [vmem:[#allocation74_spill] sm:$0xff]  ;;  %v16176_v2 = vld [vmem:[#allocation83_spill] sm:$0xff] }
 0x1d0   : > { %v2327_v26 = vmax.f32 %v2271_v58, %v2299_v16  ;;  %v12887_v30 = vpop.permute.xlu0 %1875  ;;  %v12889_v29 = vpop.permute.xlu1 %1859  ;;  %v644_v40 = vadd.f32 %v592_v11, %v12782_v44  ;;  %v1760_v24 = vadd.f32 %v1704_v23, %v1489_v10  ;;  %v1753_v39 = vadd.f32 %v1697_v52, %v1482_v9 }
 0x1d1   : > { %1889 = vrot.lane.b32.xlu0 %v12742_v20, %s11786_s18  ;;  %1887 = vrot.lane.b32.xlu1 %v12746_v28, %s11786_s18  ;;  %v651_v34 = vadd.f32 %v598_v4, %v414_v42  ;;  %v854_v55 = vadd.f32 %v802_v1, %v645_v57  ;;  %v861_v58 = vadd.f32 %v808_v37, %v652_v22  ;;  %v16175_v57 = vld [vmem:[#allocation80_spill] sm:$0xff] }
 0x1d2   : > { %v12902_v21 = vpack.c.bf16 %v2327_v26, %v2320_v19  ;;  %v801_v17 = vsel %vm800_vm1, %v16172_v36, %v16169_v31  ;;  %v807_v20 = vsel %vm800_vm1, %v16173_v12, %v16170_v50  ;;  %v1017_v28 = vsel %vm1009_vm2, %v16174_v13, %v16166_v7 }
 0x1d3   : > { %v1989_v44 = vadd.f32 %v1933_v48, %v1760_v24  ;;  %v1982_v11 = vadd.f32 %v1926_v15, %v1753_v39  ;;  %v1011_v49 = vsel %vm1009_vm2, %v16175_v57, %v16165_v3  ;;  %v853_v5 = vadd.f32 %v801_v17, %v644_v40 }
 0x1d4   : > { %16171 = vst [vmem:[#allocation57_spill] sm:$0xff] %v12902_v21  ;;  %v12913_v38 = vpop.permute.xlu0 %2108  ;;  %4996 = vmatprep.mubr.bf16.mxu1 %v12902_v21  ;;  %v12916_v42 = vpop.permute.xlu1 %2092  ;;  %v1016_v16 = vsel %vm1009_vm2, %v16176_v2, %v16174_v13  ;;  %v860_v1 = vadd.f32 %v807_v20, %v651_v34  ;;  %v1070_v50 = vadd.f32 %v1017_v28, %v861_v58 }
 0x1d5   : > { %v2162_v4 = vsel %vm2152_vm7, %v12913_v38, %v12828_v0  ;;  %v2155_v7 = vsel %vm2152_vm7, %v12916_v42, %v12794_v27  ;;  %2102 = vrot.lane.b32.xlu0 %v12770_v51, %s11787_s23  ;;  %2100 = vrot.lane.b32.xlu1 %v12774_v56, %s11787_s23  ;;  %v16177_v0 = vld [vmem:[#allocation85_spill] sm:$0xff]  ;;  %v16178_v27 = vld [vmem:[#allocation86_spill] sm:$0xff]  ;;  %v1063_v23 = vadd.f32 %v1011_v49, %v854_v55  ;;  %v16179_v56 = vld [vmem:[#allocation84_spill] sm:$0xff] }
 0x1d6   : > { %v2218_v3 = vadd.f32 %v2162_v4, %v1989_v44  ;;  %v2211_v31 = vadd.f32 %v2155_v7, %v1982_v11  ;;  %v1226_v37 = vsel %vm1218_vm3, %v16177_v0, %v12446_v47  ;;  %v1220_v51 = vsel %vm1218_vm3, %v16178_v27, %v12448_v25  ;;  %v16181_v47 = vld [vmem:[#allocation91_spill] sm:$0xff]  ;;  %v16182_v25 = vld [vmem:[#allocation92_spill] sm:$0xff]  ;;  %v16183_v55 = vld [vmem:[#allocation89_spill] sm:$0xff] }
 0x1d7   : > { %v1010_v52 = vsel %vm1009_vm2, %v16179_v56, %v16175_v57  ;;  %v1069_v22 = vadd.f32 %v1016_v16, %v860_v1  ;;  %v1435_v48 = vsel %vm1427_vm4, %v16181_v47, %v12496_v63  ;;  %v1429_v15 = vsel %vm1427_vm4, %v16182_v25, %v12498_v61  ;;  %v16184_v63 = vld [vmem:[#allocation101_spill] sm:$0xff]  ;;  %v16185_v61 = vld [vmem:[#allocation102_spill] sm:$0xff]  ;;  %v2767_v11 = vld [vmem:[#allocation4 + $0xcc0] sm:$0xff] }
 0x1d8   : > { %v2270_v10 = vadd.f32 %v12606_v8, %v2218_v3  ;;  %v2263_v9 = vadd.f32 %v12608_v54, %v2211_v31  ;;  %v12945_v19 = vpop.permute.xlu0 %989  ;;  %v12947_v26 = vpop.permute.xlu1 %987  ;;  %v1279_v40 = vadd.f32 %v1226_v37, %v1070_v50  ;;  %v1272_v24 = vadd.f32 %v1220_v51, %v1063_v23  ;;  %v2771_v57 = vld [vmem:[#allocation4 + $0xce0] sm:$0xff]  ;;  %v16187_v49 = vld [vmem:[#allocation90_spill] sm:$0xff] }
 0x1d9   : > { %16180 = vst [vmem:[#allocation58_spill] sm:$0xff] %v12945_v19  ;;  %2118 = vrot.lane.b32.xlu0 %v12754_v33, %s11787_s23  ;;  %2116 = vrot.lane.b32.xlu1 %v12758_v32, %s11787_s23  ;;  %v1225_v58 = vsel %vm1218_vm3, %v16183_v55, %v16177_v0  ;;  %v1703_v36 = vsel %vm1694_vm5, %v16184_v63, %v12546_v53  ;;  %v16188_v4 = vld [vmem:[#allocation111_spill] sm:$0xff]  ;;  %v16190_v1 = vld [vmem:[#allocation30_spill] sm:$0xff] }
 0x1da   : > { %v2298_v39 = vmul.f32 0.1, %v2270_v10  ;;  %v2291_v34 = vmul.f32 0.1, %v2263_v9  ;;  %v1696_v17 = vsel %vm1694_vm5, %v16185_v61, %v12548_v14  ;;  %v10503_v33 = vcombine.low %v12843_v46, %v12843_v46  ;;  %v2759_v56 = vld [vmem:[#allocation4 + $0xc80] sm:$0xff]  ;;  %v16195_v55 = vld [vmem:[#allocation110_spill] sm:$0xff] }
 0x1db   : > { %v1488_v32 = vadd.f32 %v1435_v48, %v1279_v40  ;;  %v1481_v12 = vadd.f32 %v1429_v15, %v1272_v24  ;;  %v1219_v53 = vsel %vm1218_vm3, %v16187_v49, %v16178_v27  ;;  %v1932_v14 = vsel %vm1923_vm6, %v12748_v59, %v12638_v45  ;;  %v16194_v15 = vld [vmem:[#allocation109_spill] sm:$0xff] }
 0x1dc   : > { %v2326_v20 = vmax.f32 %v2270_v10, %v2298_v39  ;;  %v2319_v13 = vmax.f32 %v2263_v9, %v2291_v34  ;;  %v12970_v28 = vpop.permute.xlu0 %1003  ;;  %v12972_v44 = vpop.permute.xlu1 %1001  ;;  %v1925_v46 = vsel %vm1923_vm6, %v12750_v6, %v12640_v35  ;;  %v1062_v7 = vadd.f32 %v1010_v52, %v853_v5  ;;  %v16191_v35 = vld [vmem:[#allocation95_spill] sm:$0xff]  ;;  %v16192_v10 = vld [vmem:[#allocation96_spill] sm:$0xff] }
 0x1dd   : > { %16186 = vst [vmem:[#allocation65_spill] sm:$0xff] %v12970_v28  ;;  %579 = vrot.lane.b32.xlu0 %v16188_v4, %s11780_s12  ;;  %565 = vrot.lane.b32.xlu1 %v12716_v43, %s11780_s12  ;;  %v1759_v2 = vadd.f32 %v1703_v36, %v1488_v32  ;;  %v1752_v16 = vadd.f32 %v1696_v17, %v1481_v12  ;;  %v4888_v45 = vsel %vm4886_vm8, %v10503_v33, 0  ;;  %v2763_v52 = vld [vmem:[#allocation4 + $0xca0] sm:$0xff] }
 0x1de   : > { %v12987_v3 = vpack.c.bf16 %v2326_v20, %v2319_v13  ;;  %v1278_v31 = vadd.f32 %v1225_v58, %v1069_v22  ;;  %v493_v50 = vmul.f32 %v16190_v1, %v16140_v62  ;;  %v10496_v0 = vcombine.high %v2767_v11, %v2771_v57  ;;  %v16196_v58 = vld [vmem:[#allocation25_spill] sm:$0xff]  ;;  %v2751_v13 = vld [vmem:[#allocation4 + $0xc40] sm:$0xff] }
 0x1df   : > { %v1271_v37 = vadd.f32 %v1219_v53, %v1062_v7  ;;  %v1434_v27 = vsel %vm1427_vm4, %v16191_v35, %v16181_v47  ;;  %v1988_v51 = vadd.f32 %v1932_v14, %v1759_v2  ;;  %v1981_v23 = vadd.f32 %v1925_v46, %v1752_v16  ;;  %v16193_v47 = vld [vmem:[#allocation114_spill] sm:$0xff]  ;;  %v16199_v16 = vld [vmem:[#allocation36_spill] sm:$0xff]  ;;  %v2747_v35 = vld [vmem:[#allocation4 + $0xc20] sm:$0xff] }
 0x1e0   : > { %16189 = vst [vmem:[#allocation66_spill] sm:$0xff] %v12987_v3  ;;  %v2107_v43 = vpop.permute.xlu0 %2106  ;;  %4997 = vmatmul.mubr.bf16.vlgmr.msra.gmra.mxu1 %v12987_v3  ;;  %v2091_v5 = vpop.permute.xlu1 %2090  ;;  %v1428_v9 = vsel %vm1427_vm4, %v16192_v10, %v16182_v25  ;;  %v1702_v40 = vsel %vm1694_vm5, %v16194_v15, %v16184_v63  ;;  %v10495_v34 = vcombine.low %v2767_v11, %v2771_v57  ;;  %v2755_v11 = vld [vmem:[#allocation4 + $0xc60] sm:$0xff]  ;;  %v16198_v53 = vld [vmem:[#allocation54_spill] sm:$0xff] }
 0x1e1   : > { %v2161_v22 = vsel %vm2152_vm7, %v2107_v43, %v12913_v38  ;;  %v2154_v48 = vsel %vm2152_vm7, %v2091_v5, %v12916_v42  ;;  %577 = vrot.lane.b32.xlu0 %v16193_v47, %s11780_s12  ;;  %563 = vrot.lane.b32.xlu1 %v493_v50, %s11780_s12  ;;  %v1487_v25 = vadd.f32 %v1434_v27, %v1278_v31  ;;  %v16197_v42 = vld [vmem:[#allocation33_spill] sm:$0xff] }
 0x1e2   : > { %v2217_v24 = vadd.f32 %v2161_v22, %v1988_v51  ;;  %v2210_v39 = vadd.f32 %v2154_v48, %v1981_v23  ;;  %5077 = vmatpush1.bf16.msra.mxu1 %v4888_v45  ;;  %v1695_v38 = vsel %vm1694_vm5, %v16195_v55, %v16185_v61  ;;  %v710_v36 = vmul.f32 %v16197_v42, %v16196_v58  ;;  %v16202_v48 = vld [vmem:[#allocation37_spill] sm:$0xff] }
 0x1e3   : > { %5078 = vmatprep.subr.bf16.mxu1 %v10496_v0  ;;  %v10488_v17 = vcombine.high %v2759_v56, %v2763_v52  ;;  %v1480_v33 = vadd.f32 %v1428_v9, %v1271_v37  ;;  %v1758_v57 = vadd.f32 %v1702_v40, %v1487_v25  ;;  %v1931_v61 = vsel %vm1923_vm6, %v12887_v30, %v12748_v59  ;;  %v2743_v37 = vld [vmem:[#allocation4 + $0xc00] sm:$0xff] }
 0x1e4   : > { %v2269_v32 = vadd.f32 %v12606_v8, %v2217_v24  ;;  %v2262_v12 = vadd.f32 %v12608_v54, %v2210_v39  ;;  %v13016_v63 = vpop.permute.xlu0 %999  ;;  %v13018_v20 = vpop.permute.xlu1 %985  ;;  %v1924_v49 = vsel %vm1923_vm6, %v12889_v29, %v12750_v6  ;;  %v10487_v7 = vcombine.low %v2759_v56, %v2763_v52  ;;  %v16201_v9 = vld [vmem:[#allocation39_spill] sm:$0xff] }
 0x1e5   : > { %788 = vrot.lane.b32.xlu0 %v710_v36, %s11781_s13  ;;  %774 = vrot.lane.b32.xlu1 %v16198_v53, %s11781_s13  ;;  %v1751_v14 = vadd.f32 %v1695_v38, %v1480_v33  ;;  %v709_v2 = vmul.f32 %v16197_v42, %v16140_v62  ;;  %v702_v59 = vmul.f32 %v16199_v16, %v16140_v62 }
 0x1e6   : > { %v2297_v46 = vmul.f32 0.1, %v2269_v32  ;;  %v2290_v4 = vmul.f32 0.1, %v2262_v12  ;;  %5079 = vmatpush1.bf16.msra.mxu1 %v10495_v34  ;;  %v10480_v30 = vcombine.high %v2751_v13, %v2755_v11  ;;  %v1987_v31 = vadd.f32 %v1931_v61, %v1758_v57  ;;  %v16207_v57 = vld [vmem:[#allocation44_spill] sm:$0xff] }
 0x1e7   : > { %5080 = vmatprep.subr.bf16.mxu1 %v10488_v17  ;;  %v1980_v6 = vadd.f32 %v1924_v49, %v1751_v14  ;;  %v10479_v10 = vcombine.low %v2751_v13, %v2755_v11  ;;  %v919_v22 = vmul.f32 %v16201_v9, %v16196_v58  ;;  %v912_v47 = vmul.f32 %v16202_v48, %v16196_v58  ;;  %v16206_v13 = vld [vmem:[#allocation40_spill] sm:$0xff] }
 0x1e8   : > { %v2325_v29 = vmax.f32 %v2269_v32, %v2297_v46  ;;  %v2318_v50 = vmax.f32 %v2262_v12, %v2290_v4  ;;  %v2105_v45 = vpop.permute.xlu0 %2104  ;;  %v2089_v0 = vpop.permute.xlu1 %2088  ;;  %v10471_v25 = vcombine.low %v2743_v37, %v2747_v35  ;;  %v918_v55 = vmul.f32 %v16201_v9, %v16140_v62 }
 0x1e9   : > { %v2160_v27 = vsel %vm2152_vm7, %v2105_v45, %v2107_v43  ;;  %v2153_v51 = vsel %vm2152_vm7, %v2089_v0, %v2091_v5  ;;  %786 = vrot.lane.b32.xlu0 %v709_v2, %s11781_s13  ;;  %772 = vrot.lane.b32.xlu1 %v702_v59, %s11781_s13  ;;  %v10472_v43 = vcombine.high %v2743_v37, %v2747_v35  ;;  %v16209_v2 = vld [vmem:[#allocation12_spill] sm:$0xff]  ;;  %v16210_v59 = vld [vmem:[#allocation22_spill] sm:$0xff]  ;;  %v16213_v45 = vld [vmem:[#allocation45_spill] sm:$0xff] }
 0x1ea   : > { %v2216_v23 = vadd.f32 %v2160_v27, %v1987_v31  ;;  %v2209_v56 = vadd.f32 %v2153_v51, %v1980_v6  ;;  %v13037_v52 = vpack.c.bf16 %v2325_v29, %v2318_v50  ;;  %5081 = vmatpush1.bf16.msra.mxu1 %v10487_v7  ;;  %v911_v38 = vmul.f32 %v16202_v48, %v16140_v62  ;;  %v16211_v31 = vld [vmem:[#allocation20_spill] sm:$0xff]  ;;  %v16214_v37 = vld [vmem:[#allocation41_spill] sm:$0xff]  ;;  %v16249_v48 = vld [vmem:[#allocation107_spill] sm:$0xff] }
 0x1eb   : > { %5082 = vmatprep.subr.bf16.mxu1 %v10480_v30  ;;  %v1128_v11 = vmul.f32 %v16206_v13, %v16196_v58  ;;  %v1121_v61 = vmul.f32 %v16207_v57, %v16196_v58  ;;  %v1127_v14 = vmul.f32 %v16206_v13, %v16140_v62  ;;  %v1120_v46 = vmul.f32 %v16207_v57, %v16140_v62  ;;  %v16246_v57 = vld [vmem:[#allocation48_spill] sm:$0xff] }
 0x1ec   : > { %16200 = vst [vmem:[#allocation59_spill] sm:$0xff] %v13037_v52  ;;  %v2268_v5 = vadd.f32 %v12606_v8, %v2216_v23  ;;  %v2261_v15 = vadd.f32 %v12608_v54, %v2209_v56  ;;  %v13045_v40 = vpop.permute.xlu0 %1198  ;;  %4943 = vmatprep.mubr.bf16.mxu0 %v13037_v52  ;;  %v13048_v24 = vpop.permute.xlu1 %1196  ;;  %v491_v30 = vmul.f32 %v16210_v59, %v16209_v2  ;;  %v16238_v8 = vld [vmem:[#allocation38_spill] sm:$0xff]  ;;  %v2631_v54 = vld [vmem:[#allocation4 + $0x880] sm:$0xff] }
 0x1ed   : > { %16203 = vst [vmem:[#allocation75_spill] sm:$0xff] %v13045_v40  ;;  %997 = vrot.lane.b32.xlu0 %v919_v22, %s11782_s14  ;;  %983 = vrot.lane.b32.xlu1 %v912_v47, %s11782_s14  ;;  %v484_v6 = vmul.f32 %v16211_v31, %v16209_v2  ;;  %v1337_v0 = vmul.f32 %v16213_v45, %v16196_v58  ;;  %v16217_v47 = vld [vmem:[#allocation17_spill] sm:$0xff]  ;;  %v2663_v31 = vld [vmem:[#allocation4 + $0x980] sm:$0xff] }
 0x1ee   : > { %v2296_v39 = vmul.f32 0.1, %v2268_v5  ;;  %v2289_v34 = vmul.f32 0.1, %v2261_v15  ;;  %5083 = vmatpush1.bf16.msra.mxu1 %v10479_v10  ;;  %v1330_v35 = vmul.f32 %v16214_v37, %v16196_v58  ;;  %v1336_v23 = vmul.f32 %v16213_v45, %v16140_v62  ;;  %v16237_v58 = vld [vmem:[#allocation98_spill] sm:$0xff]  ;;  %v16242_v45 = vld [vmem:[#allocation99_spill] sm:$0xff] }
 0x1ef   : > { %5084 = vmatprep.subr.bf16.mxu1 %v10472_v43  ;;  %v1329_v56 = vmul.f32 %v16214_v37, %v16140_v62  ;;  %v700_v43 = vmul.f32 %v16217_v47, %v16209_v2 }
 0x1f0   : > { %v2324_v36 = vmax.f32 %v2268_v5, %v2296_v39  ;;  %v2317_v17 = vmax.f32 %v2261_v15, %v2289_v34  ;;  %v13056_v33 = vpop.permute.xlu0 %1212  ;;  %v13058_v32 = vpop.permute.xlu1 %1210  ;;  %v16218_v5 = vld [vmem:[#allocation15_spill] sm:$0xff] }
 0x1f1   : > { %16204 = vst [vmem:[#allocation76_spill] sm:$0xff] %v13056_v33  ;;  %995 = vrot.lane.b32.xlu0 %v918_v55, %s11782_s14  ;;  %981 = vrot.lane.b32.xlu1 %v911_v38, %s11782_s14  ;;  %v693_v15 = vmul.f32 %v16218_v5, %v16209_v2  ;;  %v2675_v55 = vld [vmem:[#allocation4 + $0x9e0] sm:$0xff] }
 0x1f2   : > { %v13062_v12 = vpack.c.bf16 %v2324_v36, %v2317_v17  ;;  %5085 = vmatpush1.bf16.msra.mxu1 %v10471_v25  ;;  %v2671_v25 = vld [vmem:[#allocation4 + $0x9c0] sm:$0xff] }
 0x1f3   : > { %v10399_v38 = vcombine.low %v2671_v25, %v2675_v55  ;;  %v10400_v36 = vcombine.high %v2671_v25, %v2675_v55  ;;  %v16220_v17 = vld [vmem:[#allocation43_spill] sm:$0xff] }
 0x1f4   : > { %16205 = vst [vmem:[#allocation63_spill] sm:$0xff] %v13062_v12  ;;  %v13068_v49 = vpop.permute.xlu0 %1208  ;;  %4944 = vmatmul.mubr.bf16.vlgmr.msra.gmra.mxu0 %v13062_v12  ;;  %v13071_v53 = vpop.permute.xlu1 %1194  ;;  %v2659_v25 = vld [vmem:[#allocation4 + $0x960] sm:$0xff] }
 0x1f5   : > { %1206 = vrot.lane.b32.xlu0 %v1128_v11, %s11783_s15  ;;  %1192 = vrot.lane.b32.xlu1 %v1121_v61, %s11783_s15  ;;  %v16221_v11 = vld [vmem:[#allocation7_spill] sm:$0xff] }
 0x1f6   : > { %v1591_v61 = vmul.f32 %v16221_v11, %v16220_v17  ;;  %5017 = vmatprep.subr.bf16.mxu0 %v10400_v36  ;;  %v16225_v36 = vld [vmem:[#allocation21_spill] sm:$0xff]  ;;  %v2041_v13 = vmul.f32 %v16246_v57, %v16221_v11 }
 0x1f7   : > { %5018 = vmatpush1.bf16.msra.mxu0 %v10399_v38 }
 0x1f8   : > { %v13079_v4 = vpop.permute.xlu0 %1407  ;;  %v13081_v7 = vpop.permute.xlu1 %1405 }
 0x1f9   : > { %16208 = vst [vmem:[#allocation64_spill] sm:$0xff] %v13079_v4  ;;  %1204 = vrot.lane.b32.xlu0 %v1127_v14, %s11783_s15  ;;  %1190 = vrot.lane.b32.xlu1 %v1120_v46, %s11783_s15  ;;  %v16222_v14 = vld [vmem:[#allocation42_spill] sm:$0xff] }
 0x1fa   : > { %v1583_v46 = vmul.f32 %v16221_v11, %v16222_v14 }
 0x1fc   : > { %v13089_v29 = vpop.permute.xlu0 %1421  ;;  %v13091_v50 = vpop.permute.xlu1 %1419 }
 0x1fd   : > { %16212 = vst [vmem:[#allocation67_spill] sm:$0xff] %v13089_v29  ;;  %559 = vrot.lane.b32.xlu0 %v491_v30, %s11780_s12  ;;  %545 = vrot.lane.b32.xlu1 %v484_v6, %s11780_s12  ;;  %v2667_v6 = vld [vmem:[#allocation4 + $0x9a0] sm:$0xff] }
 0x200   : > { %v13099_v27 = vpop.permute.xlu0 %1417  ;;  %v13101_v51 = vpop.permute.xlu1 %1403 }
 0x201   : > { %1415 = vrot.lane.b32.xlu0 %v1337_v0, %s11784_s16  ;;  %1401 = vrot.lane.b32.xlu1 %v1330_v35, %s11784_s16  ;;  %v10391_v0 = vcombine.low %v2663_v31, %v2667_v6  ;;  %v10392_v35 = vcombine.high %v2663_v31, %v2667_v6 }
 0x203   : > { %5019 = vmatprep.subr.bf16.mxu0 %v10392_v35  ;;  %v2647_v35 = vld [vmem:[#allocation4 + $0x900] sm:$0xff] }
 0x204   : > { %v13109_v10 = vpop.permute.xlu0 %561  ;;  %v13111_v22 = vpop.permute.xlu1 %547  ;;  %5020 = vmatpush1.bf16.msra.mxu0 %v10391_v0 }
 0x205   : > { %16215 = vst [vmem:[#allocation68_spill] sm:$0xff] %v13109_v10  ;;  %16216 = vst [vmem:[#allocation73_spill] sm:$0xff] %v13111_v22  ;;  %1413 = vrot.lane.b32.xlu0 %v1336_v23, %s11784_s16  ;;  %1399 = vrot.lane.b32.xlu1 %v1329_v56, %s11784_s16  ;;  %v16224_v23 = vld [vmem:[#allocation8_spill] sm:$0xff] }
 0x206   : > { %v1590_v56 = vmul.f32 %v16224_v23, %v16220_v17  ;;  %v1582_v47 = vmul.f32 %v16224_v23, %v16222_v14  ;;  %v2635_v17 = vld [vmem:[#allocation4 + $0x8a0] sm:$0xff]  ;;  %v16240_v14 = vld [vmem:[#allocation77_spill] sm:$0xff] }
 0x208   : > { %v13119_v39 = vpop.permute.xlu0 %1670  ;;  %v13121_v34 = vpop.permute.xlu1 %1668 }
 0x209   : > { %16219 = vst [vmem:[#allocation74_spill] sm:$0xff] %v13119_v39  ;;  %768 = vrot.lane.b32.xlu0 %v700_v43, %s11781_s13  ;;  %754 = vrot.lane.b32.xlu1 %v693_v15, %s11781_s13  ;;  %v2655_v15 = vld [vmem:[#allocation4 + $0x940] sm:$0xff] }
 0x20a   : > { %v10383_v55 = vcombine.low %v2655_v15, %v2659_v25  ;;  %v10384_v38 = vcombine.high %v2655_v15, %v2659_v25  ;;  %v16229_v15 = vld [vmem:[#allocation46_spill] sm:$0xff] }
 0x20b   : > { %v1820_v25 = vmul.f32 %v16229_v15, %v16221_v11 }
 0x20c   : > { %v13129_v59 = vpop.permute.xlu0 %1686  ;;  %v13131_v30 = vpop.permute.xlu1 %1684  ;;  %5021 = vmatprep.subr.bf16.mxu0 %v10384_v38  ;;  %v2639_v38 = vld [vmem:[#allocation4 + $0x8c0] sm:$0xff] }
 0x20d   : > { %16223 = vst [vmem:[#allocation79_spill] sm:$0xff] %v13129_v59  ;;  %1680 = vrot.lane.b32.xlu0 %v1591_v61, %s11785_s17  ;;  %1664 = vrot.lane.b32.xlu1 %v1583_v46, %s11785_s17  ;;  %v909_v61 = vmul.f32 %v16225_v36, %v16209_v2  ;;  %v16226_v46 = vld [vmem:[#allocation14_spill] sm:$0xff]  ;;  %v16230_v36 = vld [vmem:[#allocation47_spill] sm:$0xff] }
 0x20e   : > { %v902_v31 = vmul.f32 %v16226_v46, %v16209_v2  ;;  %5022 = vmatpush1.bf16.msra.mxu0 %v10383_v55  ;;  %v1812_v46 = vmul.f32 %v16230_v36, %v16221_v11 }
 0x210   : > { %v13139_v43 = vpop.permute.xlu0 %1682  ;;  %v13141_v5 = vpop.permute.xlu1 %1666 }
 0x211   : > { %1678 = vrot.lane.b32.xlu0 %v1590_v56, %s11785_s17  ;;  %1662 = vrot.lane.b32.xlu1 %v1582_v47, %s11785_s17  ;;  %v2651_v56 = vld [vmem:[#allocation4 + $0x920] sm:$0xff] }
 0x212   : > { %v10375_v0 = vcombine.low %v2647_v35, %v2651_v56  ;;  %v10376_v47 = vcombine.high %v2647_v35, %v2651_v56  ;;  %v1819_v35 = vmul.f32 %v16229_v15, %v16224_v23  ;;  %v1811_v56 = vmul.f32 %v16230_v36, %v16224_v23  ;;  %v16239_v36 = vld [vmem:[#allocation51_spill] sm:$0xff] }
 0x214   : > { %v13149_v6 = vpop.permute.xlu0 %770  ;;  %v13151_v3 = vpop.permute.xlu1 %756  ;;  %5023 = vmatprep.subr.bf16.mxu0 %v10376_v47  ;;  %v16233_v47 = vld [vmem:[#allocation24_spill] sm:$0xff] }
 0x215   : > { %16227 = vst [vmem:[#allocation80_spill] sm:$0xff] %v13149_v6  ;;  %16228 = vst [vmem:[#allocation83_spill] sm:$0xff] %v13151_v3  ;;  %977 = vrot.lane.b32.xlu0 %v909_v61, %s11782_s14  ;;  %963 = vrot.lane.b32.xlu1 %v902_v31, %s11782_s14  ;;  %v2643_v61 = vld [vmem:[#allocation4 + $0x8e0] sm:$0xff]  ;;  %v2040_v3 = vmul.f32 %v16246_v57, %v16224_v23 }
 0x216   : > { %5024 = vmatpush1.bf16.msra.mxu0 %v10375_v0  ;;  %v10367_v55 = vcombine.low %v2639_v38, %v2643_v61  ;;  %v10368_v31 = vcombine.high %v2639_v38, %v2643_v61  ;;  %v16235_v0 = vld [vmem:[#allocation26_spill] sm:$0xff]  ;;  %v16236_v61 = vld [vmem:[#allocation97_spill] sm:$0xff] }
 0x217   : > { %v13181_v38 = vmul.f32 %v16235_v0, %v16209_v2  ;;  %v607_v15 = vsel %vm591_vm0, %v16237_v58, %v16236_v61  ;;  %v16241_v0 = vld [vmem:[#allocation18_spill] sm:$0xff]  ;;  %v10359_v61 = vcombine.low %v2631_v54, %v2635_v17 }
 0x218   : > { %v13159_v21 = vpop.permute.xlu0 %1899  ;;  %v13161_v12 = vpop.permute.xlu1 %1897  ;;  %5025 = vmatprep.subr.bf16.mxu0 %v10368_v31  ;;  %v424_v37 = vmul.f32 %v16241_v0, %v16240_v14  ;;  %v13196_v31 = vmul.f32 %v16239_v36, %v16224_v23 }
 0x219   : > { %16231 = vst [vmem:[#allocation85_spill] sm:$0xff] %v13159_v21  ;;  %1909 = vrot.lane.b32.xlu0 %v1820_v25, %s11786_s18  ;;  %1893 = vrot.lane.b32.xlu1 %v1812_v46, %s11786_s18  ;;  %v1111_v25 = vmul.f32 %v16233_v47, %v16209_v2  ;;  %v16234_v46 = vld [vmem:[#allocation27_spill] sm:$0xff]  ;;  %v1118_v47 = vmul.f32 %v16238_v8, %v16209_v2  ;;  %v16244_v8 = vld [vmem:[#allocation112_spill] sm:$0xff] }
 0x21a   : > { %v13177_v62 = vmul.f32 %v16234_v46, %v16209_v2  ;;  %v2049_v46 = vmul.f32 %v16239_v36, %v16221_v11  ;;  %5026 = vmatpush1.bf16.msra.mxu0 %v10367_v55  ;;  %v16245_v2 = vld [vmem:[#allocation113_spill] sm:$0xff]  ;;  %v661_v22 = vadd.f32 %v607_v15, %v424_v37  ;;  %v16247_v36 = vld [vmem:[#allocation78_spill] sm:$0xff]  ;;  %v16250_v11 = vld [vmem:[#allocation108_spill] sm:$0xff] }
 0x21b   : > { %v816_v10 = vsel %vm800_vm1, %v16245_v2, %v16244_v8  ;;  %v431_v55 = vmul.f32 %v16241_v0, %v16247_v36  ;;  %v606_v23 = vsel %vm591_vm0, %v16250_v11, %v16237_v58  ;;  %v16251_v37 = vld [vmem:[#allocation69_spill] sm:$0xff] }
 0x21c   : > { %v13169_v52 = vpop.permute.xlu0 %1915  ;;  %v13171_v60 = vpop.permute.xlu1 %1913  ;;  %v16252_v15 = vld [vmem:[#allocation61_spill] sm:$0xff]  ;;  %v870_v16 = vadd.f32 %v816_v10, %v661_v22 }
 0x21d   : > { %16232 = vst [vmem:[#allocation86_spill] sm:$0xff] %v13169_v52  ;;  %1907 = vrot.lane.b32.xlu0 %v1819_v35, %s11786_s18  ;;  %1891 = vrot.lane.b32.xlu1 %v1811_v56, %s11786_s18  ;;  %v10360_v35 = vcombine.high %v2631_v54, %v2635_v17  ;;  %v16243_v56 = vld [vmem:[#allocation100_spill] sm:$0xff]  ;;  %v16248_v54 = vld [vmem:[#allocation23_spill] sm:$0xff]  ;;  %v822_v0 = vsel %vm800_vm1, %v16252_v15, %v16251_v37 }
 0x21e   : > { %v613_v6 = vsel %vm591_vm0, %v16243_v56, %v16242_v45  ;;  %v430_v17 = vmul.f32 %v16248_v54, %v16247_v36  ;;  %v612_v45 = vsel %vm591_vm0, %v16249_v48, %v16243_v56  ;;  %v1025_v36 = vsel %vm1009_vm2, %v12947_v26, %v12945_v19  ;;  %v2623_v56 = vld [vmem:[#allocation4 + $0x840] sm:$0xff] }
 0x21f   : > { %5027 = vmatprep.subr.bf16.mxu0 %v10360_v35  ;;  %v2627_v48 = vld [vmem:[#allocation4 + $0x860] sm:$0xff]  ;;  %v668_v57 = vadd.f32 %v613_v6, %v431_v55  ;;  %v423_v35 = vmul.f32 %v16248_v54, %v16240_v14  ;;  %v821_v37 = vsel %vm800_vm1, %v12854_v41, %v16252_v15  ;;  %v815_v19 = vsel %vm800_vm1, %v12856_v18, %v16245_v2 }
 0x220   : > { %v13215_v9 = vpop.permute.xlu0 %2258  ;;  %v13217_v8 = vpop.permute.xlu1 %2253  ;;  %5028 = vmatpush1.bf16.msra.mxu0 %v10359_v61  ;;  %v10352_v58 = vcombine.high %v2623_v56, %v2627_v48  ;;  %v667_v6 = vadd.f32 %v612_v45, %v430_v17  ;;  %v1079_v54 = vadd.f32 %v1025_v36, %v870_v16  ;;  %v1031_v61 = vsel %vm1009_vm2, %v12972_v44, %v12970_v28  ;;  %v2615_v16 = vld [vmem:[#allocation4 + $0x800] sm:$0xff] }
 0x221   : > { %1186 = vrot.lane.b32.xlu0 %v1118_v47, %s11783_s15  ;;  %1172 = vrot.lane.b32.xlu1 %v1111_v25, %s11783_s15  ;;  %v1234_v25 = vsel %vm1218_vm3, %v13048_v24, %v13045_v40  ;;  %v10351_v47 = vcombine.low %v2623_v56, %v2627_v48  ;;  %v660_v55 = vadd.f32 %v606_v23, %v423_v35 }
 0x222   : > { %v877_v11 = vadd.f32 %v822_v0, %v668_v57  ;;  %5029 = vmatprep.subr.bf16.mxu0 %v10352_v58  ;;  %v1030_v2 = vsel %vm1009_vm2, %v13016_v63, %v12972_v44  ;;  %v1443_v48 = vsel %vm1427_vm4, %v13081_v7, %v13079_v4  ;;  %v2619_v57 = vld [vmem:[#allocation4 + $0x820] sm:$0xff]  ;;  %v876_v45 = vadd.f32 %v821_v37, %v667_v6 }
 0x223   : > { %v869_v36 = vadd.f32 %v815_v19, %v660_v55  ;;  %v1288_v17 = vadd.f32 %v1234_v25, %v1079_v54  ;;  %v10344_v23 = vcombine.high %v2615_v16, %v2619_v57  ;;  %v1024_v15 = vsel %vm1009_vm2, %v13018_v20, %v12947_v26 }
 0x224   : > { %v13241_v10 = vpop.permute.xlu0 %1911  ;;  %v13243_v22 = vpop.permute.xlu1 %1895  ;;  %5030 = vmatpush1.bf16.msra.mxu0 %v10351_v47  ;;  %v1240_v44 = vsel %vm1218_vm3, %v13058_v32, %v13056_v33  ;;  %v1086_v0 = vadd.f32 %v1031_v61, %v877_v11  ;;  %v1085_v56 = vadd.f32 %v1030_v2, %v876_v45  ;;  %v1239_v19 = vsel %vm1218_vm3, %v13068_v49, %v13058_v32  ;;  %v2735_v32 = vld [vmem:[#allocation4 + $0xbc0] sm:$0xff]  ;;  %v16290_v33 = vld [vmem:[#allocation42_spill] sm:$0xff] }
 0x225   : > { %2138 = vrot.lane.b32.xlu0 %v2049_v46, %s11787_s23  ;;  %2122 = vrot.lane.b32.xlu1 %v2041_v13, %s11787_s23  ;;  %v1712_v46 = vsel %vm1694_vm5, %v13121_v34, %v13119_v39  ;;  %v10343_v13 = vcombine.low %v2615_v16, %v2619_v57  ;;  %v1497_v37 = vadd.f32 %v1443_v48, %v1288_v17  ;;  %v2739_v47 = vld [vmem:[#allocation4 + $0xbe0] sm:$0xff] }
 0x226   : > { %5031 = vmatprep.subr.bf16.mxu0 %v10344_v23  ;;  %v1233_v26 = vsel %vm1218_vm3, %v13071_v53, %v13048_v24  ;;  %v1449_v25 = vsel %vm1427_vm4, %v13091_v50, %v13089_v29  ;;  %v1941_v11 = vsel %vm1923_vm6, %v13161_v12, %v13159_v21  ;;  %v1078_v6 = vadd.f32 %v1024_v15, %v869_v36 }
 0x227   : > { %v1295_v55 = vadd.f32 %v1240_v44, %v1086_v0  ;;  %v1768_v54 = vadd.f32 %v1712_v46, %v1497_v37  ;;  %v10464_v24 = vcombine.high %v2735_v32, %v2739_v47  ;;  %v1294_v61 = vadd.f32 %v1239_v19, %v1085_v56  ;;  %v2731_v44 = vld [vmem:[#allocation4 + $0xba0] sm:$0xff]  ;;  %v16256_v19 = vld [vmem:[#allocation29_spill] sm:$0xff] }
 0x228   : > { %v13268_v35 = vpop.permute.xlu0 %979  ;;  %v13270_v58 = vpop.permute.xlu1 %965  ;;  %5032 = vmatpush1.bf16.msra.mxu0 %v10343_v13  ;;  %v1448_v2 = vsel %vm1427_vm4, %v13099_v27, %v13091_v50  ;;  %v1719_v48 = vsel %vm1694_vm5, %v13131_v30, %v13129_v59  ;;  %v10463_v16 = vcombine.low %v2735_v32, %v2739_v47  ;;  %v1718_v50 = vsel %vm1694_vm5, %v13139_v43, %v13131_v30  ;;  %v16257_v37 = vld [vmem:[#allocation13_spill] sm:$0xff] }
 0x229   : > { %16253 = vst [vmem:[#allocation84_spill] sm:$0xff] %v13268_v35  ;;  %16254 = vst [vmem:[#allocation91_spill] sm:$0xff] %v13270_v58  ;;  %2136 = vrot.lane.b32.xlu0 %v13196_v31, %s11787_s23  ;;  %2120 = vrot.lane.b32.xlu1 %v2040_v3, %s11787_s23  ;;  %v1287_v31 = vadd.f32 %v1233_v26, %v1078_v6  ;;  %v1504_v57 = vadd.f32 %v1449_v25, %v1295_v55  ;;  %v16258_v25 = vld [vmem:[#allocation16_spill] sm:$0xff] }
 0x22a   : > { %v1442_v3 = vsel %vm1427_vm4, %v13101_v51, %v13081_v7  ;;  %v1997_v45 = vadd.f32 %v1941_v11, %v1768_v54  ;;  %5033 = vmatprep.subr.bf16.mxu0 %v10464_v24  ;;  %v1948_v23 = vsel %vm1923_vm6, %v13171_v60, %v13169_v52  ;;  %v2727_v7 = vld [vmem:[#allocation4 + $0xb80] sm:$0xff]  ;;  %v1503_v46 = vadd.f32 %v1448_v2, %v1294_v61  ;;  %v16284_v52 = vld [vmem:[#allocation68_spill] sm:$0xff] }
 0x22b   : > { %v1775_v13 = vadd.f32 %v1719_v48, %v1504_v57  ;;  %v10456_v30 = vcombine.high %v2727_v7, %v2731_v44  ;;  %v1711_v56 = vsel %vm1694_vm5, %v13141_v5, %v13121_v34  ;;  %v1579_v26 = vmul.f32 %v16257_v37, %v16256_v19  ;;  %v2719_v2 = vld [vmem:[#allocation4 + $0xb40] sm:$0xff] }
 0x22c   : > { %v13293_v36 = vpop.permute.xlu0 %2128  ;;  %v2127_v17 = vpop.permute.xlu1 %2126  ;;  %5034 = vmatpush2.bf16.msra.mxu0 %v10463_v16  ;;  %v10455_v11 = vcombine.low %v2727_v7, %v2731_v44  ;;  %v1496_v32 = vadd.f32 %v1442_v3, %v1287_v31  ;;  %v1947_v34 = vsel %vm1923_vm6, %v13241_v10, %v13171_v60  ;;  %v1940_v24 = vsel %vm1923_vm6, %v13243_v22, %v13161_v12  ;;  %v2723_v48 = vld [vmem:[#allocation4 + $0xb60] sm:$0xff]  ;;  %v13329_v60 = vld [vmem:[#allocation4 + $0x1e8] sm:$0xff] }
 0x22d   : > { %16255 = vst [vmem:[#allocation92_spill] sm:$0xff] %v13293_v36  ;;  %v2170_v15 = vsel %vm2152_vm7, %v2127_v17, %v13293_v36  ;;  %1395 = vrot.lane.b32.xlu0 %v13177_v62, %s11784_s16  ;;  %1381 = vrot.lane.b32.xlu1 %v13181_v38, %s11784_s16  ;;  %v1571_v62 = vmul.f32 %v16257_v37, %v16258_v25  ;;  %v16261_v12 = vld [vmem:[#allocation35_spill] sm:$0xff] }
 0x22e   : > { %v2226_v0 = vadd.f32 %v2170_v15, %v1997_v45  ;;  %v1774_v38 = vadd.f32 %v1718_v50, %v1503_v46  ;;  %v2004_v47 = vadd.f32 %v1948_v23, %v1775_v13  ;;  %5035 = vmatprep.subr.bf16.mxu0 %v10456_v30  ;;  %v1767_v16 = vadd.f32 %v1711_v56, %v1496_v32  ;;  %v13327_v45 = vld [vmem:[#allocation4 + $0x1c8] sm:$0xff]  ;;  %v16260_v50 = vld [vmem:[#allocation9_spill] sm:$0xff]  ;;  %v2711_v25 = vld [vmem:[#allocation4 + $0xb00] sm:$0xff] }
 0x22f   : > { %v10447_v57 = vcombine.low %v2719_v2, %v2723_v48  ;;  %v10448_v3 = vcombine.high %v2719_v2, %v2723_v48  ;;  %v506_v23 = vmul.f32 %v16261_v12, %v16260_v50  ;;  %v499_v15 = vmul.f32 %v16190_v1, %v16260_v50  ;;  %v16281_v36 = vld [vmem:[#allocation83_spill] sm:$0xff] }
 0x230   : > { %v2278_v6 = vadd.f32 %v13217_v8, %v2226_v0  ;;  %v13315_v55 = vpop.permute.xlu0 %2144  ;;  %v2143_v54 = vpop.permute.xlu1 %2142  ;;  %5036 = vmatpush2.bf16.msra.mxu0 %v10455_v11  ;;  %v10146_v7 = vcombine.high %v13327_v45, %v13329_v60  ;;  %v2003_v44 = vadd.f32 %v1947_v34, %v1774_v38  ;;  %v1996_v46 = vadd.f32 %v1940_v24, %v1767_v16  ;;  %v16262_v34 = vld [vmem:[#allocation32_spill] sm:$0xff] }
 0x231   : > { %16259 = vst [vmem:[#allocation89_spill] sm:$0xff] %v13315_v55  ;;  %v2177_v61 = vsel %vm2152_vm7, %v2143_v54, %v13315_v55  ;;  %1656 = vrot.lane.b32.xlu0 %v1579_v26, %s11785_s17  ;;  %1640 = vrot.lane.b32.xlu1 %v1571_v62, %s11785_s17  ;;  %v2715_v62 = vld [vmem:[#allocation4 + $0xb20] sm:$0xff]  ;;  %v1808_v24 = vmul.f32 %v16262_v34, %v16257_v37 }
 0x232   : > { %v2233_v31 = vadd.f32 %v2177_v61, %v2004_v47  ;;  %v2306_v13 = vmul.f32 0.1, %v2278_v6  ;;  %5037 = vmatprep.subr.bf16.mxu0 %v10448_v3  ;;  %5123 = vmatprep.subr.bf16.mxu1 %v10146_v7  ;;  %v10440_v47 = vcombine.high %v2711_v25, %v2715_v62  ;;  %v10439_v2 = vcombine.low %v2711_v25, %v2715_v62 }
 0x234   : > { %v2285_v0 = vadd.f32 %v13215_v9, %v2233_v31  ;;  %v13338_v30 = vpop.permute.xlu0 %2140  ;;  %v13340_v56 = vpop.permute.xlu1 %2124  ;;  %5038 = vmatpush2.bf16.msra.mxu0 %v10447_v57  ;;  %v2703_v57 = vld [vmem:[#allocation4 + $0xac0] sm:$0xff] }
 0x235   : > { %v2176_v19 = vsel %vm2152_vm7, %v13338_v30, %v2143_v54  ;;  %v2169_v26 = vsel %vm2152_vm7, %v13340_v56, %v2127_v17  ;;  %589 = vrot.lane.b32.xlu0 %v506_v23, %s11780_s12  ;;  %575 = vrot.lane.b32.xlu1 %v499_v15, %s11780_s12  ;;  %v16263_v54 = vld [vmem:[#allocation31_spill] sm:$0xff]  ;;  %v2334_v17 = vmax.f32 %v2278_v6, %v2306_v13  ;;  %v16267_v13 = vld [vmem:[#allocation36_spill] sm:$0xff] }
 0x236   : > { %v2313_v11 = vmul.f32 0.1, %v2285_v0  ;;  %v2232_v32 = vadd.f32 %v2176_v19, %v2003_v44  ;;  %v2225_v38 = vadd.f32 %v2169_v26, %v1996_v46  ;;  %v1800_v61 = vmul.f32 %v16263_v54, %v16257_v37  ;;  %5039 = vmatprep.subr.bf16.mxu0 %v10440_v47  ;;  %v2707_v15 = vld [vmem:[#allocation4 + $0xae0] sm:$0xff]  ;;  %v16271_v54 = vld [vmem:[#allocation49_spill] sm:$0xff] }
 0x237   : > { %v715_v6 = vmul.f32 %v16197_v42, %v16260_v50  ;;  %v10431_v19 = vcombine.low %v2703_v57, %v2707_v15  ;;  %v10432_v26 = vcombine.high %v2703_v57, %v2707_v15  ;;  %v2699_v47 = vld [vmem:[#allocation4 + $0xaa0] sm:$0xff] }
 0x238   : > { %v2341_v48 = vmax.f32 %v2285_v0, %v2313_v11  ;;  %v2284_v16 = vadd.f32 %v13215_v9, %v2232_v32  ;;  %v2277_v31 = vadd.f32 %v13217_v8, %v2225_v38  ;;  %v13354_v3 = vpop.permute.xlu0 %1188  ;;  %v13356_v23 = vpop.permute.xlu1 %1174  ;;  %5040 = vmatpush2.bf16.msra.mxu0 %v10439_v2  ;;  %v708_v0 = vmul.f32 %v16267_v13, %v16260_v50  ;;  %v2695_v38 = vld [vmem:[#allocation4 + $0xa80] sm:$0xff]  ;;  %v16272_v2 = vld [vmem:[#allocation34_spill] sm:$0xff] }
 0x239   : > { %16264 = vst [vmem:[#allocation101_spill] sm:$0xff] %v13354_v3  ;;  %16265 = vst [vmem:[#allocation102_spill] sm:$0xff] %v13356_v23  ;;  %1885 = vrot.lane.b32.xlu0 %v1808_v24, %s11786_s18  ;;  %1869 = vrot.lane.b32.xlu1 %v1800_v61, %s11786_s18  ;;  %v10424_v24 = vcombine.high %v2695_v38, %v2699_v47  ;;  %v2037_v61 = vmul.f32 %v16271_v54, %v16257_v37  ;;  %v2687_v57 = vld [vmem:[#allocation4 + $0xa40] sm:$0xff] }
 0x23a   : > { %v2312_v7 = vmul.f32 0.1, %v2284_v16  ;;  %v2305_v44 = vmul.f32 0.1, %v2277_v31  ;;  %v13360_v46 = vpack.c.bf16 %v2341_v48, %v2334_v17  ;;  %5041 = vmatprep.subr.bf16.mxu0 %v10432_v26  ;;  %v2029_v17 = vmul.f32 %v16272_v2, %v16257_v37  ;;  %v2691_v15 = vld [vmem:[#allocation4 + $0xa60] sm:$0xff] }
 0x23b   : > { %v10423_v48 = vcombine.low %v2695_v38, %v2699_v47  ;;  %v10415_v38 = vcombine.low %v2687_v57, %v2691_v15  ;;  %v16278_v47 = vld [vmem:[#allocation73_spill] sm:$0xff]  ;;  %v2679_v2 = vld [vmem:[#allocation4 + $0xa00] sm:$0xff] }
 0x23c   : > { %16266 = vst [vmem:[#allocation90_spill] sm:$0xff] %v13360_v46  ;;  %v2340_v25 = vmax.f32 %v2284_v16, %v2312_v7  ;;  %v2333_v62 = vmax.f32 %v2277_v31, %v2305_v44  ;;  %v13366_v11 = vpop.permute.xlu0 %1397  ;;  %5006 = vmatprep.mubr.bf16.mxu1 %v13360_v46  ;;  %v13369_v32 = vpop.permute.xlu1 %1383  ;;  %5042 = vmatpush2.bf16.msra.mxu0 %v10431_v19  ;;  %v16274_v7 = vld [vmem:[#allocation50_spill] sm:$0xff]  ;;  %v16276_v19 = vld [vmem:[#allocation39_spill] sm:$0xff] }
 0x23d   : > { %16268 = vst [vmem:[#allocation111_spill] sm:$0xff] %v13366_v11  ;;  %16269 = vst [vmem:[#allocation30_spill] sm:$0xff] %v13369_v32  ;;  %798 = vrot.lane.b32.xlu0 %v715_v6, %s11781_s13  ;;  %784 = vrot.lane.b32.xlu1 %v708_v0, %s11781_s13  ;;  %v413_v44 = vmul.f32 %v16260_v50, %v16274_v7  ;;  %v16275_v6 = vmov 0   ;;  %v10416_v0 = vcombine.high %v2687_v57, %v2691_v15  ;;  %v16283_v15 = vld [vmem:[#allocation44_spill] sm:$0xff] }
 0x23e   : > { %v13373_v34 = vpack.c.bf16 %v2340_v25, %v2333_v62  ;;  %5043 = vmatprep.subr.bf16.mxu0 %v10424_v24  ;;  %v924_v26 = vmul.f32 %v16276_v19, %v16260_v50  ;;  %v16277_v25 = vld [vmem:[#allocation37_spill] sm:$0xff] }
 0x23f   : > { %v917_v62 = vmul.f32 %v16277_v25, %v16260_v50  ;;  %v650_v24 = vadd.f32 %v16278_v47, %v413_v44  ;;  %v1126_v44 = vmul.f32 %v16283_v15, %v16260_v50  ;;  %v16311_v47 = vld [vmem:[#allocation107_spill] sm:$0xff] }
 0x240   : > { %16270 = vst [vmem:[#allocation95_spill] sm:$0xff] %v13373_v34  ;;  %v1645_v16 = vpop.permute.xlu0 %1644  ;;  %5007 = vmatmul.mubr.bf16.gmra.mxu1 %v13373_v34  ;;  %v13380_v31 = vpop.permute.xlu1 %1642  ;;  %5044 = vmatpush2.bf16.msra.mxu0 %v10423_v48  ;;  %v16280_v34 = vld [vmem:[#allocation52_spill] sm:$0xff] }
 0x241   : > { %16273 = vst [vmem:[#allocation96_spill] sm:$0xff] %v13380_v31  ;;  %2114 = vrot.lane.b32.xlu0 %v2037_v61, %s11787_s23  ;;  %2098 = vrot.lane.b32.xlu1 %v2029_v17, %s11787_s23  ;;  %v2683_v17 = vld [vmem:[#allocation4 + $0xa20] sm:$0xff]  ;;  %v420_v46 = vmul.f32 %v16260_v50, %v16280_v34  ;;  %v859_v55 = vadd.f32 %v16281_v36, %v650_v24  ;;  %v16282_v48 = vld [vmem:[#allocation40_spill] sm:$0xff] }
 0x242   : > { %5102 = vmatprep.mubr.bf16.mxu1 %v16275_v6  ;;  %5045 = vmatprep.subr.bf16.mxu0 %v10416_v0  ;;  %v10408_v21 = vcombine.high %v2679_v2, %v2683_v17  ;;  %v1133_v57 = vmul.f32 %v16282_v48, %v16260_v50  ;;  %v10407_v0 = vcombine.low %v2679_v2, %v2683_v17  ;;  %v16286_v24 = vld [vmem:[#allocation80_spill] sm:$0xff]  ;;  %v16287_v2 = vld [vmem:[#allocation45_spill] sm:$0xff] }
 0x243   : > { %v2388_v36 = vld [vmem:[#allocation4 + $0xe8] sm:$0xff] }
 0x244   : > { %v1661_v54 = vpop.permute.xlu0 %1660  ;;  %v13392_v61 = vpop.permute.xlu1 %1658  ;;  %5046 = vmatpush2.bf16.msra.mxu0 %v10415_v38  ;;  %v1701_v38 = vsel %vm1694_vm5, %v13380_v31, %v1645_v16 }
 0x245   : > { %16279 = vst [vmem:[#allocation114_spill] sm:$0xff] %v13392_v61  ;;  %1007 = vrot.lane.b32.xlu0 %v924_v26, %s11782_s14  ;;  %993 = vrot.lane.b32.xlu1 %v917_v62, %s11782_s14  ;;  %v657_v26 = vadd.f32 %v16284_v52, %v420_v46  ;;  %v1068_v62 = vadd.f32 %v13270_v58, %v859_v55  ;;  %v16288_v55 = vld [vmem:[#allocation41_spill] sm:$0xff] }
 0x246   : > { %5047 = vmatprep.subr.bf16.mxu0 %v10408_v21  ;;  %v1342_v46 = vmul.f32 %v16287_v2, %v16260_v50  ;;  %v1335_v17 = vmul.f32 %v16288_v55, %v16260_v50 }
 0x247   : > { %v866_v4 = vadd.f32 %v16286_v24, %v657_v26  ;;  %v1277_v29 = vadd.f32 %v13356_v23, %v1068_v62  ;;  %v2476_v24 = vld [vmem:[#allocation4 + $0x3a8] sm:$0xff] }
 0x248   : > { %v1874_v39 = vpop.permute.xlu0 %1873  ;;  %v13405_v59 = vpop.permute.xlu1 %1871  ;;  %5048 = vmatpush2.bf16.msra.mxu0 %v10407_v0  ;;  %v1708_v0 = vsel %vm1694_vm5, %v13392_v61, %v1661_v54 }
 0x249   : > { %16285 = vst [vmem:[#allocation109_spill] sm:$0xff] %v13405_v59  ;;  %1216 = vrot.lane.b32.xlu0 %v1133_v57, %s11783_s15  ;;  %1202 = vrot.lane.b32.xlu1 %v1126_v44, %s11783_s15  ;;  %v1075_v21 = vadd.f32 %v13268_v35, %v866_v4  ;;  %v1486_v57 = vadd.f32 %v13369_v32, %v1277_v29  ;;  %v16291_v4 = vld [vmem:[#allocation10_spill] sm:$0xff]  ;;  %v16292_v29 = vld [vmem:[#allocation11_spill] sm:$0xff]  ;;  %v2392_v35 = vld [vmem:[#allocation4 + $0x108] sm:$0xff] }
 0x24a   : > { %v1930_v26 = vsel %vm1923_vm6, %v13405_v59, %v1874_v39  ;;  %v1589_v28 = vmul.f32 %v16291_v4, %v16290_v33  ;;  %v1588_v50 = vmul.f32 %v16292_v29, %v16290_v33 }
 0x24b   : > { %v1284_v16 = vadd.f32 %v13354_v3, %v1075_v21  ;;  %v1757_v62 = vadd.f32 %v1701_v38, %v1486_v57  ;;  %v16294_v21 = vld [vmem:[#allocation43_spill] sm:$0xff] }
 0x24c   : > { %v1890_v40 = vpop.permute.xlu0 %1889  ;;  %v13419_v44 = vpop.permute.xlu1 %1887  ;;  %v1597_v57 = vmul.f32 %v16291_v4, %v16294_v21 }
 0x24d   : > { %16289 = vst [vmem:[#allocation110_spill] sm:$0xff] %v13419_v44  ;;  %1425 = vrot.lane.b32.xlu0 %v1342_v46, %s11784_s16  ;;  %1411 = vrot.lane.b32.xlu1 %v1335_v17, %s11784_s16  ;;  %v1493_v31 = vadd.f32 %v13366_v11, %v1284_v16  ;;  %v1986_v32 = vadd.f32 %v1930_v26, %v1757_v62  ;;  %v16295_v62 = vld [vmem:[#allocation106_spill] sm:$0xff] }
 0x24e   : > { %v1937_v46 = vsel %vm1923_vm6, %v13419_v44, %v1890_v40  ;;  %v1596_v26 = vmul.f32 %v16292_v29, %v16294_v21  ;;  %v13448_v44 = vld [vmem:[#allocation4 + $0x5c8] sm:$0xff] }
 0x24f   : > { %v1764_v54 = vadd.f32 %v1708_v0, %v1493_v31  ;;  %16297 = vst [vmem:[#allocation22_spill] sm:$0xff] %v13448_v44  ;;  %v16299_v0 = vld [vmem:[#allocation47_spill] sm:$0xff] }
 0x250   : > { %v2103_v39 = vpop.permute.xlu0 %2102  ;;  %v13433_v59 = vpop.permute.xlu1 %2100 }
 0x251   : > { %16293 = vst [vmem:[#allocation33_spill] sm:$0xff] %v13433_v59  ;;  %v2159_v38 = vsel %vm2152_vm7, %v13433_v59, %v2103_v39  ;;  %1676 = vrot.lane.b32.xlu0 %v1589_v28, %s11785_s17  ;;  %1674 = vrot.lane.b32.xlu1 %v1588_v50, %s11785_s17  ;;  %v1993_v16 = vadd.f32 %v1937_v46, %v1764_v54  ;;  %v13450_v39 = vld [vmem:[#allocation4 + $0x5e8] sm:$0xff] }
 0x252   : > { %v2215_v17 = vadd.f32 %v2159_v38, %v1986_v32  ;;  %16298 = vst [vmem:[#allocation20_spill] sm:$0xff] %v13450_v39  ;;  %v10274_v32 = vcombine.high %v13448_v44, %v13450_v39  ;;  %v1818_v46 = vmul.f32 %v16299_v0, %v16291_v4  ;;  %v1817_v38 = vmul.f32 %v16299_v0, %v16292_v29  ;;  %v2412_v59 = vld [vmem:[#allocation4 + $0x1a8] sm:$0xff] }
 0x254   : > { %v2267_v61 = vadd.f32 %v16295_v62, %v2215_v17  ;;  %v2119_v11 = vpop.permute.xlu0 %2118  ;;  %v13446_v40 = vpop.permute.xlu1 %2116  ;;  %5176 = vmatprep.subr.bf16.mxu0 %v10274_v32 }
 0x255   : > { %16296 = vst [vmem:[#allocation54_spill] sm:$0xff] %v13446_v40  ;;  %v2166_v28 = vsel %vm2152_vm7, %v13446_v40, %v2119_v11  ;;  %1692 = vrot.lane.b32.xlu0 %v1597_v57, %s11785_s17  ;;  %1690 = vrot.lane.b32.xlu1 %v1596_v26, %s11785_s17  ;;  %v16300_v11 = vld [vmem:[#allocation105_spill] sm:$0xff]  ;;  %v16303_v40 = vld [vmem:[#allocation48_spill] sm:$0xff] }
 0x256   : > { %v2222_v31 = vadd.f32 %v2166_v28, %v1993_v16  ;;  %v2295_v54 = vmul.f32 0.1, %v2267_v61  ;;  %v16301_v16 = vld [vmem:[#allocation46_spill] sm:$0xff] }
 0x257   : > { %v1826_v28 = vmul.f32 %v16301_v16, %v16291_v4  ;;  %v1825_v39 = vmul.f32 %v16301_v16, %v16292_v29 }
 0x258   : > { %v2274_v17 = vadd.f32 %v16300_v11, %v2222_v31  ;;  %v13465_v57 = vpop.permute.xlu0 %579  ;;  %v13467_v26 = vpop.permute.xlu1 %565  ;;  %v2323_v44 = vmax.f32 %v2267_v61, %v2295_v54  ;;  %v2408_v11 = vld [vmem:[#allocation4 + $0x188] sm:$0xff]  ;;  %v2047_v61 = vmul.f32 %v16303_v40, %v16291_v4 }
 0x259   : > { %1905 = vrot.lane.b32.xlu0 %v1818_v46, %s11786_s18  ;;  %1903 = vrot.lane.b32.xlu1 %v1817_v38, %s11786_s18  ;;  %v10145_v38 = vcombine.low %v13327_v45, %v13329_v60  ;;  %v10138_v54 = vcombine.high %v2408_v11, %v2412_v59  ;;  %v10137_v45 = vcombine.low %v2408_v11, %v2412_v59  ;;  %v16304_v60 = vld [vmem:[#allocation51_spill] sm:$0xff] }
 0x25a   : > { %v2302_v50 = vmul.f32 0.1, %v2274_v17  ;;  %v2054_v23 = vmul.f32 %v16304_v60, %v16292_v29 }
 0x25c   : > { %v2330_v32 = vmax.f32 %v2274_v17, %v2302_v50  ;;  %v13475_v62 = vpop.permute.xlu0 %577  ;;  %v13477_v31 = vpop.permute.xlu1 %563  ;;  %v2046_v50 = vmul.f32 %v16303_v40, %v16292_v29 }
 0x25d   : > { %1921 = vrot.lane.b32.xlu0 %v1826_v28, %s11786_s18  ;;  %1919 = vrot.lane.b32.xlu1 %v1825_v39, %s11786_s18  ;;  %v2400_v39 = vld [vmem:[#allocation4 + $0x148] sm:$0xff] }
 0x25e   : > { %v13481_v46 = vpack.c.bf16 %v2330_v32, %v2323_v44  ;;  %v2404_v44 = vld [vmem:[#allocation4 + $0x168] sm:$0xff]  ;;  %v2055_v32 = vmul.f32 %v16304_v60, %v16291_v4 }
 0x25f   : > { %v10130_v3 = vcombine.high %v2400_v39, %v2404_v44  ;;  %v10129_v59 = vcombine.low %v2400_v39, %v2404_v44  ;;  %v16305_v4 = vld [vmem:[#allocation12_spill] sm:$0xff] }
 0x260   : > { %16302 = vst [vmem:[#allocation17_spill] sm:$0xff] %v13481_v46  ;;  %v13489_v17 = vpop.permute.xlu0 %788  ;;  %10512 = vmatmul.mubr.msk.bf16.vlgmr.msra.gmra.mxu1 %vm4879_vm9, %v13481_v46  ;;  %v13493_v28 = vpop.permute.xlu1 %774  ;;  %v505_v11 = vmul.f32 %v16261_v12, %v16305_v4  ;;  %v498_v29 = vmul.f32 %v16190_v1, %v16305_v4  ;;  %v714_v12 = vmul.f32 %v16197_v42, %v16305_v4 }
 0x261   : > { %2134 = vrot.lane.b32.xlu0 %v2047_v61, %s11787_s23  ;;  %2132 = vrot.lane.b32.xlu1 %v2046_v50, %s11787_s23  ;;  %v2396_v61 = vld [vmem:[#allocation4 + $0x128] sm:$0xff]  ;;  %v707_v1 = vmul.f32 %v16267_v13, %v16305_v4  ;;  %v923_v42 = vmul.f32 %v16276_v19, %v16305_v4  ;;  %v916_v13 = vmul.f32 %v16277_v25, %v16305_v4 }
 0x262   : > { %5124 = vmatpush1.bf16.msra.mxu1 %v10145_v38  ;;  %5112 = vmatprep.mubr.bf16.mxu1 %v16275_v6  ;;  %v10122_v38 = vcombine.high %v2392_v35, %v2396_v61  ;;  %v2384_v6 = vld [vmem:[#allocation4 + $0xc8] sm:$0xff]  ;;  %v1125_v19 = vmul.f32 %v16283_v15, %v16305_v4  ;;  %v1341_v15 = vmul.f32 %v16287_v2, %v16305_v4 }
 0x263   : > { %5125 = vmatprep.subr.bf16.mxu1 %v10138_v54 }
 0x264   : > { %v13502_v46 = vpop.permute.xlu0 %786  ;;  %v13504_v58 = vpop.permute.xlu1 %772 }
 0x265   : > { %2150 = vrot.lane.b32.xlu0 %v2055_v32, %s11787_s23  ;;  %2148 = vrot.lane.b32.xlu1 %v2054_v23, %s11787_s23  ;;  %v10121_v23 = vcombine.low %v2392_v35, %v2396_v61  ;;  %v2380_v32 = vld [vmem:[#allocation4 + $0xa8] sm:$0xff]  ;;  %v10113_v35 = vcombine.low %v2384_v6, %v2388_v36 }
 0x266   : > { %5126 = vmatpush1.bf16.msra.mxu1 %v10137_v45  ;;  %v2376_v45 = vld [vmem:[#allocation4 + $0x88] sm:$0xff] }
 0x267   : > { %5127 = vmatprep.subr.bf16.mxu1 %v10130_v3  ;;  %v10114_v3 = vcombine.high %v2384_v6, %v2388_v36  ;;  %v10106_v61 = vcombine.high %v2376_v45, %v2380_v32  ;;  %v10105_v36 = vcombine.low %v2376_v45, %v2380_v32  ;;  %v1132_v6 = vmul.f32 %v16282_v48, %v16305_v4  ;;  %v2360_v48 = vld [vmem:[#allocation4 + $0x8] sm:$0xff] }
 0x268   : > { %v13512_v50 = vpop.permute.xlu0 %997  ;;  %v13514_v54 = vpop.permute.xlu1 %983  ;;  %v2364_v45 = vld [vmem:[#allocation4 + $0x28] sm:$0xff] }
 0x269   : > { %587 = vrot.lane.b32.xlu0 %v505_v11, %s11780_s12  ;;  %573 = vrot.lane.b32.xlu1 %v498_v29, %s11780_s12  ;;  %v2368_v29 = vld [vmem:[#allocation4 + $0x48] sm:$0xff]  ;;  %v10089_v2 = vcombine.low %v2360_v48, %v2364_v45 }
 0x26a   : > { %5128 = vmatpush1.bf16.msra.mxu1 %v10129_v59 }
 0x26b   : > { %5129 = vmatprep.subr.bf16.mxu1 %v10122_v38  ;;  %v2372_v38 = vld [vmem:[#allocation4 + $0x68] sm:$0xff] }
 0x26c   : > { %v13522_v39 = vpop.permute.xlu0 %995  ;;  %v13524_v44 = vpop.permute.xlu1 %981  ;;  %v10098_v25 = vcombine.high %v2368_v29, %v2372_v38  ;;  %v10097_v32 = vcombine.low %v2368_v29, %v2372_v38 }
 0x26d   : > { %796 = vrot.lane.b32.xlu0 %v714_v12, %s11781_s13  ;;  %782 = vrot.lane.b32.xlu1 %v707_v1, %s11781_s13  ;;  %v13544_v12 = vld [vmem:[#allocation4 + $0x9e8] sm:$0xff] }
 0x26e   : > { %5130 = vmatpush1.bf16.msra.mxu1 %v10121_v23  ;;  %v13542_v23 = vld [vmem:[#allocation4 + $0x9c8] sm:$0xff] }
 0x26f   : > { %5131 = vmatprep.subr.bf16.mxu1 %v10114_v3 }
 0x270   : > { %v13532_v59 = vpop.permute.xlu0 %1206  ;;  %v13534_v11 = vpop.permute.xlu1 %1192 }
 0x271   : > { %1005 = vrot.lane.b32.xlu0 %v923_v42, %s11782_s14  ;;  %991 = vrot.lane.b32.xlu1 %v916_v13, %s11782_s14 }
 0x272   : > { %5132 = vmatpush1.bf16.msra.mxu1 %v10113_v35  ;;  %v10090_v35 = vcombine.high %v2360_v48, %v2364_v45 }
 0x273   : > { %5133 = vmatprep.subr.bf16.mxu1 %v10106_v61  ;;  %v1334_v61 = vmul.f32 %v16288_v55, %v16305_v4  ;;  %v16313_v4 = vld [vmem:[#allocation25_spill] sm:$0xff] }
 0x274   : > { %v13546_v1 = vpop.permute.xlu0 %1204  ;;  %v13548_v3 = vpop.permute.xlu1 %1190  ;;  %v422_v34 = vmul.f32 %v16313_v4, %v16240_v14 }
 0x275   : > { %1214 = vrot.lane.b32.xlu0 %v1132_v6, %s11783_s15  ;;  %1200 = vrot.lane.b32.xlu1 %v1125_v19, %s11783_s15  ;;  %v2480_v6 = vld [vmem:[#allocation4 + $0x3c8] sm:$0xff] }
 0x276   : > { %5134 = vmatpush1.bf16.msra.mxu1 %v10105_v36  ;;  %v2484_v19 = vld [vmem:[#allocation4 + $0x3e8] sm:$0xff]  ;;  %v1595_v36 = vmul.f32 %v16257_v37, %v16294_v21  ;;  %v1824_v21 = vmul.f32 %v16301_v16, %v16257_v37  ;;  %v2053_v16 = vmul.f32 %v16304_v60, %v16257_v37 }
 0x277   : > { %5135 = vmatprep.subr.bf16.mxu1 %v10098_v25  ;;  %v1587_v25 = vmul.f32 %v16257_v37, %v16290_v33  ;;  %v10210_v55 = vcombine.high %v2480_v6, %v2484_v19  ;;  %v10209_v48 = vcombine.low %v2480_v6, %v2484_v19  ;;  %v1816_v33 = vmul.f32 %v16299_v0, %v16257_v37 }
 0x278   : > { %v13556_v42 = vpop.permute.xlu0 %559  ;;  %v13558_v13 = vpop.permute.xlu1 %545  ;;  %v2045_v0 = vmul.f32 %v16303_v40, %v16257_v37 }
 0x279   : > { %16306 = vst [vmem:[#allocation15_spill] sm:$0xff] %v13558_v13  ;;  %1423 = vrot.lane.b32.xlu0 %v1341_v15, %s11784_s16  ;;  %1409 = vrot.lane.b32.xlu1 %v1334_v61, %s11784_s16  ;;  %v2472_v15 = vld [vmem:[#allocation4 + $0x388] sm:$0xff]  ;;  %v16312_v13 = vld [vmem:[#allocation78_spill] sm:$0xff] }
 0x27a   : > { %5136 = vmatpush1.bf16.msra.mxu1 %v10097_v32  ;;  %v2464_v61 = vld [vmem:[#allocation4 + $0x348] sm:$0xff]  ;;  %v10201_v6 = vcombine.low %v2472_v15, %v2476_v24 }
 0x27b   : > { %5137 = vmatprep.subr.bf16.mxu1 %v10090_v35  ;;  %v10202_v35 = vcombine.high %v2472_v15, %v2476_v24 }
 0x27c   : > { %v13566_v29 = vpop.permute.xlu0 %1415  ;;  %v13568_v38 = vpop.permute.xlu1 %1401 }
 0x27d   : > { %1688 = vrot.lane.b32.xlu0 %v1595_v36, %s11785_s17  ;;  %1672 = vrot.lane.b32.xlu1 %v1587_v25, %s11785_s17  ;;  %v2468_v36 = vld [vmem:[#allocation4 + $0x368] sm:$0xff] }
 0x27e   : > { %5138 = vmatpush1.bf16.msra.mxu1 %v10089_v2  ;;  %v10194_v25 = vcombine.high %v2464_v61, %v2468_v36 }
 0x27f   : > { %5139 = vmatprep.subr.bf16.mxu1 %v10210_v55  ;;  %v2456_v55 = vld [vmem:[#allocation4 + $0x308] sm:$0xff] }
 0x280   : > { %v13576_v45 = vpop.permute.xlu0 %1413  ;;  %v13578_v32 = vpop.permute.xlu1 %1399 }
 0x281   : > { %1917 = vrot.lane.b32.xlu0 %v1824_v21, %s11786_s18  ;;  %1901 = vrot.lane.b32.xlu1 %v1816_v33, %s11786_s18  ;;  %v2460_v21 = vld [vmem:[#allocation4 + $0x328] sm:$0xff]  ;;  %v10193_v33 = vcombine.low %v2464_v61, %v2468_v36 }
 0x282   : > { %5140 = vmatpush2.bf16.msra.mxu1 %v10209_v48  ;;  %v10186_v15 = vcombine.high %v2456_v55, %v2460_v21  ;;  %v2448_v48 = vld [vmem:[#allocation4 + $0x2c8] sm:$0xff]  ;;  %v10185_v37 = vcombine.low %v2456_v55, %v2460_v21  ;;  %v611_v55 = vsel %vm591_vm0, %v13465_v57, %v16311_v47  ;;  %v604_v47 = vsel %vm591_vm0, %v13477_v31, %v13467_v26 }
 0x283   : > { %5141 = vmatprep.subr.bf16.mxu1 %v10202_v35  ;;  %v2432_v21 = vld [vmem:[#allocation4 + $0x248] sm:$0xff] }
 0x284   : > { %v13586_v19 = vpop.permute.xlu0 %768  ;;  %v13588_v2 = vpop.permute.xlu1 %754 }
 0x285   : > { %16307 = vst [vmem:[#allocation7_spill] sm:$0xff] %v13586_v19  ;;  %16308 = vst [vmem:[#allocation8_spill] sm:$0xff] %v13588_v2  ;;  %2146 = vrot.lane.b32.xlu0 %v2053_v16, %s11787_s23  ;;  %2130 = vrot.lane.b32.xlu1 %v2045_v0, %s11787_s23  ;;  %v2452_v2 = vld [vmem:[#allocation4 + $0x2e8] sm:$0xff] }
 0x286   : > { %5142 = vmatpush2.bf16.msra.mxu1 %v10201_v6  ;;  %v10178_v16 = vcombine.high %v2448_v48, %v2452_v2  ;;  %v2440_v19 = vld [vmem:[#allocation4 + $0x288] sm:$0xff]  ;;  %v10177_v61 = vcombine.low %v2448_v48, %v2452_v2  ;;  %v610_v48 = vsel %vm591_vm0, %v13475_v62, %v13465_v57  ;;  %v814_v62 = vsel %vm800_vm1, %v13493_v28, %v12856_v18 }
 0x287   : > { %5143 = vmatprep.subr.bf16.mxu1 %v10194_v25  ;;  %v2444_v0 = vld [vmem:[#allocation4 + $0x2a8] sm:$0xff] }
 0x288   : > { %v13594_v60 = vpop.permute.xlu0 %1680  ;;  %v13596_v24 = vpop.permute.xlu1 %1664  ;;  %v10170_v25 = vcombine.high %v2440_v19, %v2444_v0 }
 0x28a   : > { %5144 = vmatpush2.bf16.msra.mxu1 %v10193_v33  ;;  %v2436_v33 = vld [vmem:[#allocation4 + $0x268] sm:$0xff] }
 0x28b   : > { %5145 = vmatprep.subr.bf16.mxu1 %v10186_v15  ;;  %v429_v15 = vmul.f32 %v16313_v4, %v16312_v13  ;;  %v10169_v4 = vcombine.low %v2440_v19, %v2444_v0  ;;  %v1029_v19 = vsel %vm1009_vm2, %v13512_v50, %v13016_v63  ;;  %v2424_v0 = vld [vmem:[#allocation4 + $0x208] sm:$0xff]  ;;  %v1238_v63 = vsel %vm1218_vm3, %v13532_v59, %v13068_v49 }
 0x28c   : > { %v13598_v40 = vpop.permute.xlu0 %1678  ;;  %v13600_v35 = vpop.permute.xlu1 %1662 }
 0x28d   : > { %v666_v7 = vadd.f32 %v611_v55, %v429_v15  ;;  %v813_v15 = vsel %vm800_vm1, %v13504_v58, %v13493_v28  ;;  %v1232_v58 = vsel %vm1218_vm3, %v13534_v11, %v13071_v53  ;;  %v1441_v53 = vsel %vm1427_vm4, %v13568_v38, %v13101_v51 }
 0x28e   : > { %5146 = vmatpush2.bf16.msra.mxu1 %v10185_v37  ;;  %v16314_v37 = vld [vmem:[#allocation108_spill] sm:$0xff]  ;;  %v1710_v51 = vsel %vm1694_vm5, %v13596_v24, %v13141_v5  ;;  %v1440_v5 = vsel %vm1427_vm4, %v13578_v32, %v13568_v38 }
 0x28f   : > { %5147 = vmatprep.subr.bf16.mxu1 %v10178_v16  ;;  %v605_v2 = vsel %vm591_vm0, %v13467_v26, %v16314_v37  ;;  %v16315_v16 = vld [vmem:[#allocation28_spill] sm:$0xff]  ;;  %v10162_v26 = vcombine.high %v2432_v21, %v2436_v33 }
 0x290   : > { %v13602_v36 = vpop.permute.xlu0 %977  ;;  %v13604_v6 = vpop.permute.xlu1 %963  ;;  %v421_v37 = vmul.f32 %v16315_v16, %v16240_v14  ;;  %v659_v31 = vadd.f32 %v605_v2, %v422_v34  ;;  %v1023_v34 = vsel %vm1009_vm2, %v13514_v54, %v13018_v20 }
 0x291   : > { %16309 = vst [vmem:[#allocation21_spill] sm:$0xff] %v13602_v36  ;;  %16310 = vst [vmem:[#allocation14_spill] sm:$0xff] %v13604_v6  ;;  %v428_v6 = vmul.f32 %v16315_v16, %v16312_v13  ;;  %v820_v36 = vsel %vm800_vm1, %v13489_v17, %v12854_v41  ;;  %v819_v41 = vsel %vm800_vm1, %v13502_v46, %v13489_v17 }
 0x292   : > { %5148 = vmatpush2.bf16.msra.mxu1 %v10177_v61  ;;  %v2428_v61 = vld [vmem:[#allocation4 + $0x228] sm:$0xff]  ;;  %v658_v55 = vadd.f32 %v604_v47, %v421_v37  ;;  %v875_v18 = vadd.f32 %v820_v36, %v666_v7  ;;  %v1028_v46 = vsel %vm1009_vm2, %v13522_v39, %v13512_v50  ;;  %v10161_v17 = vcombine.low %v2432_v21, %v2436_v33 }
 0x293   : > { %5149 = vmatprep.subr.bf16.mxu1 %v10170_v25  ;;  %v665_v52 = vadd.f32 %v610_v48, %v428_v6  ;;  %v868_v6 = vadd.f32 %v814_v62, %v659_v31  ;;  %v10154_v20 = vcombine.high %v2424_v0, %v2428_v61  ;;  %v1447_v50 = vsel %vm1427_vm4, %v13566_v29, %v13099_v27 }
 0x294   : > { %v13632_v57 = vpop.permute.xlu0 %1909  ;;  %v13634_v13 = vpop.permute.xlu1 %1893  ;;  %v1084_v36 = vadd.f32 %v1029_v19, %v875_v18  ;;  %v867_v2 = vadd.f32 %v813_v15, %v658_v55  ;;  %v1237_v33 = vsel %vm1218_vm3, %v13546_v1, %v13532_v59  ;;  %v1717_v16 = vsel %vm1694_vm5, %v13594_v60, %v13139_v43 }
 0x295   : > { %v874_v7 = vadd.f32 %v819_v41, %v665_v52  ;;  %v1077_v48 = vadd.f32 %v1023_v34, %v868_v6  ;;  %v1022_v52 = vsel %vm1009_vm2, %v13524_v44, %v13514_v54  ;;  %v10153_v27 = vcombine.low %v2424_v0, %v2428_v61 }
 0x296   : > { %5150 = vmatpush2.bf16.msra.mxu1 %v10169_v4  ;;  %v1293_v49 = vadd.f32 %v1238_v63, %v1084_v36  ;;  %v1231_v54 = vsel %vm1218_vm3, %v13548_v3, %v13534_v11  ;;  %v10402_v59 = vcombine.high %v13542_v23, %v13544_v12  ;;  %v1076_v43 = vadd.f32 %v1022_v52, %v867_v2 }
 0x297   : > { %5151 = vmatprep.subr.bf16.mxu1 %v10162_v26  ;;  %v1083_v39 = vadd.f32 %v1028_v46, %v874_v7  ;;  %v1286_v21 = vadd.f32 %v1232_v58, %v1077_v48  ;;  %v1446_v37 = vsel %vm1427_vm4, %v13576_v45, %v13566_v29  ;;  %v1946_v11 = vsel %vm1923_vm6, %v13632_v57, %v13241_v10 }
 0x298   : > { %v1908_v28 = vpop.permute.xlu0 %1907  ;;  %v1892_v25 = vpop.permute.xlu1 %1891  ;;  %v1502_v44 = vadd.f32 %v1447_v50, %v1293_v49  ;;  %v1939_v26 = vsel %vm1923_vm6, %v13634_v13, %v13243_v22  ;;  %v1285_v31 = vadd.f32 %v1231_v54, %v1076_v43  ;;  %v1716_v29 = vsel %vm1694_vm5, %v13598_v40, %v13594_v60 }
 0x299   : > { %v1495_v1 = vadd.f32 %v1441_v53, %v1286_v21  ;;  %v1292_v3 = vadd.f32 %v1237_v33, %v1083_v39  ;;  %v1709_v10 = vsel %vm1694_vm5, %v13600_v35, %v13596_v24  ;;  %v1945_v22 = vsel %vm1923_vm6, %v1908_v28, %v13632_v57  ;;  %v16316_v33 = vld [vmem:[#allocation55_spill] sm:$0xff] }
 0x29a   : > { %5152 = vmatpush2.bf16.msra.mxu1 %v10161_v17  ;;  %v1773_v62 = vadd.f32 %v1717_v16, %v1502_v44  ;;  %v1494_v38 = vadd.f32 %v1440_v5, %v1285_v31  ;;  %v1938_v60 = vsel %vm1923_vm6, %v1892_v25, %v13634_v13  ;;  %v602_v16 = vsel %vm591_vm0, %v16316_v33, %v13556_v42  ;;  %v16318_v44 = vld [vmem:[#allocation50_spill] sm:$0xff] }
 0x29b   : > { %5153 = vmatprep.subr.bf16.mxu1 %v10154_v20  ;;  %v1766_v41 = vadd.f32 %v1710_v51, %v1495_v1  ;;  %v1501_v45 = vadd.f32 %v1446_v37, %v1292_v3  ;;  %v16319_v51 = vld [vmem:[#allocation19_spill] sm:$0xff]  ;;  %v16320_v37 = vld [vmem:[#allocation52_spill] sm:$0xff] }
 0x29c   : > { %v13678_v47 = vpop.permute.xlu0 %1186  ;;  %v13680_v4 = vpop.permute.xlu1 %1172  ;;  %v2002_v19 = vadd.f32 %v1946_v11, %v1773_v62  ;;  %v1765_v35 = vadd.f32 %v1709_v10, %v1494_v38  ;;  %v418_v11 = vmul.f32 %v16319_v51, %v16320_v37  ;;  %v16321_v3 = vld [vmem:[#allocation12_spill] sm:$0xff]  ;;  %v16322_v62 = vld [vmem:[#allocation15_spill] sm:$0xff]  ;;  %v16326_v10 = vld [vmem:[#allocation62_spill] sm:$0xff] }
 0x29d   : > { %v1995_v32 = vadd.f32 %v1939_v26, %v1766_v41  ;;  %v1772_v18 = vadd.f32 %v1716_v29, %v1501_v45  ;;  %v419_v5 = vmul.f32 %v16321_v3, %v16320_v37  ;;  %v16323_v26 = vld [vmem:[#allocation53_spill] sm:$0xff]  ;;  %v412_v29 = vmul.f32 %v16321_v3, %v16318_v44  ;;  %v16325_v45 = vld [vmem:[#allocation7_spill] sm:$0xff] }
 0x29e   : > { %5154 = vmatpush2.bf16.msra.mxu1 %v10153_v27  ;;  %v1994_v63 = vadd.f32 %v1938_v60, %v1765_v35  ;;  %v16317_v27 = vld [vmem:[#allocation68_spill] sm:$0xff]  ;;  %v596_v31 = vsel %vm591_vm0, %v16323_v26, %v16322_v62  ;;  %v16324_v41 = vld [vmem:[#allocation73_spill] sm:$0xff] }
 0x29f   : > { %5229 = vmatprep.subr.bf16.mxu1 %v10402_v59  ;;  %v2001_v34 = vadd.f32 %v1945_v22, %v1772_v18  ;;  %v603_v54 = vsel %vm591_vm0, %v13556_v42, %v16317_v27  ;;  %v411_v59 = vmul.f32 %v16319_v51, %v16318_v44  ;;  %v597_v42 = vsel %vm591_vm0, %v16322_v62, %v16324_v41  ;;  %v16329_v18 = vld [vmem:[#allocation60_spill] sm:$0xff] }
 0x2a0   : > { %v2139_v0 = vpop.permute.xlu0 %2138  ;;  %v2123_v55 = vpop.permute.xlu1 %2122  ;;  %v655_v22 = vadd.f32 %v602_v16, %v418_v11  ;;  %v16341_v62 = vld [vmem:[#allocation88_spill] sm:$0xff] }
 0x2a1   : > { %v2175_v61 = vsel %vm2152_vm7, %v2139_v0, %v13338_v30  ;;  %v2168_v24 = vsel %vm2152_vm7, %v2123_v55, %v13340_v56 }
 0x2a2   : > { %v2231_v40 = vadd.f32 %v2175_v61, %v2002_v19  ;;  %v2224_v15 = vadd.f32 %v2168_v24, %v1995_v32  ;;  %v811_v19 = vsel %vm800_vm1, %v16326_v10, %v16325_v45  ;;  %v656_v61 = vadd.f32 %v603_v54, %v419_v5  ;;  %v16339_v54 = vld [vmem:[#allocation81_spill] sm:$0xff] }
 0x2a3   : > { %v1223_v44 = vsel %vm1218_vm3, %v16339_v54, %v13680_v4  ;;  %v16354_v54 = vld [vmem:[#allocation54_spill] sm:$0xff] }
 0x2a4   : > { %v2283_v6 = vadd.f32 %v13215_v9, %v2231_v40  ;;  %v2137_v46 = vpop.permute.xlu0 %2136  ;;  %v2276_v57 = vadd.f32 %v13217_v8, %v2224_v15  ;;  %v2121_v17 = vpop.permute.xlu1 %2120  ;;  %v16330_v40 = vld [vmem:[#allocation83_spill] sm:$0xff]  ;;  %v648_v15 = vadd.f32 %v596_v31, %v411_v59  ;;  %v16340_v59 = vld [vmem:[#allocation102_spill] sm:$0xff] }
 0x2a5   : > { %v2174_v30 = vsel %vm2152_vm7, %v2137_v46, %v2139_v0  ;;  %v2167_v13 = vsel %vm2152_vm7, %v2121_v17, %v2123_v55  ;;  %v16327_v0 = vld [vmem:[#allocation80_spill] sm:$0xff]  ;;  %v16342_v31 = vld [vmem:[#allocation111_spill] sm:$0xff] }
 0x2a6   : > { %v2311_v7 = vmul.f32 0.1, %v2283_v6  ;;  %v2230_v36 = vadd.f32 %v2174_v30, %v2001_v34  ;;  %v2304_v58 = vmul.f32 0.1, %v2276_v57  ;;  %v2223_v28 = vadd.f32 %v2167_v13, %v1994_v63  ;;  %v16328_v55 = vld [vmem:[#allocation8_spill] sm:$0xff]  ;;  %v16334_v13 = vld [vmem:[#allocation14_spill] sm:$0xff] }
 0x2a7   : > { %v812_v38 = vsel %vm800_vm1, %v16325_v45, %v16327_v0  ;;  %v805_v60 = vsel %vm800_vm1, %v16329_v18, %v16328_v55  ;;  %v806_v24 = vsel %vm800_vm1, %v16328_v55, %v16330_v40  ;;  %v649_v34 = vadd.f32 %v597_v42, %v412_v29  ;;  %v16332_v46 = vld [vmem:[#allocation72_spill] sm:$0xff]  ;;  %v16343_v45 = vld [vmem:[#allocation87_spill] sm:$0xff]  ;;  %v16346_v55 = vld [vmem:[#allocation114_spill] sm:$0xff] }
 0x2a8   : > { %v2339_v25 = vmax.f32 %v2283_v6, %v2311_v7  ;;  %v2282_v56 = vadd.f32 %v13215_v9, %v2230_v36  ;;  %v1396_v20 = vpop.permute.xlu0 %1395  ;;  %v2332_v2 = vmax.f32 %v2276_v57, %v2304_v58  ;;  %v2275_v48 = vadd.f32 %v13217_v8, %v2223_v28  ;;  %v1382_v50 = vpop.permute.xlu1 %1381  ;;  %v16331_v6 = vld [vmem:[#allocation21_spill] sm:$0xff]  ;;  %v16333_v57 = vld [vmem:[#allocation84_spill] sm:$0xff]  ;;  %v16335_v58 = vld [vmem:[#allocation70_spill] sm:$0xff] }
 0x2a9   : > { %v1020_v63 = vsel %vm1009_vm2, %v16332_v46, %v16331_v6  ;;  %v1021_v30 = vsel %vm1009_vm2, %v16331_v6, %v16333_v57  ;;  %v864_v7 = vadd.f32 %v811_v19, %v655_v22  ;;  %v865_v36 = vadd.f32 %v812_v38, %v656_v61  ;;  %v16344_v19 = vld [vmem:[#allocation30_spill] sm:$0xff] }
 0x2aa   : > { %v2310_v39 = vmul.f32 0.1, %v2282_v56  ;;  %v2303_v52 = vmul.f32 0.1, %v2275_v48  ;;  %v13716_v49 = vpack.c.bf16 %v2339_v25, %v2332_v2  ;;  %v1014_v28 = vsel %vm1009_vm2, %v16335_v58, %v16334_v13  ;;  %v16336_v25 = vld [vmem:[#allocation91_spill] sm:$0xff]  ;;  %v16345_v22 = vld [vmem:[#allocation94_spill] sm:$0xff] }
 0x2ab   : > { %v857_v2 = vadd.f32 %v805_v60, %v648_v15  ;;  %v1073_v16 = vadd.f32 %v1020_v63, %v864_v7  ;;  %v1074_v27 = vadd.f32 %v1021_v30, %v865_v36  ;;  %v1438_v26 = vsel %vm1427_vm4, %v16341_v62, %v1396_v20  ;;  %v16348_v15 = vld [vmem:[#allocation96_spill] sm:$0xff]  ;;  %v16350_v30 = vld [vmem:[#allocation110_spill] sm:$0xff]  ;;  %v16351_v58 = vld [vmem:[#allocation103_spill] sm:$0xff] }
 0x2ac   : > { %v2338_v53 = vmax.f32 %v2282_v56, %v2310_v39  ;;  %v1657_v21 = vpop.permute.xlu0 %1656  ;;  %v2331_v43 = vmax.f32 %v2275_v48, %v2303_v52  ;;  %4953 = vmatprep.mubr.bf16.mxu0 %v13716_v49  ;;  %v1641_v1 = vpop.permute.xlu1 %1640  ;;  %v1015_v56 = vsel %vm1009_vm2, %v16334_v13, %v16336_v25  ;;  %v858_v48 = vadd.f32 %v806_v24, %v649_v34  ;;  %v16337_v39 = vld [vmem:[#allocation82_spill] sm:$0xff]  ;;  %v16349_v63 = vld [vmem:[#allocation104_spill] sm:$0xff]  ;;  %v16352_v25 = vld [vmem:[#allocation109_spill] sm:$0xff] }
 0x2ad   : > { %v1229_v52 = vsel %vm1218_vm3, %v16337_v39, %v13678_v47  ;;  %v1066_v11 = vadd.f32 %v1014_v28, %v857_v2  ;;  %v1439_v41 = vsel %vm1427_vm4, %v1396_v20, %v16342_v31  ;;  %v1432_v10 = vsel %vm1427_vm4, %v16343_v45, %v1382_v50  ;;  %v16347_v20 = vld [vmem:[#allocation93_spill] sm:$0xff] }
 0x2ae   : > { %v13745_v32 = vpack.c.bf16 %v2338_v53, %v2331_v43  ;;  %v16338_v53 = vld [vmem:[#allocation101_spill] sm:$0xff]  ;;  %v1224_v43 = vsel %vm1218_vm3, %v13680_v4, %v16340_v59  ;;  %v1067_v5 = vadd.f32 %v1015_v56, %v858_v48  ;;  %v1282_v42 = vadd.f32 %v1229_v52, %v1073_v16  ;;  %v16353_v16 = vld [vmem:[#allocation56_spill] sm:$0xff] }
 0x2af   : > { %v1230_v33 = vsel %vm1218_vm3, %v13678_v47, %v16338_v53  ;;  %v1433_v0 = vsel %vm1427_vm4, %v1382_v50, %v16344_v19  ;;  %v1275_v38 = vadd.f32 %v1223_v44, %v1066_v11  ;;  %v1706_v61 = vsel %vm1694_vm5, %v16345_v22, %v1657_v21  ;;  %v16355_v11 = vld [vmem:[#allocation71_spill] sm:$0xff]  ;;  %v16356_v62 = vld [vmem:[#allocation33_spill] sm:$0xff] }
 0x2b0   : > { %v13753_v35 = vpop.permute.xlu0 %589  ;;  %4954 = vmatmul.mubr.bf16.gmra.mxu0 %v13745_v32  ;;  %v13762_v17 = vpop.permute.xlu1 %575  ;;  %v1283_v29 = vadd.f32 %v1230_v33, %v1074_v27  ;;  %v1276_v4 = vadd.f32 %v1224_v43, %v1067_v5  ;;  %v1707_v18 = vsel %vm1694_vm5, %v1657_v21, %v16346_v55  ;;  %v1491_v60 = vadd.f32 %v1438_v26, %v1282_v42 }
 0x2b1   : > { %v1699_v24 = vsel %vm1694_vm5, %v16347_v20, %v1641_v1  ;;  %v1700_v34 = vsel %vm1694_vm5, %v1641_v1, %v16348_v15  ;;  %v1484_v46 = vadd.f32 %v1432_v10, %v1275_v38  ;;  %v16358_v10 = vld [vmem:[#allocation106_spill] sm:$0xff] }
 0x2b2   : > { %v1492_v40 = vadd.f32 %v1439_v41, %v1283_v29  ;;  %v1485_v50 = vadd.f32 %v1433_v0, %v1276_v4  ;;  %v1762_v21 = vadd.f32 %v1706_v61, %v1491_v60 }
 0x2b3   : > { %v1755_v56 = vadd.f32 %v1699_v24, %v1484_v46  ;;  %v2540_v46 = vld [vmem:[#allocation4 + $0x5a8] sm:$0xff] }
 0x2b4   : > { %v1886_v37 = vpop.permute.xlu0 %1885  ;;  %v1870_v47 = vpop.permute.xlu1 %1869  ;;  %v1763_v13 = vadd.f32 %v1707_v18, %v1492_v40  ;;  %v1756_v2 = vadd.f32 %v1700_v34, %v1485_v50  ;;  %v2536_v34 = vld [vmem:[#allocation4 + $0x588] sm:$0xff] }
 0x2b5   : > { %v1935_v57 = vsel %vm1923_vm6, %v16349_v63, %v1886_v37  ;;  %v1936_v7 = vsel %vm1923_vm6, %v1886_v37, %v16350_v30  ;;  %v1928_v28 = vsel %vm1923_vm6, %v16351_v58, %v1870_v47  ;;  %v1929_v1 = vsel %vm1923_vm6, %v1870_v47, %v16352_v25  ;;  %v16357_v47 = vld [vmem:[#allocation105_spill] sm:$0xff]  ;;  %v16360_v58 = vld [vmem:[#allocation22_spill] sm:$0xff] }
 0x2b6   : > { %v1991_v48 = vadd.f32 %v1935_v57, %v1762_v21  ;;  %v1992_v39 = vadd.f32 %v1936_v7, %v1763_v13  ;;  %v1984_v53 = vadd.f32 %v1928_v28, %v1755_v56  ;;  %v1985_v33 = vadd.f32 %v1929_v1, %v1756_v2  ;;  %v2528_v21 = vld [vmem:[#allocation4 + $0x548] sm:$0xff] }
 0x2b7   : > { %v10266_v30 = vcombine.high %v2536_v34, %v2540_v46  ;;  %v2532_v13 = vld [vmem:[#allocation4 + $0x568] sm:$0xff]  ;;  %v10265_v1 = vcombine.low %v2536_v34, %v2540_v46 }
 0x2b8   : > { %v13798_v6 = vpop.permute.xlu0 %798  ;;  %v13804_v36 = vpop.permute.xlu1 %784  ;;  %v16361_v28 = vld [vmem:[#allocation20_spill] sm:$0xff]  ;;  %v10258_v2 = vcombine.high %v2528_v21, %v2532_v13 }
 0x2b9   : > { %v16362_v25 = vcombine.low %v16360_v58, %v16361_v28  ;;  %v2496_v34 = vld [vmem:[#allocation4 + $0x448] sm:$0xff] }
 0x2ba   : > { %v2500_v46 = vld [vmem:[#allocation4 + $0x468] sm:$0xff] }
 0x2bc   : > { %v2115_v52 = vpop.permute.xlu0 %2114  ;;  %v2099_v59 = vpop.permute.xlu1 %2098 }
 0x2bd   : > { %v2164_v27 = vsel %vm2152_vm7, %v16353_v16, %v2115_v52  ;;  %v2165_v44 = vsel %vm2152_vm7, %v2115_v52, %v16354_v54  ;;  %v2157_v5 = vsel %vm2152_vm7, %v16355_v11, %v2099_v59  ;;  %v2158_v26 = vsel %vm2152_vm7, %v2099_v59, %v16356_v62  ;;  %v2524_v52 = vld [vmem:[#allocation4 + $0x528] sm:$0xff]  ;;  %v16364_v11 = vld [vmem:[#allocation78_spill] sm:$0xff] }
 0x2be   : > { %v2220_v43 = vadd.f32 %v2164_v27, %v1991_v48  ;;  %v2221_v37 = vadd.f32 %v2165_v44, %v1992_v39  ;;  %v2213_v31 = vadd.f32 %v2157_v5, %v1984_v53  ;;  %v2214_v41 = vadd.f32 %v2158_v26, %v1985_v33  ;;  %v2520_v39 = vld [vmem:[#allocation4 + $0x508] sm:$0xff]  ;;  %v16363_v53 = vld [vmem:[#allocation9_spill] sm:$0xff] }
 0x2bf   : > { %v427_v33 = vmul.f32 %v16363_v53, %v16240_v14  ;;  %v10257_v16 = vcombine.low %v2528_v21, %v2532_v13  ;;  %v10250_v54 = vcombine.high %v2520_v39, %v2524_v52  ;;  %v434_v5 = vmul.f32 %v16363_v53, %v16364_v11  ;;  %v2492_v53 = vld [vmem:[#allocation4 + $0x428] sm:$0xff] }
 0x2c0   : > { %v2272_v42 = vadd.f32 %v16357_v47, %v2220_v43  ;;  %v2273_v29 = vadd.f32 %v16357_v47, %v2221_v37  ;;  %v13820_v45 = vpop.permute.xlu0 %1007  ;;  %v2265_v19 = vadd.f32 %v16358_v10, %v2213_v31  ;;  %v2266_v0 = vadd.f32 %v16358_v10, %v2214_v41  ;;  %v13824_v38 = vpop.permute.xlu1 %993  ;;  %v2512_v43 = vld [vmem:[#allocation4 + $0x4c8] sm:$0xff] }
 0x2c1   : > { %v664_v44 = vadd.f32 %v13762_v17, %v427_v33  ;;  %v2516_v37 = vld [vmem:[#allocation4 + $0x4e8] sm:$0xff]  ;;  %v10249_v26 = vcombine.low %v2520_v39, %v2524_v52  ;;  %v671_v47 = vadd.f32 %v13753_v35, %v434_v5 }
 0x2c2   : > { %v2300_v4 = vmul.f32 0.1, %v2272_v42  ;;  %v2301_v22 = vmul.f32 0.1, %v2273_v29  ;;  %v2293_v61 = vmul.f32 0.1, %v2265_v19  ;;  %v10242_v41 = vcombine.high %v2512_v43, %v2516_v37 }
 0x2c3   : > { %v2294_v55 = vmul.f32 0.1, %v2266_v0  ;;  %v873_v62 = vadd.f32 %v13804_v36, %v664_v44  ;;  %v2504_v10 = vld [vmem:[#allocation4 + $0x488] sm:$0xff] }
 0x2c4   : > { %v2328_v18 = vmax.f32 %v2272_v42, %v2300_v4  ;;  %v2329_v60 = vmax.f32 %v2273_v29, %v2301_v22  ;;  %v13826_v40 = vpop.permute.xlu0 %1216  ;;  %v2321_v20 = vmax.f32 %v2265_v19, %v2293_v61  ;;  %v13828_v15 = vpop.permute.xlu1 %1202  ;;  %v2508_v19 = vld [vmem:[#allocation4 + $0x4a8] sm:$0xff]  ;;  %v10241_v22 = vcombine.low %v2512_v43, %v2516_v37 }
 0x2c5   : > { %v2322_v24 = vmax.f32 %v2266_v0, %v2294_v55  ;;  %v1082_v42 = vadd.f32 %v13824_v38, %v873_v62  ;;  %v880_v0 = vadd.f32 %v13798_v6, %v671_v47  ;;  %v10233_v58 = vcombine.low %v2504_v10, %v2508_v19  ;;  %v2488_v52 = vld [vmem:[#allocation4 + $0x408] sm:$0xff] }
 0x2c6   : > { %v13830_v50 = vpack.c.bf16 %v2328_v18, %v2321_v20  ;;  %v10234_v18 = vcombine.high %v2504_v10, %v2508_v19  ;;  %v10218_v37 = vcombine.high %v2488_v52, %v2492_v53  ;;  %v10217_v10 = vcombine.low %v2488_v52, %v2492_v53  ;;  %v13889_v52 = vld [vmem:[#allocation4 + $0x948] sm:$0xff] }
 0x2c7   : > { %v13832_v63 = vpack.c.bf16 %v2329_v60, %v2322_v24  ;;  %v1291_v4 = vadd.f32 %v13828_v15, %v1082_v42  ;;  %v1089_v60 = vadd.f32 %v13820_v45, %v880_v0  ;;  %v13891_v53 = vld [vmem:[#allocation4 + $0x968] sm:$0xff] }
 0x2c8   : > { %16359 = vst [vmem:[#allocation24_spill] sm:$0xff] %v13830_v50  ;;  %v13834_v57 = vpop.permute.xlu0 %1425  ;;  %v13837_v7 = vpop.permute.xlu1 %1411 }
 0x2c9   : > { %5049 = vmatprep.mubr.bf16.mxu0 %v13832_v63  ;;  %v1500_v20 = vadd.f32 %v13837_v7, %v1291_v4  ;;  %v1298_v21 = vadd.f32 %v13826_v40, %v1089_v60 }
 0x2ca   : > { %5050 = vmatmul.mubr.bf16.vlgmr.msra.gmra.mxu0 %v13830_v50 }
 0x2cb   : > { %5177 = vmatpush1.bf16.msra.mxu0 %v16362_v25 }
 0x2cc   : > { %v1677_v56 = vpop.permute.xlu0 %1676  ;;  %5178 = vmatprep.subr.bf16.mxu0 %v10266_v30  ;;  %v13843_v48 = vpop.permute.xlu1 %1674 }
 0x2cd   : > { %v1715_v61 = vsel %vm1694_vm5, %v13843_v48, %v1677_v56  ;;  %v1507_v56 = vadd.f32 %v13834_v57, %v1298_v21 }
 0x2ce   : > { %v1771_v13 = vadd.f32 %v1715_v61, %v1500_v20 }
 0x2cf   : > { %5179 = vmatpush1.bf16.msra.mxu0 %v10265_v1  ;;  %v10226_v1 = vcombine.high %v2496_v34, %v2500_v46 }
 0x2d0   : > { %v1693_v27 = vpop.permute.xlu0 %1692  ;;  %5180 = vmatprep.subr.bf16.mxu0 %v10258_v2  ;;  %v13848_v59 = vpop.permute.xlu1 %1690 }
 0x2d1   : > { %v1722_v28 = vsel %vm1694_vm5, %v13848_v59, %v1693_v27  ;;  %v10225_v27 = vcombine.low %v2496_v34, %v2500_v46 }
 0x2d3   : > { %5181 = vmatpush1.bf16.msra.mxu0 %v10257_v16 }
 0x2d4   : > { %v1906_v31 = vpop.permute.xlu0 %1905  ;;  %5182 = vmatprep.subr.bf16.mxu0 %v10250_v54  ;;  %v13855_v29 = vpop.permute.xlu1 %1903  ;;  %v1778_v54 = vadd.f32 %v1722_v28, %v1507_v56  ;;  %v2596_v28 = vld [vmem:[#allocation4 + $0x768] sm:$0xff] }
 0x2d5   : > { %v1944_v30 = vsel %vm1923_vm6, %v13855_v29, %v1906_v31  ;;  %v2608_v31 = vld [vmem:[#allocation4 + $0x7c8] sm:$0xff] }
 0x2d6   : > { %v2000_v2 = vadd.f32 %v1944_v30, %v1771_v13  ;;  %v13887_v56 = vld [vmem:[#allocation4 + $0x9a8] sm:$0xff] }
 0x2d7   : > { %5183 = vmatpush1.bf16.msra.mxu0 %v10249_v26 }
 0x2d8   : > { %v1922_v55 = vpop.permute.xlu0 %1921  ;;  %5184 = vmatprep.subr.bf16.mxu0 %v10242_v41  ;;  %v13863_v24 = vpop.permute.xlu1 %1919  ;;  %v2612_v41 = vld [vmem:[#allocation4 + $0x7e8] sm:$0xff] }
 0x2d9   : > { %v1951_v33 = vsel %vm1923_vm6, %v13863_v24, %v1922_v55  ;;  %v10338_v0 = vcombine.high %v2608_v31, %v2612_v41  ;;  %v2600_v55 = vld [vmem:[#allocation4 + $0x788] sm:$0xff]  ;;  %v10337_v20 = vcombine.low %v2608_v31, %v2612_v41 }
 0x2da   : > { %v2007_v5 = vadd.f32 %v1951_v33, %v1778_v54  ;;  %v13893_v54 = vld [vmem:[#allocation4 + $0x908] sm:$0xff] }
 0x2db   : > { %5185 = vmatpush1.bf16.msra.mxu0 %v10241_v22  ;;  %v13907_v31 = vld [vmem:[#allocation4 + $0x728] sm:$0xff] }
 0x2dc   : > { %v2135_v25 = vpop.permute.xlu0 %2134  ;;  %5186 = vmatprep.subr.bf16.mxu0 %v10234_v18  ;;  %v13871_v39 = vpop.permute.xlu1 %2132  ;;  %v2604_v18 = vld [vmem:[#allocation4 + $0x7a8] sm:$0xff] }
 0x2dd   : > { %v2173_v16 = vsel %vm2152_vm7, %v13871_v39, %v2135_v25  ;;  %v10330_v46 = vcombine.high %v2600_v55, %v2604_v18  ;;  %v13883_v25 = vld [vmem:[#allocation4 + $0x988] sm:$0xff] }
 0x2de   : > { %v2229_v44 = vadd.f32 %v2173_v16, %v2000_v2  ;;  %v10329_v2 = vcombine.low %v2600_v55, %v2604_v18  ;;  %v13909_v41 = vld [vmem:[#allocation4 + $0x8c8] sm:$0xff]  ;;  %v16368_v55 = vld [vmem:[#allocation97_spill] sm:$0xff] }
 0x2df   : > { %5187 = vmatpush1.bf16.msra.mxu0 %v10233_v58  ;;  %v2592_v58 = vld [vmem:[#allocation4 + $0x748] sm:$0xff] }
 0x2e0   : > { %v2151_v43 = vpop.permute.xlu0 %2150  ;;  %5188 = vmatprep.subr.bf16.mxu0 %v10226_v1  ;;  %v2281_v62 = vadd.f32 %v13217_v8, %v2229_v44  ;;  %v13878_v26 = vpop.permute.xlu1 %2148  ;;  %v10322_v16 = vcombine.high %v2592_v58, %v2596_v28  ;;  %v13895_v44 = vld [vmem:[#allocation4 + $0x928] sm:$0xff] }
 0x2e1   : > { %v2180_v47 = vsel %vm2152_vm7, %v13878_v26, %v2151_v43  ;;  %v433_v43 = vmul.f32 %v16321_v3, %v16364_v11 }
 0x2e2   : > { %v2236_v42 = vadd.f32 %v2180_v47, %v2007_v5  ;;  %v2309_v4 = vmul.f32 0.1, %v2281_v62  ;;  %v426_v47 = vmul.f32 %v16321_v3, %v16240_v14  ;;  %v10321_v3 = vcombine.low %v2592_v58, %v2596_v28 }
 0x2e3   : > { %5189 = vmatpush1.bf16.msra.mxu0 %v10225_v27  ;;  %v432_v27 = vmul.f32 %v16319_v51, %v16364_v11 }
 0x2e4   : > { %v588_v19 = vpop.permute.xlu0 %587  ;;  %5190 = vmatprep.subr.bf16.mxu0 %v10218_v37  ;;  %v2288_v22 = vadd.f32 %v13215_v9, %v2236_v42  ;;  %v574_v61 = vpop.permute.xlu1 %573  ;;  %v2337_v30 = vmax.f32 %v2281_v62, %v2309_v4  ;;  %v425_v37 = vmul.f32 %v16319_v51, %v16240_v14  ;;  %v13905_v62 = vld [vmem:[#allocation4 + $0x708] sm:$0xff]  ;;  %v16366_v42 = vld [vmem:[#allocation59_spill] sm:$0xff]  ;;  %v10394_v51 = vcombine.high %v13883_v25, %v13887_v56 }
 0x2e5   : > { %v13922_v4 = vld [vmem:[#allocation4 + $0x6c8] sm:$0xff]  ;;  %v10313_v58 = vcombine.low %v13905_v62, %v13907_v31  ;;  %v10314_v28 = vcombine.high %v13905_v62, %v13907_v31  ;;  %v608_v18 = vsel %vm591_vm0, %v16368_v55, %v574_v61 }
 0x2e6   : > { %v2316_v60 = vmul.f32 0.1, %v2288_v22  ;;  %v16370_v55 = vld [vmem:[#allocation112_spill] sm:$0xff] }
 0x2e7   : > { %5191 = vmatpush1.bf16.msra.mxu0 %v10217_v10  ;;  %v609_v10 = vsel %vm591_vm0, %v574_v61, %v13762_v17 }
 0x2e8   : > { %v797_v34 = vpop.permute.xlu0 %796  ;;  %5192 = vmatprep.subr.bf16.mxu0 %v10338_v0  ;;  %v2344_v21 = vmax.f32 %v2288_v22, %v2316_v60  ;;  %v783_v13 = vpop.permute.xlu1 %782  ;;  %v13920_v0 = vld [vmem:[#allocation4 + $0x8e8] sm:$0xff] }
 0x2e9   : > { %v13924_v22 = vld [vmem:[#allocation4 + $0x6e8] sm:$0xff]  ;;  %v824_v11 = vsel %vm800_vm1, %v797_v34, %v13798_v6  ;;  %v818_v50 = vsel %vm800_vm1, %v783_v13, %v13804_v36  ;;  %v16373_v36 = vld [vmem:[#allocation63_spill] sm:$0xff] }
 0x2ea   : > { %v13885_v1 = vpack.c.bf16 %v2344_v21, %v2337_v30  ;;  %v13932_v60 = vld [vmem:[#allocation4 + $0x688] sm:$0xff]  ;;  %v615_v21 = vsel %vm591_vm0, %v588_v19, %v13753_v35  ;;  %v10306_v35 = vcombine.high %v13922_v4, %v13924_v22  ;;  %v10305_v62 = vcombine.low %v13922_v4, %v13924_v22 }
 0x2eb   : > { %5193 = vmatpush2.bf16.msra.mxu0 %v10337_v20  ;;  %v13934_v20 = vld [vmem:[#allocation4 + $0x6a8] sm:$0xff]  ;;  %v670_v61 = vadd.f32 %v615_v21, %v433_v43 }
 0x2ec   : > { %16365 = vst [vmem:[#allocation27_spill] sm:$0xff] %v13885_v1  ;;  %v1006_v33 = vpop.permute.xlu0 %1005  ;;  %5194 = vmatprep.subr.bf16.mxu0 %v10330_v46  ;;  %10513 = vmatmul.mubr.msk.bf16.gmra.mxu1 %vm4879_vm9, %v13885_v1  ;;  %v992_v5 = vpop.permute.xlu1 %991  ;;  %v16367_v46 = vld [vmem:[#allocation99_spill] sm:$0xff]  ;;  %v10297_v31 = vcombine.low %v13932_v60, %v13934_v20  ;;  %v16371_v1 = vld [vmem:[#allocation65_spill] sm:$0xff]  ;;  %v10298_v4 = vcombine.high %v13932_v60, %v13934_v20  ;;  %v16389_v20 = vld [vmem:[#allocation92_spill] sm:$0xff] }
 0x2ed   : > { %5155 = vmatprep.mubr.bf16.mxu1 %v16366_v42  ;;  %v614_v30 = vsel %vm591_vm0, %v16367_v46, %v588_v19  ;;  %v16369_v19 = vld [vmem:[#allocation69_spill] sm:$0xff]  ;;  %v817_v46 = vsel %vm800_vm1, %v16370_v55, %v783_v13  ;;  %v662_v42 = vadd.f32 %v608_v18, %v425_v37  ;;  %v1032_v6 = vsel %vm1009_vm2, %v16371_v1, %v1006_v33 }
 0x2ee   : > { %v669_v17 = vadd.f32 %v614_v30, %v432_v27  ;;  %v879_v27 = vadd.f32 %v824_v11, %v670_v61  ;;  %v1033_v43 = vsel %vm1009_vm2, %v1006_v33, %v13820_v45  ;;  %v16372_v30 = vld [vmem:[#allocation58_spill] sm:$0xff]  ;;  %v1027_v1 = vsel %vm1009_vm2, %v992_v5, %v13824_v38  ;;  %v16376_v33 = vld [vmem:[#allocation75_spill] sm:$0xff]  ;;  %v13987_v38 = vld [vmem:[#allocation4 + $0x668] sm:$0xff] }
 0x2ef   : > { %5195 = vmatpush2.bf16.msra.mxu0 %v10329_v2  ;;  %v1026_v21 = vsel %vm1009_vm2, %v16372_v30, %v992_v5  ;;  %v871_v37 = vadd.f32 %v817_v46, %v662_v42  ;;  %v16375_v11 = vcombine.low %v13542_v23, %v13544_v12  ;;  %v16377_v12 = vld [vmem:[#allocation67_spill] sm:$0xff]  ;;  %v16388_v60 = vcombine.low %v13893_v54, %v13895_v44 }
 0x2f0   : > { %v1215_v2 = vpop.permute.xlu0 %1214  ;;  %5196 = vmatprep.subr.bf16.mxu0 %v10322_v16  ;;  %v1201_v14 = vpop.permute.xlu1 %1200  ;;  %v823_v16 = vsel %vm800_vm1, %v16369_v19, %v797_v34  ;;  %v663_v19 = vadd.f32 %v609_v10, %v426_v47  ;;  %v16374_v10 = vld [vmem:[#allocation76_spill] sm:$0xff]  ;;  %v1088_v5 = vadd.f32 %v1033_v43, %v879_v27  ;;  %v16381_v43 = vcombine.high %v13889_v52, %v13891_v53 }
 0x2f1   : > { %v878_v22 = vadd.f32 %v823_v16, %v669_v17  ;;  %v1242_v45 = vsel %vm1218_vm3, %v1215_v2, %v13826_v40  ;;  %v1080_v42 = vadd.f32 %v1026_v21, %v871_v37  ;;  %v1236_v23 = vsel %vm1218_vm3, %v1201_v14, %v13828_v15  ;;  %v16382_v21 = vld [vmem:[#allocation74_spill] sm:$0xff] }
 0x2f2   : > { %v872_v47 = vadd.f32 %v818_v50, %v663_v19  ;;  %v13985_v50 = vld [vmem:[#allocation4 + $0x648] sm:$0xff]  ;;  %v1297_v19 = vadd.f32 %v1242_v45, %v1088_v5  ;;  %vm9993_vm1 = vcmask 453632  }
 0x2f3   : > { %5197 = vmatpush2.bf16.msra.mxu0 %v10321_v3  ;;  %v1241_v3 = vsel %vm1218_vm3, %v16374_v10, %v1215_v2  ;;  %v1087_v18 = vadd.f32 %v1032_v6, %v878_v22 }
 0x2f4   : > { %v1424_v34 = vpop.permute.xlu0 %1423  ;;  %5198 = vmatprep.subr.bf16.mxu0 %v10314_v28  ;;  %5156 = vmatmul.mubr.bf16.vlgmr.msra.gmra.mxu1 %v16373_v36  ;;  %v1410_v13 = vpop.permute.xlu1 %1409  ;;  %v1235_v28 = vsel %vm1218_vm3, %v16376_v33, %v1201_v14  ;;  %v1081_v40 = vadd.f32 %v1027_v1, %v872_v47  ;;  %v16379_v14 = vcombine.low %v13883_v25, %v13887_v56  ;;  %v16383_v47 = vld [vmem:[#allocation86_spill] sm:$0xff] }
 0x2f5   : > { %5230 = vmatpush1.bf16.msra.mxu1 %v16375_v11  ;;  %5165 = vmatprep.mubr.bf16.mxu1 %v13716_v49  ;;  %v1450_v46 = vsel %vm1427_vm4, %v16377_v12, %v1424_v34  ;;  %v1296_v2 = vadd.f32 %v1241_v3, %v1087_v18  ;;  %v1451_v17 = vsel %vm1427_vm4, %v1424_v34, %v13834_v57  ;;  %v16380_v57 = vld [vmem:[#allocation79_spill] sm:$0xff]  ;;  %v2552_v3 = vld [vmem:[#allocation4 + $0x608] sm:$0xff] }
 0x2f6   : > { %5231 = vmatprep.subr.bf16.mxu1 %v10394_v51  ;;  %v16378_v51 = vld [vmem:[#allocation64_spill] sm:$0xff]  ;;  %v1289_v6 = vadd.f32 %v1235_v28, %v1080_v42  ;;  %v1445_v15 = vsel %vm1427_vm4, %v1410_v13, %v13837_v7  ;;  %v1290_v22 = vadd.f32 %v1236_v23, %v1081_v40  ;;  %v1506_v7 = vadd.f32 %v1451_v17, %v1297_v19  ;;  %v16387_v17 = vld [vmem:[#allocation89_spill] sm:$0xff] }
 0x2f7   : > { %5199 = vmatpush2.bf16.msra.mxu0 %v10313_v58  ;;  %v1444_v61 = vsel %vm1427_vm4, %v16378_v51, %v1410_v13  ;;  %v10290_v58 = vcombine.high %v13985_v50, %v13987_v38  ;;  %v1505_v27 = vadd.f32 %v1450_v46, %v1296_v2  ;;  %v2556_v11 = vld [vmem:[#allocation4 + $0x628] sm:$0xff]  ;;  %v10369_v42 = vcombine.low %v13909_v41, %v13920_v0 }
 0x2f8   : > { %v1689_v16 = vpop.permute.xlu0 %1688  ;;  %v1673_v55 = vpop.permute.xlu1 %1672  ;;  %5200 = vmatprep.subr.bf16.mxu0 %v10306_v35  ;;  %v1498_v30 = vadd.f32 %v1444_v61, %v1289_v6  ;;  %v1499_v37 = vadd.f32 %v1445_v15, %v1290_v22  ;;  %v2632_v12 = vld [vmem:[#allocation4 + $0x888] sm:$0xff] }
 0x2f9   : > { %5232 = vmatpush1.bf16.msra.mxu1 %v16379_v14  ;;  %v1720_v34 = vsel %vm1694_vm5, %v16380_v57, %v1689_v16  ;;  %v1721_v35 = vsel %vm1694_vm5, %v1689_v16, %v13848_v59  ;;  %v1713_v25 = vsel %vm1694_vm5, %v16382_v21, %v1673_v55  ;;  %v1714_v56 = vsel %vm1694_vm5, %v1673_v55, %v13843_v48  ;;  %v2636_v46 = vld [vmem:[#allocation4 + $0x8a8] sm:$0xff] }
 0x2fa   : > { %5233 = vmatprep.subr.bf16.mxu1 %v16381_v43  ;;  %v1776_v18 = vadd.f32 %v1720_v34, %v1505_v27  ;;  %v1777_v45 = vadd.f32 %v1721_v35, %v1506_v7  ;;  %v16384_v48 = vcombine.low %v13889_v52, %v13891_v53  ;;  %v1769_v5 = vadd.f32 %v1713_v25, %v1498_v30 }
 0x2fb   : > { %5201 = vmatpush2.bf16.msra.mxu0 %v10305_v62  ;;  %v16385_v62 = vld [vmem:[#allocation85_spill] sm:$0xff]  ;;  %v10282_v16 = vcombine.high %v2552_v3, %v2556_v11  ;;  %v10281_v57 = vcombine.low %v2552_v3, %v2556_v11  ;;  %v2736_v3 = vld [vmem:[#allocation4 + $0xbc8] sm:$0xff] }
 0x2fc   : > { %v1918_v13 = vpop.permute.xlu0 %1917  ;;  %5166 = vmatmul.mubr.bf16.gmra.mxu1 %v13745_v32  ;;  %v1902_v10 = vpop.permute.xlu1 %1901  ;;  %5202 = vmatprep.subr.bf16.mxu0 %v10298_v4  ;;  %v16386_v4 = vcombine.high %v13893_v54, %v13895_v44  ;;  %v2624_v54 = vld [vmem:[#allocation4 + $0x848] sm:$0xff] }
 0x2fd   : > { %v1949_v1 = vsel %vm1923_vm6, %v16383_v47, %v1918_v13  ;;  %v1950_v59 = vsel %vm1923_vm6, %v1918_v13, %v13863_v24  ;;  %5234 = vmatpush1.bf16.msra.mxu1 %v16384_v48  ;;  %v1942_v33 = vsel %vm1923_vm6, %v16385_v62, %v1902_v10  ;;  %v1943_v28 = vsel %vm1923_vm6, %v1902_v10, %v13855_v29  ;;  %v2628_v44 = vld [vmem:[#allocation4 + $0x868] sm:$0xff] }
 0x2fe   : > { %v1770_v24 = vadd.f32 %v1714_v56, %v1499_v37  ;;  %5261 = vmatprep.mubr.bf16.mxu1 %v13832_v63  ;;  %5235 = vmatprep.subr.bf16.mxu1 %v16386_v4  ;;  %v2005_v23 = vadd.f32 %v1949_v1, %v1776_v18  ;;  %v2006_v52 = vadd.f32 %v1950_v59, %v1777_v45  ;;  %v2616_v56 = vld [vmem:[#allocation4 + $0x808] sm:$0xff]  ;;  %v16391_v45 = vld [vmem:[#allocation57_spill] sm:$0xff] }
 0x2ff   : > { %5203 = vmatpush2.bf16.msra.mxu0 %v10297_v31  ;;  %v10289_v29 = vcombine.low %v13985_v50, %v13987_v38  ;;  %v1998_v40 = vadd.f32 %v1942_v33, %v1769_v5  ;;  %v2776_v38 = vld [vmem:[#allocation4 + $0xd08] sm:$0xff]  ;;  %v10354_v21 = vcombine.high %v2624_v54, %v2628_v44 }
 0x300   : > { %v2147_v53 = vpop.permute.xlu0 %2146  ;;  %v1999_v2 = vadd.f32 %v1943_v28, %v1770_v24  ;;  %v2131_v55 = vpop.permute.xlu1 %2130  ;;  %5204 = vmatprep.subr.bf16.mxu0 %v10290_v58  ;;  %v10362_v58 = vcombine.high %v2632_v12, %v2636_v46  ;;  %v10506_v35 = vcombine.high %v2776_v38, %v2776_v38  ;;  %v2620_v13 = vld [vmem:[#allocation4 + $0x828] sm:$0xff]  ;;  %v10505_v62 = vcombine.low %v2776_v38, %v2776_v38 }
 0x301   : > { %v2178_v51 = vsel %vm2152_vm7, %v16387_v17, %v2147_v53  ;;  %v2179_v61 = vsel %vm2152_vm7, %v2147_v53, %v13878_v26  ;;  %5236 = vmatpush1.bf16.msra.mxu1 %v16388_v60  ;;  %v2171_v31 = vsel %vm2152_vm7, %v16389_v20, %v2131_v55  ;;  %v2172_v50 = vsel %vm2152_vm7, %v2131_v55, %v13871_v39  ;;  %v2740_v11 = vld [vmem:[#allocation4 + $0xbe8] sm:$0xff] }
 0x302   : > { %v2234_v19 = vadd.f32 %v2178_v51, %v2005_v23  ;;  %v2235_v6 = vadd.f32 %v2179_v61, %v2006_v52  ;;  %v2227_v15 = vadd.f32 %v2171_v31, %v1998_v40  ;;  %v2228_v14 = vadd.f32 %v2172_v50, %v1999_v2  ;;  %v2728_v33 = vld [vmem:[#allocation4 + $0xb88] sm:$0xff]  ;;  %v16393_v2 = vld [vmem:[#allocation90_spill] sm:$0xff] }
 0x303   : > { %v16390_v26 = vcombine.high %v13909_v41, %v13920_v0  ;;  %5205 = vmatpush2.bf16.msra.mxu0 %v10289_v29  ;;  %v10361_v41 = vcombine.low %v2632_v12, %v2636_v46  ;;  %v10346_v10 = vcombine.high %v2616_v56, %v2620_v13  ;;  %v10345_v18 = vcombine.low %v2616_v56, %v2620_v13  ;;  %v2732_v28 = vld [vmem:[#allocation4 + $0xba8] sm:$0xff]  ;;  %v2409_v56 = vld [vmem:[#allocation4 + $0x190] sm:$0xff] }
 0x304   : > { %v2286_v22 = vadd.f32 %v13215_v9, %v2234_v19  ;;  %v2287_v27 = vadd.f32 %v13215_v9, %v2235_v6  ;;  %v2279_v34 = vadd.f32 %v13217_v8, %v2227_v15  ;;  %v2280_v39 = vadd.f32 %v13217_v8, %v2228_v14  ;;  %5206 = vmatprep.subr.bf16.mxu0 %v10282_v16  ;;  %v2768_v5 = vld [vmem:[#allocation4 + $0xcc8] sm:$0xff]  ;;  %v16392_v16 = vld [vmem:[#allocation66_spill] sm:$0xff]  ;;  %v2413_v13 = vld [vmem:[#allocation4 + $0x1b0] sm:$0xff] }
 0x305   : > { %5237 = vmatprep.subr.bf16.mxu1 %v16390_v26  ;;  %v10353_v8 = vcombine.low %v2624_v54, %v2628_v44  ;;  %v10466_v48 = vcombine.high %v2736_v3, %v2740_v11  ;;  %v2772_v24 = vld [vmem:[#allocation4 + $0xce8] sm:$0xff]  ;;  %v10465_v4 = vcombine.low %v2736_v3, %v2740_v11  ;;  %v10458_v23 = vcombine.high %v2728_v33, %v2732_v28 }
 0x306   : > { %v2314_v43 = vmul.f32 0.1, %v2286_v22  ;;  %v2315_v7 = vmul.f32 0.1, %v2287_v27  ;;  %5238 = vmatpush1.bf16.msra.mxu1 %v10369_v42  ;;  %v2307_v0 = vmul.f32 0.1, %v2279_v34  ;;  %v10498_v52 = vcombine.high %v2768_v5, %v2772_v24 }
 0x307   : > { %v2308_v30 = vmul.f32 0.1, %v2280_v39  ;;  %5239 = vmatprep.subr.bf16.mxu1 %v10362_v58  ;;  %5207 = vmatpush2.bf16.msra.mxu0 %v10281_v57  ;;  %v4894_v42 = vsel %vm4886_vm8, %v10505_v62, 0  ;;  %v2720_v53 = vld [vmem:[#allocation4 + $0xb48] sm:$0xff]  ;;  %v10457_v40 = vcombine.low %v2728_v33, %v2732_v28  ;;  %v10497_v17 = vcombine.low %v2768_v5, %v2772_v24  ;;  %v16396_v62 = vld [vmem:[#allocation17_spill] sm:$0xff] }
 0x308   : > { %v2342_v25 = vmax.f32 %v2286_v22, %v2314_v43  ;;  %v2343_v9 = vmax.f32 %v2287_v27, %v2315_v7  ;;  %v2335_v37 = vmax.f32 %v2279_v34, %v2307_v0  ;;  %10514 = vmatprep.subr.msk.bf16.mxu0 %vm4886_vm8, %v10506_v35  ;;  %v2724_v12 = vld [vmem:[#allocation4 + $0xb68] sm:$0xff]  ;;  %v16394_v22 = vld [vmem:[#allocation95_spill] sm:$0xff]  ;;  %v16395_v35 = vmov 0   ;;  %v2417_v43 = vld [vmem:[#allocation4 + $0x1d0] sm:$0xff] }
 0x309   : > { %v2336_v47 = vmax.f32 %v2280_v39, %v2308_v30  ;;  %v2760_v46 = vld [vmem:[#allocation4 + $0xc88] sm:$0xff]  ;;  %v10450_v51 = vcombine.high %v2720_v53, %v2724_v12  ;;  %v10449_v20 = vcombine.low %v2720_v53, %v2724_v12  ;;  %v2421_v7 = vld [vmem:[#allocation4 + $0x1f0] sm:$0xff]  ;;  %v10139_v28 = vcombine.low %v2409_v56, %v2413_v13 }
 0x30a   : > { %5240 = vmatpush1.bf16.msra.mxu1 %v10361_v41  ;;  %v14059_v59 = vpack.c.bf16 %v2342_v25, %v2335_v37  ;;  %v2764_v29 = vld [vmem:[#allocation4 + $0xca8] sm:$0xff] }
 0x30b   : > { %5241 = vmatprep.subr.bf16.mxu1 %v10354_v21  ;;  %v14057_v1 = vpack.c.bf16 %v2343_v9, %v2336_v47  ;;  %v10490_v61 = vcombine.high %v2760_v46, %v2764_v29  ;;  %v2712_v55 = vld [vmem:[#allocation4 + $0xb08] sm:$0xff]  ;;  %v10489_v31 = vcombine.low %v2760_v46, %v2764_v29  ;;  %v10148_v21 = vcombine.high %v2417_v43, %v2421_v7 }
 0x30c   : > { %v2716_v19 = vld [vmem:[#allocation4 + $0xb28] sm:$0xff]  ;;  %v10147_v47 = vcombine.low %v2417_v43, %v2421_v7  ;;  %v2373_v43 = vld [vmem:[#allocation4 + $0x70] sm:$0xff] }
 0x30d   : > { %5059 = vmatprep.mubr.bf16.mxu0 %v14057_v1  ;;  %v2752_v6 = vld [vmem:[#allocation4 + $0xc48] sm:$0xff]  ;;  %v10442_v50 = vcombine.high %v2712_v55, %v2716_v19  ;;  %v10441_v27 = vcombine.low %v2712_v55, %v2716_v19  ;;  %v16397_v55 = vld [vmem:[#allocation27_spill] sm:$0xff] }
 0x30e   : > { %5242 = vmatpush1.bf16.msra.mxu1 %v10353_v8  ;;  %5060 = vmatmul.mubr.bf16.gmra.mxu0 %v14059_v59  ;;  %v2756_v60 = vld [vmem:[#allocation4 + $0xc68] sm:$0xff] }
 0x30f   : > { %5208 = vmatprep.mubr.bf16.mxu0 %v16391_v45  ;;  %5243 = vmatprep.subr.bf16.mxu1 %v10346_v10  ;;  %v10482_v38 = vcombine.high %v2752_v6, %v2756_v60  ;;  %v2704_v15 = vld [vmem:[#allocation4 + $0xac8] sm:$0xff]  ;;  %v10481_v54 = vcombine.low %v2752_v6, %v2756_v60  ;;  %v10140_v10 = vcombine.high %v2409_v56, %v2413_v13  ;;  %v16398_v6 = vld [vmem:[#allocation59_spill] sm:$0xff]  ;;  %v2365_v56 = vld [vmem:[#allocation4 + $0x30] sm:$0xff] }
 0x310   : > { %v2708_v14 = vld [vmem:[#allocation4 + $0xae8] sm:$0xff] }
 0x311   : > { %v2744_v26 = vld [vmem:[#allocation4 + $0xc08] sm:$0xff]  ;;  %v10434_v44 = vcombine.high %v2704_v15, %v2708_v14  ;;  %v10433_v41 = vcombine.low %v2704_v15, %v2708_v14  ;;  %v2377_v14 = vld [vmem:[#allocation4 + $0x90] sm:$0xff] }
 0x312   : > { %5244 = vmatpush1.bf16.msra.mxu1 %v10345_v18  ;;  %v2748_v58 = vld [vmem:[#allocation4 + $0xc28] sm:$0xff]  ;;  %v2401_v18 = vld [vmem:[#allocation4 + $0x150] sm:$0xff] }
 0x313   : > { %5245 = vmatprep.subr.bf16.mxu1 %v10466_v48  ;;  %v10474_v57 = vcombine.high %v2744_v26, %v2748_v58  ;;  %v2696_v34 = vld [vmem:[#allocation4 + $0xa88] sm:$0xff]  ;;  %v10473_v0 = vcombine.low %v2744_v26, %v2748_v58  ;;  %v2405_v48 = vld [vmem:[#allocation4 + $0x170] sm:$0xff] }
 0x314   : > { %v2700_v39 = vld [vmem:[#allocation4 + $0xaa8] sm:$0xff]  ;;  %v10132_v24 = vcombine.high %v2401_v18, %v2405_v48  ;;  %v10131_v12 = vcombine.low %v2401_v18, %v2405_v48  ;;  %v2381_v26 = vld [vmem:[#allocation4 + $0xb0] sm:$0xff] }
 0x315   : > { %v10426_v30 = vcombine.high %v2696_v34, %v2700_v39  ;;  %v2688_v25 = vld [vmem:[#allocation4 + $0xa48] sm:$0xff]  ;;  %v10425_v37 = vcombine.low %v2696_v34, %v2700_v39  ;;  %v2525_v34 = vld [vmem:[#allocation4 + $0x530] sm:$0xff] }
 0x316   : > { %5246 = vmatpush2.bf16.msra.mxu1 %v10465_v4  ;;  %5209 = vmatmul.mubr.bf16.vlgmr.msra.gmra.mxu0 %v16392_v16  ;;  %v2692_v9 = vld [vmem:[#allocation4 + $0xa68] sm:$0xff]  ;;  %v2545_v4 = vld [vmem:[#allocation4 + $0x5d0] sm:$0xff] }
 0x317   : > { %5289 = vmatpush1.bf16.msra.mxu0 %v4894_v42  ;;  %5218 = vmatprep.mubr.bf16.mxu0 %v16393_v2  ;;  %v10418_v8 = vcombine.high %v2688_v25, %v2692_v9  ;;  %v2680_v3 = vld [vmem:[#allocation4 + $0xa08] sm:$0xff]  ;;  %v10417_v33 = vcombine.low %v2688_v25, %v2692_v9  ;;  %v2549_v42 = vld [vmem:[#allocation4 + $0x5f0] sm:$0xff] }
 0x318   : > { %5247 = vmatprep.subr.bf16.mxu1 %v10458_v23  ;;  %5290 = vmatprep.subr.bf16.mxu0 %v10498_v52  ;;  %v2684_v11 = vld [vmem:[#allocation4 + $0xa28] sm:$0xff]  ;;  %v2393_v23 = vld [vmem:[#allocation4 + $0x110] sm:$0xff]  ;;  %v10276_v46 = vcombine.high %v2545_v4, %v2549_v42  ;;  %v10275_v19 = vcombine.low %v2545_v4, %v2549_v42 }
 0x319   : > { %v10410_v5 = vcombine.high %v2680_v3, %v2684_v11  ;;  %v2397_v52 = vld [vmem:[#allocation4 + $0x130] sm:$0xff]  ;;  %v10409_v53 = vcombine.low %v2680_v3, %v2684_v11  ;;  %v16399_v15 = vld [vmem:[#allocation24_spill] sm:$0xff] }
 0x31a   : > { %5248 = vmatpush2.bf16.msra.mxu1 %v10457_v40  ;;  %v10124_v29 = vcombine.high %v2393_v23, %v2397_v52  ;;  %v2537_v40 = vld [vmem:[#allocation4 + $0x590] sm:$0xff]  ;;  %v10123_v60 = vcombine.low %v2393_v23, %v2397_v52 }
 0x31b   : > { %5291 = vmatpush1.bf16.msra.mxu0 %v10497_v17  ;;  %5249 = vmatprep.subr.bf16.mxu1 %v10450_v51  ;;  %v2541_v17 = vld [vmem:[#allocation4 + $0x5b0] sm:$0xff] }
 0x31c   : > { %5292 = vmatprep.subr.bf16.mxu0 %v10490_v61  ;;  %v2385_v51 = vld [vmem:[#allocation4 + $0xd0] sm:$0xff]  ;;  %v10267_v58 = vcombine.low %v2537_v40, %v2541_v17 }
 0x31d   : > { %v2389_v61 = vld [vmem:[#allocation4 + $0xf0] sm:$0xff] }
 0x31e   : > { %5250 = vmatpush2.bf16.msra.mxu1 %v10449_v20  ;;  %5219 = vmatmul.mubr.bf16.gmra.mxu0 %v16394_v22  ;;  %v10268_v20 = vcombine.high %v2537_v40, %v2541_v17  ;;  %v2369_v39 = vld [vmem:[#allocation4 + $0x50] sm:$0xff] }
 0x31f   : > { %5293 = vmatpush1.bf16.msra.mxu0 %v10489_v31  ;;  %5251 = vmatprep.subr.bf16.mxu1 %v10442_v50  ;;  %v10116_v31 = vcombine.high %v2385_v51, %v2389_v61  ;;  %v2529_v50 = vld [vmem:[#allocation4 + $0x550] sm:$0xff] }
 0x320   : > { %5294 = vmatprep.subr.bf16.mxu0 %v10482_v38  ;;  %5314 = vmatprep.mubr.bf16.mxu0 %v16395_v35  ;;  %v2533_v38 = vld [vmem:[#allocation4 + $0x570] sm:$0xff] }
 0x321   : > { %v10259_v7 = vcombine.low %v2529_v50, %v2533_v38  ;;  %v2517_v25 = vld [vmem:[#allocation4 + $0x4f0] sm:$0xff] }
 0x322   : > { %5252 = vmatpush2.bf16.msra.mxu1 %v10441_v27  ;;  %v10115_v27 = vcombine.low %v2385_v51, %v2389_v61  ;;  %v2361_v9 = vld [vmem:[#allocation4 + $0x10] sm:$0xff] }
 0x323   : > { %5295 = vmatpush1.bf16.msra.mxu0 %v10481_v54  ;;  %5253 = vmatprep.subr.bf16.mxu1 %v10434_v44  ;;  %v10260_v54 = vcombine.high %v2529_v50, %v2533_v38  ;;  %v10108_v44 = vcombine.high %v2377_v14, %v2381_v26  ;;  %v2509_v3 = vld [vmem:[#allocation4 + $0x4b0] sm:$0xff] }
 0x324   : > { %5296 = vmatprep.subr.bf16.mxu0 %v10474_v57  ;;  %v2521_v57 = vld [vmem:[#allocation4 + $0x510] sm:$0xff] }
 0x325   : > { %v10251_v13 = vcombine.low %v2521_v57, %v2525_v34  ;;  %v2481_v11 = vld [vmem:[#allocation4 + $0x3d0] sm:$0xff] }
 0x326   : > { %5254 = vmatpush2.bf16.msra.mxu1 %v10433_v41  ;;  %v10107_v41 = vcombine.low %v2377_v14, %v2381_v26  ;;  %v2485_v18 = vld [vmem:[#allocation4 + $0x3f0] sm:$0xff] }
 0x327   : > { %5297 = vmatpush1.bf16.msra.mxu0 %v10473_v0  ;;  %5255 = vmatprep.subr.bf16.mxu1 %v10426_v30  ;;  %v10252_v0 = vcombine.high %v2521_v57, %v2525_v34  ;;  %v10100_v30 = vcombine.high %v2369_v39, %v2373_v43  ;;  %v2501_v4 = vld [vmem:[#allocation4 + $0x470] sm:$0xff] }
 0x328   : > { %5335 = vmatprep.subr.bf16.mxu0 %v10148_v21  ;;  %v2513_v21 = vld [vmem:[#allocation4 + $0x4d0] sm:$0xff] }
 0x329   : > { %v10243_v48 = vcombine.low %v2513_v21, %v2517_v25  ;;  %v2473_v42 = vld [vmem:[#allocation4 + $0x390] sm:$0xff] }
 0x32a   : > { %5256 = vmatpush2.bf16.msra.mxu1 %v10425_v37  ;;  %10515 = vmatmul.mubr.msk.bf16.vlgmr.msra.gmra.mxu0 %vm4879_vm9, %v16396_v62  ;;  %v10099_v37 = vcombine.low %v2369_v39, %v2373_v43  ;;  %v2477_v23 = vld [vmem:[#allocation4 + $0x3b0] sm:$0xff] }
 0x32b   : > { %5336 = vmatpush1.bf16.msra.mxu0 %v10147_v47  ;;  %5257 = vmatprep.subr.bf16.mxu1 %v10418_v8  ;;  %v10244_v47 = vcombine.high %v2513_v21, %v2517_v25  ;;  %v10092_v8 = vcombine.high %v2361_v9, %v2365_v56  ;;  %v2493_v40 = vld [vmem:[#allocation4 + $0x430] sm:$0xff] }
 0x32c   : > { %5337 = vmatprep.subr.bf16.mxu0 %v10140_v10  ;;  %5324 = vmatprep.mubr.bf16.mxu0 %v16395_v35  ;;  %v2505_v10 = vld [vmem:[#allocation4 + $0x490] sm:$0xff] }
 0x32d   : > { %v10235_v52 = vcombine.low %v2505_v10, %v2509_v3  ;;  %v2465_v17 = vld [vmem:[#allocation4 + $0x350] sm:$0xff] }
 0x32e   : > { %5258 = vmatpush2.bf16.msra.mxu1 %v10417_v33  ;;  %v10091_v33 = vcombine.low %v2361_v9, %v2365_v56  ;;  %v2469_v51 = vld [vmem:[#allocation4 + $0x370] sm:$0xff] }
 0x32f   : > { %5338 = vmatpush1.bf16.msra.mxu0 %v10139_v28  ;;  %5259 = vmatprep.subr.bf16.mxu1 %v10410_v5  ;;  %v10236_v28 = vcombine.high %v2505_v10, %v2509_v3  ;;  %v10212_v5 = vcombine.high %v2481_v11, %v2485_v18  ;;  %v2613_v50 = vld [vmem:[#allocation4 + $0x7f0] sm:$0xff] }
 0x330   : > { %5339 = vmatprep.subr.bf16.mxu0 %v10132_v24  ;;  %v2497_v24 = vld [vmem:[#allocation4 + $0x450] sm:$0xff] }
 0x331   : > { %v10227_v61 = vcombine.low %v2497_v24, %v2501_v4  ;;  %v2457_v38 = vld [vmem:[#allocation4 + $0x310] sm:$0xff] }
 0x332   : > { %5260 = vmatpush2.bf16.msra.mxu1 %v10409_v53  ;;  %10516 = vmatmul.mubr.msk.bf16.gmra.mxu0 %vm4879_vm9, %v16397_v55  ;;  %v10211_v53 = vcombine.low %v2481_v11, %v2485_v18  ;;  %v2461_v14 = vld [vmem:[#allocation4 + $0x330] sm:$0xff] }
 0x333   : > { %5340 = vmatpush1.bf16.msra.mxu0 %v10131_v12  ;;  %5367 = vmatprep.mubr.bf16.mxu0 %v16398_v6  ;;  %v10228_v12 = vcombine.high %v2497_v24, %v2501_v4  ;;  %v2605_v57 = vld [vmem:[#allocation4 + $0x7b0] sm:$0xff] }
 0x334   : > { %5388 = vmatprep.subr.bf16.mxu1 %v10276_v46  ;;  %5341 = vmatprep.subr.bf16.mxu0 %v10124_v29  ;;  %v10204_v46 = vcombine.high %v2473_v42, %v2477_v23  ;;  %v2489_v29 = vld [vmem:[#allocation4 + $0x410] sm:$0xff] }
 0x335   : > { %5262 = vmatmul.mubr.bf16.vlgmr.msra.gmra.mxu1 %v16399_v15  ;;  %v10219_v26 = vcombine.low %v2489_v29, %v2493_v40  ;;  %v2449_v34 = vld [vmem:[#allocation4 + $0x2d0] sm:$0xff] }
 0x336   : > { %5271 = vmatprep.mubr.bf16.mxu1 %v14057_v1  ;;  %5389 = vmatpush1.bf16.msra.mxu1 %v10275_v19  ;;  %v10203_v19 = vcombine.low %v2473_v42, %v2477_v23  ;;  %v2453_v39 = vld [vmem:[#allocation4 + $0x2f0] sm:$0xff] }
 0x337   : > { %5342 = vmatpush1.bf16.msra.mxu0 %v10123_v60  ;;  %5390 = vmatprep.subr.bf16.mxu1 %v10268_v20  ;;  %v10220_v60 = vcombine.high %v2489_v29, %v2493_v40  ;;  %v10196_v20 = vcombine.high %v2465_v17, %v2469_v51  ;;  %v2597_v21 = vld [vmem:[#allocation4 + $0x770] sm:$0xff] }
 0x338   : > { %5343 = vmatprep.subr.bf16.mxu0 %v10116_v31  ;;  %v2609_v31 = vld [vmem:[#allocation4 + $0x7d0] sm:$0xff] }
 0x339   : > { %v10339_v43 = vcombine.low %v2609_v31, %v2613_v50  ;;  %v2441_v25 = vld [vmem:[#allocation4 + $0x290] sm:$0xff] }
 0x33a   : > { %5391 = vmatpush1.bf16.msra.mxu1 %v10267_v58  ;;  %v10195_v58 = vcombine.low %v2465_v17, %v2469_v51  ;;  %v2445_v9 = vld [vmem:[#allocation4 + $0x2b0] sm:$0xff] }
 0x33b   : > { %5344 = vmatpush1.bf16.msra.mxu0 %v10115_v27  ;;  %5392 = vmatprep.subr.bf16.mxu1 %v10260_v54  ;;  %v10340_v27 = vcombine.high %v2609_v31, %v2613_v50  ;;  %v10188_v54 = vcombine.high %v2457_v38, %v2461_v14  ;;  %v2589_v10 = vld [vmem:[#allocation4 + $0x730] sm:$0xff] }
 0x33c   : > { %5345 = vmatprep.subr.bf16.mxu0 %v10108_v44  ;;  %v2601_v44 = vld [vmem:[#allocation4 + $0x790] sm:$0xff] }
 0x33d   : > { %5272 = vmatmul.mubr.bf16.gmra.mxu1 %v14059_v59  ;;  %v10331_v56 = vcombine.low %v2601_v44, %v2605_v57  ;;  %v2433_v3 = vld [vmem:[#allocation4 + $0x250] sm:$0xff] }
 0x33e   : > { %5393 = vmatpush1.bf16.msra.mxu1 %v10259_v7  ;;  %5420 = vmatprep.mubr.bf16.mxu1 %v16391_v45  ;;  %v10187_v7 = vcombine.low %v2457_v38, %v2461_v14  ;;  %v2437_v11 = vld [vmem:[#allocation4 + $0x270] sm:$0xff] }
 0x33f   : > { %5346 = vmatpush1.bf16.msra.mxu0 %v10107_v41  ;;  %5394 = vmatprep.subr.bf16.mxu1 %v10252_v0  ;;  %v10332_v41 = vcombine.high %v2601_v44, %v2605_v57  ;;  %v10180_v0 = vcombine.high %v2449_v34, %v2453_v39  ;;  %v2581_v24 = vld [vmem:[#allocation4 + $0x6f0] sm:$0xff] }
 0x340   : > { %5347 = vmatprep.subr.bf16.mxu0 %v10100_v30  ;;  %v2593_v30 = vld [vmem:[#allocation4 + $0x750] sm:$0xff] }
 0x341   : > { %v10323_v18 = vcombine.low %v2593_v30, %v2597_v21  ;;  %v2425_v4 = vld [vmem:[#allocation4 + $0x210] sm:$0xff] }
 0x342   : > { %5395 = vmatpush1.bf16.msra.mxu1 %v10251_v13  ;;  %v10179_v13 = vcombine.low %v2449_v34, %v2453_v39  ;;  %v2429_v42 = vld [vmem:[#allocation4 + $0x230] sm:$0xff] }
 0x343   : > { %5348 = vmatpush1.bf16.msra.mxu0 %v10099_v37  ;;  %5396 = vmatprep.subr.bf16.mxu1 %v10244_v47  ;;  %v10324_v37 = vcombine.high %v2593_v30, %v2597_v21  ;;  %v10172_v47 = vcombine.high %v2441_v25, %v2445_v9  ;;  %v2573_v29 = vld [vmem:[#allocation4 + $0x6b0] sm:$0xff] }
 0x344   : > { %5349 = vmatprep.subr.bf16.mxu0 %v10092_v8  ;;  %v2585_v8 = vld [vmem:[#allocation4 + $0x710] sm:$0xff] }
 0x345   : > { %v10315_v23 = vcombine.low %v2585_v8, %v2589_v10  ;;  %v2673_v40 = vld [vmem:[#allocation4 + $0x9d0] sm:$0xff] }
 0x346   : > { %5397 = vmatpush1.bf16.msra.mxu1 %v10243_v48  ;;  %v10171_v48 = vcombine.low %v2441_v25, %v2445_v9  ;;  %v2677_v17 = vld [vmem:[#allocation4 + $0x9f0] sm:$0xff] }
 0x347   : > { %5350 = vmatpush1.bf16.msra.mxu0 %v10091_v33  ;;  %5398 = vmatprep.subr.bf16.mxu1 %v10236_v28  ;;  %v10316_v33 = vcombine.high %v2585_v8, %v2589_v10  ;;  %v10164_v28 = vcombine.high %v2433_v3, %v2437_v11  ;;  %v2565_v31 = vld [vmem:[#allocation4 + $0x670] sm:$0xff] }
 0x348   : > { %5351 = vmatprep.subr.bf16.mxu0 %v10212_v5  ;;  %v2577_v5 = vld [vmem:[#allocation4 + $0x6d0] sm:$0xff] }
 0x349   : > { %v10307_v51 = vcombine.low %v2577_v5, %v2581_v24  ;;  %v2665_v50 = vld [vmem:[#allocation4 + $0x990] sm:$0xff] }
 0x34a   : > { %5399 = vmatpush1.bf16.msra.mxu1 %v10235_v52  ;;  %v10163_v52 = vcombine.low %v2433_v3, %v2437_v11  ;;  %v2669_v38 = vld [vmem:[#allocation4 + $0x9b0] sm:$0xff] }
 0x34b   : > { %5352 = vmatpush2.bf16.msra.mxu0 %v10211_v53  ;;  %5400 = vmatprep.subr.bf16.mxu1 %v10228_v12  ;;  %v10308_v53 = vcombine.high %v2577_v5, %v2581_v24  ;;  %v10156_v12 = vcombine.high %v2425_v4, %v2429_v42  ;;  %v2557_v44 = vld [vmem:[#allocation4 + $0x630] sm:$0xff] }
 0x34c   : > { %5353 = vmatprep.subr.bf16.mxu0 %v10204_v46  ;;  %v2569_v46 = vld [vmem:[#allocation4 + $0x690] sm:$0xff] }
 0x34d   : > { %v10299_v14 = vcombine.low %v2569_v46, %v2573_v29  ;;  %v2657_v57 = vld [vmem:[#allocation4 + $0x950] sm:$0xff] }
 0x34e   : > { %5401 = vmatpush1.bf16.msra.mxu1 %v10227_v61  ;;  %v10155_v61 = vcombine.low %v2425_v4, %v2429_v42  ;;  %v2661_v34 = vld [vmem:[#allocation4 + $0x970] sm:$0xff] }
 0x34f   : > { %5354 = vmatpush2.bf16.msra.mxu0 %v10203_v19  ;;  %5402 = vmatprep.subr.bf16.mxu1 %v10220_v60  ;;  %v10300_v19 = vcombine.high %v2569_v46, %v2573_v29  ;;  %v10404_v60 = vcombine.high %v2673_v40, %v2677_v17  ;;  %v2649_v30 = vld [vmem:[#allocation4 + $0x910] sm:$0xff]  ;;  %v10387_v9 = vcombine.low %v2657_v57, %v2661_v34 }
 0x350   : > { %5355 = vmatprep.subr.bf16.mxu0 %v10196_v20  ;;  %v2561_v20 = vld [vmem:[#allocation4 + $0x650] sm:$0xff] }
 0x351   : > { %v10291_v39 = vcombine.low %v2561_v20, %v2565_v31  ;;  %v2653_v21 = vld [vmem:[#allocation4 + $0x930] sm:$0xff] }
 0x352   : > { %5403 = vmatpush1.bf16.msra.mxu1 %v10219_v26  ;;  %v10403_v26 = vcombine.low %v2673_v40, %v2677_v17  ;;  %v2773_v8 = vld [vmem:[#allocation4 + $0xcf0] sm:$0xff]  ;;  %v10379_v11 = vcombine.low %v2649_v30, %v2653_v21 }
 0x353   : > { %5356 = vmatpush2.bf16.msra.mxu0 %v10195_v58  ;;  %5404 = vmatprep.subr.bf16.mxu1 %v10340_v27  ;;  %v10292_v58 = vcombine.high %v2561_v20, %v2565_v31  ;;  %v10396_v27 = vcombine.high %v2665_v50, %v2669_v38  ;;  %v2641_v10 = vld [vmem:[#allocation4 + $0x8d0] sm:$0xff] }
 0x354   : > { %5357 = vmatprep.subr.bf16.mxu0 %v10188_v54  ;;  %v2553_v54 = vld [vmem:[#allocation4 + $0x610] sm:$0xff] }
 0x355   : > { %v10283_v25 = vcombine.low %v2553_v54, %v2557_v44  ;;  %v2645_v3 = vld [vmem:[#allocation4 + $0x8f0] sm:$0xff] }
 0x356   : > { %5405 = vmatpush2.bf16.msra.mxu1 %v10339_v43  ;;  %v10395_v43 = vcombine.low %v2665_v50, %v2669_v38  ;;  %v2765_v5 = vld [vmem:[#allocation4 + $0xcb0] sm:$0xff] }
 0x357   : > { %5358 = vmatpush2.bf16.msra.mxu0 %v10187_v7  ;;  %5406 = vmatprep.subr.bf16.mxu1 %v10332_v41  ;;  %v10284_v7 = vcombine.high %v2553_v54, %v2557_v44  ;;  %v10388_v41 = vcombine.high %v2657_v57, %v2661_v34  ;;  %v2633_v24 = vld [vmem:[#allocation4 + $0x890] sm:$0xff]  ;;  %v2422_v54 = vld [vmem:[#allocation4 + $0x1f8] sm:$0xff] }
 0x358   : > { %5359 = vmatprep.subr.bf16.mxu0 %v10180_v0  ;;  %v2777_v0 = vld [vmem:[#allocation4 + $0xd10] sm:$0xff] }
 0x359   : > { %v2637_v4 = vld [vmem:[#allocation4 + $0x8b0] sm:$0xff] }
 0x35a   : > { %5407 = vmatpush2.bf16.msra.mxu1 %v10331_v56  ;;  %v10507_v56 = vcombine.low %v2777_v0, %v2777_v0  ;;  %v2757_v46 = vld [vmem:[#allocation4 + $0xc70] sm:$0xff] }
 0x35b   : > { %5360 = vmatpush2.bf16.msra.mxu0 %v10179_v13  ;;  %5408 = vmatprep.subr.bf16.mxu1 %v10324_v37  ;;  %v10508_v13 = vcombine.high %v2777_v0, %v2777_v0  ;;  %v10380_v37 = vcombine.high %v2649_v30, %v2653_v21  ;;  %v2625_v29 = vld [vmem:[#allocation4 + $0x850] sm:$0xff]  ;;  %v2414_v0 = vld [vmem:[#allocation4 + $0x1b8] sm:$0xff] }
 0x35c   : > { %5361 = vmatprep.subr.bf16.mxu0 %v10172_v47  ;;  %v2769_v47 = vld [vmem:[#allocation4 + $0xcd0] sm:$0xff] }
 0x35d   : > { %v10499_v42 = vcombine.low %v2769_v47, %v2773_v8  ;;  %v2629_v40 = vld [vmem:[#allocation4 + $0x870] sm:$0xff] }
 0x35e   : > { %5409 = vmatpush2.bf16.msra.mxu1 %v10323_v18  ;;  %v4900_v18 = vsel %vm4886_vm8, %v10507_v56, 0  ;;  %v2749_v20 = vld [vmem:[#allocation4 + $0xc30] sm:$0xff] }
 0x35f   : > { %5362 = vmatpush2.bf16.msra.mxu0 %v10171_v48  ;;  %5410 = vmatprep.subr.bf16.mxu1 %v10316_v33  ;;  %v10500_v48 = vcombine.high %v2769_v47, %v2773_v8  ;;  %v10372_v33 = vcombine.high %v2641_v10, %v2645_v3  ;;  %v2617_v31 = vld [vmem:[#allocation4 + $0x810] sm:$0xff]  ;;  %v2406_v47 = vld [vmem:[#allocation4 + $0x178] sm:$0xff] }
 0x360   : > { %5363 = vmatprep.subr.bf16.mxu0 %v10164_v28  ;;  %v2761_v28 = vld [vmem:[#allocation4 + $0xc90] sm:$0xff] }
 0x361   : > { %v10491_v17 = vcombine.low %v2761_v28, %v2765_v5  ;;  %v2621_v50 = vld [vmem:[#allocation4 + $0x830] sm:$0xff] }
 0x362   : > { %5411 = vmatpush2.bf16.msra.mxu1 %v10315_v23  ;;  %v10371_v23 = vcombine.low %v2641_v10, %v2645_v3  ;;  %v2737_v44 = vld [vmem:[#allocation4 + $0xbd0] sm:$0xff] }
 0x363   : > { %5364 = vmatpush2.bf16.msra.mxu0 %v10163_v52  ;;  %5412 = vmatprep.subr.bf16.mxu1 %v10308_v53  ;;  %v10492_v52 = vcombine.high %v2761_v28, %v2765_v5  ;;  %v10364_v53 = vcombine.high %v2633_v24, %v2637_v4  ;;  %v2741_v57 = vld [vmem:[#allocation4 + $0xbf0] sm:$0xff]  ;;  %v2398_v28 = vld [vmem:[#allocation4 + $0x138] sm:$0xff] }
 0x364   : > { %5365 = vmatprep.subr.bf16.mxu0 %v10156_v12  ;;  %v2753_v12 = vld [vmem:[#allocation4 + $0xc50] sm:$0xff] }
 0x365   : > { %v10483_v38 = vcombine.low %v2753_v12, %v2757_v46  ;;  %v2729_v30 = vld [vmem:[#allocation4 + $0xb90] sm:$0xff] }
 0x366   : > { %5413 = vmatpush2.bf16.msra.mxu1 %v10307_v51  ;;  %v10363_v51 = vcombine.low %v2633_v24, %v2637_v4  ;;  %v2733_v21 = vld [vmem:[#allocation4 + $0xbb0] sm:$0xff] }
 0x367   : > { %5366 = vmatpush2.bf16.msra.mxu0 %v10155_v61  ;;  %5414 = vmatprep.subr.bf16.mxu1 %v10300_v19  ;;  %v10484_v61 = vcombine.high %v2753_v12, %v2757_v46  ;;  %v10356_v19 = vcombine.high %v2625_v29, %v2629_v40  ;;  %v2721_v8 = vld [vmem:[#allocation4 + $0xb50] sm:$0xff]  ;;  %v2390_v12 = vld [vmem:[#allocation4 + $0xf8] sm:$0xff] }
 0x368   : > { %5441 = vmatprep.subr.bf16.mxu0 %v10404_v60  ;;  %v2745_v60 = vld [vmem:[#allocation4 + $0xc10] sm:$0xff] }
 0x369   : > { %v10475_v34 = vcombine.low %v2745_v60, %v2749_v20  ;;  %v2725_v10 = vld [vmem:[#allocation4 + $0xb70] sm:$0xff] }
 0x36a   : > { %5368 = vmatmul.mubr.bf16.vlgmr.msra.gmra.mxu0 %v16373_v36  ;;  %5415 = vmatpush2.bf16.msra.mxu1 %v10299_v14  ;;  %v10355_v14 = vcombine.low %v2625_v29, %v2629_v40  ;;  %v2713_v5 = vld [vmem:[#allocation4 + $0xb10] sm:$0xff] }
 0x36b   : > { %5377 = vmatprep.mubr.bf16.mxu0 %v13716_v49  ;;  %5442 = vmatpush1.bf16.msra.mxu0 %v10403_v26  ;;  %v10476_v26 = vcombine.high %v2745_v60, %v2749_v20  ;;  %v2717_v24 = vld [vmem:[#allocation4 + $0xb30] sm:$0xff]  ;;  %v2382_v60 = vld [vmem:[#allocation4 + $0xb8] sm:$0xff] }
 0x36c   : > { %5416 = vmatprep.subr.bf16.mxu1 %v10292_v58  ;;  %5443 = vmatprep.subr.bf16.mxu0 %v10396_v27  ;;  %v10348_v58 = vcombine.high %v2617_v31, %v2621_v50  ;;  %v2418_v27 = vld [vmem:[#allocation4 + $0x1d8] sm:$0xff]  ;;  %v2705_v46 = vld [vmem:[#allocation4 + $0xad0] sm:$0xff] }
 0x36d   : > { %v2709_v29 = vld [vmem:[#allocation4 + $0xaf0] sm:$0xff] }
 0x36e   : > { %5417 = vmatpush2.bf16.msra.mxu1 %v10291_v39  ;;  %v10347_v39 = vcombine.low %v2617_v31, %v2621_v50  ;;  %v2697_v20 = vld [vmem:[#allocation4 + $0xa90] sm:$0xff] }
 0x36f   : > { %5444 = vmatpush1.bf16.msra.mxu0 %v10395_v43  ;;  %5418 = vmatprep.subr.bf16.mxu1 %v10284_v7  ;;  %v10150_v43 = vcombine.high %v2418_v27, %v2422_v54  ;;  %v10468_v7 = vcombine.high %v2737_v44, %v2741_v57  ;;  %v2701_v31 = vld [vmem:[#allocation4 + $0xab0] sm:$0xff] }
 0x370   : > { %5445 = vmatprep.subr.bf16.mxu0 %v10388_v41  ;;  %v2410_v41 = vld [vmem:[#allocation4 + $0x198] sm:$0xff] }
 0x371   : > { %v10142_v56 = vcombine.high %v2410_v41, %v2414_v0  ;;  %v10141_v3 = vcombine.low %v2410_v41, %v2414_v0  ;;  %v14095_v41 = vpop.f32.mrf.mxu1  ;;  %v2681_v0 = vld [vmem:[#allocation4 + $0xa10] sm:$0xff] }
 0x372   : > { %5378 = vmatmul.mubr.bf16.gmra.mxu0 %v13745_v32  ;;  %5419 = vmatpush2.bf16.msra.mxu1 %v10283_v25  ;;  %v10149_v25 = vcombine.low %v2418_v27, %v2422_v54  ;;  %v2689_v27 = vld [vmem:[#allocation4 + $0xa50] sm:$0xff] }
 0x373   : > { %5446 = vmatpush1.bf16.msra.mxu0 %v10387_v9  ;;  %5473 = vmatprep.mubr.bf16.mxu0 %v13832_v63  ;;  %v10467_v9 = vcombine.low %v2737_v44, %v2741_v57  ;;  %v2693_v54 = vld [vmem:[#allocation4 + $0xa70] sm:$0xff]  ;;  %v10427_v57 = vcombine.low %v2697_v20, %v2701_v31 }
 0x374   : > { %10517 = vmatprep.subr.msk.bf16.mxu1 %vm4886_vm8, %v10508_v13  ;;  %5447 = vmatprep.subr.bf16.mxu0 %v10380_v37  ;;  %v10460_v13 = vcombine.high %v2729_v30, %v2733_v21  ;;  %v2402_v37 = vld [vmem:[#allocation4 + $0x158] sm:$0xff] }
 0x375   : > { %5421 = vmatmul.mubr.bf16.vlgmr.msra.gmra.mxu1 %v16392_v16  ;;  %v10133_v4 = vcombine.low %v2402_v37, %v2406_v47 }
 0x376   : > { %5430 = vmatprep.mubr.bf16.mxu1 %v16393_v2  ;;  %5501 = vmatpush1.bf16.msra.mxu1 %v4900_v18  ;;  %v10134_v18 = vcombine.high %v2402_v37, %v2406_v47  ;;  %v2486_v37 = vld [vmem:[#allocation4 + $0x3f8] sm:$0xff]  ;;  %v14097_v47 = vpop.f32.mrf.mxu1 }
 0x377   : > { %5448 = vmatpush1.bf16.msra.mxu0 %v10379_v11  ;;  %5502 = vmatprep.subr.bf16.mxu1 %v10500_v48  ;;  %v10459_v11 = vcombine.low %v2729_v30, %v2733_v21  ;;  %v10452_v48 = vcombine.high %v2721_v8, %v2725_v10  ;;  %v2685_v30 = vld [vmem:[#allocation4 + $0xa30] sm:$0xff] }
 0x378   : > { %5449 = vmatprep.subr.bf16.mxu0 %v10372_v33  ;;  %v2394_v33 = vld [vmem:[#allocation4 + $0x118] sm:$0xff] }
 0x379   : > { %v10125_v40 = vcombine.low %v2394_v33, %v2398_v28 }
 0x37a   : > { %5503 = vmatpush1.bf16.msra.mxu1 %v10499_v42  ;;  %v10451_v42 = vcombine.low %v2721_v8, %v2725_v10  ;;  %v2546_v8 = vld [vmem:[#allocation4 + $0x5d8] sm:$0xff] }
 0x37b   : > { %5450 = vmatpush1.bf16.msra.mxu0 %v10371_v23  ;;  %5504 = vmatprep.subr.bf16.mxu1 %v10492_v52  ;;  %v10126_v23 = vcombine.high %v2394_v33, %v2398_v28  ;;  %v10444_v52 = vcombine.high %v2713_v5, %v2717_v24  ;;  %v2550_v10 = vld [vmem:[#allocation4 + $0x5f8] sm:$0xff] }
 0x37c   : > { %5451 = vmatprep.subr.bf16.mxu0 %v10364_v53  ;;  %v2386_v53 = vld [vmem:[#allocation4 + $0xd8] sm:$0xff]  ;;  %v10278_v33 = vcombine.high %v2546_v8, %v2550_v10 }
 0x37d   : > { %5431 = vmatmul.mubr.bf16.gmra.mxu1 %v16394_v22  ;;  %v10117_v50 = vcombine.low %v2386_v53, %v2390_v12  ;;  %v2474_v28 = vld [vmem:[#allocation4 + $0x398] sm:$0xff] }
 0x37e   : > { %5505 = vmatpush1.bf16.msra.mxu1 %v10491_v17  ;;  %5526 = vmatprep.mubr.bf16.mxu1 %v16395_v35  ;;  %v10443_v17 = vcombine.low %v2713_v5, %v2717_v24  ;;  %v14101_v5 = vpop.f32.mrf.mxu1  ;;  %v2478_v24 = vld [vmem:[#allocation4 + $0x3b8] sm:$0xff] }
 0x37f   : > { %5452 = vmatpush1.bf16.msra.mxu0 %v10363_v51  ;;  %5506 = vmatprep.subr.bf16.mxu1 %v10484_v61  ;;  %v10118_v51 = vcombine.high %v2386_v53, %v2390_v12  ;;  %v10436_v61 = vcombine.high %v2705_v46, %v2709_v29  ;;  %v10206_v12 = vcombine.high %v2474_v28, %v2478_v24 }
 0x380   : > { %5453 = vmatprep.subr.bf16.mxu0 %v10356_v19  ;;  %v2378_v19 = vld [vmem:[#allocation4 + $0x98] sm:$0xff] }
 0x381   : > { %v10109_v44 = vcombine.low %v2378_v19, %v2382_v60 }
 0x382   : > { %5507 = vmatpush1.bf16.msra.mxu1 %v10483_v38  ;;  %v10435_v38 = vcombine.low %v2705_v46, %v2709_v29  ;;  %v2466_v29 = vld [vmem:[#allocation4 + $0x358] sm:$0xff] }
 0x383   : > { %5454 = vmatpush1.bf16.msra.mxu0 %v10355_v14  ;;  %5508 = vmatprep.subr.bf16.mxu1 %v10476_v26  ;;  %v10110_v14 = vcombine.high %v2378_v19, %v2382_v60  ;;  %v10428_v26 = vcombine.high %v2697_v20, %v2701_v31  ;;  %v10205_v19 = vcombine.low %v2474_v28, %v2478_v24 }
 0x384   : > { %5455 = vmatprep.subr.bf16.mxu0 %v10348_v58  ;;  %v2374_v58 = vld [vmem:[#allocation4 + $0x78] sm:$0xff] }
 0x386   : > { %5509 = vmatpush1.bf16.msra.mxu1 %v10475_v34 }
 0x387   : > { %5456 = vmatpush1.bf16.msra.mxu0 %v10347_v39  ;;  %5547 = vmatprep.subr.bf16.mxu1 %v10150_v43  ;;  %v10420_v39 = vcombine.high %v2689_v27, %v2693_v54  ;;  %v2362_v43 = vld [vmem:[#allocation4 + $0x18] sm:$0xff] }
 0x388   : > { %5457 = vmatprep.subr.bf16.mxu0 %v10468_v7  ;;  %v2366_v7 = vld [vmem:[#allocation4 + $0x38] sm:$0xff] }
 0x389   : > { %10518 = vmatmul.mubr.msk.bf16.vlgmr.msra.gmra.mxu1 %vm4879_vm9, %v16396_v62 }
 0x38a   : > { %5548 = vmatpush1.bf16.msra.mxu1 %v10149_v25  ;;  %5536 = vmatprep.mubr.bf16.mxu1 %v16395_v35  ;;  %v10419_v25 = vcombine.low %v2689_v27, %v2693_v54 }
 0x38b   : > { %5458 = vmatpush2.bf16.msra.mxu0 %v10467_v9  ;;  %5549 = vmatprep.subr.bf16.mxu1 %v10142_v56  ;;  %v10094_v9 = vcombine.high %v2362_v43, %v2366_v7  ;;  %v10412_v56 = vcombine.high %v2681_v0, %v2685_v30 }
 0x38c   : > { %5459 = vmatprep.subr.bf16.mxu0 %v10460_v13  ;;  %v2482_v13 = vld [vmem:[#allocation4 + $0x3d8] sm:$0xff] }
 0x38e   : > { %5550 = vmatpush1.bf16.msra.mxu1 %v10141_v3  ;;  %v10093_v3 = vcombine.low %v2362_v43, %v2366_v7  ;;  %v2450_v43 = vld [vmem:[#allocation4 + $0x2d8] sm:$0xff] }
 0x38f   : > { %5460 = vmatpush2.bf16.msra.mxu0 %v10459_v11  ;;  %5551 = vmatprep.subr.bf16.mxu1 %v10134_v18  ;;  %v10411_v11 = vcombine.low %v2681_v0, %v2685_v30  ;;  %v10214_v18 = vcombine.high %v2482_v13, %v2486_v37  ;;  %v2454_v7 = vld [vmem:[#allocation4 + $0x2f8] sm:$0xff] }
 0x390   : > { %5461 = vmatprep.subr.bf16.mxu0 %v10452_v48  ;;  %v14099_v48 = vpop.f32.mrf.mxu0  ;;  %v2514_v0 = vld [vmem:[#allocation4 + $0x4d8] sm:$0xff] }
 0x391   : > { %10519 = vmatmul.mubr.msk.bf16.gmra.mxu1 %vm4879_vm9, %v16397_v55  ;;  %v2518_v30 = vld [vmem:[#allocation4 + $0x4f8] sm:$0xff] }
 0x392   : > { %5552 = vmatpush1.bf16.msra.mxu1 %v10133_v4  ;;  %5579 = vmatprep.mubr.bf16.mxu1 %v16398_v6  ;;  %v2370_v6 = vld [vmem:[#allocation4 + $0x58] sm:$0xff]  ;;  %v14103_v53 = vpop.f32.mrf.mxu0  ;;  %v10245_v24 = vcombine.low %v2514_v0, %v2518_v30 }
 0x393   : > { %5462 = vmatpush2.bf16.msra.mxu0 %v10451_v42  ;;  %5553 = vmatprep.subr.bf16.mxu1 %v10126_v23  ;;  %v10102_v34 = vcombine.high %v2370_v6, %v2374_v58  ;;  %v10101_v21 = vcombine.low %v2370_v6, %v2374_v58  ;;  %v2538_v4 = vld [vmem:[#allocation4 + $0x598] sm:$0xff]  ;;  %v10213_v23 = vcombine.low %v2482_v13, %v2486_v37 }
 0x394   : > { %5463 = vmatprep.subr.bf16.mxu0 %v10444_v52  ;;  %v2542_v42 = vld [vmem:[#allocation4 + $0x5b8] sm:$0xff]  ;;  %v10277_v52 = vcombine.low %v2546_v8, %v2550_v10  ;;  %v10182_v13 = vcombine.high %v2450_v43, %v2454_v7  ;;  %v10246_v37 = vcombine.high %v2514_v0, %v2518_v30 }
 0x395   : > { %v10270_v46 = vcombine.high %v2538_v4, %v2542_v42  ;;  %v10269_v20 = vcombine.low %v2538_v4, %v2542_v42  ;;  %v2522_v6 = vld [vmem:[#allocation4 + $0x518] sm:$0xff] }
 0x396   : > { %5554 = vmatpush1.bf16.msra.mxu1 %v10125_v40  ;;  %v2470_v40 = vld [vmem:[#allocation4 + $0x378] sm:$0xff] }
 0x397   : > { %5464 = vmatpush2.bf16.msra.mxu0 %v10443_v17  ;;  %5555 = vmatprep.subr.bf16.mxu1 %v10118_v51  ;;  %v14105_v17 = vpop.f32.mrf.mxu1  ;;  %v2530_v51 = vld [vmem:[#allocation4 + $0x558] sm:$0xff]  ;;  %v10198_v31 = vcombine.high %v2466_v29, %v2470_v40  ;;  %v10197_v27 = vcombine.low %v2466_v29, %v2470_v40 }
 0x398   : > { %5465 = vmatprep.subr.bf16.mxu0 %v10436_v61  ;;  %v2534_v61 = vld [vmem:[#allocation4 + $0x578] sm:$0xff] }
 0x399   : > { %v14108_v60 = vpop.f32.mrf.mxu1  ;;  %v2526_v58 = vld [vmem:[#allocation4 + $0x538] sm:$0xff] }
 0x39a   : > { %5556 = vmatpush1.bf16.msra.mxu1 %v10117_v50  ;;  %v14111_v50 = vpop.f32.mrf.mxu0  ;;  %v2442_v8 = vld [vmem:[#allocation4 + $0x298] sm:$0xff] }
 0x39b   : > { %5466 = vmatpush2.bf16.msra.mxu0 %v10435_v38  ;;  %5557 = vmatprep.subr.bf16.mxu1 %v10110_v14  ;;  %v10262_v38 = vcombine.high %v2530_v51, %v2534_v61  ;;  %v2458_v14 = vld [vmem:[#allocation4 + $0x318] sm:$0xff]  ;;  %v14113_v54 = vpop.f32.mrf.mxu1 }
 0x39c   : > { %5467 = vmatprep.subr.bf16.mxu0 %v10428_v26  ;;  %v2462_v26 = vld [vmem:[#allocation4 + $0x338] sm:$0xff] }
 0x39d   : > { %v2446_v10 = vld [vmem:[#allocation4 + $0x2b8] sm:$0xff] }
 0x39e   : > { %5558 = vmatpush1.bf16.msra.mxu1 %v10109_v44  ;;  %v10261_v44 = vcombine.low %v2530_v51, %v2534_v61  ;;  %v10174_v4 = vcombine.high %v2442_v8, %v2446_v10  ;;  %v2434_v42 = vld [vmem:[#allocation4 + $0x258] sm:$0xff]  ;;  %v10173_v40 = vcombine.low %v2442_v8, %v2446_v10 }
 0x39f   : > { %5468 = vmatpush2.bf16.msra.mxu0 %v10427_v57  ;;  %5559 = vmatprep.subr.bf16.mxu1 %v10102_v34  ;;  %v14115_v57 = vpop.f32.mrf.mxu0  ;;  %v10190_v34 = vcombine.high %v2458_v14, %v2462_v26  ;;  %v2610_v30 = vld [vmem:[#allocation4 + $0x7d8] sm:$0xff] }
 0x3a0   : > { %5469 = vmatprep.subr.bf16.mxu0 %v10420_v39  ;;  %v10254_v39 = vcombine.high %v2522_v6, %v2526_v58 }
 0x3a2   : > { %5560 = vmatpush1.bf16.msra.mxu1 %v10101_v21  ;;  %v14117_v21 = vpop.f32.mrf.mxu0 }
 0x3a3   : > { %5470 = vmatpush2.bf16.msra.mxu0 %v10419_v25  ;;  %5561 = vmatprep.subr.bf16.mxu1 %v10094_v9  ;;  %v10189_v25 = vcombine.low %v2458_v14, %v2462_v26  ;;  %v14120_v9 = vpop.f32.mrf.mxu1  ;;  %v2490_v14 = vld [vmem:[#allocation4 + $0x418] sm:$0xff] }
 0x3a4   : > { %5471 = vmatprep.subr.bf16.mxu0 %v10412_v56  ;;  %v10253_v56 = vcombine.low %v2522_v6, %v2526_v58  ;;  %v2494_v26 = vld [vmem:[#allocation4 + $0x438] sm:$0xff] }
 0x3a5   : > { %v14125_v28 = vpop.f32.mrf.mxu1 }
 0x3a6   : > { %5562 = vmatpush1.bf16.msra.mxu1 %v10093_v3  ;;  %v2506_v3 = vld [vmem:[#allocation4 + $0x498] sm:$0xff] }
 0x3a7   : > { %5472 = vmatpush2.bf16.msra.mxu0 %v10411_v11  ;;  %5563 = vmatprep.subr.bf16.mxu1 %v10214_v18  ;;  %v2510_v11 = vld [vmem:[#allocation4 + $0x4b8] sm:$0xff]  ;;  %v14123_v18 = vpop.f32.mrf.mxu0 }
 0x3a8   : > { %5600 = vmatprep.subr.bf16.mxu0 %v10278_v33  ;;  %v10181_v33 = vcombine.low %v2450_v43, %v2454_v7  ;;  %v10237_v51 = vcombine.low %v2506_v3, %v2510_v11  ;;  %v2674_v43 = vld [vmem:[#allocation4 + $0x9d8] sm:$0xff] }
 0x3a9   : > { %v14129_v29 = vpop.f32.mrf.mxu0  ;;  %v2678_v7 = vld [vmem:[#allocation4 + $0x9f8] sm:$0xff] }
 0x3aa   : > { %5474 = vmatmul.mubr.bf16.vlgmr.msra.gmra.mxu0 %v16399_v15  ;;  %5564 = vmatpush2.bf16.msra.mxu1 %v10213_v23  ;;  %v2438_v23 = vld [vmem:[#allocation4 + $0x278] sm:$0xff] }
 0x3ab   : > { %5483 = vmatprep.mubr.bf16.mxu0 %v14057_v1  ;;  %5601 = vmatpush1.bf16.msra.mxu0 %v10277_v52  ;;  %v14127_v52 = vpop.f32.mrf.mxu1  ;;  %v10166_v61 = vcombine.high %v2434_v42, %v2438_v23  ;;  %v14133_v6 = vpop.f32.mrf.mxu0  ;;  %v10165_v58 = vcombine.low %v2434_v42, %v2438_v23 }
 0x3ac   : > { %5565 = vmatprep.subr.bf16.mxu1 %v10206_v12  ;;  %5602 = vmatprep.subr.bf16.mxu0 %v10270_v46  ;;  %v2498_v12 = vld [vmem:[#allocation4 + $0x458] sm:$0xff] }
 0x3ad   : > { %v2502_v46 = vld [vmem:[#allocation4 + $0x478] sm:$0xff] }
 0x3ae   : > { %5566 = vmatpush2.bf16.msra.mxu1 %v10205_v19  ;;  %v10230_v19 = vcombine.high %v2498_v12, %v2502_v46 }
 0x3af   : > { %5603 = vmatpush1.bf16.msra.mxu0 %v10269_v20  ;;  %5567 = vmatprep.subr.bf16.mxu1 %v10198_v31  ;;  %v2426_v20 = vld [vmem:[#allocation4 + $0x218] sm:$0xff] }
 0x3b0   : > { %5604 = vmatprep.subr.bf16.mxu0 %v10262_v38  ;;  %v2430_v31 = vld [vmem:[#allocation4 + $0x238] sm:$0xff]  ;;  %v14131_v38 = vpop.f32.mrf.mxu1 }
 0x3b2   : > { %5484 = vmatmul.mubr.bf16.gmra.mxu0 %v14059_v59  ;;  %5568 = vmatpush2.bf16.msra.mxu1 %v10197_v27  ;;  %v10229_v27 = vcombine.low %v2498_v12, %v2502_v46  ;;  %v14137_v0 = vpop.f32.mrf.mxu1 }
 0x3b3   : > { %5605 = vmatpush1.bf16.msra.mxu0 %v10261_v44  ;;  %5632 = vmatprep.mubr.bf16.mxu0 %v16391_v45  ;;  %v10238_v45 = vcombine.high %v2506_v3, %v2510_v11  ;;  %v10158_v44 = vcombine.high %v2426_v20, %v2430_v31  ;;  %v2666_v3 = vld [vmem:[#allocation4 + $0x998] sm:$0xff] }
 0x3b4   : > { %5569 = vmatprep.subr.bf16.mxu1 %v10190_v34  ;;  %5606 = vmatprep.subr.bf16.mxu0 %v10254_v39  ;;  %v14135_v34 = vpop.f32.mrf.mxu0  ;;  %v10222_v39 = vcombine.high %v2490_v14, %v2494_v26  ;;  %v2670_v11 = vld [vmem:[#allocation4 + $0x9b8] sm:$0xff] }
 0x3b5   : > { %v10398_v12 = vcombine.high %v2666_v3, %v2670_v11 }
 0x3b6   : > { %5570 = vmatpush2.bf16.msra.mxu1 %v10189_v25  ;;  %v2614_v25 = vld [vmem:[#allocation4 + $0x7f8] sm:$0xff]  ;;  %v14139_v8 = vpop.f32.mrf.mxu0 }
 0x3b7   : > { %5607 = vmatpush1.bf16.msra.mxu0 %v10253_v56  ;;  %5571 = vmatprep.subr.bf16.mxu1 %v10182_v13  ;;  %v10157_v56 = vcombine.low %v2426_v20, %v2430_v31  ;;  %v10221_v13 = vcombine.low %v2490_v14, %v2494_v26  ;;  %v10342_v10 = vcombine.high %v2610_v30, %v2614_v25  ;;  %v2598_v20 = vld [vmem:[#allocation4 + $0x778] sm:$0xff] }
 0x3b8   : > { %5608 = vmatprep.subr.bf16.mxu0 %v10246_v37  ;;  %v10406_v37 = vcombine.high %v2674_v43, %v2678_v7  ;;  %v10341_v23 = vcombine.low %v2610_v30, %v2614_v25  ;;  %v5055_v46 = vpop.f32.mrf.mxu0  ;;  %v10397_v31 = vcombine.low %v2666_v3, %v2670_v11  ;;  %v2590_v30 = vld [vmem:[#allocation4 + $0x738] sm:$0xff]  ;;  %v4999_v11 = vadd.f32 %v14095_v41, %v14099_v48 }
 0x3b9   : > { %v14153_v3 = vld [vmem:[#allocation4 + $0x8f8] sm:$0xff] }
 0x3ba   : > { %5572 = vmatpush2.bf16.msra.mxu1 %v10181_v33  ;;  %v14141_v33 = vpop.f32.mrf.mxu1  ;;  %v2578_v41 = vld [vmem:[#allocation4 + $0x6d8] sm:$0xff] }
 0x3bb   : > { %5609 = vmatpush1.bf16.msra.mxu0 %v10245_v24  ;;  %5573 = vmatprep.subr.bf16.mxu1 %v10174_v4  ;;  %v2602_v24 = vld [vmem:[#allocation4 + $0x798] sm:$0xff] }
 0x3bc   : > { %5610 = vmatprep.subr.bf16.mxu0 %v10238_v45  ;;  %v2606_v4 = vld [vmem:[#allocation4 + $0x7b8] sm:$0xff]  ;;  %v10405_v45 = vcombine.low %v2674_v43, %v2678_v7  ;;  %v14143_v42 = vpop.f32.mrf.mxu1 }
 0x3bd   : > { %v10333_v26 = vcombine.low %v2602_v24, %v2606_v4  ;;  %v2654_v43 = vld [vmem:[#allocation4 + $0x938] sm:$0xff] }
 0x3be   : > { %5574 = vmatpush2.bf16.msra.mxu1 %v10173_v40  ;;  %v10334_v40 = vcombine.high %v2602_v24, %v2606_v4  ;;  %v14147_v14 = vpop.f32.mrf.mxu1  ;;  %v2586_v7 = vld [vmem:[#allocation4 + $0x718] sm:$0xff]  ;;  %v5003_v24 = vadd.f32 %v14101_v5, %v14111_v50  ;;  %v5005_v4 = vadd.f32 %v14105_v17, %v14115_v57 }
 0x3bf   : > { %5611 = vmatpush1.bf16.msra.mxu0 %v10237_v51  ;;  %5575 = vmatprep.subr.bf16.mxu1 %v10166_v61  ;;  %v2658_v51 = vld [vmem:[#allocation4 + $0x958] sm:$0xff]  ;;  %v10317_v17 = vcombine.low %v2586_v7, %v2590_v30 }
 0x3c0   : > { %5612 = vmatprep.subr.bf16.mxu0 %v10230_v19  ;;  %v2662_v61 = vld [vmem:[#allocation4 + $0x978] sm:$0xff] }
 0x3c1   : > { %v2594_v19 = vld [vmem:[#allocation4 + $0x758] sm:$0xff]  ;;  %v10389_v25 = vcombine.low %v2658_v51, %v2662_v61 }
 0x3c2   : > { %5576 = vmatpush2.bf16.msra.mxu1 %v10165_v58  ;;  %v10390_v58 = vcombine.high %v2658_v51, %v2662_v61  ;;  %v2582_v48 = vld [vmem:[#allocation4 + $0x6f8] sm:$0xff]  ;;  %v5056_v51 = vadd.f32 %v5055_v46, %v5003_v24 }
 0x3c3   : > { %5613 = vmatpush1.bf16.msra.mxu0 %v10229_v27  ;;  %5577 = vmatprep.subr.bf16.mxu1 %v10158_v44  ;;  %v5057_v27 = vpop.f32.mrf.mxu0  ;;  %v10326_v44 = vcombine.high %v2594_v19, %v2598_v20  ;;  %v2634_v61 = vld [vmem:[#allocation4 + $0x898] sm:$0xff] }
 0x3c4   : > { %5614 = vmatprep.subr.bf16.mxu0 %v10222_v39  ;;  %v2650_v39 = vld [vmem:[#allocation4 + $0x918] sm:$0xff] }
 0x3c6   : > { %5578 = vmatpush2.bf16.msra.mxu1 %v10157_v56  ;;  %v5118_v56 = vpop.f32.mrf.mxu1 }
 0x3c7   : > { %5615 = vmatpush1.bf16.msra.mxu0 %v10221_v13  ;;  %5653 = vmatprep.subr.bf16.mxu1 %v10406_v37  ;;  %v10325_v13 = vcombine.low %v2594_v19, %v2598_v20  ;;  %v10382_v37 = vcombine.high %v2650_v39, %v2654_v43  ;;  %v5058_v19 = vadd.f32 %v5057_v27, %v5005_v4 }
 0x3c8   : > { %5616 = vmatprep.subr.bf16.mxu0 %v10342_v10  ;;  %v14151_v10 = vld [vmem:[#allocation4 + $0x8d8] sm:$0xff]  ;;  %v5120_v57 = vpop.f32.mrf.mxu1 }
 0x3c9   : > { %5580 = vmatmul.mubr.bf16.vlgmr.msra.gmra.mxu1 %v16373_v36  ;;  %v10374_v50 = vcombine.high %v14151_v10, %v14153_v3 }
 0x3ca   : > { %5589 = vmatprep.mubr.bf16.mxu1 %v13716_v49  ;;  %5654 = vmatpush1.bf16.msra.mxu1 %v10405_v45  ;;  %v5009_v49 = vadd.f32 %v14108_v60, %v14117_v21  ;;  %v10318_v60 = vcombine.high %v2586_v7, %v2590_v30  ;;  %v5011_v21 = vadd.f32 %v14113_v54, %v14123_v18 }
 0x3cb   : > { %5617 = vmatpush2.bf16.msra.mxu0 %v10341_v23  ;;  %5655 = vmatprep.subr.bf16.mxu1 %v10398_v12  ;;  %v5013_v23 = vadd.f32 %v14120_v9, %v14129_v29  ;;  %v5015_v54 = vadd.f32 %v14125_v28, %v14133_v6  ;;  %v5052_v29 = vadd.f32 %v14135_v34, %v4999_v11  ;;  %v2638_v28 = vld [vmem:[#allocation4 + $0x8b8] sm:$0xff] }
 0x3cc   : > { %5618 = vmatprep.subr.bf16.mxu0 %v10334_v40  ;;  %v10381_v40 = vcombine.low %v2650_v39, %v2654_v43  ;;  %v2570_v6 = vld [vmem:[#allocation4 + $0x698] sm:$0xff]  ;;  %v5109_v39 = vadd.f32 %v14137_v0, %v5056_v51  ;;  %v10309_v34 = vcombine.low %v2578_v41, %v2582_v48  ;;  %v14181_v43 = vpop.f32.mrf.mxu1  ;;  %v10366_v0 = vcombine.high %v2634_v61, %v2638_v28 }
 0x3ce   : > { %5656 = vmatpush1.bf16.msra.mxu1 %v10397_v31  ;;  %v5061_v36 = vpop.f32.mrf.mxu0  ;;  %v14199_v4 = vpop.f32.mrf.mxu1 }
 0x3cf   : > { %5619 = vmatpush2.bf16.msra.mxu0 %v10333_v26  ;;  %5657 = vmatprep.subr.bf16.mxu1 %v10390_v58  ;;  %v5062_v12 = vadd.f32 %v5061_v36, %v5009_v49  ;;  %v2574_v58 = vld [vmem:[#allocation4 + $0x6b8] sm:$0xff]  ;;  %v5111_v49 = vadd.f32 %v14141_v33, %v5058_v19 }
 0x3d0   : > { %v5063_v45 = vpop.f32.mrf.mxu0  ;;  %5620 = vmatprep.subr.bf16.mxu0 %v10326_v44  ;;  %v2626_v36 = vld [vmem:[#allocation4 + $0x858] sm:$0xff]  ;;  %v14211_v51 = vpop.f32.mrf.mxu1 }
 0x3d1   : > { %5590 = vmatmul.mubr.bf16.gmra.mxu1 %v13745_v32  ;;  %v5064_v9 = vadd.f32 %v5063_v45, %v5011_v21  ;;  %v5001_v32 = vadd.f32 %v14097_v47, %v14103_v53  ;;  %v5115_v20 = vadd.f32 %v14143_v42, %v5062_v12  ;;  %v10373_v53 = vcombine.low %v14151_v10, %v14153_v3  ;;  %v2618_v21 = vld [vmem:[#allocation4 + $0x818] sm:$0xff] }
 0x3d2   : > { %5658 = vmatpush1.bf16.msra.mxu1 %v10389_v25  ;;  %5685 = vmatprep.mubr.bf16.mxu1 %v13832_v63  ;;  %v5065_v5 = vpop.f32.mrf.mxu0  ;;  %v10310_v63 = vcombine.high %v2578_v41, %v2582_v48  ;;  %v5105_v25 = vadd.f32 %v14127_v52, %v5052_v29  ;;  %v10365_v3 = vcombine.low %v2634_v61, %v2638_v28  ;;  %v2554_v12 = vld [vmem:[#allocation4 + $0x618] sm:$0xff]  ;;  %v14219_v29 = vpop.f32.mrf.mxu1 }
 0x3d3   : > { %v5066_v18 = vadd.f32 %v5065_v5, %v5013_v23  ;;  %5621 = vmatpush2.bf16.msra.mxu0 %v10325_v13  ;;  %5659 = vmatprep.subr.bf16.mxu1 %v10382_v37  ;;  %v5054_v44 = vadd.f32 %v14139_v8, %v5001_v32  ;;  %v5117_v42 = vadd.f32 %v14147_v14, %v5064_v9  ;;  %v2630_v14 = vld [vmem:[#allocation4 + $0x878] sm:$0xff] }
 0x3d4   : > { %v5067_v46 = vpop.f32.mrf.mxu0  ;;  %5622 = vmatprep.subr.bf16.mxu0 %v10318_v60  ;;  %v10302_v8 = vcombine.high %v2570_v6, %v2574_v58  ;;  %v2562_v13 = vld [vmem:[#allocation4 + $0x658] sm:$0xff]  ;;  %v14197_v24 = vpack.c.bf16 %v5109_v39, %v5105_v25  ;;  %v10301_v52 = vcombine.low %v2570_v6, %v2574_v58  ;;  %v10358_v45 = vcombine.high %v2626_v36, %v2630_v14 }
 0x3d5   : > { %v5119_v31 = vadd.f32 %v5118_v56, %v5066_v18  ;;  %v5068_v26 = vadd.f32 %v5067_v46, %v5015_v54  ;;  %v2566_v37 = vld [vmem:[#allocation4 + $0x678] sm:$0xff]  ;;  %v5107_v11 = vadd.f32 %v14131_v38, %v5054_v44  ;;  %v10357_v48 = vcombine.low %v2626_v36, %v2630_v14  ;;  %v14225_v44 = vpop.f32.mrf.mxu1 }
 0x3d6   : > { %5660 = vmatpush1.bf16.msra.mxu1 %v10381_v40  ;;  %v14177_v47 = vpop.f32.mrf.mxu0  ;;  %v10294_v60 = vcombine.high %v2562_v13, %v2566_v37  ;;  %v2622_v38 = vld [vmem:[#allocation4 + $0x838] sm:$0xff]  ;;  %v10293_v5 = vcombine.low %v2562_v13, %v2566_v37 }
 0x3d7   : > { %v14184_v27 = vpack.c.bf16 %v5119_v31, %v5115_v20  ;;  %v5121_v7 = vadd.f32 %v5120_v57, %v5068_v26  ;;  %5623 = vmatpush2.bf16.msra.mxu0 %v10317_v17  ;;  %5661 = vmatprep.subr.bf16.mxu1 %v10374_v50  ;;  %v14205_v23 = vpack.c.bf16 %v5111_v49, %v5107_v11  ;;  %v2558_v40 = vld [vmem:[#allocation4 + $0x638] sm:$0xff]  ;;  %v14234_v14 = vpop.f32.mrf.mxu1 }
 0x3d8   : > { %v14186_v30 = vpop.f32.mrf.mxu0  ;;  %5624 = vmatprep.subr.bf16.mxu0 %v10310_v63  ;;  %v10350_v50 = vcombine.high %v2618_v21, %v2622_v38  ;;  %v10286_v54 = vcombine.high %v2554_v12, %v2558_v40  ;;  %v2738_v57 = vld [vmem:[#allocation4 + $0xbd8] sm:$0xff]  ;;  %v10349_v32 = vcombine.low %v2618_v21, %v2622_v38  ;;  %v10285_v46 = vcombine.low %v2554_v12, %v2558_v40 }
 0x3d9   : > { %v14190_v56 = vpack.c.bf16 %v5121_v7, %v5117_v42  ;;  %6180 = vrot.lane.b32.xlu1 %v14184_v27, %s11780_s12  ;;  %v2742_v9 = vld [vmem:[#allocation4 + $0xbf8] sm:$0xff]  ;;  %v5171_v38 = vpop.f32.mrf.mxu1 }
 0x3da   : > { %5662 = vmatpush1.bf16.msra.mxu1 %v10373_v53  ;;  %v14194_v10 = vpop.f32.mrf.mxu0  ;;  %v2778_v18 = vld [vmem:[#allocation4 + $0xd18] sm:$0xff]  ;;  %v10470_v63 = vcombine.high %v2738_v57, %v2742_v9  ;;  %v10469_v58 = vcombine.low %v2738_v57, %v2742_v9 }
 0x3db   : > { %5625 = vmatpush2.bf16.msra.mxu0 %v10309_v34  ;;  %6182 = vrot.lane.b32.xlu0 %v14190_v56, %s11780_s12  ;;  %v10510_v19 = vcombine.high %v2778_v18, %v2778_v18  ;;  %v10509_v20 = vcombine.low %v2778_v18, %v2778_v18  ;;  %v2730_v31 = vld [vmem:[#allocation4 + $0xb98] sm:$0xff]  ;;  %v5173_v18 = vpop.f32.mrf.mxu1 }
 0x3dc   : > { %v14203_v33 = vpop.f32.mrf.mxu0  ;;  %5663 = vmatprep.subr.bf16.mxu1 %v10366_v0  ;;  %5626 = vmatprep.subr.bf16.mxu0 %v10302_v8  ;;  %v2734_v26 = vld [vmem:[#allocation4 + $0xbb8] sm:$0xff] }
 0x3dd   : > { %6176 = vrot.lane.b32.xlu1 %v14197_v24, %s11780_s12  ;;  %v2770_v28 = vld [vmem:[#allocation4 + $0xcd8] sm:$0xff]  ;;  %v4906_v53 = vsel %vm4886_vm8, %v10509_v20, 0  ;;  %v10462_v34 = vcombine.high %v2730_v31, %v2734_v26  ;;  %v10461_v49 = vcombine.low %v2730_v31, %v2734_v26 }
 0x3de   : > { %5664 = vmatpush1.bf16.msra.mxu1 %v10365_v3  ;;  %v14209_v41 = vpop.f32.mrf.mxu0  ;;  %v2774_v6 = vld [vmem:[#allocation4 + $0xcf8] sm:$0xff] }
 0x3df   : > { %5627 = vmatpush2.bf16.msra.mxu0 %v10301_v52  ;;  %6178 = vrot.lane.b32.xlu0 %v14205_v23, %s11780_s12  ;;  %v10502_v42 = vcombine.high %v2770_v28, %v2774_v6  ;;  %v2722_v7 = vld [vmem:[#allocation4 + $0xb58] sm:$0xff]  ;;  %v10501_v13 = vcombine.low %v2770_v28, %v2774_v6 }
 0x3e0   : > { %v14215_v17 = vpop.f32.mrf.mxu0  ;;  %5665 = vmatprep.subr.bf16.mxu1 %v10358_v45  ;;  %5628 = vmatprep.subr.bf16.mxu0 %v10294_v60  ;;  %v2726_v0 = vld [vmem:[#allocation4 + $0xb78] sm:$0xff] }
 0x3e1   : > { %6777 = vrot.lane.b32.xlu1 %v14184_v27, %s11788_s28  ;;  %v2762_v8 = vld [vmem:[#allocation4 + $0xc98] sm:$0xff]  ;;  %v10454_v37 = vcombine.high %v2722_v7, %v2726_v0 }
 0x3e2   : > { %5666 = vmatpush1.bf16.msra.mxu1 %v10357_v48  ;;  %v14223_v61 = vpop.f32.mrf.mxu0  ;;  %v2766_v36 = vld [vmem:[#allocation4 + $0xcb8] sm:$0xff] }
 0x3e3   : > { %5629 = vmatpush2.bf16.msra.mxu0 %v10293_v5  ;;  %6779 = vrot.lane.b32.xlu0 %v14190_v56, %s11788_s28  ;;  %v10494_v3 = vcombine.high %v2762_v8, %v2766_v36  ;;  %v2714_v11 = vld [vmem:[#allocation4 + $0xb18] sm:$0xff]  ;;  %v10493_v12 = vcombine.low %v2762_v8, %v2766_v36 }
 0x3e4   : > { %5667 = vmatprep.subr.bf16.mxu1 %v10350_v50  ;;  %5630 = vmatprep.subr.bf16.mxu0 %v10286_v54  ;;  %v14227_v39 = vpop.f32.mrf.mxu0  ;;  %v2718_v52 = vld [vmem:[#allocation4 + $0xb38] sm:$0xff] }
 0x3e5   : > { %v2754_v60 = vld [vmem:[#allocation4 + $0xc58] sm:$0xff]  ;;  %v10446_v40 = vcombine.high %v2714_v11, %v2718_v52  ;;  %v10445_v9 = vcombine.low %v2714_v11, %v2718_v52 }
 0x3e6   : > { %5668 = vmatpush1.bf16.msra.mxu1 %v10349_v32  ;;  %v2758_v21 = vld [vmem:[#allocation4 + $0xc78] sm:$0xff] }
 0x3e7   : > { %5631 = vmatpush2.bf16.msra.mxu0 %v10285_v46  ;;  %5669 = vmatprep.subr.bf16.mxu1 %v10470_v63  ;;  %v2706_v48 = vld [vmem:[#allocation4 + $0xad8] sm:$0xff]  ;;  %v10485_v32 = vcombine.low %v2754_v60, %v2758_v21 }
 0x3e8   : > { %10520 = vmatprep.subr.msk.bf16.mxu0 %vm4886_vm8, %v10510_v19  ;;  %v2710_v5 = vld [vmem:[#allocation4 + $0xaf8] sm:$0xff] }
 0x3e9   : > { %v2746_v54 = vld [vmem:[#allocation4 + $0xc18] sm:$0xff]  ;;  %v10438_v46 = vcombine.high %v2706_v48, %v2710_v5  ;;  %v10437_v28 = vcombine.low %v2706_v48, %v2710_v5 }
 0x3ea   : > { %v14231_v25 = vpop.f32.mrf.mxu0  ;;  %5633 = vmatmul.mubr.bf16.vlgmr.msra.gmra.mxu0 %v16392_v16  ;;  %5670 = vmatpush2.bf16.msra.mxu1 %v10469_v58  ;;  %v10453_v16 = vcombine.low %v2722_v7, %v2726_v0  ;;  %v2750_v57 = vld [vmem:[#allocation4 + $0xc38] sm:$0xff] }
 0x3eb   : > { %5642 = vmatprep.mubr.bf16.mxu0 %v16393_v2  ;;  %5713 = vmatpush1.bf16.msra.mxu0 %v4906_v53  ;;  %v10486_v2 = vcombine.high %v2754_v60, %v2758_v21  ;;  %v10478_v63 = vcombine.high %v2746_v54, %v2750_v57  ;;  %v2698_v19 = vld [vmem:[#allocation4 + $0xa98] sm:$0xff]  ;;  %v5217_v21 = vadd.f32 %v14203_v33, %v14219_v29 }
 0x3ec   : > { %5671 = vmatprep.subr.bf16.mxu1 %v10462_v34  ;;  %5714 = vmatprep.subr.bf16.mxu0 %v10502_v42  ;;  %v14237_v45 = vpop.f32.mrf.mxu0  ;;  %v2702_v20 = vld [vmem:[#allocation4 + $0xab8] sm:$0xff]  ;;  %v5215_v33 = vadd.f32 %v14194_v10, %v14211_v51 }
 0x3ed   : > { %v10430_v58 = vcombine.high %v2698_v19, %v2702_v20  ;;  %v2690_v53 = vld [vmem:[#allocation4 + $0xa58] sm:$0xff]  ;;  %v10429_v0 = vcombine.low %v2698_v19, %v2702_v20  ;;  %v11543_v20 = vld [vmem:[%s15818_s4 + $0x10] sm:$0xff]  }
 0x3ee   : > { %5672 = vmatpush2.bf16.msra.mxu1 %v10461_v49  ;;  %v14239_v50 = vpop.f32.mrf.mxu0  ;;  %v2694_v34 = vld [vmem:[#allocation4 + $0xa78] sm:$0xff] }
 0x3ef   : > { %5715 = vmatpush1.bf16.msra.mxu0 %v10501_v13  ;;  %5673 = vmatprep.subr.bf16.mxu1 %v10454_v37  ;;  %v10422_v36 = vcombine.high %v2690_v53, %v2694_v34  ;;  %v2682_v49 = vld [vmem:[#allocation4 + $0xa18] sm:$0xff]  ;;  %v10421_v11 = vcombine.low %v2690_v53, %v2694_v34 }
 0x3f0   : > { %5716 = vmatprep.subr.bf16.mxu0 %v10494_v3  ;;  %v5322_v31 = vpop.f32.mrf.mxu0  ;;  %v2686_v13 = vld [vmem:[#allocation4 + $0xa38] sm:$0xff] }
 0x3f1   : > { %v10414_v60 = vcombine.high %v2682_v49, %v2686_v13  ;;  %v10413_v5 = vcombine.low %v2682_v49, %v2686_v13 }
 0x3f2   : > { %5643 = vmatmul.mubr.bf16.gmra.mxu0 %v16394_v22  ;;  %5674 = vmatpush2.bf16.msra.mxu1 %v10453_v16  ;;  %v10477_v22 = vcombine.low %v2746_v54, %v2750_v57  ;;  %v5326_v42 = vpop.f32.mrf.mxu0  ;;  %v5223_v16 = vadd.f32 %v14215_v17, %v14234_v14  ;;  %v5227_v54 = vadd.f32 %v14227_v39, %v5173_v18 }
 0x3f3   : > { %5717 = vmatpush1.bf16.msra.mxu0 %v10493_v12  ;;  %5675 = vmatprep.subr.bf16.mxu1 %v10446_v40  ;;  %v5225_v12 = vadd.f32 %v14223_v61, %v5171_v38  ;;  %v5213_v40 = vadd.f32 %v14186_v30, %v14199_v4  ;;  %v5211_v4 = vadd.f32 %v14177_v47, %v14181_v43 }
 0x3f4   : > { %5718 = vmatprep.subr.bf16.mxu0 %v10486_v2  ;;  %5738 = vmatprep.mubr.bf16.mxu0 %v16395_v35  ;;  %v5328_v37 = vpop.f32.mrf.mxu0 }
 0x3f5   : > { %v5263_v26 = vpop.f32.mrf.mxu1 }
 0x3f6   : > { %5676 = vmatpush2.bf16.msra.mxu1 %v10445_v9  ;;  %v5330_v2 = vpop.f32.mrf.mxu0 }
 0x3f7   : > { %v5265_v6 = vpop.f32.mrf.mxu1  ;;  %5719 = vmatpush1.bf16.msra.mxu0 %v10485_v32  ;;  %5677 = vmatprep.subr.bf16.mxu1 %v10438_v46  ;;  %v5264_v46 = vadd.f32 %v5263_v26, %v5211_v4  ;;  %v11545_v26 = vld [vmem:[%s15818_s4 + $0x18] sm:$0xff]  }
 0x3f8   : > { %5720 = vmatprep.subr.bf16.mxu0 %v10478_v63  ;;  %v5266_v61 = vadd.f32 %v5265_v6, %v5213_v40 }
 0x3f9   : > { %v5267_v7 = vpop.f32.mrf.mxu1  ;;  %v5317_v19 = vadd.f32 %v14231_v25, %v5264_v46  ;;  %v11540_v25 = vld [vmem:[%s15818_s4 + $0x28] sm:$0xff]  }
 0x3fa   : > { %5678 = vmatpush2.bf16.msra.mxu1 %v10437_v28  ;;  %v5319_v51 = vadd.f32 %v14237_v45, %v5266_v61 }
 0x3fb   : > { %v5269_v8 = vpop.f32.mrf.mxu1  ;;  %5721 = vmatpush1.bf16.msra.mxu0 %v10477_v22  ;;  %5679 = vmatprep.subr.bf16.mxu1 %v10430_v58 }
 0x3fc   : > { %v5270_v57 = vadd.f32 %v5269_v8, %v5217_v21  ;;  %v11548_v21 = vld [vmem:[%s15818_s4 + $0x48] sm:$0xff]  }
 0x3fd   : > { %v5273_v3 = vpop.f32.mrf.mxu1 }
 0x3fe   : > { %5680 = vmatpush2.bf16.msra.mxu1 %v10429_v0  ;;  %10521 = vmatmul.mubr.msk.bf16.vlgmr.msra.gmra.mxu0 %vm4879_vm9, %v16396_v62  ;;  %v5221_v62 = vadd.f32 %v14209_v41, %v14225_v44  ;;  %v5332_v41 = vpop.f32.mrf.mxu0  ;;  %v5268_v44 = vadd.f32 %v5267_v7, %v5215_v33  ;;  %v5323_v38 = vadd.f32 %v5322_v31, %v5270_v57  ;;  %v11544_v31 = vld [vmem:[%s15818_s4 + $0x38] sm:$0xff]  }
 0x3ff   : > { %v5275_v52 = vpop.f32.mrf.mxu1  ;;  %5681 = vmatprep.subr.bf16.mxu1 %v10422_v36  ;;  %5748 = vmatprep.mubr.bf16.mxu0 %v16395_v35  ;;  %v11552_v33 = vld [vmem:[%s15818_s4 + $0x58] sm:$0xff]  }
 0x400   : > { %v5276_v9 = vadd.f32 %v5275_v52, %v5223_v16  ;;  %v5274_v17 = vadd.f32 %v5273_v3, %v5221_v62  ;;  %v5321_v47 = vadd.f32 %v14239_v50, %v5268_v44  ;;  %v11542_v50 = vld [vmem:[%s15818_s4 + $0x30] sm:$0xff]  }
 0x401   : > { %v5277_v48 = vpop.f32.mrf.mxu1 }
 0x402   : > { %v5278_v32 = vadd.f32 %v5277_v48, %v5225_v12  ;;  %5682 = vmatpush2.bf16.msra.mxu1 %v10421_v11  ;;  %v5329_v39 = vadd.f32 %v5328_v37, %v5276_v9  ;;  %v5327_v10 = vadd.f32 %v5326_v42, %v5274_v17  ;;  %v14280_v45 = vpack.c.bf16 %v5321_v47, %v5317_v19  ;;  %v11546_v37 = vld [vmem:[%s15818_s4 + $0x40] sm:$0xff]   ;;  %v11550_v48 = vld [vmem:[%s15818_s4 + $0x50] sm:$0xff]  }
 0x403   : > { %v5279_v29 = vpop.f32.mrf.mxu1  ;;  %5683 = vmatprep.subr.bf16.mxu1 %v10414_v60 }
 0x404   : > { %v5280_v30 = vadd.f32 %v5279_v29, %v5227_v54  ;;  %v5331_v14 = vadd.f32 %v5330_v2, %v5278_v32 }
 0x406   : > { %v5333_v18 = vadd.f32 %v5332_v41, %v5280_v30  ;;  %5684 = vmatpush2.bf16.msra.mxu1 %v10413_v5  ;;  %10522 = vmatmul.mubr.msk.bf16.gmra.mxu0 %vm4879_vm9, %v16397_v55  ;;  %v14268_v43 = vpack.c.bf16 %v5331_v14, %v5327_v10  ;;  %v14273_v55 = vpack.c.bf16 %v5323_v38, %v5319_v51 }
 0x407   : > { %6086 = vmatprep.subr.bf16.mxu1 %v14190_v56  ;;  %5981 = vmatprep.mubr.bf16.mxu0 %v16395_v35 }
 0x408   : > { %v14265_v63 = vpack.c.bf16 %v5333_v18, %v5329_v39 }
 0x409   : > { %5686 = vmatmul.mubr.bf16.vlgmr.msra.gmra.mxu1 %v16399_v15  ;;  %v11539_v15 = vld [vmem:[%s15818_s4] sm:$0xff]  }
 0x40a   : > { %5695 = vmatprep.mubr.bf16.mxu1 %v14057_v1  ;;  %5961 = vmatprep.subr.bf16.mxu0 %v14265_v63  ;;  %v11538_v1 = vld [vmem:[%s15818_s4 + $0x20] sm:$0xff]  }
 0x40b   : > { %6087 = vmatpush1.bf16.msra.mxu1 %v14184_v27  ;;  %5962 = vmatpush1.bf16.msra.mxu0 %v14268_v43 }
 0x40c   : > { %6088 = vmatprep.subr.bf16.mxu1 %v14205_v23  ;;  %5963 = vmatprep.subr.bf16.mxu0 %v14273_v55 }
 0x40f   : > { %6089 = vmatpush1.bf16.msra.mxu1 %v14197_v24  ;;  %5964 = vmatpush1.bf16.msra.mxu0 %v14280_v45 }
 0x411   : > { %5696 = vmatmul.mubr.bf16.gmra.mxu1 %v14059_v59  ;;  %v11541_v59 = vld [vmem:[%s15818_s4 + $0x8] sm:$0xff]  }
 0x412   : > { %10555 = vmatmul.mubr.msk.bf16.vlgmr.msra.gmra.mxu0 %vm5936_vm10, %v11538_v1  ;;  %6106 = vmatprep.mubr.bf16.mxu1 %v16395_v35 }
 0x413   : > { %5991 = vmatprep.mubr.bf16.mxu0 %v16395_v35 }
 0x419   : > { %10567 = vmatmul.mubr.msk.bf16.vlgmr.msra.gmra.mxu1 %vm5936_vm10, %v11539_v15 }
 0x41a   : > { %10556 = vmatmul.mubr.msk.bf16.gmra.mxu0 %vm5936_vm10, %v11540_v25  ;;  %6116 = vmatprep.mubr.bf16.mxu1 %v16395_v35 }
 0x41b   : > { %6001 = vmatprep.mubr.bf16.mxu0 %v16395_v35 }
 0x421   : > { %10568 = vmatmul.mubr.msk.bf16.gmra.mxu1 %vm5936_vm10, %v11541_v59 }
 0x422   : > { %10557 = vmatmul.mubr.msk.bf16.gmra.mxu0 %vm5936_vm10, %v11542_v50  ;;  %6126 = vmatprep.mubr.bf16.mxu1 %v16395_v35 }
 0x423   : > { %6011 = vmatprep.mubr.bf16.mxu0 %v16395_v35 }
 0x429   : > { %10569 = vmatmul.mubr.msk.bf16.gmra.mxu1 %vm5936_vm10, %v11543_v20 }
 0x42a   : > { %10558 = vmatmul.mubr.msk.bf16.gmra.mxu0 %vm5936_vm10, %v11544_v31  ;;  %6136 = vmatprep.mubr.bf16.mxu1 %v16395_v35  ;;  %v5369_v53 = vpop.f32.mrf.mxu0 }
 0x42b   : > { %6235 = vmatprep.mubr.bf16.mxu0 %v16395_v35 }
 0x42c   : > { %v5371_v0 = vpop.f32.mrf.mxu0 }
 0x42e   : > { %v5373_v3 = vpop.f32.mrf.mxu0 }
 0x430   : > { %v5375_v52 = vpop.f32.mrf.mxu0 }
 0x431   : > { %10570 = vmatmul.mubr.msk.bf16.gmra.mxu1 %vm5936_vm10, %v11545_v26 }
 0x432   : > { %6389 = vmatprep.mubr.bf16.mxu1 %v16395_v35  ;;  %v5379_v16 = vpop.f32.mrf.mxu0 }
 0x434   : > { %v5381_v62 = vpop.f32.mrf.mxu0 }
 0x435   : > { %v5422_v28 = vpop.f32.mrf.mxu1 }
 0x436   : > { %v5383_v5 = vpop.f32.mrf.mxu0  ;;  %v5423_v51 = vadd.f32 %v5422_v28, %v5369_v53 }
 0x437   : > { %v5424_v6 = vpop.f32.mrf.mxu1 }
 0x438   : > { %v5385_v57 = vpop.f32.mrf.mxu0  ;;  %v5425_v47 = vadd.f32 %v5424_v6, %v5371_v0 }
 0x439   : > { %v5426_v22 = vpop.f32.mrf.mxu1 }
 0x43a   : > { %v5427_v14 = vadd.f32 %v5426_v22, %v5373_v3 }
 0x43b   : > { %v5428_v34 = vpop.f32.mrf.mxu1 }
 0x43c   : > { %v5429_v39 = vadd.f32 %v5428_v34, %v5375_v52  ;;  %v11549_v52 = vld [vmem:[%s15818_s4 + $0x68] sm:$0xff]  }
 0x43d   : > { %v5432_v8 = vpop.f32.mrf.mxu1 }
 0x43e   : > { %v5433_v44 = vadd.f32 %v5432_v8, %v5379_v16 }
 0x43f   : > { %v5434_v11 = vpop.f32.mrf.mxu1 }
 0x440   : > { %v5435_v18 = vadd.f32 %v5434_v11, %v5381_v62  ;;  %v11547_v11 = vld [vmem:[%s15818_s4 + $0x60] sm:$0xff]  }
 0x441   : > { %v5436_v60 = vpop.f32.mrf.mxu1 }
 0x442   : > { %v5437_v46 = vadd.f32 %v5436_v60, %v5383_v5  ;;  %v7184_v60 = vld [vmem:[%s15819_s5 + $0x30] sm:$0xff] }
 0x443   : > { %v5438_v12 = vpop.f32.mrf.mxu1 }
 0x444   : > { %v5439_v25 = vadd.f32 %v5438_v12, %v5385_v57 }
 0x449   : > { %v5528_v40 = vpop.f32.mrf.mxu1 }
 0x44b   : > { %v6181_v58 = vpop.permute.xlu1 %6180  ;;  %v5530_v2 = vpop.f32.mrf.mxu1 }
 0x44d   : > { %v6183_v42 = vpop.permute.xlu0 %6182  ;;  %v5532_v54 = vpop.f32.mrf.mxu1 }
 0x44e   : > { %v6186_v7 = vsel %vm591_vm0, %v6181_v58, %v6183_v42  ;;  %6215 = vmatprep.subr.bf16.mxu0 %v6183_v42 }
 0x44f   : > { %6216 = vmatpush1.bf16.msra.mxu0 %v6186_v7  ;;  %v6177_v36 = vpop.permute.xlu1 %6176  ;;  %v5534_v9 = vpop.f32.mrf.mxu1 }
 0x451   : > { %v6179_v49 = vpop.permute.xlu0 %6178  ;;  %v5538_v29 = vpop.f32.mrf.mxu1 }
 0x452   : > { %v6185_v13 = vsel %vm591_vm0, %v6177_v36, %v6179_v49  ;;  %6217 = vmatprep.subr.bf16.mxu0 %v6179_v49 }
 0x453   : > { %6218 = vmatpush1.bf16.msra.mxu0 %v6185_v13  ;;  %v5540_v4 = vpop.f32.mrf.mxu1 }
 0x455   : > { %v5542_v19 = vpop.f32.mrf.mxu1 }
 0x456   : > { %10583 = vmatmul.mubr.msk.bf16.vlgmr.msra.gmra.mxu0 %vm5936_vm10, %v11546_v37 }
 0x457   : > { %6245 = vmatprep.mubr.bf16.mxu0 %v16395_v35  ;;  %v5544_v8 = vpop.f32.mrf.mxu1 }
 0x45e   : > { %10584 = vmatmul.mubr.msk.bf16.gmra.mxu0 %vm5936_vm10, %v11548_v21  ;;  %v7185_v21 = vld [vmem:[%s15819_s5 + $0x38] sm:$0xff] }
 0x45f   : > { %6255 = vmatprep.mubr.bf16.mxu0 %v16395_v35 }
 0x466   : > { %10585 = vmatmul.mubr.msk.bf16.gmra.mxu0 %vm5936_vm10, %v11550_v48 }
 0x467   : > { %6265 = vmatprep.mubr.bf16.mxu0 %v16395_v35 }
 0x46a   : > { %v5475_v32 = vpop.f32.mrf.mxu0 }
 0x46b   : > { %v5476_v31 = vadd.f32 %v5475_v32, %v5423_v51 }
 0x46c   : > { %v5477_v17 = vpop.f32.mrf.mxu0 }
 0x46d   : > { %v5478_v58 = vadd.f32 %v5477_v17, %v5425_v47  ;;  %v5529_v6 = vadd.f32 %v5528_v40, %v5476_v31 }
 0x46e   : > { %v5479_v61 = vpop.f32.mrf.mxu0  ;;  %10586 = vmatmul.mubr.msk.bf16.gmra.mxu0 %vm5936_vm10, %v11552_v33 }
 0x46f   : > { %6543 = vmatprep.mubr.bf16.mxu0 %v16395_v35  ;;  %v5480_v1 = vadd.f32 %v5479_v61, %v5427_v14  ;;  %v5531_v53 = vadd.f32 %v5530_v2, %v5478_v58 }
 0x470   : > { %v5481_v30 = vpop.f32.mrf.mxu0 }
 0x471   : > { %v5482_v59 = vadd.f32 %v5481_v30, %v5429_v39  ;;  %v5533_v34 = vadd.f32 %v5532_v54, %v5480_v1 }
 0x472   : > { %v5485_v41 = vpop.f32.mrf.mxu0 }
 0x473   : > { %v5486_v10 = vadd.f32 %v5485_v41, %v5433_v44  ;;  %v5535_v36 = vadd.f32 %v5534_v9, %v5482_v59  ;;  %v11128_v37 = vpack.c.bf16 %v5533_v34, %v5529_v6 }
 0x474   : > { %v5487_v38 = vpop.f32.mrf.mxu0 }
 0x475   : > { %v5488_v50 = vadd.f32 %v5487_v38, %v5435_v18  ;;  %v5539_v42 = vadd.f32 %v5538_v29, %v5486_v10  ;;  %v11129_v3 = vpack.c.bf16 %v5535_v36, %v5531_v53 }
 0x476   : > { %v5489_v15 = vpop.f32.mrf.mxu0 }
 0x477   : > { %v5490_v20 = vadd.f32 %v5489_v15, %v5437_v46  ;;  %v5541_v49 = vadd.f32 %v5540_v4, %v5488_v50 }
 0x478   : > { %v5491_v26 = vpop.f32.mrf.mxu0 }
 0x479   : > { %v5543_v7 = vadd.f32 %v5542_v19, %v5490_v20  ;;  %v5492_v22 = vadd.f32 %v5491_v26, %v5439_v25 }
 0x47b   : > { %v11130_v13 = vpack.c.bf16 %v5543_v7, %v5539_v42  ;;  %v5545_v28 = vadd.f32 %v5544_v8, %v5492_v22 }
 0x47d   : > { %v11131_v0 = vpack.c.bf16 %v5545_v28, %v5541_v49  ;;  %6633 = vrot.lane.b32.xlu1 %v11130_v13, %s11780_s12 }
 0x47f   : > { %6635 = vrot.lane.b32.xlu0 %v11131_v0, %s11780_s12  ;;  %6369 = vmatprep.subr.bf16.mxu1 %v11131_v0 }
 0x480   : > { %6370 = vmatpush1.bf16.msra.mxu1 %v11130_v13 }
 0x481   : > { %6629 = vrot.lane.b32.xlu1 %v11128_v37, %s11780_s12  ;;  %6371 = vmatprep.subr.bf16.mxu1 %v11129_v3 }
 0x483   : > { %6631 = vrot.lane.b32.xlu0 %v11129_v3, %s11780_s12 }
 0x484   : > { %6372 = vmatpush1.bf16.msra.mxu1 %v11128_v37 }
 0x485   : > { %6773 = vrot.lane.b32.xlu1 %v14197_v24, %s11788_s28 }
 0x487   : > { %6775 = vrot.lane.b32.xlu0 %v14205_v23, %s11788_s28  ;;  %10603 = vmatmul.mubr.msk.bf16.vlgmr.msra.gmra.mxu1 %vm5936_vm10, %v11547_v11 }
 0x488   : > { %6399 = vmatprep.mubr.bf16.mxu1 %v16395_v35 }
 0x489   : > { %6922 = vrot.lane.b32.xlu1 %v14268_v43, %s11788_s28  ;;  %v11553_v43 = vld [vmem:[%s15818_s4 + $0x78] sm:$0xff]   ;;  %v5581_v12 = vpop.f32.mrf.mxu1 }
 0x48b   : > { %6924 = vrot.lane.b32.xlu0 %v14265_v63, %s11788_s28  ;;  %v11551_v63 = vld [vmem:[%s15818_s4 + $0x70] sm:$0xff]   ;;  %v5583_v2 = vpop.f32.mrf.mxu1 }
 0x48d   : > { %7066 = vrot.lane.b32.xlu1 %v14184_v27, %s11789_s22  ;;  %v7178_v27 = vld [vmem:[%s15819_s5] sm:$0xff]  ;;  %v5585_v54 = vpop.f32.mrf.mxu1 }
 0x48f   : > { %7068 = vrot.lane.b32.xlu0 %v14190_v56, %s11789_s22  ;;  %10604 = vmatmul.mubr.msk.bf16.gmra.mxu1 %vm5936_vm10, %v11549_v52  ;;  %v7179_v56 = vld [vmem:[%s15819_s5 + $0x8] sm:$0xff]  ;;  %v5587_v9 = vpop.f32.mrf.mxu1 }
 0x490   : > { %6409 = vmatprep.mubr.bf16.mxu1 %v16395_v35 }
 0x491   : > { %6918 = vrot.lane.b32.xlu1 %v14280_v45, %s11788_s28  ;;  %v7183_v45 = vld [vmem:[%s15819_s5 + $0x28] sm:$0xff]  ;;  %v5591_v33 = vpop.f32.mrf.mxu1 }
 0x493   : > { %6920 = vrot.lane.b32.xlu0 %v14273_v55, %s11788_s28  ;;  %v7182_v55 = vld [vmem:[%s15819_s5 + $0x20] sm:$0xff]  ;;  %v5593_v61 = vpop.f32.mrf.mxu1 }
 0x495   : > { %7062 = vrot.lane.b32.xlu1 %v14197_v24, %s11789_s22  ;;  %v7180_v24 = vld [vmem:[%s15819_s5 + $0x10] sm:$0xff]  ;;  %v5595_v41 = vpop.f32.mrf.mxu1 }
 0x497   : > { %7064 = vrot.lane.b32.xlu0 %v14205_v23, %s11789_s22  ;;  %10605 = vmatmul.mubr.msk.bf16.gmra.mxu1 %vm5936_vm10, %v11551_v63  ;;  %v7181_v23 = vld [vmem:[%s15819_s5 + $0x18] sm:$0xff]  ;;  %v5597_v38 = vpop.f32.mrf.mxu1 }
 0x498   : > { %6419 = vmatprep.mubr.bf16.mxu1 %v16395_v35 }
 0x499   : > { %7188 = vperm.xlu1 %11528, %v7178_v27  }
 0x49b   : > { %7193 = vperm.xlu0 %11529, %v7179_v56  }
 0x49d   : > { %7198 = vperm.xlu1 %11528, %v7180_v24  }
 0x49f   : > { %7203 = vperm.xlu0 %11529, %v7181_v23   ;;  %10606 = vmatmul.mubr.msk.bf16.gmra.mxu1 %vm5936_vm10, %v11553_v43 }
 0x4a0   : > { %6687 = vmatprep.mubr.bf16.mxu1 %v16395_v35 }
 0x4a1   : > { %7208 = vperm.xlu1 %11528, %v7182_v55  }
 0x4a3   : > { %7213 = vperm.xlu0 %11529, %v7183_v45  }
 0x4a5   : > { %7218 = vperm.xlu1 %11528, %v7184_v60  }
 0x4a7   : > { %7223 = vperm.xlu0 %11529, %v7185_v21  }
 0x4aa   : > { %v5634_v16 = vpop.f32.mrf.mxu0 }
 0x4ab   : > { %v5635_v37 = vadd.f32 %v5634_v16, %v5581_v12 }
 0x4ac   : > { %v5636_v40 = vpop.f32.mrf.mxu0 }
 0x4ad   : > { %v5637_v26 = vadd.f32 %v5636_v40, %v5583_v2 }
 0x4ae   : > { %v5638_v62 = vpop.f32.mrf.mxu0 }
 0x4af   : > { %v5639_v49 = vadd.f32 %v5638_v62, %v5585_v54 }
 0x4b0   : > { %v5640_v48 = vpop.f32.mrf.mxu0 }
 0x4b1   : > { %v5641_v59 = vadd.f32 %v5640_v48, %v5587_v9 }
 0x4b2   : > { %v5644_v5 = vpop.f32.mrf.mxu0 }
 0x4b3   : > { %v5645_v58 = vadd.f32 %v5644_v5, %v5591_v33 }
 0x4b4   : > { %v5646_v57 = vpop.f32.mrf.mxu0 }
 0x4b5   : > { %v5647_v50 = vadd.f32 %v5646_v57, %v5593_v61  ;;  %v11554_v61 = vld [vmem:[%s15818_s4 + $0x80] sm:$0xff]  }
 0x4b6   : > { %v5648_v32 = vpop.f32.mrf.mxu0 }
 0x4b7   : > { %v5649_v20 = vadd.f32 %v5648_v32, %v5595_v41  ;;  %v6780_v41 = vpop.permute.xlu0 %6779 }
 0x4b8   : > { %v5650_v17 = vpop.f32.mrf.mxu0 }
 0x4b9   : > { %v5651_v7 = vadd.f32 %v5650_v17, %v5597_v38  ;;  %v6778_v38 = vpop.permute.xlu1 %6777 }
 0x4be   : > { %v5740_v29 = vpop.f32.mrf.mxu0 }
 0x4c0   : > { %v5742_v30 = vpop.f32.mrf.mxu0 }
 0x4c2   : > { %v5744_v4 = vpop.f32.mrf.mxu0 }
 0x4c4   : > { %v5746_v44 = vpop.f32.mrf.mxu0 }
 0x4c6   : > { %v5750_v14 = vpop.f32.mrf.mxu0 }
 0x4c8   : > { %v5752_v39 = vpop.f32.mrf.mxu0 }
 0x4c9   : > { %v5687_v18 = vpop.f32.mrf.mxu1 }
 0x4ca   : > { %v5754_v10 = vpop.f32.mrf.mxu0  ;;  %v5688_v23 = vadd.f32 %v5687_v18, %v5635_v37  ;;  %v6783_v18 = vsel %vm6781_vm11, %v6778_v38, %v6780_v41  ;;  %v11565_v38 = vld [vmem:[%s15818_s4 + $0xe0] sm:$0xff]  }
 0x4cb   : > { %v5689_v46 = vpop.f32.mrf.mxu1 }
 0x4cc   : > { %v5756_v19 = vpop.f32.mrf.mxu0  ;;  %v5690_v6 = vadd.f32 %v5689_v46, %v5637_v26  ;;  %v5741_v57 = vadd.f32 %v5740_v29, %v5688_v23 }
 0x4cd   : > { %v5691_v51 = vpop.f32.mrf.mxu1 }
 0x4ce   : > { %v5692_v3 = vadd.f32 %v5691_v51, %v5639_v49  ;;  %v5743_v60 = vadd.f32 %v5742_v30, %v5690_v6 }
 0x4cf   : > { %v5693_v47 = vpop.f32.mrf.mxu1 }
 0x4d0   : > { %v5694_v22 = vadd.f32 %v5693_v47, %v5641_v59  ;;  %v5745_v2 = vadd.f32 %v5744_v4, %v5692_v3 }
 0x4d1   : > { %v5697_v1 = vpop.f32.mrf.mxu1 }
 0x4d2   : > { %v5983_v15 = vpop.f32.mrf.mxu0  ;;  %v5698_v13 = vadd.f32 %v5697_v1, %v5645_v58  ;;  %v5747_v63 = vadd.f32 %v5746_v44, %v5694_v22  ;;  %v11132_v33 = vpack.c.bf16 %v5745_v2, %v5741_v57  ;;  %v11555_v1 = vld [vmem:[%s15818_s4 + $0x88] sm:$0xff]   ;;  %v11560_v2 = vld [vmem:[%s15818_s4 + $0xc0] sm:$0xff]   ;;  %v11561_v57 = vld [vmem:[%s15818_s4 + $0xb0] sm:$0xff]  }
 0x4d3   : > { %v5699_v25 = vpop.f32.mrf.mxu1 }
 0x4d4   : > { %v5985_v31 = vpop.f32.mrf.mxu0  ;;  %v5700_v8 = vadd.f32 %v5699_v25, %v5647_v50  ;;  %v5751_v55 = vadd.f32 %v5750_v14, %v5698_v13  ;;  %v11133_v12 = vpack.c.bf16 %v5747_v63, %v5743_v60  ;;  %v11559_v60 = vld [vmem:[%s15818_s4 + $0xa8] sm:$0xff]  }
 0x4d5   : > { %v5701_v42 = vpop.f32.mrf.mxu1 }
 0x4d6   : > { %v5702_v34 = vadd.f32 %v5701_v42, %v5649_v20  ;;  %v5987_v36 = vpop.f32.mrf.mxu0  ;;  %v5753_v27 = vadd.f32 %v5752_v39, %v5700_v8 }
 0x4d7   : > { %v5703_v28 = vpop.f32.mrf.mxu1 }
 0x4d8   : > { %v5704_v53 = vadd.f32 %v5703_v28, %v5651_v7  ;;  %v14416_v0 = vpop.f32.mrf.mxu0  ;;  %v5755_v11 = vadd.f32 %v5754_v10, %v5702_v34  ;;  %v11556_v34 = vld [vmem:[%s15818_s4 + $0x90] sm:$0xff]  }
 0x4d9   : > { %v6108_v52 = vpop.f32.mrf.mxu1 }
 0x4da   : > { %v5757_v56 = vadd.f32 %v5756_v19, %v5704_v53  ;;  %v14418_v24 = vadd.f32 %v6108_v52, %v5983_v15  ;;  %v5993_v43 = vpop.f32.mrf.mxu0  ;;  %v11134_v48 = vpack.c.bf16 %v5755_v11, %v5751_v55  ;;  %v11557_v11 = vld [vmem:[%s15818_s4 + $0xa0] sm:$0xff]  }
 0x4db   : > { %v6110_v45 = vpop.f32.mrf.mxu1 }
 0x4dc   : > { %v11135_v21 = vpack.c.bf16 %v5757_v56, %v5753_v27  ;;  %v14420_v40 = vadd.f32 %v6110_v45, %v5985_v31  ;;  %v5995_v62 = vpop.f32.mrf.mxu0 }
 0x4dd   : > { %v6112_v16 = vpop.f32.mrf.mxu1 }
 0x4de   : > { %6523 = vmatprep.subr.bf16.mxu0 %v11135_v21  ;;  %v14422_v5 = vadd.f32 %v6112_v16, %v5987_v36  ;;  %v5997_v54 = vpop.f32.mrf.mxu0 }
 0x4df   : > { %6524 = vmatpush1.bf16.msra.mxu0 %v11134_v48  ;;  %v14424_v9 = vpop.f32.mrf.mxu1 }
 0x4e0   : > { %6525 = vmatprep.subr.bf16.mxu0 %v11133_v12  ;;  %v14426_v32 = vpop.f32.mrf.mxu0 }
 0x4e1   : > { %v6118_v17 = vpop.f32.mrf.mxu1 }
 0x4e2   : > { %v14431_v30 = vadd.f32 %v6118_v17, %v5993_v43  ;;  %v6003_v4 = vpop.f32.mrf.mxu0  ;;  %v11558_v43 = vld [vmem:[%s15818_s4 + $0x98] sm:$0xff]  }
 0x4e3   : > { %6526 = vmatpush1.bf16.msra.mxu0 %v11132_v33  ;;  %v6120_v44 = vpop.f32.mrf.mxu1 }
 0x4e4   : > { %6812 = vmatprep.subr.bf16.mxu0 %v6780_v41  ;;  %v14433_v29 = vadd.f32 %v6120_v44, %v5995_v62  ;;  %v6005_v14 = vpop.f32.mrf.mxu0  ;;  %v11563_v41 = vld [vmem:[%s15818_s4 + $0xb8] sm:$0xff]   ;;  %v11564_v44 = vld [vmem:[%s15818_s4 + $0xd0] sm:$0xff]  }
 0x4e5   : > { %v6122_v39 = vpop.f32.mrf.mxu1 }
 0x4e6   : > { %10623 = vmatmul.mubr.msk.bf16.vlgmr.msra.gmra.mxu0 %vm5936_vm10, %v11554_v61  ;;  %v14437_v46 = vadd.f32 %v6122_v39, %v5997_v54  ;;  %v6007_v10 = vpop.f32.mrf.mxu0 }
 0x4e7   : > { %6813 = vmatpush1.bf16.msra.mxu0 %v6783_v18  ;;  %6553 = vmatprep.mubr.bf16.mxu0 %v16395_v35  ;;  %v14440_v51 = vpop.f32.mrf.mxu1 }
 0x4e8   : > { %v14442_v47 = vpop.f32.mrf.mxu0 }
 0x4e9   : > { %v6128_v19 = vpop.f32.mrf.mxu1 }
 0x4ea   : > { %v14447_v15 = vadd.f32 %v6128_v19, %v6003_v4  ;;  %v6013_v50 = vpop.f32.mrf.mxu0  ;;  %v11562_v4 = vld [vmem:[%s15818_s4 + $0xc8] sm:$0xff]  }
 0x4eb   : > { %v6130_v25 = vpop.f32.mrf.mxu1 }
 0x4ec   : > { %v14449_v59 = vadd.f32 %v6130_v25, %v6005_v14  ;;  %v6015_v42 = vpop.f32.mrf.mxu0 }
 0x4ed   : > { %v6132_v20 = vpop.f32.mrf.mxu1 }
 0x4ee   : > { %10624 = vmatmul.mubr.msk.bf16.gmra.mxu0 %vm5936_vm10, %v11555_v1  ;;  %v14452_v31 = vadd.f32 %v6132_v20, %v6007_v10  ;;  %v6017_v28 = vpop.f32.mrf.mxu0  ;;  %v11566_v1 = vld [vmem:[%s15818_s4 + $0xd8] sm:$0xff]  }
 0x4ef   : > { %v6634_v26 = vpop.permute.xlu1 %6633  ;;  %6563 = vmatprep.mubr.bf16.mxu0 %v16395_v35  ;;  %v14455_v58 = vpop.f32.mrf.mxu1 }
 0x4f0   : > { %v14511_v14 = vpop.f32.mrf.mxu0 }
 0x4f1   : > { %v6636_v7 = vpop.permute.xlu0 %6635  ;;  %v6138_v22 = vpop.f32.mrf.mxu1 }
 0x4f2   : > { %v6638_v8 = vsel %vm591_vm0, %v6634_v26, %v6636_v7  ;;  %6667 = vmatprep.subr.bf16.mxu1 %v6636_v7  ;;  %v14461_v36 = vadd.f32 %v6138_v22, %v6013_v50 }
 0x4f3   : > { %v6630_v49 = vpop.permute.xlu1 %6629  ;;  %6668 = vmatpush1.bf16.msra.mxu1 %v6638_v8  ;;  %v6140_v13 = vpop.f32.mrf.mxu1 }
 0x4f4   : > { %v14463_v6 = vadd.f32 %v6140_v13, %v6015_v42 }
 0x4f5   : > { %v6632_v53 = vpop.permute.xlu0 %6631  ;;  %v6142_v37 = vpop.f32.mrf.mxu1 }
 0x4f6   : > { %v6637_v3 = vsel %vm591_vm0, %v6630_v49, %v6632_v53  ;;  %10625 = vmatmul.mubr.msk.bf16.gmra.mxu0 %vm5936_vm10, %v11556_v34  ;;  %6669 = vmatprep.subr.bf16.mxu1 %v6632_v53  ;;  %v14470_v52 = vadd.f32 %v6142_v37, %v6017_v28  ;;  %vm9433_vm0 = vcmask 392192  }
 0x4f7   : > { %v6774_v63 = vpop.permute.xlu1 %6773  ;;  %6670 = vmatpush1.bf16.msra.mxu1 %v6637_v3  ;;  %6573 = vmatprep.mubr.bf16.mxu0 %v16395_v35 }
 0x4f9   : > { %v6776_v27 = vpop.permute.xlu0 %6775 }
 0x4fa   : > { %v6782_v56 = vsel %vm6781_vm11, %v6774_v63, %v6776_v27  ;;  %10639 = vmatmul.mubr.msk.bf16.vlgmr.msra.gmra.mxu1 %vm5936_vm10, %v11557_v11  ;;  %6814 = vmatprep.subr.bf16.mxu0 %v6776_v27 }
 0x4fb   : > { %6815 = vmatpush1.bf16.msra.mxu0 %v6782_v56  ;;  %v6923_v23 = vpop.permute.xlu1 %6922  ;;  %6697 = vmatprep.mubr.bf16.mxu1 %v16395_v35 }
 0x4fd   : > { %v6925_v55 = vpop.permute.xlu0 %6924 }
 0x4fe   : > { %v6927_v45 = vsel %vm6781_vm11, %v6923_v23, %v6925_v55  ;;  %10626 = vmatmul.mubr.msk.bf16.gmra.mxu0 %vm5936_vm10, %v11558_v43  ;;  %6956 = vmatprep.subr.bf16.mxu1 %v6925_v55  ;;  %v11576_v23 = vld [vmem:[%s15820_s6 + $0xac] ss:$12 sps:$4 sm:$0xff]   ;;  %v14610_v55 = vpop.f32.mrf.mxu1 }
 0x4ff   : > { %v7067_v21 = vpop.permute.xlu1 %7066  ;;  %6957 = vmatpush1.bf16.msra.mxu1 %v6927_v45  ;;  %6832 = vmatprep.mubr.bf16.mxu0 %v16395_v35  ;;  %v11578_v45 = vld [vmem:[%s15820_s6 + $0x90] ss:$12 sps:$4 sm:$0xff]  }
 0x501   : > { %v7069_v62 = vpop.permute.xlu0 %7068 }
 0x502   : > { %10640 = vmatmul.mubr.msk.bf16.gmra.mxu1 %vm5936_vm10, %v11559_v60  ;;  %7101 = vmatprep.subr.bf16.mxu0 %v7069_v62  ;;  %v7072_v12 = vsel %vm7070_vm12, %v7067_v21, %v7069_v62  ;;  %v11580_v60 = vld [vmem:[%s15820_s6 + $0x94] ss:$12 sps:$4 sm:$0xff]   ;;  %v11581_v21 = vld [vmem:[%s15820_s6 + $0x98] ss:$12 sps:$4 sm:$0xff]  }
 0x503   : > { %v6919_v48 = vpop.permute.xlu1 %6918  ;;  %6707 = vmatprep.mubr.bf16.mxu1 %v16395_v35 }
 0x505   : > { %v6921_v16 = vpop.permute.xlu0 %6920 }
 0x506   : > { %v6926_v54 = vsel %vm6781_vm11, %v6919_v48, %v6921_v16  ;;  %10655 = vmatmul.mubr.msk.bf16.vlgmr.msra.gmra.mxu0 %vm5936_vm10, %v11560_v2  ;;  %6958 = vmatprep.subr.bf16.mxu1 %v6921_v16  ;;  %v11582_v16 = vld [vmem:[%s15820_s6 + $0x78] ss:$12 sps:$4 sm:$0xff]  }
 0x507   : > { %7102 = vmatpush1.bf16.msra.mxu0 %v7072_v12  ;;  %6959 = vmatpush1.bf16.msra.mxu1 %v6926_v54  ;;  %v7063_v33 = vpop.permute.xlu1 %7062  ;;  %v11584_v12 = vld [vmem:[%s15820_s6 + $0x7c] ss:$12 sps:$4 sm:$0xff]   ;;  %v11585_v54 = vld [vmem:[%s15820_s6 + $0x80] ss:$12 sps:$4 sm:$0xff]  }
 0x508   : > { %6842 = vmatprep.mubr.bf16.mxu0 %v16395_v35  ;;  %7574 = vmatprep.subr.bf16.mxu1 %v11576_v23  ;;  %v11612_v23 = vld [vmem:[%s15820_s6 + $0x124] ss:$12 sps:$4 sm:$0xff]  }
 0x509   : > { %v7065_v17 = vpop.permute.xlu0 %7064 }
 0x50a   : > { %v7071_v61 = vsel %vm7070_vm12, %v7063_v33, %v7065_v17  ;;  %10641 = vmatmul.mubr.msk.bf16.gmra.mxu1 %vm5936_vm10, %v11561_v57  ;;  %7103 = vmatprep.subr.bf16.mxu0 %v7065_v17  ;;  %v11586_v17 = vld [vmem:[%s15820_s6 + $0x60] ss:$12 sps:$4 sm:$0xff]  }
 0x50b   : > { %7104 = vmatpush1.bf16.msra.mxu0 %v7071_v61  ;;  %6717 = vmatprep.mubr.bf16.mxu1 %v16395_v35  ;;  %v11588_v61 = vld [vmem:[%s15820_s6 + $0x64] ss:$12 sps:$4 sm:$0xff]  }
 0x50c   : > { %7647 = vmatprep.subr.bf16.mxu0 %v16395_v35 }
 0x50e   : > { %10656 = vmatmul.mubr.msk.bf16.gmra.mxu0 %vm5936_vm10, %v11562_v4  ;;  %v11589_v4 = vld [vmem:[%s15820_s6 + $0x68] ss:$12 sps:$4 sm:$0xff]  }
 0x50f   : > { %6852 = vmatprep.mubr.bf16.mxu0 %v16395_v35 }
 0x512   : > { %10642 = vmatmul.mubr.msk.bf16.gmra.mxu1 %vm5936_vm10, %v11563_v41 }
 0x513   : > { %6976 = vmatprep.mubr.bf16.mxu1 %v16395_v35 }
 0x516   : > { %10657 = vmatmul.mubr.msk.bf16.gmra.mxu0 %vm5936_vm10, %v11564_v44  ;;  %v6237_v39 = vpop.f32.mrf.mxu0 }
 0x517   : > { %6862 = vmatprep.mubr.bf16.mxu0 %v16395_v35  ;;  %v14520_v18 = vadd.f32 %v6237_v39, %v14418_v24  ;;  %v11567_v24 = vld [vmem:[%s15818_s4 + $0xe8] sm:$0xff]  }
 0x518   : > { %v6239_v10 = vpop.f32.mrf.mxu0  ;;  %v11590_v39 = vld [vmem:[%s15820_s6 + $0x48] ss:$12 sps:$4 sm:$0xff]  }
 0x519   : > { %v14523_v19 = vadd.f32 %v6239_v10, %v14420_v40  ;;  %v11593_v10 = vld [vmem:[%s15820_s6 + $0x50] ss:$12 sps:$4 sm:$0xff]  }
 0x51a   : > { %10671 = vmatmul.mubr.msk.bf16.vlgmr.msra.gmra.mxu1 %vm5936_vm10, %v11565_v38  ;;  %v6241_v25 = vpop.f32.mrf.mxu0 }
 0x51b   : > { %6986 = vmatprep.mubr.bf16.mxu1 %v16395_v35  ;;  %v14531_v50 = vadd.f32 %v6241_v25, %v14422_v5  ;;  %v11568_v5 = vld [vmem:[%s15818_s4 + $0x100] sm:$0xff]  }
 0x51c   : > { %v14533_v20 = vpop.f32.mrf.mxu0 }
 0x51e   : > { %10658 = vmatmul.mubr.msk.bf16.gmra.mxu0 %vm5936_vm10, %v11566_v1  ;;  %v6247_v40 = vpop.f32.mrf.mxu0 }
 0x51f   : > { %7121 = vmatprep.mubr.bf16.mxu0 %v16395_v35  ;;  %v14541_v26 = vadd.f32 %v6247_v40, %v14431_v30  ;;  %v11569_v30 = vld [vmem:[%s15818_s4 + $0xf0] sm:$0xff]  }
 0x520   : > { %v6249_v42 = vpop.f32.mrf.mxu0  ;;  %v11596_v40 = vld [vmem:[%s15820_s6 + $0x34] ss:$12 sps:$4 sm:$0xff]  }
 0x521   : > { %v14544_v7 = vadd.f32 %v6249_v42, %v14433_v29 }
 0x522   : > { %10672 = vmatmul.mubr.msk.bf16.gmra.mxu1 %vm5936_vm10, %v11567_v24  ;;  %v6251_v22 = vpop.f32.mrf.mxu0  ;;  %v11594_v24 = vld [vmem:[%s15820_s6 + $0x30] ss:$12 sps:$4 sm:$0xff]  }
 0x523   : > { %6996 = vmatprep.mubr.bf16.mxu1 %v16395_v35  ;;  %v14552_v8 = vadd.f32 %v6251_v22, %v14437_v46  ;;  %v11570_v46 = vld [vmem:[%s15818_s4 + $0x108] sm:$0xff]  }
 0x524   : > { %v14554_v34 = vpop.f32.mrf.mxu0 }
 0x526   : > { %10687 = vmatmul.mubr.msk.bf16.vlgmr.msra.gmra.mxu0 %vm5936_vm10, %v11568_v5  ;;  %v6257_v29 = vpop.f32.mrf.mxu0 }
 0x527   : > { %7131 = vmatprep.mubr.bf16.mxu0 %v16395_v35  ;;  %v14562_v49 = vadd.f32 %v6257_v29, %v14447_v15  ;;  %v11571_v15 = vld [vmem:[%s15818_s4 + $0xf8] sm:$0xff]  }
 0x528   : > { %v6259_v13 = vpop.f32.mrf.mxu0  ;;  %v11600_v29 = vld [vmem:[%s15820_s6 + $0x1c] ss:$12 sps:$4 sm:$0xff]  }
 0x529   : > { %v14565_v28 = vadd.f32 %v6259_v13, %v14449_v59  ;;  %v11601_v13 = vld [vmem:[%s15820_s6 + $0x20] ss:$12 sps:$4 sm:$0xff]  }
 0x52a   : > { %10673 = vmatmul.mubr.msk.bf16.gmra.mxu1 %vm5936_vm10, %v11569_v30  ;;  %v6261_v53 = vpop.f32.mrf.mxu0  ;;  %v11598_v30 = vld [vmem:[%s15820_s6 + $0x18] ss:$12 sps:$4 sm:$0xff]  }
 0x52b   : > { %7006 = vmatprep.mubr.bf16.mxu1 %v16395_v35  ;;  %v14573_v37 = vadd.f32 %v6261_v53, %v14452_v31  ;;  %v11572_v31 = vld [vmem:[%s15818_s4 + $0x110] sm:$0xff]   ;;  %v11602_v53 = vld [vmem:[%s15820_s6] ss:$12 sps:$4 sm:$0xff]  }
 0x52c   : > { %v14575_v3 = vpop.f32.mrf.mxu0 }
 0x52e   : > { %10688 = vmatmul.mubr.msk.bf16.gmra.mxu0 %vm5936_vm10, %v11570_v46  ;;  %v6267_v59 = vpop.f32.mrf.mxu0 }
 0x52f   : > { %7141 = vmatprep.mubr.bf16.mxu0 %v16395_v35  ;;  %v14583_v11 = vadd.f32 %v6267_v59, %v14461_v36  ;;  %v11573_v36 = vld [vmem:[%s15818_s4 + $0x118] sm:$0xff]   ;;  %v11605_v59 = vld [vmem:[%s15820_s6 + $0x8] ss:$12 sps:$4 sm:$0xff]  }
 0x530   : > { %v6269_v63 = vpop.f32.mrf.mxu0 }
 0x531   : > { %v14586_v27 = vadd.f32 %v6269_v63, %v14463_v6  ;;  %v11574_v6 = vld [vmem:[%s15820_s6 + $0xa8] ss:$12 sps:$4 sm:$0xff]  }
 0x532   : > { %10674 = vmatmul.mubr.msk.bf16.gmra.mxu1 %vm5936_vm10, %v11571_v15  ;;  %v6271_v56 = vpop.f32.mrf.mxu0  ;;  %v11604_v15 = vld [vmem:[%s15820_s6 + $0x4] ss:$12 sps:$4 sm:$0xff]  }
 0x533   : > { %v14593_v43 = vadd.f32 %v6271_v56, %v14470_v52  ;;  %v11577_v52 = vld [vmem:[%s15820_s6 + $0xb0] ss:$12 sps:$4 sm:$0xff]   ;;  %7575 = vmatpush1.bf16.msra.mxu1 %v11574_v6  ;;  %v11606_v56 = vld [vmem:[%s15820_s6 + $0x138] ss:$12 sps:$4 sm:$0xff]   ;;  %v11609_v6 = vld [vmem:[%s15820_s6 + $0x140] ss:$12 sps:$4 sm:$0xff]  }
 0x534   : > { %7648 = vmatpush1.bf16.msra.mxu0 %v11577_v52  ;;  %7576 = vmatprep.subr.bf16.mxu1 %v11580_v60  ;;  %v11613_v52 = vld [vmem:[%s15820_s6 + $0x128] ss:$12 sps:$4 sm:$0xff]  }
 0x535   : > { %7649 = vmatprep.subr.bf16.mxu0 %v16395_v35  ;;  %v11614_v60 = vld [vmem:[%s15820_s6 + $0x108] ss:$12 sps:$4 sm:$0xff]  }
 0x536   : > { %10689 = vmatmul.mubr.msk.bf16.gmra.mxu0 %vm5936_vm10, %v11572_v31 }
 0x537   : > { %7151 = vmatprep.mubr.bf16.mxu0 %v16395_v35  ;;  %7577 = vmatpush1.bf16.msra.mxu1 %v11578_v45  ;;  %v11616_v45 = vld [vmem:[%s15820_s6 + $0x10c] ss:$12 sps:$4 sm:$0xff]  }
 0x538   : > { %7650 = vmatpush1.bf16.msra.mxu0 %v11581_v21  ;;  %7578 = vmatprep.subr.bf16.mxu1 %v11584_v12  ;;  %v11617_v21 = vld [vmem:[%s15820_s6 + $0x110] ss:$12 sps:$4 sm:$0xff]   ;;  %v11621_v12 = vld [vmem:[%s15820_s6 + $0xf8] ss:$12 sps:$4 sm:$0xff]  }
 0x539   : > { %7651 = vmatprep.subr.bf16.mxu0 %v16395_v35 }
 0x53b   : > { %7579 = vmatpush1.bf16.msra.mxu1 %v11582_v16  ;;  %v11618_v16 = vld [vmem:[%s15820_s6 + $0xf0] ss:$12 sps:$4 sm:$0xff]  }
 0x53c   : > { %7652 = vmatpush1.bf16.msra.mxu0 %v11585_v54  ;;  %7580 = vmatprep.subr.bf16.mxu1 %v11588_v61  ;;  %v11624_v54 = vld [vmem:[%s15820_s6 + $0xdc] ss:$12 sps:$4 sm:$0xff]   ;;  %v11625_v61 = vld [vmem:[%s15820_s6 + $0xe0] ss:$12 sps:$4 sm:$0xff]  }
 0x53d   : > { %7653 = vmatprep.subr.bf16.mxu0 %v16395_v35 }
 0x53e   : > { %10690 = vmatmul.mubr.msk.bf16.gmra.mxu0 %vm5936_vm10, %v11573_v36  ;;  %v11608_v36 = vld [vmem:[%s15820_s6 + $0x13c] ss:$12 sps:$4 sm:$0xff]  }
 0x53f   : > { %7581 = vmatpush1.bf16.msra.mxu1 %v11586_v17  ;;  %v11622_v17 = vld [vmem:[%s15820_s6 + $0xd8] ss:$12 sps:$4 sm:$0xff]  }
 0x540   : > { %7654 = vmatpush1.bf16.msra.mxu0 %v11589_v4  ;;  %v11628_v4 = vld [vmem:[%s15820_s6 + $0xc4] ss:$12 sps:$4 sm:$0xff]  }
 0x541   : > { %7655 = vmatprep.subr.bf16.mxu0 %v16395_v35 }
 0x544   : > { %7656 = vmatpush1.bf16.msra.mxu0 %v11593_v10 }
 0x545   : > { %7657 = vmatprep.subr.bf16.mxu0 %v16395_v35 }
 0x547   : > { %v6391_v62 = vpop.f32.mrf.mxu1 }
 0x548   : > { %v14623_v2 = vadd.f32 %v6391_v62, %v14520_v18  ;;  %v11592_v18 = vld [vmem:[%s15820_s6 + $0x4c] ss:$12 sps:$4 sm:$0xff]   ;;  %v11620_v62 = vld [vmem:[%s15820_s6 + $0xf4] ss:$12 sps:$4 sm:$0xff]  }
 0x549   : > { %v14626_v48 = vpop.f32.mrf.mxu1  ;;  %7582 = vmatprep.subr.bf16.mxu1 %v11592_v18  ;;  %v14772_v18 = vpop.f32.mrf.mxu0 }
 0x54a   : > { %7583 = vmatpush1.bf16.msra.mxu1 %v11590_v39  ;;  %v11629_v39 = vld [vmem:[%s15820_s6 + $0xc8] ss:$12 sps:$4 sm:$0xff]  }
 0x54b   : > { %v14637_v57 = vpop.f32.mrf.mxu1  ;;  %7584 = vmatprep.subr.bf16.mxu1 %v11596_v40 }
 0x54d   : > { %v14640_v33 = vpop.f32.mrf.mxu1 }
 0x54e   : > { %7585 = vmatpush1.bf16.msra.mxu1 %v11594_v24 }
 0x54f   : > { %v6401_v41 = vpop.f32.mrf.mxu1  ;;  %7586 = vmatprep.subr.bf16.mxu1 %v11600_v29 }
 0x550   : > { %v14652_v44 = vadd.f32 %v6401_v41, %v14541_v26  ;;  %v11597_v26 = vld [vmem:[%s15820_s6 + $0x38] ss:$12 sps:$4 sm:$0xff]   ;;  %v11626_v41 = vld [vmem:[%s15820_s6 + $0xc0] ss:$12 sps:$4 sm:$0xff]  }
 0x551   : > { %v14655_v38 = vpop.f32.mrf.mxu1  ;;  %7658 = vmatpush1.bf16.msra.mxu0 %v11597_v26 }
 0x552   : > { %7659 = vmatprep.subr.bf16.mxu0 %v16395_v35  ;;  %7587 = vmatpush1.bf16.msra.mxu1 %v11598_v30 }
 0x553   : > { %v14666_v1 = vpop.f32.mrf.mxu1  ;;  %7588 = vmatprep.subr.bf16.mxu1 %v11604_v15 }
 0x555   : > { %v14669_v25 = vpop.f32.mrf.mxu1  ;;  %7660 = vmatpush1.bf16.msra.mxu0 %v11601_v13 }
 0x556   : > { %7661 = vmatprep.subr.bf16.mxu0 %v16395_v35  ;;  %7589 = vmatpush1.bf16.msra.mxu1 %v11602_v53 }
 0x557   : > { %v6411_v42 = vpop.f32.mrf.mxu1  ;;  %7594 = vmatprep.subr.bf16.mxu1 %v11608_v36 }
 0x558   : > { %v14681_v5 = vadd.f32 %v6411_v42, %v14562_v49 }
 0x559   : > { %v14684_v22 = vpop.f32.mrf.mxu1  ;;  %7662 = vmatpush1.bf16.msra.mxu0 %v11605_v59 }
 0x55a   : > { %7667 = vmatprep.subr.bf16.mxu0 %v16395_v35  ;;  %7595 = vmatpush2.bf16.msra.mxu1 %v11606_v56 }
 0x55b   : > { %v14695_v46 = vpop.f32.mrf.mxu1  ;;  %7596 = vmatprep.subr.bf16.mxu1 %v11612_v23 }
 0x55d   : > { %v14698_v49 = vpop.f32.mrf.mxu1  ;;  %7668 = vmatpush2.bf16.msra.mxu0 %v11609_v6 }
 0x55e   : > { %7669 = vmatprep.subr.bf16.mxu0 %v16395_v35 }
 0x55f   : > { %v6421_v63 = vpop.f32.mrf.mxu1 }
 0x560   : > { %v14710_v31 = vadd.f32 %v6421_v63, %v14583_v11  ;;  %v11610_v11 = vld [vmem:[%s15820_s6 + $0x120] ss:$12 sps:$4 sm:$0xff]  }
 0x561   : > { %7670 = vmatpush2.bf16.msra.mxu0 %v11613_v52  ;;  %7597 = vmatpush2.bf16.msra.mxu1 %v11610_v11  ;;  %v14786_v29 = vpop.f32.mrf.mxu1 }
 0x562   : > { %7671 = vmatprep.subr.bf16.mxu0 %v16395_v35  ;;  %7598 = vmatprep.subr.bf16.mxu1 %v11616_v45 }
 0x563   : > { %v14792_v15 = vpop.f32.mrf.mxu1 }
 0x565   : > { %7599 = vmatpush2.bf16.msra.mxu1 %v11614_v60  ;;  %7672 = vmatpush2.bf16.msra.mxu0 %v11617_v21  ;;  %v14799_v56 = vpop.f32.mrf.mxu1 }
 0x566   : > { %7673 = vmatprep.subr.bf16.mxu0 %v16395_v35  ;;  %7600 = vmatprep.subr.bf16.mxu1 %v11620_v62 }
 0x569   : > { %7601 = vmatpush2.bf16.msra.mxu1 %v11618_v16  ;;  %7674 = vmatpush2.bf16.msra.mxu0 %v11621_v12 }
 0x56a   : > { %7675 = vmatprep.subr.bf16.mxu0 %v16395_v35  ;;  %7602 = vmatprep.subr.bf16.mxu1 %v11624_v54 }
 0x56d   : > { %7603 = vmatpush2.bf16.msra.mxu1 %v11622_v17  ;;  %7676 = vmatpush2.bf16.msra.mxu0 %v11625_v61 }
 0x56e   : > { %7677 = vmatprep.subr.bf16.mxu0 %v16395_v35  ;;  %7604 = vmatprep.subr.bf16.mxu1 %v11628_v4 }
 0x571   : > { %7605 = vmatpush2.bf16.msra.mxu1 %v11626_v41  ;;  %7678 = vmatpush2.bf16.msra.mxu0 %v11629_v39 }
 0x5a6   : > { %v6545_v10 = vpop.f32.mrf.mxu0 }
 0x5a7   : > { %v14775_v24 = vadd.f32 %v6545_v10, %v14623_v2 }
 0x5a8   : > { %v14777_v40 = vpop.f32.mrf.mxu0 }
 0x5aa   : > { %v14779_v35 = vpop.f32.mrf.mxu0 }
 0x5ac   : > { %v14781_v26 = vpop.f32.mrf.mxu0 }
 0x5ae   : > { %v6555_v42 = vpop.f32.mrf.mxu0 }
 0x5af   : > { %v14784_v30 = vadd.f32 %v6555_v42, %v14652_v44 }
 0x5b0   : > { %v14788_v13 = vpop.f32.mrf.mxu0 }
 0x5b2   : > { %v14790_v53 = vpop.f32.mrf.mxu0 }
 0x5b4   : > { %v14794_v2 = vpop.f32.mrf.mxu0 }
 0x5b6   : > { %v6565_v59 = vpop.f32.mrf.mxu0 }
 0x5b7   : > { %v14797_v63 = vadd.f32 %v6565_v59, %v14681_v5 }
 0x5b8   : > { %v14801_v36 = vpop.f32.mrf.mxu0 }
 0x5b9   : > { %16400 = vst [vmem:[#allocation26_spill] sm:$0xff] %v14797_v63 }
 0x5ba   : > { %v14803_v44 = vpop.f32.mrf.mxu0  ;;  %v6689_v6 = vpop.f32.mrf.mxu1 }
 0x5bc   : > { %v14805_v11 = vpop.f32.mrf.mxu0  ;;  %v6691_v23 = vpop.f32.mrf.mxu1 }
 0x5bd   : > { %16401 = vst [vmem:[#allocation98_spill] sm:$0xff] %v14805_v11 }
 0x5be   : > { %v6575_v52 = vpop.f32.mrf.mxu0  ;;  %v6693_v45 = vpop.f32.mrf.mxu1 }
 0x5bf   : > { %v14808_v60 = vadd.f32 %v6575_v52, %v14710_v31 }
 0x5c0   : > { %v14810_v21 = vpop.f32.mrf.mxu0  ;;  %v14812_v62 = vpop.f32.mrf.mxu1 }
 0x5c1   : > { %16402 = vst [vmem:[#allocation38_spill] sm:$0xff] %v14808_v60  ;;  %16403 = vst [vmem:[#allocation77_spill] sm:$0xff] %v14810_v21 }
 0x5c2   : > { %v14814_v5 = vpop.f32.mrf.mxu0  ;;  %v14816_v16 = vpop.f32.mrf.mxu1 }
 0x5c3   : > { %16404 = vst [vmem:[#allocation18_spill] sm:$0xff] %v14814_v5 }
 0x5c4   : > { %v14818_v12 = vpop.f32.mrf.mxu0  ;;  %v14820_v54 = vpop.f32.mrf.mxu1 }
 0x5c5   : > { %16405 = vst [vmem:[#allocation100_spill] sm:$0xff] %v14818_v12 }
 0x5c6   : > { %v14822_v17 = vpop.f32.mrf.mxu1  ;;  %v6834_v61 = vpop.f32.mrf.mxu0 }
 0x5c7   : > { %16406 = vst [vmem:[#allocation113_spill] sm:$0xff] %v14822_v17 }
 0x5c8   : > { %v14824_v4 = vpop.f32.mrf.mxu1  ;;  %v6836_v41 = vpop.f32.mrf.mxu0 }
 0x5c9   : > { %16407 = vst [vmem:[#allocation23_spill] sm:$0xff] %v14824_v4 }
 0x5ca   : > { %v14826_v31 = vpop.f32.mrf.mxu1  ;;  %v6838_v39 = vpop.f32.mrf.mxu0 }
 0x5cb   : > { %16408 = vst [vmem:[#allocation61_spill] sm:$0xff] %v14826_v31 }
 0x5cc   : > { %v14828_v10 = vpop.f32.mrf.mxu1  ;;  %v14830_v42 = vpop.f32.mrf.mxu0 }
 0x5cd   : > { %16409 = vst [vmem:[#allocation29_spill] sm:$0xff] %v14828_v10 }
 0x5ce   : > { %v14832_v59 = vpop.f32.mrf.mxu1  ;;  %v14834_v52 = vpop.f32.mrf.mxu0 }
 0x5cf   : > { %16410 = vst [vmem:[#allocation13_spill] sm:$0xff] %v14832_v59 }
 0x5d0   : > { %v14836_v60 = vpop.f32.mrf.mxu1  ;;  %v14838_v63 = vpop.f32.mrf.mxu0 }
 0x5d1   : > { %16411 = vst [vmem:[#allocation16_spill] sm:$0xff] %v14836_v60  ;;  %16412 = vst [vmem:[#allocation35_spill] sm:$0xff] %v14838_v63 }
 0x5d2   : > { %v14840_v17 = vpop.f32.mrf.mxu1  ;;  %v14842_v12 = vpop.f32.mrf.mxu0 }
 0x5d3   : > { %16413 = vst [vmem:[#allocation32_spill] sm:$0xff] %v14840_v17  ;;  %16414 = vst [vmem:[#allocation31_spill] sm:$0xff] %v14842_v12  ;;  %v6115_v17 = vadd.f32 %v14424_v9, %v14416_v0 }
 0x5d4   : > { %v14844_v4 = vpop.f32.mrf.mxu1  ;;  %v14846_v31 = vpop.f32.mrf.mxu0 }
 0x5d5   : > { %16415 = vst [vmem:[#allocation36_spill] sm:$0xff] %v14844_v4  ;;  %v6125_v4 = vadd.f32 %v14440_v51, %v14426_v32  ;;  %v6279_v0 = vadd.f32 %v14533_v20, %v6115_v17  ;;  %v6432_v32 = vadd.f32 %v14637_v57, %v14531_v50  ;;  %v6435_v50 = vadd.f32 %v14655_v38, %v14544_v7 }
 0x5d6   : > { %v14848_v5 = vpop.f32.mrf.mxu1  ;;  %v14850_v10 = vpop.f32.mrf.mxu0 }
 0x5d7   : > { %16416 = vst [vmem:[#allocation49_spill] sm:$0xff] %v14848_v5  ;;  %16417 = vst [vmem:[#allocation34_spill] sm:$0xff] %v14850_v10  ;;  %v6135_v5 = vadd.f32 %v14455_v58, %v14442_v47  ;;  %v6283_v51 = vadd.f32 %v14554_v34, %v6125_v4  ;;  %v6728_v58 = vadd.f32 %v6689_v6, %v14775_v24 }
 0x5d8   : > { %v14852_v21 = vpop.f32.mrf.mxu1  ;;  %v14854_v59 = vpop.f32.mrf.mxu0  ;;  %v6433_v17 = vadd.f32 %v14640_v33, %v6279_v0  ;;  %v6436_v34 = vadd.f32 %v14666_v1, %v14552_v8  ;;  %v6440_v33 = vadd.f32 %v14695_v46, %v14573_v37  ;;  %v6589_v37 = vadd.f32 %v14788_v13, %v6435_v50  ;;  %v16424_v0 = vld [vmem:[#allocation77_spill] sm:$0xff] }
 0x5d9   : > { %16418 = vst [vmem:[#allocation39_spill] sm:$0xff] %v14852_v21  ;;  %16419 = vst [vmem:[#allocation37_spill] sm:$0xff] %v14854_v59  ;;  %v6431_v59 = vadd.f32 %v14626_v48, %v14523_v19 }
 0x5da   : > { %v14856_v11 = vpop.f32.mrf.mxu0  ;;  %v6978_v60 = vpop.f32.mrf.mxu1  ;;  %v6587_v8 = vadd.f32 %v14781_v26, %v6433_v17  ;;  %v6732_v26 = vadd.f32 %v14816_v16, %v14784_v30  ;;  %v16423_v16 = vld [vmem:[#allocation98_spill] sm:$0xff]  ;;  %v16427_v17 = vld [vmem:[#allocation100_spill] sm:$0xff] }
 0x5db   : > { %16420 = vst [vmem:[#allocation40_spill] sm:$0xff] %v14856_v11  ;;  %v6145_v11 = vadd.f32 %v14610_v55, %v14511_v14  ;;  %v6585_v47 = vadd.f32 %v14777_v40, %v6431_v59  ;;  %v6586_v14 = vadd.f32 %v14779_v35, %v6432_v32  ;;  %v6873_v55 = vadd.f32 %v6834_v61, %v6728_v58 }
 0x5dc   : > { %v14860_v63 = vpop.f32.mrf.mxu0  ;;  %v6980_v12 = vpop.f32.mrf.mxu1  ;;  %v6437_v40 = vadd.f32 %v14669_v25, %v6283_v51  ;;  %v6877_v30 = vadd.f32 %v14834_v52, %v6732_v26  ;;  %v16428_v52 = vld [vmem:[#allocation113_spill] sm:$0xff] }
 0x5dd   : > { %16421 = vst [vmem:[#allocation44_spill] sm:$0xff] %v14860_v63  ;;  %v6729_v20 = vadd.f32 %v6691_v23, %v6585_v47  ;;  %v6291_v57 = vadd.f32 %v14772_v18, %v6145_v11  ;;  %v6730_v6 = vadd.f32 %v6693_v45, %v6586_v14  ;;  %v7017_v35 = vadd.f32 %v6978_v60, %v6873_v55  ;;  %v7189_v18 = vpop.permute.xlu1 %7188  ;;  %v16425_v47 = vld [vmem:[#allocation35_spill] sm:$0xff]  ;;  %v16426_v55 = vld [vmem:[#allocation18_spill] sm:$0xff] }
 0x5de   : > { %v14866_v10 = vpop.f32.mrf.mxu0  ;;  %v6982_v21 = vpop.f32.mrf.mxu1  ;;  %v6439_v23 = vadd.f32 %v14684_v22, %v14565_v28  ;;  %v6443_v11 = vadd.f32 %v14786_v29, %v14586_v27  ;;  %v6444_v60 = vadd.f32 %v14792_v15, %v14593_v43  ;;  %v6731_v22 = vadd.f32 %v14812_v62, %v6587_v8  ;;  %v16432_v8 = vld [vmem:[#allocation31_spill] sm:$0xff] }
 0x5df   : > { %16422 = vst [vmem:[#allocation45_spill] sm:$0xff] %v14866_v10  ;;  %v6287_v10 = vadd.f32 %v14575_v3, %v6135_v5  ;;  %v6874_v5 = vadd.f32 %v6836_v41, %v6729_v20  ;;  %v6875_v25 = vadd.f32 %v6838_v39, %v6730_v6  ;;  %v6445_v28 = vadd.f32 %v14799_v56, %v6291_v57  ;;  %v7194_v39 = vpop.permute.xlu0 %7193  ;;  %v16429_v6 = vld [vmem:[#allocation23_spill] sm:$0xff] }
 0x5e0   : > { %v14873_v9 = vpop.f32.mrf.mxu0  ;;  %v6984_v63 = vpop.f32.mrf.mxu1  ;;  %v6590_v29 = vadd.f32 %v14790_v53, %v6436_v34  ;;  %v6593_v43 = vadd.f32 %v14801_v36, %v6439_v23  ;;  %v6876_v15 = vadd.f32 %v14830_v42, %v6731_v22  ;;  %v6594_v62 = vadd.f32 %v14803_v44, %v6440_v33  ;;  %v16430_v33 = vld [vmem:[#allocation26_spill] sm:$0xff] }
 0x5e1   : > { %v6441_v7 = vadd.f32 %v14698_v49, %v6287_v10  ;;  %v7018_v45 = vadd.f32 %v6980_v12, %v6874_v5  ;;  %v7019_v4 = vadd.f32 %v6982_v21, %v6875_v25  ;;  %v6591_v12 = vadd.f32 %v14794_v2, %v6437_v40 }
 0x5e2   : > { %v14881_v19 = vpop.f32.mrf.mxu0  ;;  %v6988_v48 = vpop.f32.mrf.mxu1  ;;  %v6733_v10 = vadd.f32 %v14820_v54, %v6589_v37  ;;  %v6597_v53 = vadd.f32 %v16424_v0, %v6443_v11  ;;  %v7020_v32 = vadd.f32 %v6984_v63, %v6876_v15  ;;  %v6598_v44 = vadd.f32 %v16426_v55, %v6444_v60 }
 0x5e3   : > { %v6595_v59 = vadd.f32 %v16423_v16, %v6441_v7  ;;  %v7021_v58 = vadd.f32 %v6988_v48, %v6877_v30  ;;  %v14920_v54 = vadd.f32 %v16427_v17, %v6445_v28  ;;  %v6734_v50 = vadd.f32 %v16428_v52, %v6590_v29  ;;  %v16431_v7 = vld [vmem:[#allocation61_spill] sm:$0xff] }
 0x5e4   : > { %v14890_v24 = vpop.f32.mrf.mxu0  ;;  %v6990_v3 = vpop.f32.mrf.mxu1  ;;  %v6878_v42 = vadd.f32 %v16425_v47, %v6733_v10  ;;  %v6735_v63 = vadd.f32 %v16429_v6, %v6591_v12  ;;  %v6736_v48 = vadd.f32 %v16431_v7, %v16430_v33  ;;  %v16434_v12 = vld [vmem:[#allocation34_spill] sm:$0xff]  ;;  %v16436_v47 = vld [vmem:[#allocation16_spill] sm:$0xff]  ;;  %v16442_v33 = vld [vmem:[#allocation49_spill] sm:$0xff] }
 0x5e5   : > { %v6742_v7 = vadd.f32 %v16442_v33, %v6598_v44 }
 0x5e6   : > { %v6992_v38 = vpop.f32.mrf.mxu1  ;;  %v7123_v1 = vpop.f32.mrf.mxu0  ;;  %v7022_v5 = vadd.f32 %v6990_v3, %v6878_v42  ;;  %v6880_v60 = vadd.f32 %v14846_v31, %v6735_v63  ;;  %v6881_v15 = vadd.f32 %v16434_v12, %v6736_v48  ;;  %v6739_v42 = vadd.f32 %v16436_v47, %v6595_v59  ;;  %v16439_v63 = vld [vmem:[#allocation38_spill] sm:$0xff] }
 0x5e7   : > { %v7162_v61 = vadd.f32 %v7123_v1, %v7017_v35  ;;  %v6879_v1 = vadd.f32 %v16432_v8, %v6734_v50 }
 0x5e8   : > { %v6994_v46 = vpop.f32.mrf.mxu1  ;;  %v7125_v49 = vpop.f32.mrf.mxu0 }
 0x5e9   : > { %v7226_v41 = vadd.f32 %v7189_v18, %v7162_v61  ;;  %v7163_v27 = vadd.f32 %v7125_v49, %v7018_v45  ;;  %v7199_v61 = vpop.permute.xlu1 %7198  ;;  %v16433_v49 = vld [vmem:[#allocation29_spill] sm:$0xff]  ;;  %v7023_v3 = vadd.f32 %v6992_v38, %v6879_v1 }
 0x5ea   : > { %v6998_v56 = vpop.f32.mrf.mxu1  ;;  %v7127_v13 = vpop.f32.mrf.mxu0  ;;  %v6737_v26 = vadd.f32 %v16433_v49, %v6593_v43  ;;  %v16437_v43 = vld [vmem:[#allocation37_spill] sm:$0xff] }
 0x5eb   : > { %v7164_v21 = vadd.f32 %v7127_v13, %v7019_v4  ;;  %v7227_v2 = vadd.f32 %v7189_v18, %v7163_v27  ;;  %v7242_v14 = vmul.f32 0.1, %v7226_v41  ;;  %v7024_v13 = vadd.f32 %v6994_v46, %v6880_v60  ;;  %v16444_v60 = vld [vmem:[#allocation44_spill] sm:$0xff]  ;;  %v16445_v49 = vld [vmem:[#allocation45_spill] sm:$0xff] }
 0x5ec   : > { %v7000_v51 = vpop.f32.mrf.mxu1  ;;  %v7129_v36 = vpop.f32.mrf.mxu0  ;;  %v6882_v38 = vadd.f32 %v16437_v43, %v6737_v26 }
 0x5ed   : > { %v7228_v20 = vadd.f32 %v7194_v39, %v7164_v21  ;;  %v7165_v34 = vadd.f32 %v7129_v36, %v7020_v32  ;;  %v7243_v18 = vmul.f32 0.1, %v7227_v2  ;;  %v7258_v28 = vmax.f32 %v7226_v41, %v7242_v14  ;;  %v7204_v36 = vpop.permute.xlu0 %7203 }
 0x5ee   : > { %v7002_v57 = vpop.f32.mrf.mxu1  ;;  %v7133_v40 = vpop.f32.mrf.mxu0 }
 0x5ef   : > { %v7244_v35 = vmul.f32 0.1, %v7228_v20  ;;  %v7166_v23 = vadd.f32 %v7133_v40, %v7021_v58  ;;  %v7229_v11 = vadd.f32 %v7194_v39, %v7165_v34  ;;  %v16435_v39 = vld [vmem:[#allocation13_spill] sm:$0xff]  ;;  %v7259_v16 = vmax.f32 %v7227_v2, %v7243_v18  ;;  %v7209_v34 = vpop.permute.xlu1 %7208 }
 0x5f0   : > { %v7004_v25 = vpop.f32.mrf.mxu1  ;;  %v7135_v45 = vpop.f32.mrf.mxu0  ;;  %v6738_v21 = vadd.f32 %v16435_v39, %v6594_v62  ;;  %v7025_v58 = vadd.f32 %v6998_v56, %v6881_v15  ;;  %v7026_v62 = vadd.f32 %v7000_v51, %v6882_v38 }
 0x5f1   : > { %v7260_v37 = vmax.f32 %v7228_v20, %v7244_v35  ;;  %v7167_v22 = vadd.f32 %v7135_v45, %v7022_v5  ;;  %v7245_v4 = vmul.f32 0.1, %v7229_v11  ;;  %v7230_v27 = vadd.f32 %v7199_v61, %v7166_v23  ;;  %v16438_v20 = vld [vmem:[#allocation40_spill] sm:$0xff]  ;;  %v16443_v45 = vld [vmem:[#allocation39_spill] sm:$0xff] }
 0x5f2   : > { %v7137_v29 = vpop.f32.mrf.mxu0  ;;  %v7008_v32 = vpop.f32.mrf.mxu1  ;;  %v6883_v55 = vadd.f32 %v16438_v20, %v6738_v21  ;;  %v16440_v5 = vld [vmem:[#allocation32_spill] sm:$0xff] }
 0x5f3   : > { %v7274_v10 = vpack.c.bf16 %v7260_v37, %v7258_v28  ;;  %v7231_v30 = vadd.f32 %v7199_v61, %v7167_v22  ;;  %v7261_v0 = vmax.f32 %v7229_v11, %v7245_v4  ;;  %v7168_v31 = vadd.f32 %v7137_v29, %v7023_v3  ;;  %v16441_v23 = vld [vmem:[#allocation36_spill] sm:$0xff]  ;;  %v7214_v22 = vpop.permute.xlu0 %7213 }
 0x5f4   : > { %v7139_v41 = vpop.f32.mrf.mxu0  ;;  %v7246_v46 = vmul.f32 0.1, %v7230_v27  ;;  %v6740_v35 = vadd.f32 %v16440_v5, %v16439_v63  ;;  %v6741_v59 = vadd.f32 %v16441_v23, %v6597_v53  ;;  %v7010_v48 = vpop.f32.mrf.mxu1  ;;  %v7027_v1 = vadd.f32 %v7002_v57, %v6883_v55 }
 0x5f5   : > { %v7169_v14 = vadd.f32 %v7139_v41, %v7024_v13  ;;  %v7275_v17 = vpack.c.bf16 %v7261_v0, %v7259_v16  ;;  %v7232_v52 = vadd.f32 %v7204_v36, %v7168_v31  ;;  %v7247_v2 = vmul.f32 0.1, %v7231_v30 }
 0x5f6   : > { %v7143_v50 = vpop.f32.mrf.mxu0  ;;  %v6743_v61 = vadd.f32 %v16443_v45, %v14920_v54  ;;  %v6884_v53 = vadd.f32 %v16444_v60, %v6739_v42  ;;  %v7262_v28 = vmax.f32 %v7230_v27, %v7246_v46  ;;  %v6885_v26 = vadd.f32 %v16445_v49, %v6740_v35  ;;  %v7012_v15 = vpop.f32.mrf.mxu1 }
 0x5f7   : > { %v7233_v40 = vadd.f32 %v7204_v36, %v7169_v14  ;;  %v7170_v6 = vadd.f32 %v7143_v50, %v7025_v58  ;;  %v7248_v56 = vmul.f32 0.1, %v7232_v52  ;;  %10733 = vmatprep.mubr.msk.bf16.mxu1 %vm1427_vm4, %v7275_v17  ;;  %10737 = vmatprep.mubr.msk.bf16.mxu0 %vm1427_vm4, %v7275_v17  ;;  %v7263_v3 = vmax.f32 %v7231_v30, %v7247_v2  ;;  %v7219_v36 = vpop.permute.xlu1 %7218 }
 0x5f8   : > { %v7145_v8 = vpop.f32.mrf.mxu0  ;;  %7607 = vmatmul.mubr.bf16.vlgmr.msra.gmra.mxu1 %v7274_v10  ;;  %7680 = vmatmul.mubr.bf16.vlgmr.msra.gmra.mxu0 %v7274_v10  ;;  %v7028_v57 = vadd.f32 %v7004_v25, %v6884_v53  ;;  %v6886_v21 = vadd.f32 %v14873_v9, %v6741_v59  ;;  %v7029_v54 = vadd.f32 %v7008_v32, %v6885_v26  ;;  %v7014_v9 = vpop.f32.mrf.mxu1 }
 0x5f9   : > { %v7249_v18 = vmul.f32 0.1, %v7233_v40  ;;  %v7234_v51 = vadd.f32 %v7209_v34, %v7170_v6  ;;  %v7171_v11 = vadd.f32 %v7145_v8, %v7026_v62  ;;  %v7264_v44 = vmax.f32 %v7232_v52, %v7248_v56  ;;  %v7224_v62 = vpop.permute.xlu0 %7223 }
 0x5fa   : > { %v7147_v37 = vpop.f32.mrf.mxu0  ;;  %v6887_v27 = vadd.f32 %v14881_v19, %v6742_v7  ;;  %v6888_v30 = vadd.f32 %v14890_v24, %v6743_v61  ;;  %v7030_v47 = vadd.f32 %v7010_v48, %v6886_v21 }
 0x5fb   : > { %v7265_v4 = vmax.f32 %v7233_v40, %v7249_v18  ;;  %v7172_v29 = vadd.f32 %v7147_v37, %v7027_v1  ;;  %v7276_v12 = vpack.c.bf16 %v7264_v44, %v7262_v28  ;;  %v7250_v13 = vmul.f32 0.1, %v7234_v51 }
 0x5fc   : > { %v7235_v39 = vadd.f32 %v7209_v34, %v7171_v11  ;;  %v7149_v10 = vpop.f32.mrf.mxu0  ;;  %v7031_v43 = vadd.f32 %v7012_v15, %v6887_v27  ;;  %v7032_v46 = vadd.f32 %v7014_v9, %v6888_v30 }
 0x5fd   : > { %v7277_v16 = vpack.c.bf16 %v7265_v4, %v7263_v3  ;;  %v7236_v0 = vadd.f32 %v7214_v22, %v7172_v29  ;;  %v7173_v31 = vadd.f32 %v7149_v10, %v7028_v57  ;;  %v7266_v38 = vmax.f32 %v7234_v51, %v7250_v13 }
 0x5fe   : > { %v7153_v41 = vpop.f32.mrf.mxu0  ;;  %v7251_v32 = vmul.f32 0.1, %v7235_v39 }
 0x5ff   : > { %v7252_v42 = vmul.f32 0.1, %v7236_v0  ;;  %v7174_v25 = vadd.f32 %v7153_v41, %v7029_v54  ;;  %10734 = vmatprep.mubr.msk.bf16.mxu1 %vm1427_vm4, %v7277_v16  ;;  %10738 = vmatprep.mubr.msk.bf16.mxu0 %vm1427_vm4, %v7277_v16  ;;  %v7237_v58 = vadd.f32 %v7214_v22, %v7173_v31 }
 0x600   : > { %v7155_v14 = vpop.f32.mrf.mxu0  ;;  %7617 = vmatmul.mubr.bf16.gmra.mxu1 %v7276_v12  ;;  %7688 = vmatmul.mubr.bf16.gmra.mxu0 %v7276_v12  ;;  %v7267_v2 = vmax.f32 %v7235_v39, %v7251_v32 }
 0x601   : > { %v7268_v20 = vmax.f32 %v7236_v0, %v7252_v42  ;;  %v7238_v19 = vadd.f32 %v7219_v36, %v7174_v25  ;;  %v7175_v55 = vadd.f32 %v7155_v14, %v7030_v47  ;;  %v7253_v17 = vmul.f32 0.1, %v7237_v58 }
 0x602   : > { %v7157_v24 = vpop.f32.mrf.mxu0 }
 0x603   : > { %v7278_v52 = vpack.c.bf16 %v7268_v20, %v7266_v38  ;;  %v7239_v50 = vadd.f32 %v7219_v36, %v7175_v55  ;;  %v7176_v34 = vadd.f32 %v7157_v24, %v7031_v43  ;;  %v7269_v40 = vmax.f32 %v7237_v58, %v7253_v17 }
 0x604   : > { %v7159_v6 = vpop.f32.mrf.mxu0  ;;  %v7254_v63 = vmul.f32 0.1, %v7238_v19 }
 0x605   : > { %v7240_v5 = vadd.f32 %v7224_v62, %v7176_v34  ;;  %v7177_v35 = vadd.f32 %v7159_v6, %v7032_v46  ;;  %v7279_v23 = vpack.c.bf16 %v7269_v40, %v7267_v2  ;;  %v7255_v59 = vmul.f32 0.1, %v7239_v50 }
 0x606   : > { %v7270_v56 = vmax.f32 %v7238_v19, %v7254_v63 }
 0x607   : > { %v7256_v33 = vmul.f32 0.1, %v7240_v5  ;;  %v7241_v7 = vadd.f32 %v7224_v62, %v7177_v35  ;;  %10735 = vmatprep.mubr.msk.bf16.mxu1 %vm1427_vm4, %v7279_v23  ;;  %10739 = vmatprep.mubr.msk.bf16.mxu0 %vm1427_vm4, %v7279_v23  ;;  %v7271_v1 = vmax.f32 %v7239_v50, %v7255_v59  ;;  %v11650_v59 = vld [vmem:[%s15821_s7] sm:$0xff]  }
 0x608   : > { %7627 = vmatmul.mubr.bf16.gmra.mxu1 %v7278_v52  ;;  %7696 = vmatmul.mubr.bf16.gmra.mxu0 %v7278_v52 }
 0x609   : > { %v7272_v48 = vmax.f32 %v7240_v5, %v7256_v33  ;;  %v7257_v8 = vmul.f32 0.1, %v7241_v7 }
 0x60b   : > { %v7280_v18 = vpack.c.bf16 %v7272_v48, %v7270_v56  ;;  %v7273_v51 = vmax.f32 %v7241_v7, %v7257_v8  ;;  %v11654_v8 = vld [vmem:[%s15821_s7 + $0x40] sm:$0xff]  }
 0x60d   : > { %v7281_v11 = vpack.c.bf16 %v7273_v51, %v7271_v1 }
 0x60f   : > { %10736 = vmatprep.mubr.msk.bf16.mxu1 %vm1427_vm4, %v7281_v11  ;;  %10740 = vmatprep.mubr.msk.bf16.mxu0 %vm1427_vm4, %v7281_v11  ;;  %v11651_v11 = vld [vmem:[%s15821_s7 + $0x8] sm:$0xff]  }
 0x610   : > { %7637 = vmatmul.mubr.bf16.gmra.mxu1 %v7280_v18  ;;  %7704 = vmatmul.mubr.bf16.gmra.mxu0 %v7280_v18 }
 0x611   : > { %11276 = vmatprep.mubr.msk.bf16.mxu0 %vm7922_vm14, %v11650_v59  ;;  %11252 = vmatprep.mubr.msk.bf16.mxu1 %vm7922_vm14, %v11654_v8 }
 0x6b8   : > { %v14953_v45 = vpop.f32.mrf.mxu1  ;;  %v7681_v61 = vpop.f32.mrf.mxu0 }
 0x6b9   : > { %v11089_v60 = vpack.c.bf16 %v7681_v61, %v7681_v61 }
 0x6ba   : > { %v14955_v53 = vpop.f32.mrf.mxu1  ;;  %v7683_v28 = vpop.f32.mrf.mxu0 }
 0x6bb   : > { %7794 = vst.msk [vmem:[#allocation3 + $0x8] sm:$0xf] %vm7793_vm13, %v11089_v60  ;;  %v11088_v44 = vpack.c.bf16 %v14955_v53, %v14953_v45  ;;  %v11652_v28 = vld [vmem:[%s15821_s7 + $0x10] sm:$0xff]  }
 0x6bc   : > { %v14960_v37 = vpop.f32.mrf.mxu1  ;;  %v7684_v22 = vpop.f32.mrf.mxu0 }
 0x6bd   : > { %7792 = vst [vmem:[#allocation3] sm:$0xff] %v11088_v44  ;;  %v11091_v49 = vpack.c.bf16 %v7684_v22, %v7684_v22  ;;  %v11722_v15 = vpack.c.bf16 %v14960_v37, %v14953_v45  ;;  %v9788_v45 = vld [vmem:[%s15822_s8 + $0x18] sm:$0xff] }
 0x6be   : > { %v14962_v26 = vpop.f32.mrf.mxu1  ;;  %v7686_v3 = vpop.f32.mrf.mxu0 }
 0x6bf   : > { %7796 = vst.msk [vmem:[#allocation3 + $0x14] sm:$0xf] %vm7793_vm13, %v11091_v49  ;;  %v11090_v4 = vpack.c.bf16 %v14962_v26, %v14960_v37  ;;  %v11723_v13 = vpack.c.bf16 %v14962_v26, %v14955_v53  ;;  %v11653_v49 = vld [vmem:[%s15821_s7 + $0x18] sm:$0xff]   ;;  %v9790_v37 = vld [vmem:[%s15822_s8 + $0x28] sm:$0xff]  ;;  %v9789_v26 = vld [vmem:[%s15822_s8 + $0x20] sm:$0xff] }
 0x6c0   : > { %v14967_v29 = vpop.f32.mrf.mxu1  ;;  %v7689_v57 = vpop.f32.mrf.mxu0  ;;  %v9794_v53 = vld [vmem:[%s15822_s8 + $0x48] sm:$0xff] }
 0x6c1   : > { %7795 = vst [vmem:[#allocation3 + $0xc] sm:$0xff] %v11090_v4  ;;  %v11093_v12 = vpack.c.bf16 %v7689_v57, %v7689_v57  ;;  %v11656_v57 = vld [vmem:[%s15821_s7 + $0x20] sm:$0xff]  }
 0x6c2   : > { %v14973_v39 = vpop.f32.mrf.mxu1  ;;  %v7691_v10 = vpop.f32.mrf.mxu0 }
 0x6c3   : > { %7798 = vst.msk [vmem:[#allocation3 + $0x20] sm:$0xf] %vm7793_vm13, %v11093_v12  ;;  %v11092_v21 = vpack.c.bf16 %v14973_v39, %v14967_v29 }
 0x6c4   : > { %v14978_v54 = vpop.f32.mrf.mxu1  ;;  %v7692_v16 = vpop.f32.mrf.mxu0 }
 0x6c5   : > { %7797 = vst [vmem:[#allocation3 + $0x18] sm:$0xff] %v11092_v21  ;;  %v11095_v0 = vpack.c.bf16 %v7692_v16, %v7692_v16  ;;  %v11725_v25 = vpack.c.bf16 %v14978_v54, %v14967_v29  ;;  %v11657_v21 = vld [vmem:[%s15821_s7 + $0x28] sm:$0xff]   ;;  %v9785_v29 = vld [vmem:[%s15822_s8] sm:$0xff] }
 0x6c6   : > { %v14980_v27 = vpop.f32.mrf.mxu1  ;;  %v7694_v31 = vpop.f32.mrf.mxu0  ;;  %v11645_v12 = vld [vmem:[#allocation3 + $0x8] ss:$12 sps:$4 sm:$0xff]  }
 0x6c7   : > { %7800 = vst.msk [vmem:[#allocation3 + $0x2c] sm:$0xf] %vm7793_vm13, %v11095_v0  ;;  %v11094_v41 = vpack.c.bf16 %v14980_v27, %v14978_v54  ;;  %v11724_v42 = vpack.c.bf16 %v14980_v27, %v14973_v39  ;;  %v11660_v0 = vld [vmem:[%s15821_s7 + $0x30] sm:$0xff]   ;;  %v9786_v39 = vld [vmem:[%s15822_s8 + $0x8] sm:$0xff] }
 0x6c8   : > { %v14985_v36 = vpop.f32.mrf.mxu1  ;;  %v7697_v30 = vpop.f32.mrf.mxu0  ;;  %v15030_v56 = vld [vmem:[#allocation3] ss:$12 sps:$4 sm:$0xff]   ;;  %v11643_v3 = vld [vmem:[#allocation3 + $0x4] ss:$12 sps:$4 sm:$0xff]  }
 0x6c9   : > { %7799 = vst [vmem:[#allocation3 + $0x24] sm:$0xff] %v11094_v41  ;;  %v11097_v47 = vpack.c.bf16 %v7697_v30, %v7697_v30  ;;  %v11649_v31 = vld [vmem:[#allocation3 + $0x4] ss:$12 sps:$4 sm:$0xff]   ;;  %v11661_v41 = vld [vmem:[%s15821_s7 + $0x38] sm:$0xff]  }
 0x6ca   : > { %v14991_v43 = vpop.f32.mrf.mxu1  ;;  %v7699_v38 = vpop.f32.mrf.mxu0  ;;  %v11664_v30 = vld [vmem:[%s15821_s7 + $0xc0] sm:$0xff]   ;;  %v9787_v54 = vld [vmem:[%s15822_s8 + $0x10] sm:$0xff] }
 0x6cb   : > { %7802 = vst.msk [vmem:[#allocation3 + $0x38] sm:$0xf] %vm7793_vm13, %v11097_v47  ;;  %v11096_v9 = vpack.c.bf16 %v14991_v43, %v14985_v36  ;;  %v9791_v27 = vld [vmem:[%s15822_s8 + $0x30] sm:$0xff]  ;;  %v9797_v38 = vld [vmem:[%s15822_s8 + $0x60] sm:$0xff] }
 0x6cc   : > { %v14996_v32 = vpop.f32.mrf.mxu1  ;;  %v7700_v58 = vpop.f32.mrf.mxu0 }
 0x6cd   : > { %7801 = vst [vmem:[#allocation3 + $0x30] sm:$0xff] %v11096_v9  ;;  %v11099_v14 = vpack.c.bf16 %v7700_v58, %v7700_v58  ;;  %v11726_v52 = vpack.c.bf16 %v14996_v32, %v14985_v36  ;;  %v9798_v36 = vld [vmem:[%s15822_s8 + $0x68] sm:$0xff]  ;;  %v9799_v9 = vld [vmem:[%s15822_s8 + $0x70] sm:$0xff] }
 0x6ce   : > { %v14998_v20 = vpop.f32.mrf.mxu1  ;;  %v7702_v19 = vpop.f32.mrf.mxu0  ;;  %v11648_v16 = vld [vmem:[#allocation3 + $0x20] ss:$12 sps:$4 sm:$0xff]  }
 0x6cf   : > { %7804 = vst.msk [vmem:[#allocation3 + $0x44] sm:$0xf] %vm7793_vm13, %v11099_v14  ;;  %v11098_v55 = vpack.c.bf16 %v14998_v20, %v14996_v32  ;;  %v11727_v50 = vpack.c.bf16 %v14998_v20, %v14991_v43  ;;  %v9795_v43 = vld [vmem:[%s15822_s8 + $0x50] sm:$0xff] }
 0x6d0   : > { %v15003_v17 = vpop.f32.mrf.mxu1  ;;  %v7705_v24 = vpop.f32.mrf.mxu0  ;;  %v15043_v1 = vld [vmem:[#allocation3 + $0x18] ss:$12 sps:$4 sm:$0xff]   ;;  %v11640_v44 = vld [vmem:[#allocation3 + $0x1c] ss:$12 sps:$4 sm:$0xff]  }
 0x6d1   : > { %7803 = vst [vmem:[#allocation3 + $0x3c] sm:$0xff] %v11098_v55  ;;  %v11101_v46 = vpack.c.bf16 %v7705_v24, %v7705_v24  ;;  %v11647_v10 = vld [vmem:[#allocation3 + $0x1c] ss:$12 sps:$4 sm:$0xff]  }
 0x6d2   : > { %v15009_v34 = vpop.f32.mrf.mxu1  ;;  %v7707_v62 = vpop.f32.mrf.mxu0 }
 0x6d3   : > { %7806 = vst.msk [vmem:[#allocation3 + $0x50] sm:$0xf] %vm7793_vm13, %v11101_v46  ;;  %v11100_v2 = vpack.c.bf16 %v15009_v34, %v15003_v17 }
 0x6d4   : > { %v15014_v40 = vpop.f32.mrf.mxu1  ;;  %v7708_v6 = vpop.f32.mrf.mxu0 }
 0x6d5   : > { %7805 = vst [vmem:[#allocation3 + $0x48] sm:$0xff] %v11100_v2  ;;  %v11103_v63 = vpack.c.bf16 %v7708_v6, %v7708_v6  ;;  %v11728_v7 = vpack.c.bf16 %v15014_v40, %v15003_v17 }
 0x6d6   : > { %v15016_v5 = vpop.f32.mrf.mxu1  ;;  %v7710_v35 = vpop.f32.mrf.mxu0  ;;  %v11635_v51 = vld [vmem:[#allocation3 + $0x38] ss:$12 sps:$4 sm:$0xff]  }
 0x6d7   : > { %7808 = vst.msk [vmem:[#allocation3 + $0x5c] sm:$0xf] %vm7793_vm13, %v11103_v63  ;;  %v11102_v23 = vpack.c.bf16 %v15016_v5, %v15014_v40  ;;  %v11729_v47 = vpack.c.bf16 %v15016_v5, %v15009_v34  ;;  %v11658_v34 = vld [vmem:[%s15821_s7 + $0x50] sm:$0xff]   ;;  %v11659_v63 = vld [vmem:[%s15821_s7 + $0x58] sm:$0xff]   ;;  %v11662_v5 = vld [vmem:[%s15821_s7 + $0x60] sm:$0xff]  }
 0x6d8   : > { %v15024_v33 = vld [vmem:[#allocation3 + $0x30] ss:$12 sps:$4 sm:$0xff]   ;;  %v11634_v18 = vld [vmem:[#allocation3 + $0x34] ss:$12 sps:$4 sm:$0xff]  }
 0x6d9   : > { %7807 = vst [vmem:[#allocation3 + $0x54] sm:$0xff] %v11102_v23  ;;  %7914 = vrot.lane.b32.xlu0 %v15024_v33, %s11790_s25  ;;  %v11639_v60 = vld [vmem:[#allocation3 + $0x34] ss:$12 sps:$4 sm:$0xff]  }
 0x6dd   : > { %7910 = vrot.lane.b32.xlu0 %v15030_v56, %s11790_s25 }
 0x6de   : > { %v11644_v4 = vld [vmem:[#allocation3 + $0x50] ss:$12 sps:$4 sm:$0xff]  }
 0x6e0   : > { %v15033_v48 = vld [vmem:[#allocation3 + $0x48] ss:$12 sps:$4 sm:$0xff]   ;;  %v11637_v61 = vld [vmem:[#allocation3 + $0x4c] ss:$12 sps:$4 sm:$0xff]  }
 0x6e1   : > { %8270 = vrot.lane.b32.xlu0 %v15024_v33, %s11780_s12  ;;  %7916 = vrot.lane.b32.xlu1 %v15033_v48, %s11790_s25  ;;  %v11642_v22 = vld [vmem:[#allocation3 + $0x4c] ss:$12 sps:$4 sm:$0xff]  }
 0x6e2   : > { %11268 = vmatprep.subr.bf16.mxu0 %v15033_v48 }
 0x6e3   : > { %11269 = vmatpush3.bf16.msra.mxu0 %v15033_v48 }
 0x6e4   : > { %11270 = vmatprep.subr.bf16.mxu0 %v15024_v33 }
 0x6e5   : > { %8266 = vrot.lane.b32.xlu0 %v15030_v56, %s11780_s12  ;;  %7912 = vrot.lane.b32.xlu1 %v15043_v1, %s11790_s25 }
 0x6e7   : > { %11271 = vmatpush3.bf16.msra.mxu0 %v15024_v33 }
 0x6e8   : > { %11272 = vmatprep.subr.bf16.mxu0 %v15043_v1 }
 0x6e9   : > { %8504 = vrot.lane.b32.xlu0 %v11634_v18, %s11788_s28  ;;  %8272 = vrot.lane.b32.xlu1 %v15033_v48, %s11780_s12 }
 0x6eb   : > { %11273 = vmatpush3.bf16.msra.mxu0 %v15043_v1 }
 0x6ec   : > { %11274 = vmatprep.subr.bf16.mxu0 %v15030_v56 }
 0x6ed   : > { %8756 = vrot.lane.b32.xlu0 %v11635_v51, %s11791_s29  ;;  %8268 = vrot.lane.b32.xlu1 %v15043_v1, %s11780_s12  ;;  %v11668_v51 = vld [vmem:[%s15821_s7 + $0xd0] sm:$0xff]   ;;  %s11071_s12 = sshll.u32 %s16507_s10, 6 }
 0x6ee   : > { %s15748_s17 = scalar_lea.vmem %s15823_s9, %s11071_s12 }
 0x6ef   : > { %11275 = vmatpush3.bf16.msra.mxu0 %v15030_v56 }
 0x6f1   : > { %8758 = vrot.lane.b32.xlu0 %v11637_v61, %s11791_s29  ;;  %8754 = vrot.lane.b32.xlu1 %v11639_v60, %s11791_s29  ;;  %v11667_v60 = vld [vmem:[%s15821_s7 + $0x78] sm:$0xff]  }
 0x6f2   : > { %11277 = vmatmul.mubr.msk.bf16.vlgmr.msra.gmra.mxu0 %vm7922_vm14, %v11651_v11 }
 0x6f3   : > { %11280 = vmatprep.mubr.msk.bf16.mxu0 %vm7922_vm14, %v11652_v28  ;;  %v11670_v28 = vld [vmem:[%s15821_s7 + $0x80] sm:$0xff]  }
 0x6f5   : > { %8750 = vrot.lane.b32.xlu0 %v11640_v44, %s11791_s29  ;;  %8506 = vrot.lane.b32.xlu1 %v11642_v22, %s11788_s28 }
 0x6f9   : > { %8500 = vrot.lane.b32.xlu0 %v11643_v3, %s11788_s28  ;;  %8760 = vrot.lane.b32.xlu1 %v11644_v4, %s11791_s29 }
 0x6fa   : > { %11281 = vmatmul.mubr.msk.bf16.gmra.mxu0 %vm7922_vm14, %v11653_v49  ;;  %v11669_v49 = vld [vmem:[%s15821_s7 + $0xd8] sm:$0xff]  }
 0x6fb   : > { %11284 = vmatprep.mubr.msk.bf16.mxu0 %vm7922_vm14, %v11656_v57  ;;  %v11671_v57 = vld [vmem:[%s15821_s7 + $0x88] sm:$0xff]  }
 0x6fd   : > { %8748 = vrot.lane.b32.xlu0 %v11645_v12, %s11791_s29  ;;  %8502 = vrot.lane.b32.xlu1 %v11647_v10, %s11788_s28 }
 0x701   : > { %9177 = vrot.lane.b32.xlu0 %v15033_v48, %s11792_s24  ;;  %8752 = vrot.lane.b32.xlu1 %v11648_v16, %s11791_s29  ;;  %v11673_v16 = vld [vmem:[%s15821_s7 + $0xe8] sm:$0xff]  }
 0x702   : > { %11285 = vmatmul.mubr.msk.bf16.gmra.mxu0 %vm7922_vm14, %v11657_v21 }
 0x703   : > { %11288 = vmatprep.mubr.msk.bf16.mxu0 %vm7922_vm14, %v11660_v0 }
 0x705   : > { %9175 = vrot.lane.b32.xlu0 %v15024_v33, %s11792_s24  ;;  %8746 = vrot.lane.b32.xlu1 %v11649_v31, %s11791_s29  ;;  %s11793_s29 = smov 48   ;;  %v11676_v31 = vld [vmem:[%s15821_s7 + $0xf0] sm:$0xff]  }
 0x709   : > { %9173 = vrot.lane.b32.xlu0 %v15043_v1, %s11792_s24  ;;  %8971 = vrot.lane.b32.xlu1 %v11642_v22, %s11789_s22 }
 0x70a   : > { %11289 = vmatmul.mubr.msk.bf16.gmra.mxu0 %vm7922_vm14, %v11661_v41 }
 0x70b   : > { %11324 = vmatprep.mubr.msk.bf16.mxu0 %vm7922_vm14, %v11664_v30 }
 0x70d   : > { %9171 = vrot.lane.b32.xlu0 %v15030_v56, %s11792_s24  ;;  %8969 = vrot.lane.b32.xlu1 %v11634_v18, %s11789_s22  ;;  %v11665_v18 = vld [vmem:[%s15821_s7 + $0xc8] sm:$0xff]  }
 0x711   : > { %9425 = vrot.lane.b32.xlu0 %v11726_v52, %s11793_s29  ;;  %8967 = vrot.lane.b32.xlu1 %v11647_v10, %s11789_s22  ;;  %v11674_v10 = vld [vmem:[%s15821_s7 + $0x90] sm:$0xff]  }
 0x715   : > { %9431 = vrot.lane.b32.xlu0 %v11729_v47, %s11793_s29  ;;  %8965 = vrot.lane.b32.xlu1 %v11643_v3, %s11789_s22  ;;  %v11672_v3 = vld [vmem:[%s15821_s7 + $0xe0] sm:$0xff]   ;;  %v11675_v47 = vld [vmem:[%s15821_s7 + $0x98] sm:$0xff]  }
 0x719   : > { %9640 = vrot.lane.b32.xlu0 %v15024_v33, %s11794_s11  ;;  %9427 = vrot.lane.b32.xlu1 %v11727_v50, %s11793_s29  ;;  %v11655_v50 = vld [vmem:[%s15821_s7 + $0x48] sm:$0xff]  }
 0x71d   : > { %9423 = vrot.lane.b32.xlu0 %v11724_v42, %s11793_s29  ;;  %9429 = vrot.lane.b32.xlu1 %v11728_v7, %s11793_s29  ;;  %v9793_v42 = vld [vmem:[%s15822_s8 + $0x40] sm:$0xff]  ;;  %v11663_v7 = vld [vmem:[%s15821_s7 + $0x68] sm:$0xff]  }
 0x721   : > { %9417 = vrot.lane.b32.xlu0 %v11722_v15, %s11793_s29  ;;  %9642 = vrot.lane.b32.xlu1 %v15033_v48, %s11794_s11  ;;  %v9792_v15 = vld [vmem:[%s15822_s8 + $0x38] sm:$0xff]  ;;  %v11666_v48 = vld [vmem:[%s15821_s7 + $0x70] sm:$0xff]  }
 0x725   : > { %9636 = vrot.lane.b32.xlu0 %v15030_v56, %s11794_s11  ;;  %9421 = vrot.lane.b32.xlu1 %v11725_v25, %s11793_s29  ;;  %v9800_v25 = vld [vmem:[%s15822_s8 + $0x78] sm:$0xff] }
 0x729   : > { %9808 = vperm.xlu0 %11529, %v9786_v39   ;;  %9638 = vrot.lane.b32.xlu1 %v15043_v1, %s11794_s11 }
 0x72d   : > { %9818 = vperm.xlu0 %11529, %v9788_v45   ;;  %9419 = vrot.lane.b32.xlu1 %v11723_v13, %s11793_s29  ;;  %v9796_v13 = vld [vmem:[%s15822_s8 + $0x58] sm:$0xff]  ;;  %v11678_v45 = vld [vmem:[%s15821_s7 + $0xa0] sm:$0xff]  }
 0x731   : > { %9828 = vperm.xlu0 %11529, %v9790_v37   ;;  %9803 = vperm.xlu1 %11528, %v9785_v29   ;;  %v11677_v29 = vld [vmem:[%s15821_s7 + $0xf8] sm:$0xff]  }
 0x735   : > { %9838 = vperm.xlu0 %11529, %v9792_v15   ;;  %9813 = vperm.xlu1 %11528, %v9787_v54  }
 0x739   : > { %9848 = vperm.xlu0 %11529, %v9794_v53   ;;  %9823 = vperm.xlu1 %11528, %v9789_v26   ;;  %v11680_v53 = vld [vmem:[%s15821_s7 + $0x140] sm:$0xff]  }
 0x73d   : > { %9858 = vperm.xlu0 %11529, %v9796_v13   ;;  %9833 = vperm.xlu1 %11528, %v9791_v27   ;;  %v11679_v27 = vld [vmem:[%s15821_s7 + $0xa8] sm:$0xff]  }
 0x741   : > { %9868 = vperm.xlu0 %11529, %v9798_v36   ;;  %9843 = vperm.xlu1 %11528, %v9793_v42   ;;  %v11682_v36 = vld [vmem:[%s15821_s7 + $0xb0] sm:$0xff]  }
 0x745   : > { %9878 = vperm.xlu0 %11529, %v9800_v25   ;;  %9853 = vperm.xlu1 %11528, %v9795_v43   ;;  %v11681_v43 = vld [vmem:[%s15821_s7 + $0x148] sm:$0xff]  }
 0x749   : > { %9863 = vperm.xlu1 %11528, %v9797_v38   ;;  %v11688_v38 = vld [vmem:[%s15821_s7 + $0x150] sm:$0xff]  }
 0x74b   : > { %v7915_v32 = vpop.permute.xlu0 %7914 }
 0x74d   : > { %9873 = vperm.xlu1 %11528, %v9799_v9  }
 0x74f   : > { %v7911_v58 = vpop.permute.xlu0 %7910 }
 0x753   : > { %v8271_v14 = vpop.permute.xlu0 %8270  ;;  %v7917_v20 = vpop.permute.xlu1 %7916 }
 0x754   : > { %11244 = vmatprep.subr.bf16.mxu1 %v7917_v20 }
 0x755   : > { %11245 = vmatpush3.bf16.msra.mxu1 %v7917_v20  ;;  %v11684_v20 = vld [vmem:[%s15821_s7 + $0x100] sm:$0xff]  }
 0x756   : > { %11246 = vmatprep.subr.bf16.mxu1 %v7915_v32 }
 0x757   : > { %v8267_v19 = vpop.permute.xlu0 %8266  ;;  %v7913_v55 = vpop.permute.xlu1 %7912 }
 0x759   : > { %11247 = vmatpush3.bf16.msra.mxu1 %v7915_v32  ;;  %v11683_v32 = vld [vmem:[%s15821_s7 + $0xb8] sm:$0xff]  }
 0x75a   : > { %11248 = vmatprep.subr.bf16.mxu1 %v7913_v55 }
 0x75b   : > { %v8505_v17 = vpop.permute.xlu0 %8504  ;;  %v8273_v24 = vpop.permute.xlu1 %8272 }
 0x75d   : > { %11249 = vmatpush3.bf16.msra.mxu1 %v7913_v55  ;;  %v11689_v55 = vld [vmem:[%s15821_s7 + $0x158] sm:$0xff]  }
 0x75e   : > { %11250 = vmatprep.subr.bf16.mxu1 %v7911_v58 }
 0x75f   : > { %v15186_v46 = vpop.permute.xlu0 %8756  ;;  %v8269_v52 = vpop.permute.xlu1 %8268 }
 0x761   : > { %11251 = vmatpush3.bf16.msra.mxu1 %v7911_v58 }
 0x762   : > { %11292 = vmatprep.subr.bf16.mxu1 %v8273_v24 }
 0x763   : > { %v8759_v62 = vpop.permute.xlu0 %8758  ;;  %v15194_v2 = vpop.permute.xlu1 %8754 }
 0x764   : > { %11253 = vmatmul.mubr.msk.bf16.vlgmr.msra.gmra.mxu1 %vm7922_vm14, %v11655_v50  ;;  %v8765_v0 = vsel %vm8762_vm15, %v15194_v2, %v15186_v46  ;;  %v11693_v2 = vld [vmem:[%s15821_s7 + $0x168] sm:$0xff]  }
 0x765   : > { %11293 = vmatpush3.bf16.msra.mxu1 %v8273_v24  ;;  %11256 = vmatprep.mubr.msk.bf16.mxu1 %vm7922_vm14, %v11658_v34  ;;  %v11692_v24 = vld [vmem:[%s15821_s7 + $0x160] sm:$0xff]   ;;  %v11685_v34 = vld [vmem:[%s15821_s7 + $0x108] sm:$0xff]  }
 0x766   : > { %11294 = vmatprep.subr.bf16.mxu1 %v8271_v14 }
 0x767   : > { %v15198_v40 = vpop.permute.xlu0 %8750  ;;  %v8507_v6 = vpop.permute.xlu1 %8506 }
 0x768   : > { %11316 = vmatprep.subr.bf16.mxu0 %v8507_v6 }
 0x769   : > { %11295 = vmatpush3.bf16.msra.mxu1 %v8271_v14  ;;  %11317 = vmatpush3.bf16.msra.mxu0 %v8507_v6  ;;  %v11687_v6 = vld [vmem:[%s15821_s7 + $0x118] sm:$0xff]  }
 0x76a   : > { %11296 = vmatprep.subr.bf16.mxu1 %v8269_v52  ;;  %11318 = vmatprep.subr.bf16.mxu0 %v8505_v17 }
 0x76b   : > { %v8501_v35 = vpop.permute.xlu0 %8500  ;;  %v8761_v23 = vpop.permute.xlu1 %8760 }
 0x76c   : > { %11257 = vmatmul.mubr.msk.bf16.gmra.mxu1 %vm7922_vm14, %v11659_v63  ;;  %v8766_v56 = vsel %vm8762_vm15, %v8759_v62, %v8761_v23  ;;  %v11686_v62 = vld [vmem:[%s15821_s7 + $0x110] sm:$0xff]   ;;  %v11690_v63 = vld [vmem:[%s15821_s7 + $0x120] sm:$0xff]   ;;  %v11691_v23 = vld [vmem:[%s15821_s7 + $0x128] sm:$0xff]  }
 0x76d   : > { %11297 = vmatpush3.bf16.msra.mxu1 %v8269_v52  ;;  %11319 = vmatpush3.bf16.msra.mxu0 %v8505_v17 }
 0x76e   : > { %11298 = vmatprep.subr.bf16.mxu1 %v8267_v19  ;;  %11260 = vmatprep.mubr.msk.bf16.mxu1 %vm7922_vm14, %v11662_v5  ;;  %v11697_v5 = vld [vmem:[%s15821_s7 + $0x178] sm:$0xff]  }
 0x76f   : > { %v15208_v59 = vpop.permute.xlu0 %8748  ;;  %v8503_v33 = vpop.permute.xlu1 %8502 }
 0x770   : > { %11320 = vmatprep.subr.bf16.mxu0 %v8503_v33 }
 0x771   : > { %11299 = vmatpush3.bf16.msra.mxu1 %v8267_v19  ;;  %11321 = vmatpush3.bf16.msra.mxu0 %v8503_v33  ;;  %v11701_v33 = vld [vmem:[%s15821_s7 + $0x1c8] sm:$0xff]  }
 0x772   : > { %11322 = vmatprep.subr.bf16.mxu0 %v8501_v35  ;;  %11340 = vmatprep.subr.bf16.mxu1 %v8766_v56 }
 0x773   : > { %v15217_v8 = vpop.permute.xlu0 %9177  ;;  %v8753_v1 = vpop.permute.xlu1 %8752 }
 0x774   : > { %11261 = vmatmul.mubr.msk.bf16.gmra.mxu1 %vm7922_vm14, %v11663_v7  ;;  %v8764_v39 = vsel %vm8762_vm15, %v15198_v40, %v8753_v1  ;;  %v11696_v40 = vld [vmem:[%s15821_s7 + $0x170] sm:$0xff]   ;;  %v11708_v1 = vld [vmem:[%s15821_s7 + $0x1e0] sm:$0xff]  }
 0x775   : > { %11323 = vmatpush3.bf16.msra.mxu0 %v8501_v35  ;;  %11264 = vmatprep.mubr.msk.bf16.mxu1 %vm7922_vm14, %v11666_v48  ;;  %v11700_v35 = vld [vmem:[%s15821_s7 + $0x1c0] sm:$0xff]   ;;  %v11704_v7 = vld [vmem:[%s15821_s7 + $0x1d0] sm:$0xff]  }
 0x776   : > { %v11698_v48 = vld [vmem:[%s15821_s7 + $0x180] sm:$0xff]  }
 0x777   : > { %v15227_v11 = vpop.permute.xlu0 %9175  ;;  %v8747_v61 = vpop.permute.xlu1 %8746 }
 0x778   : > { %11325 = vmatmul.mubr.msk.bf16.vlgmr.msra.gmra.mxu0 %vm7922_vm14, %v11665_v18  ;;  %v8763_v54 = vsel %vm8762_vm15, %v8747_v61, %v15208_v59  ;;  %v11694_v59 = vld [vmem:[%s15821_s7 + $0x130] sm:$0xff]   ;;  %v11699_v18 = vld [vmem:[%s15821_s7 + $0x188] sm:$0xff]  }
 0x779   : > { %11328 = vmatprep.mubr.msk.bf16.mxu0 %vm7922_vm14, %v11668_v51  ;;  %v11702_v51 = vld [vmem:[%s15821_s7 + $0x190] sm:$0xff]  }
 0x77a   : > { %v11712_v61 = vld [vmem:[%s15821_s7 + $0x1f0] sm:$0xff]  }
 0x77b   : > { %v15237_v44 = vpop.permute.xlu0 %9173  ;;  %v8972_v22 = vpop.permute.xlu1 %8971 }
 0x77c   : > { %11265 = vmatmul.mubr.msk.bf16.gmra.mxu1 %vm7922_vm14, %v11667_v60  ;;  %11364 = vmatprep.subr.bf16.mxu0 %v8972_v22  ;;  %v11703_v60 = vld [vmem:[%s15821_s7 + $0x198] sm:$0xff]  }
 0x77d   : > { %11365 = vmatpush3.bf16.msra.mxu0 %v8972_v22  ;;  %11300 = vmatprep.mubr.msk.bf16.mxu1 %vm7922_vm14, %v11670_v28  ;;  %v11706_v28 = vld [vmem:[%s15821_s7 + $0x1a0] sm:$0xff]  }
 0x77f   : > { %v8970_v4 = vpop.permute.xlu1 %8969  ;;  %v15251_v12 = vpop.permute.xlu0 %9171 }
 0x780   : > { %11329 = vmatmul.mubr.msk.bf16.gmra.mxu0 %vm7922_vm14, %v11669_v49  ;;  %11366 = vmatprep.subr.bf16.mxu0 %v8970_v4  ;;  %v11707_v49 = vld [vmem:[%s15821_s7 + $0x1a8] sm:$0xff]  }
 0x781   : > { %11367 = vmatpush3.bf16.msra.mxu0 %v8970_v4  ;;  %11332 = vmatprep.mubr.msk.bf16.mxu0 %vm7922_vm14, %v11672_v3  ;;  %v11710_v3 = vld [vmem:[%s15821_s7 + $0x1b0] sm:$0xff]   ;;  %v11711_v4 = vld [vmem:[%s15821_s7 + $0x1b8] sm:$0xff]  }
 0x783   : > { %v8968_v21 = vpop.permute.xlu1 %8967  ;;  %v9426_v41 = vpop.permute.xlu0 %9425 }
 0x784   : > { %11301 = vmatmul.mubr.msk.bf16.vlgmr.msra.gmra.mxu1 %vm7922_vm14, %v11671_v57  ;;  %11368 = vmatprep.subr.bf16.mxu0 %v8968_v21  ;;  %v11714_v57 = vld [vmem:[%s15821_s7 + $0x200] sm:$0xff]  }
 0x785   : > { %11341 = vmatpush3.bf16.msra.mxu1 %v8766_v56  ;;  %11369 = vmatpush3.bf16.msra.mxu0 %v8968_v21  ;;  %v11695_v56 = vld [vmem:[%s15821_s7 + $0x138] sm:$0xff]  }
 0x786   : > { %11342 = vmatprep.subr.bf16.mxu1 %v8765_v0  ;;  %11304 = vmatprep.mubr.msk.bf16.mxu1 %vm7922_vm14, %v11674_v10  ;;  %v11716_v10 = vld [vmem:[%s15821_s7 + $0x210] sm:$0xff]   ;;  %v11717_v21 = vld [vmem:[%s15821_s7 + $0x218] sm:$0xff]  }
 0x787   : > { %v8966_v30 = vpop.permute.xlu1 %8965  ;;  %v9432_v15 = vpop.permute.xlu0 %9431 }
 0x788   : > { %11333 = vmatmul.mubr.msk.bf16.gmra.mxu0 %vm7922_vm14, %v11673_v16  ;;  %11370 = vmatprep.subr.bf16.mxu0 %v8966_v30  ;;  %v11718_v16 = vld [vmem:[%s15821_s7 + $0x220] sm:$0xff]  }
 0x789   : > { %11343 = vmatpush3.bf16.msra.mxu1 %v8765_v0  ;;  %11371 = vmatpush3.bf16.msra.mxu0 %v8966_v30  ;;  %v11719_v0 = vld [vmem:[%s15821_s7 + $0x228] sm:$0xff]  }
 0x78a   : > { %11344 = vmatprep.subr.bf16.mxu1 %v8764_v39  ;;  %11336 = vmatprep.mubr.msk.bf16.mxu0 %vm7922_vm14, %v11676_v31  ;;  %v11720_v31 = vld [vmem:[%s15821_s7 + $0x230] sm:$0xff]  }
 0x78b   : > { %v9428_v37 = vpop.permute.xlu1 %9427  ;;  %v15298_v42 = vpop.permute.xlu0 %9640 }
 0x78c   : > { %11305 = vmatmul.mubr.msk.bf16.gmra.mxu1 %vm7922_vm14, %v11675_v47  ;;  %v9436_v14 = vsel %vm9433_vm0, %v9426_v41, %v9428_v37  ;;  %v11721_v41 = vld [vmem:[%s15821_s7 + $0x238] sm:$0xff]  }
 0x78d   : > { %11345 = vmatpush3.bf16.msra.mxu1 %v8764_v39  ;;  %11308 = vmatprep.mubr.msk.bf16.mxu1 %vm7922_vm14, %v11678_v45 }
 0x78e   : > { %11346 = vmatprep.subr.bf16.mxu1 %v8763_v54 }
 0x78f   : > { %v9430_v26 = vpop.permute.xlu1 %9429  ;;  %v9424_v58 = vpop.permute.xlu0 %9423 }
 0x790   : > { %11337 = vmatmul.mubr.msk.bf16.gmra.mxu0 %vm7922_vm14, %v11677_v29  ;;  %v9437_v13 = vsel %vm9433_vm0, %v9430_v26, %v9432_v15 }
 0x791   : > { %11347 = vmatpush3.bf16.msra.mxu1 %v8763_v54  ;;  %11412 = vmatprep.subr.bf16.mxu0 %v9437_v13 }
 0x792   : > { %11388 = vmatprep.subr.bf16.mxu1 %v15217_v8  ;;  %11372 = vmatprep.mubr.msk.bf16.mxu0 %vm7922_vm14, %v11680_v53 }
 0x793   : > { %v15300_v25 = vpop.permute.xlu1 %9642  ;;  %v9418_v46 = vpop.permute.xlu0 %9417 }
 0x794   : > { %11309 = vmatmul.mubr.msk.bf16.gmra.mxu1 %vm7922_vm14, %v11679_v27 }
 0x795   : > { %11312 = vmatprep.mubr.msk.bf16.mxu1 %vm7922_vm14, %v11682_v36 }
 0x797   : > { %v9422_v9 = vpop.permute.xlu1 %9421  ;;  %v9637_v22 = vpop.permute.xlu0 %9636 }
 0x798   : > { %11373 = vmatmul.mubr.msk.bf16.vlgmr.msra.gmra.mxu0 %vm7922_vm14, %v11681_v43  ;;  %v9435_v17 = vsel %vm9433_vm0, %v9422_v9, %v9424_v58 }
 0x799   : > { %11413 = vmatpush3.bf16.msra.mxu0 %v9437_v13  ;;  %11376 = vmatprep.mubr.msk.bf16.mxu0 %vm7922_vm14, %v11688_v38 }
 0x79a   : > { %11414 = vmatprep.subr.bf16.mxu0 %v9436_v14 }
 0x79b   : > { %v15319_v19 = vpop.permute.xlu1 %9638 }
 0x79c   : > { %11313 = vmatmul.mubr.msk.bf16.gmra.mxu1 %vm7922_vm14, %v11683_v32 }
 0x79d   : > { %11415 = vmatpush3.bf16.msra.mxu0 %v9436_v14  ;;  %11348 = vmatprep.mubr.msk.bf16.mxu1 %vm7922_vm14, %v11684_v20 }
 0x79e   : > { %11416 = vmatprep.subr.bf16.mxu0 %v9435_v17 }
 0x79f   : > { %v9420_v52 = vpop.permute.xlu1 %9419 }
 0x7a0   : > { %v9434_v50 = vsel %vm9433_vm0, %v9418_v46, %v9420_v52  ;;  %11377 = vmatmul.mubr.msk.bf16.gmra.mxu0 %vm7922_vm14, %v11689_v55 }
 0x7a1   : > { %11417 = vmatpush3.bf16.msra.mxu0 %v9435_v17  ;;  %11380 = vmatprep.mubr.msk.bf16.mxu0 %vm7922_vm14, %v11692_v24 }
 0x7a2   : > { %11418 = vmatprep.subr.bf16.mxu0 %v9434_v50 }
 0x7a4   : > { %11349 = vmatmul.mubr.msk.bf16.vlgmr.msra.gmra.mxu1 %vm7922_vm14, %v11685_v34 }
 0x7a5   : > { %11389 = vmatpush3.bf16.msra.mxu1 %v15217_v8  ;;  %11419 = vmatpush3.bf16.msra.mxu0 %v9434_v50  ;;  %v11705_v8 = vld [vmem:[%s15821_s7 + $0x1d8] sm:$0xff]  }
 0x7a6   : > { %11390 = vmatprep.subr.bf16.mxu1 %v15227_v11  ;;  %11352 = vmatprep.mubr.msk.bf16.mxu1 %vm7922_vm14, %v11686_v62 }
 0x7a8   : > { %11381 = vmatmul.mubr.msk.bf16.gmra.mxu0 %vm7922_vm14, %v11693_v2 }
 0x7a9   : > { %11391 = vmatpush3.bf16.msra.mxu1 %v15227_v11  ;;  %11384 = vmatprep.mubr.msk.bf16.mxu0 %vm7922_vm14, %v11696_v40  ;;  %v11709_v11 = vld [vmem:[%s15821_s7 + $0x1e8] sm:$0xff]  }
 0x7aa   : > { %11392 = vmatprep.subr.bf16.mxu1 %v15237_v44 }
 0x7ac   : > { %11353 = vmatmul.mubr.msk.bf16.gmra.mxu1 %vm7922_vm14, %v11687_v6 }
 0x7ad   : > { %11393 = vmatpush3.bf16.msra.mxu1 %v15237_v44  ;;  %11356 = vmatprep.mubr.msk.bf16.mxu1 %vm7922_vm14, %v11690_v63  ;;  %v11713_v44 = vld [vmem:[%s15821_s7 + $0x1f8] sm:$0xff]  }
 0x7ae   : > { %11394 = vmatprep.subr.bf16.mxu1 %v15251_v12 }
 0x7b0   : > { %11385 = vmatmul.mubr.msk.bf16.gmra.mxu0 %vm7922_vm14, %v11697_v5 }
 0x7b1   : > { %11395 = vmatpush3.bf16.msra.mxu1 %v15251_v12  ;;  %11420 = vmatprep.mubr.msk.bf16.mxu0 %vm7922_vm14, %v11700_v35  ;;  %v11715_v12 = vld [vmem:[%s15821_s7 + $0x208] sm:$0xff]  }
 0x7b2   : > { %11436 = vmatprep.subr.bf16.mxu1 %v15300_v25  ;;  %v11278_v30 = vpop.f32.mrf.mxu0 }
 0x7b4   : > { %11357 = vmatmul.mubr.msk.bf16.gmra.mxu1 %vm7922_vm14, %v11691_v23  ;;  %v8146_v47 = vpop.f32.mrf.mxu0 }
 0x7b5   : > { %11360 = vmatprep.mubr.msk.bf16.mxu1 %vm7922_vm14, %v11694_v59 }
 0x7b6   : > { %v11279_v39 = vpop.f32.mrf.mxu0 }
 0x7b8   : > { %11421 = vmatmul.mubr.msk.bf16.vlgmr.msra.gmra.mxu0 %vm7922_vm14, %v11701_v33  ;;  %v8149_v45 = vpop.f32.mrf.mxu0 }
 0x7b9   : > { %11424 = vmatprep.mubr.msk.bf16.mxu0 %vm7922_vm14, %v11704_v7 }
 0x7ba   : > { %v11282_v37 = vpop.f32.mrf.mxu0 }
 0x7bc   : > { %11361 = vmatmul.mubr.msk.bf16.gmra.mxu1 %vm7922_vm14, %v11695_v56  ;;  %v8162_v29 = vpop.f32.mrf.mxu0 }
 0x7bd   : > { %11396 = vmatprep.mubr.msk.bf16.mxu1 %vm7922_vm14, %v11698_v48 }
 0x7be   : > { %v11283_v15 = vpop.f32.mrf.mxu0 }
 0x7c0   : > { %11425 = vmatmul.mubr.msk.bf16.gmra.mxu0 %vm7922_vm14, %v11705_v8  ;;  %v8165_v54 = vpop.f32.mrf.mxu0 }
 0x7c1   : > { %11428 = vmatprep.mubr.msk.bf16.mxu0 %vm7922_vm14, %v11708_v1 }
 0x7c2   : > { %v11286_v53 = vpop.f32.mrf.mxu0 }
 0x7c4   : > { %11397 = vmatmul.mubr.msk.bf16.vlgmr.msra.gmra.mxu1 %vm7922_vm14, %v11699_v18  ;;  %v15482_v26 = vpop.f32.mrf.mxu0 }
 0x7c5   : > { %11437 = vmatpush3.bf16.msra.mxu1 %v15300_v25  ;;  %11400 = vmatprep.mubr.msk.bf16.mxu1 %vm7922_vm14, %v11702_v51 }
 0x7c6   : > { %11438 = vmatprep.subr.bf16.mxu1 %v15298_v42  ;;  %v15484_v13 = vpop.f32.mrf.mxu0 }
 0x7c8   : > { %11429 = vmatmul.mubr.msk.bf16.gmra.mxu0 %vm7922_vm14, %v11709_v11 }
 0x7c9   : > { %11439 = vmatpush3.bf16.msra.mxu1 %v15298_v42  ;;  %11432 = vmatprep.mubr.msk.bf16.mxu0 %vm7922_vm14, %v11712_v61  ;;  %v15486_v42 = vpop.f32.mrf.mxu0 }
 0x7ca   : > { %11440 = vmatprep.subr.bf16.mxu1 %v15319_v19 }
 0x7cb   : > { %v15488_v38 = vpop.f32.mrf.mxu0 }
 0x7cc   : > { %11401 = vmatmul.mubr.msk.bf16.gmra.mxu1 %vm7922_vm14, %v11703_v60 }
 0x7cd   : > { %11441 = vmatpush3.bf16.msra.mxu1 %v15319_v19  ;;  %11404 = vmatprep.mubr.msk.bf16.mxu1 %vm7922_vm14, %v11706_v28  ;;  %v15490_v58 = vpop.f32.mrf.mxu0 }
 0x7ce   : > { %11442 = vmatprep.subr.bf16.mxu1 %v9637_v22 }
 0x7cf   : > { %v15492_v19 = vpop.f32.mrf.mxu0 }
 0x7d0   : > { %11433 = vmatmul.mubr.msk.bf16.gmra.mxu0 %vm7922_vm14, %v11713_v44 }
 0x7d1   : > { %11443 = vmatpush3.bf16.msra.mxu1 %v9637_v22  ;;  %v8197_v24 = vpop.f32.mrf.mxu0 }
 0x7d4   : > { %11405 = vmatmul.mubr.msk.bf16.gmra.mxu1 %vm7922_vm14, %v11707_v49 }
 0x7d5   : > { %11408 = vmatprep.mubr.msk.bf16.mxu1 %vm7922_vm14, %v11710_v3 }
 0x7dc   : > { %11409 = vmatmul.mubr.msk.bf16.gmra.mxu1 %vm7922_vm14, %v11711_v4 }
 0x7dd   : > { %11444 = vmatprep.mubr.msk.bf16.mxu1 %vm7922_vm14, %v11714_v57 }
 0x7e4   : > { %11445 = vmatmul.mubr.msk.bf16.vlgmr.msra.gmra.mxu1 %vm7922_vm14, %v11715_v12 }
 0x7e5   : > { %11448 = vmatprep.mubr.msk.bf16.mxu1 %vm7922_vm14, %v11716_v10 }
 0x7ec   : > { %11449 = vmatmul.mubr.msk.bf16.gmra.mxu1 %vm7922_vm14, %v11717_v21 }
 0x7ed   : > { %11452 = vmatprep.mubr.msk.bf16.mxu1 %vm7922_vm14, %v11718_v16 }
 0x7f4   : > { %11453 = vmatmul.mubr.msk.bf16.gmra.mxu1 %vm7922_vm14, %v11719_v0 }
 0x7f5   : > { %11456 = vmatprep.mubr.msk.bf16.mxu1 %vm7922_vm14, %v11720_v31 }
 0x7fc   : > { %11457 = vmatmul.mubr.msk.bf16.gmra.mxu1 %vm7922_vm14, %v11721_v41 }
 0x824   : > { %v11254_v27 = vpop.f32.mrf.mxu1 }
 0x825   : > { %v8155_v59 = vadd.f32 %v11278_v30, %v11254_v27 }
 0x826   : > { %v7981_v36 = vpop.f32.mrf.mxu1 }
 0x827   : > { %v8147_v48 = vadd.f32 %v8146_v47, %v7981_v36 }
 0x828   : > { %v11255_v25 = vpop.f32.mrf.mxu1 }
 0x829   : > { %v8158_v51 = vadd.f32 %v11279_v39, %v11255_v25 }
 0x82a   : > { %v7984_v43 = vpop.f32.mrf.mxu1 }
 0x82b   : > { %v8150_v28 = vadd.f32 %v8149_v45, %v7984_v43 }
 0x82c   : > { %v11258_v9 = vpop.f32.mrf.mxu1 }
 0x82d   : > { %v8171_v3 = vadd.f32 %v11282_v37, %v11258_v9 }
 0x82e   : > { %v7997_v32 = vpop.f32.mrf.mxu1 }
 0x82f   : > { %v8163_v10 = vadd.f32 %v8162_v29, %v7997_v32 }
 0x830   : > { %v11259_v14 = vpop.f32.mrf.mxu1 }
 0x831   : > { %v8174_v31 = vadd.f32 %v11283_v15, %v11259_v14 }
 0x832   : > { %v8000_v20 = vpop.f32.mrf.mxu1 }
 0x833   : > { %v8166_v39 = vadd.f32 %v8165_v54, %v8000_v20 }
 0x834   : > { %v11262_v55 = vpop.f32.mrf.mxu1 }
 0x835   : > { %v8187_v36 = vadd.f32 %v11286_v53, %v11262_v55 }
 0x836   : > { %v8013_v17 = vpop.f32.mrf.mxu1 }
 0x837   : > { %v8179_v9 = vadd.f32 %v15482_v26, %v8013_v17 }
 0x838   : > { %v11263_v46 = vpop.f32.mrf.mxu1  ;;  %v15494_v52 = vpop.f32.mrf.mxu0 }
 0x839   : > { %v8190_v54 = vadd.f32 %v15484_v13, %v11263_v46 }
 0x83a   : > { %v8016_v50 = vpop.f32.mrf.mxu1  ;;  %v15496_v34 = vpop.f32.mrf.mxu0 }
 0x83b   : > { %v8182_v53 = vadd.f32 %v15486_v42, %v8016_v50 }
 0x83c   : > { %v11266_v62 = vpop.f32.mrf.mxu1  ;;  %v15498_v2 = vpop.f32.mrf.mxu0 }
 0x83d   : > { %v8203_v26 = vadd.f32 %v15488_v38, %v11266_v62 }
 0x83e   : > { %v8029_v40 = vpop.f32.mrf.mxu1  ;;  %v15500_v6 = vpop.f32.mrf.mxu0 }
 0x83f   : > { %v8195_v13 = vadd.f32 %v15490_v58, %v8029_v40 }
 0x840   : > { %v11267_v63 = vpop.f32.mrf.mxu1  ;;  %v15502_v5 = vpop.f32.mrf.mxu0 }
 0x841   : > { %v8206_v42 = vadd.f32 %v15492_v19, %v11267_v63 }
 0x842   : > { %v8032_v35 = vpop.f32.mrf.mxu1  ;;  %v15504_v23 = vpop.f32.mrf.mxu0 }
 0x843   : > { %v8198_v33 = vadd.f32 %v8197_v24, %v8032_v35 }
 0x844   : > { %v11302_v7 = vpop.f32.mrf.mxu1  ;;  %v15506_v56 = vpop.f32.mrf.mxu0 }
 0x845   : > { %v15508_v8 = vadd.f32 %v11302_v7, %v8155_v59 }
 0x846   : > { %v8336_v1 = vpop.f32.mrf.mxu1  ;;  %v15510_v18 = vpop.f32.mrf.mxu0 }
 0x847   : > { %v15512_v11 = vadd.f32 %v8336_v1, %v8147_v48 }
 0x848   : > { %v11303_v61 = vpop.f32.mrf.mxu1  ;;  %v15514_v60 = vpop.f32.mrf.mxu0 }
 0x849   : > { %v15516_v44 = vadd.f32 %v11303_v61, %v8158_v51 }
 0x84a   : > { %v8339_v22 = vpop.f32.mrf.mxu1  ;;  %v15518_v49 = vpop.f32.mrf.mxu0 }
 0x84b   : > { %v15520_v4 = vadd.f32 %v8339_v22, %v8150_v28 }
 0x84c   : > { %v11306_v57 = vpop.f32.mrf.mxu1  ;;  %v15522_v12 = vpop.f32.mrf.mxu0 }
 0x84d   : > { %v15524_v21 = vadd.f32 %v11306_v57, %v8171_v3 }
 0x84e   : > { %v8352_v16 = vpop.f32.mrf.mxu1  ;;  %v15526_v0 = vpop.f32.mrf.mxu0 }
 0x84f   : > { %v15528_v41 = vadd.f32 %v8352_v16, %v8163_v10 }
 0x850   : > { %v11307_v30 = vpop.f32.mrf.mxu1  ;;  %v15530_v47 = vpop.f32.mrf.mxu0 }
 0x851   : > { %v15532_v45 = vadd.f32 %v11307_v30, %v8174_v31 }
 0x852   : > { %v8355_v37 = vpop.f32.mrf.mxu1  ;;  %v15534_v27 = vpop.f32.mrf.mxu0 }
 0x853   : > { %v15536_v25 = vadd.f32 %v8355_v37, %v8166_v39 }
 0x854   : > { %v11310_v29 = vpop.f32.mrf.mxu1  ;;  %v15538_v43 = vpop.f32.mrf.mxu0 }
 0x855   : > { %v15541_v15 = vadd.f32 %v11310_v29, %v8187_v36 }
 0x856   : > { %v8368_v32 = vpop.f32.mrf.mxu1  ;;  %v15543_v14 = vpop.f32.mrf.mxu0 }
 0x857   : > { %v15546_v20 = vadd.f32 %v8368_v32, %v8179_v9 }
 0x858   : > { %v11311_v24 = vpop.f32.mrf.mxu1  ;;  %v15548_v35 = vpop.f32.mrf.mxu0 }
 0x859   : > { %v15551_v55 = vadd.f32 %v11311_v24, %v8190_v54 }
 0x85a   : > { %v8371_v59 = vpop.f32.mrf.mxu1  ;;  %v15553_v7 = vpop.f32.mrf.mxu0 }
 0x85b   : > { %v15556_v17 = vadd.f32 %v8371_v59, %v8182_v53 }
 0x85c   : > { %v11314_v48 = vpop.f32.mrf.mxu1  ;;  %v15558_v1 = vpop.f32.mrf.mxu0 }
 0x85d   : > { %v15561_v46 = vadd.f32 %v11314_v48, %v8203_v26 }
 0x85e   : > { %v8384_v51 = vpop.f32.mrf.mxu1  ;;  %v15563_v61 = vpop.f32.mrf.mxu0 }
 0x85f   : > { %v15566_v50 = vadd.f32 %v8384_v51, %v8195_v13 }
 0x860   : > { %v11315_v28 = vpop.f32.mrf.mxu1  ;;  %v15568_v22 = vpop.f32.mrf.mxu0 }
 0x861   : > { %v15570_v38 = vadd.f32 %v11315_v28, %v8206_v42 }
 0x862   : > { %v8387_v62 = vpop.f32.mrf.mxu1  ;;  %v15572_v3 = vpop.f32.mrf.mxu0 }
 0x863   : > { %v15574_v57 = vadd.f32 %v8387_v62, %v8198_v33 }
 0x864   : > { %v11350_v58 = vpop.f32.mrf.mxu1  ;;  %v15576_v40 = vpop.f32.mrf.mxu0 }
 0x865   : > { %16446 = vst [vmem:[#allocation41_spill] sm:$0xff] %v15576_v40 }
 0x866   : > { %v8829_v10 = vpop.f32.mrf.mxu1  ;;  %v15578_v16 = vpop.f32.mrf.mxu0 }
 0x867   : > { %16447 = vst [vmem:[#allocation42_spill] sm:$0xff] %v15578_v16 }
 0x868   : > { %v11351_v31 = vpop.f32.mrf.mxu1  ;;  %v15580_v19 = vpop.f32.mrf.mxu0 }
 0x869   : > { %16448 = vst [vmem:[#allocation10_spill] sm:$0xff] %v15580_v19 }
 0x86a   : > { %v8832_v63 = vpop.f32.mrf.mxu1  ;;  %v15582_v30 = vpop.f32.mrf.mxu0 }
 0x86b   : > { %16449 = vst [vmem:[#allocation11_spill] sm:$0xff] %v15582_v30 }
 0x86c   : > { %v15584_v39 = vpop.f32.mrf.mxu1  ;;  %v15586_v37 = vpop.f32.mrf.mxu0 }
 0x86d   : > { %16450 = vst [vmem:[#allocation43_spill] sm:$0xff] %v15586_v37 }
 0x86e   : > { %v15588_v36 = vpop.f32.mrf.mxu1  ;;  %v15590_v33 = vpop.f32.mrf.mxu0 }
 0x86f   : > { %16451 = vst [vmem:[#allocation47_spill] sm:$0xff] %v15590_v33 }
 0x870   : > { %v15592_v29 = vpop.f32.mrf.mxu1  ;;  %v15594_v9 = vpop.f32.mrf.mxu0 }
 0x871   : > { %16452 = vst [vmem:[#allocation46_spill] sm:$0xff] %v15594_v9 }
 0x872   : > { %v15596_v32 = vpop.f32.mrf.mxu1  ;;  %v15600_v24 = vpop.f32.mrf.mxu0 }
 0x873   : > { %16453 = vst [vmem:[#allocation48_spill] sm:$0xff] %v15600_v24 }
 0x874   : > { %v15598_v54 = vpop.f32.mrf.mxu1  ;;  %v15606_v26 = vpop.f32.mrf.mxu0 }
 0x875   : > { %16456 = vst [vmem:[#allocation25_spill] sm:$0xff] %v15606_v26 }
 0x876   : > { %v15602_v53 = vpop.f32.mrf.mxu1  ;;  %v15612_v51 = vpop.f32.mrf.mxu0 }
 0x877   : > { %16454 = vst [vmem:[#allocation51_spill] sm:$0xff] %v15602_v53  ;;  %16459 = vst [vmem:[#allocation55_spill] sm:$0xff] %v15612_v51 }
 0x878   : > { %v15604_v59 = vpop.f32.mrf.mxu1  ;;  %v11422_v62 = vpop.f32.mrf.mxu0 }
 0x879   : > { %16455 = vst [vmem:[#allocation107_spill] sm:$0xff] %v15604_v59 }
 0x87a   : > { %v15608_v48 = vpop.f32.mrf.mxu1  ;;  %v15620_v33 = vpop.f32.mrf.mxu0 }
 0x87b   : > { %16457 = vst [vmem:[#allocation108_spill] sm:$0xff] %v15608_v48 }
 0x87c   : > { %v15610_v13 = vpop.f32.mrf.mxu1  ;;  %v15622_v19 = vpop.f32.mrf.mxu0 }
 0x87d   : > { %16458 = vst [vmem:[#allocation28_spill] sm:$0xff] %v15610_v13  ;;  %16463 = vst [vmem:[#allocation52_spill] sm:$0xff] %v15622_v19 }
 0x87e   : > { %v15614_v42 = vpop.f32.mrf.mxu1  ;;  %v15626_v13 = vpop.f32.mrf.mxu0 }
 0x87f   : > { %16460 = vst [vmem:[#allocation68_spill] sm:$0xff] %v15614_v42  ;;  %16465 = vst [vmem:[#allocation15_spill] sm:$0xff] %v15626_v13 }
 0x880   : > { %v15616_v28 = vpop.f32.mrf.mxu1 }
 0x881   : > { %16461 = vst [vmem:[#allocation50_spill] sm:$0xff] %v15616_v28  ;;  %v15632_v28 = vpop.f32.mrf.mxu0 }
 0x882   : > { %v15618_v9 = vpop.f32.mrf.mxu1  ;;  %16468 = vst [vmem:[#allocation7_spill] sm:$0xff] %v15632_v28  ;;  %v8633_v28 = vadd.f32 %v15496_v34, %v15512_v11  ;;  %v8639_v34 = vadd.f32 %v15502_v5, %v15524_v21  ;;  %v8643_v5 = vadd.f32 %v15514_v60, %v15541_v15  ;;  %v8641_v21 = vadd.f32 %v15518_v49, %v15546_v20 }
 0x883   : > { %16462 = vst [vmem:[#allocation19_spill] sm:$0xff] %v15618_v9  ;;  %v15636_v9 = vpop.permute.xlu1 %9803  ;;  %v15640_v53 = vpop.f32.mrf.mxu0  ;;  %v8647_v60 = vadd.f32 %v15530_v47, %v15561_v46  ;;  %v15710_v47 = vadd.f32 %v15543_v14, %v15574_v57  ;;  %v16477_v57 = vld [vmem:[#allocation51_spill] sm:$0xff] }
 0x884   : > { %v11398_v24 = vpop.f32.mrf.mxu1  ;;  %16470 = vst [vmem:[#allocation80_spill] sm:$0xff] %v15636_v9  ;;  %16472 = vst [vmem:[#allocation60_spill] sm:$0xff] %v15640_v53 }
 0x886   : > { %v9241_v37 = vpop.f32.mrf.mxu1 }
 0x887   : > { %v9814_v9 = vpop.permute.xlu1 %9813 }
 0x888   : > { %v11399_v30 = vpop.f32.mrf.mxu1 }
 0x88a   : > { %v9244_v26 = vpop.f32.mrf.mxu1 }
 0x88c   : > { %v15624_v48 = vpop.f32.mrf.mxu1 }
 0x88d   : > { %16464 = vst [vmem:[#allocation12_spill] sm:$0xff] %v15624_v48  ;;  %v8635_v48 = vadd.f32 %v15494_v52, %v15508_v8  ;;  %v8634_v52 = vadd.f32 %v15500_v6, %v15520_v4  ;;  %v15674_v6 = vpop.permute.xlu1 %9823  ;;  %v8640_v4 = vadd.f32 %v15506_v56, %v15532_v45 }
 0x88e   : > { %v15628_v51 = vpop.f32.mrf.mxu1 }
 0x88f   : > { %16466 = vst [vmem:[#allocation53_spill] sm:$0xff] %v15628_v51  ;;  %v15648_v51 = vpop.permute.xlu0 %9808  ;;  %v8899_v45 = vadd.f32 %v15592_v29, %v8640_v4  ;;  %v16478_v29 = vld [vmem:[#allocation107_spill] sm:$0xff] }
 0x890   : > { %v15630_v42 = vpop.f32.mrf.mxu1  ;;  %16475 = vst [vmem:[#allocation72_spill] sm:$0xff] %v15648_v51 }
 0x891   : > { %16467 = vst [vmem:[#allocation73_spill] sm:$0xff] %v15630_v42  ;;  %v8894_v42 = vadd.f32 %v11350_v58, %v8635_v48 }
 0x892   : > { %v15634_v16 = vpop.f32.mrf.mxu1 }
 0x893   : > { %16469 = vst [vmem:[#allocation62_spill] sm:$0xff] %v15634_v16  ;;  %v15652_v16 = vpop.f32.mrf.mxu0  ;;  %v9100_v8 = vadd.f32 %v15548_v35, %v8894_v42  ;;  %v15669_v58 = vpop.permute.xlu0 %9818  ;;  %v8638_v35 = vadd.f32 %v15510_v18, %v15536_v25  ;;  %v8642_v18 = vadd.f32 %v15526_v0, %v15556_v17  ;;  %v15706_v0 = vadd.f32 %v15538_v43, %v15570_v38  ;;  %v16481_v42 = vld [vmem:[#allocation10_spill] sm:$0xff] }
 0x894   : > { %v15638_v59 = vpop.f32.mrf.mxu1  ;;  %v8902_v17 = vadd.f32 %v15598_v54, %v8643_v5  ;;  %v9834_v43 = vpop.permute.xlu1 %9833  ;;  %v16486_v5 = vld [vmem:[#allocation80_spill] sm:$0xff] }
 0x895   : > { %16471 = vst [vmem:[#allocation8_spill] sm:$0xff] %v15638_v59  ;;  %v8636_v59 = vadd.f32 %v15498_v2, %v15516_v44  ;;  %v15663_v51 = vpop.f32.mrf.mxu0  ;;  %v8637_v2 = vadd.f32 %v15504_v23, %v15528_v41  ;;  %v9306_v48 = vadd.f32 %v11398_v24, %v9100_v8  ;;  %v8644_v23 = vadd.f32 %v15522_v12, %v15551_v55  ;;  %v16479_v24 = vld [vmem:[#allocation42_spill] sm:$0xff]  ;;  %v16483_v8 = vld [vmem:[#allocation12_spill] sm:$0xff] }
 0x896   : > { %v15642_v19 = vpop.f32.mrf.mxu1  ;;  %v8897_v15 = vadd.f32 %v15596_v32, %v8638_v35 }
 0x897   : > { %16473 = vst [vmem:[#allocation83_spill] sm:$0xff] %v15642_v19  ;;  %v8892_v19 = vadd.f32 %v8829_v10, %v8633_v28  ;;  %v8893_v10 = vadd.f32 %v8832_v63, %v8634_v52  ;;  %v15690_v56 = vpop.f32.mrf.mxu0  ;;  %v8896_v49 = vadd.f32 %v15588_v36, %v8637_v2  ;;  %v9565_v20 = vadd.f32 %v11422_v62, %v9306_v48  ;;  %v16482_v62 = vld [vmem:[#allocation108_spill] sm:$0xff] }
 0x898   : > { %v15646_v13 = vpop.f32.mrf.mxu1  ;;  %v8900_v36 = vadd.f32 %v16477_v57, %v8641_v21  ;;  %v8903_v32 = vadd.f32 %v16478_v29, %v8644_v23  ;;  %v9108_v28 = vadd.f32 %v16481_v42, %v8902_v17  ;;  %v8901_v52 = vadd.f32 %v16482_v62, %v8642_v18  ;;  %v16493_v57 = vld [vmem:[#allocation60_spill] sm:$0xff] }
 0x899   : > { %16474 = vst [vmem:[#allocation21_spill] sm:$0xff] %v15646_v13  ;;  %v8895_v13 = vadd.f32 %v11351_v31, %v8636_v59  ;;  %v9098_v44 = vadd.f32 %v15553_v7, %v8892_v19  ;;  %v8898_v7 = vadd.f32 %v15584_v39, %v8639_v34  ;;  %v9099_v12 = vadd.f32 %v15563_v61, %v8893_v10  ;;  %v15713_v61 = vpop.permute.xlu0 %9828  ;;  %v16484_v34 = vld [vmem:[#allocation53_spill] sm:$0xff]  ;;  %v16485_v10 = vld [vmem:[#allocation15_spill] sm:$0xff] }
 0x89a   : > { %v15654_v40 = vpop.f32.mrf.mxu1  ;;  %v9102_v38 = vadd.f32 %v15572_v3, %v8896_v49  ;;  %v9103_v59 = vadd.f32 %v16479_v24, %v8897_v15  ;;  %v16489_v49 = vld [vmem:[#allocation28_spill] sm:$0xff]  ;;  %v16494_v29 = vld [vmem:[#allocation62_spill] sm:$0xff] }
 0x89b   : > { %v9101_v41 = vadd.f32 %v15558_v1, %v8895_v13  ;;  %v9304_v19 = vadd.f32 %v9241_v37, %v9098_v44  ;;  %v8645_v1 = vadd.f32 %v15534_v27, %v15566_v50  ;;  %v9104_v63 = vadd.f32 %v15568_v22, %v8898_v7  ;;  %v15717_v27 = vpop.f32.mrf.mxu0  ;;  %v16476_v37 = vld [vmem:[#allocation41_spill] sm:$0xff]  ;;  %v16480_v22 = vld [vmem:[#allocation52_spill] sm:$0xff]  ;;  %v16488_v7 = vld [vmem:[#allocation43_spill] sm:$0xff] }
 0x89c   : > { %v15658_v53 = vpop.f32.mrf.mxu1  ;;  %v9305_v39 = vadd.f32 %v9244_v26, %v9099_v12  ;;  %v9105_v14 = vadd.f32 %v16476_v37, %v8899_v45  ;;  %v9308_v2 = vadd.f32 %v16484_v34, %v9102_v38  ;;  %v8906_v18 = vadd.f32 %v16489_v49, %v8647_v60  ;;  %v16490_v45 = vld [vmem:[#allocation73_spill] sm:$0xff]  ;;  %v16492_v38 = vld [vmem:[#allocation7_spill] sm:$0xff]  ;;  %v16497_v62 = vld [vmem:[#allocation8_spill] sm:$0xff] }
 0x89d   : > { %v9307_v55 = vadd.f32 %v11399_v30, %v9101_v41  ;;  %v9563_v30 = vadd.f32 %v15620_v33, %v9304_v19  ;;  %v9310_v3 = vadd.f32 %v16483_v8, %v9104_v63  ;;  %v15730_v4 = vpop.f32.mrf.mxu0  ;;  %v9109_v19 = vadd.f32 %v16488_v7, %v8903_v32 }
 0x89e   : > { %v15667_v11 = vpop.f32.mrf.mxu1  ;;  %v9564_v48 = vadd.f32 %v16485_v10, %v9305_v39  ;;  %v9311_v12 = vadd.f32 %v16490_v45, %v9105_v14  ;;  %v16491_v39 = vld [vmem:[#allocation47_spill] sm:$0xff]  ;;  %v9309_v32 = vadd.f32 %v16494_v29, %v9103_v59  ;;  %v9314_v59 = vadd.f32 %v16497_v62, %v9108_v28  ;;  %v16498_v10 = vld [vmem:[#allocation46_spill] sm:$0xff] }
 0x89f   : > { %v9566_v13 = vadd.f32 %v16480_v22, %v9307_v55  ;;  %v9569_v37 = vadd.f32 %v16492_v38, %v9310_v3  ;;  %v9535_v14 = vpop.f32.mrf.mxu0  ;;  %v16495_v22 = vld [vmem:[#allocation72_spill] sm:$0xff] }
 0x8a0   : > { %v15684_v31 = vpop.f32.mrf.mxu1  ;;  %v9570_v42 = vadd.f32 %v15652_v16, %v9311_v12 }
 0x8a1   : > { %v11434_v28 = vpop.f32.mrf.mxu0 }
 0x8a2   : > { %v15698_v25 = vpop.f32.mrf.mxu1 }
 0x8a4   : > { %v11446_v46 = vpop.f32.mrf.mxu1 }
 0x8a5   : > { %v9771_v50 = vadd.f32 %v11446_v46, %v9565_v20  ;;  %v9839_v20 = vpop.permute.xlu0 %9838 }
 0x8a6   : > { %v9706_v54 = vpop.f32.mrf.mxu1 }
 0x8a7   : > { %v9883_v33 = vadd.f32 %v9814_v9, %v9771_v50  ;;  %v9769_v26 = vadd.f32 %v9706_v54, %v9563_v30  ;;  %v16487_v9 = vld [vmem:[#allocation11_spill] sm:$0xff]  ;;  %v15739_v30 = vpop.permute.xlu1 %9843  ;;  %v9107_v50 = vadd.f32 %v16491_v39, %v8901_v52 }
 0x8a8   : > { %v11447_v44 = vpop.f32.mrf.mxu1  ;;  %v9106_v41 = vadd.f32 %v16487_v9, %v8900_v36  ;;  %v9567_v36 = vadd.f32 %v16493_v57, %v9308_v2 }
 0x8a9   : > { %v9899_v35 = vmul.f32 0.1, %v9883_v33  ;;  %v9881_v21 = vadd.f32 %v16486_v5, %v9769_v26  ;;  %v9772_v23 = vadd.f32 %v11447_v44, %v9566_v13 }
 0x8aa   : > { %v9709_v15 = vpop.f32.mrf.mxu1 }
 0x8ab   : > { %v9915_v55 = vmax.f32 %v9883_v33, %v9899_v35  ;;  %v9897_v17 = vmul.f32 0.1, %v9881_v21  ;;  %v9884_v46 = vadd.f32 %v15669_v58, %v9772_v23  ;;  %v9770_v63 = vadd.f32 %v9709_v15, %v9564_v48  ;;  %v16496_v33 = vld [vmem:[#allocation68_spill] sm:$0xff]  ;;  %v16499_v35 = vld [vmem:[#allocation50_spill] sm:$0xff]  ;;  %v15760_v23 = vpop.permute.xlu0 %9848  ;;  %v9854_v12 = vpop.permute.xlu1 %9853 }
 0x8ac   : > { %v11450_v60 = vpop.f32.mrf.mxu1  ;;  %v8904_v26 = vadd.f32 %v16496_v33, %v8645_v1  ;;  %v9112_v48 = vadd.f32 %v16498_v10, %v8906_v18  ;;  %v8907_v5 = vadd.f32 %v16499_v35, %v15706_v0  ;;  %v9568_v1 = vadd.f32 %v15663_v51, %v9309_v32  ;;  %v16500_v18 = vld [vmem:[#allocation83_spill] sm:$0xff]  ;;  %v16501_v51 = vld [vmem:[#allocation21_spill] sm:$0xff] }
 0x8ad   : > { %v11106_v58 = vpack.c.bf16 %v9915_v55, %v9915_v55  ;;  %v9913_v54 = vmax.f32 %v9881_v21, %v9897_v17  ;;  %v9900_v24 = vmul.f32 0.1, %v9884_v46  ;;  %v9882_v13 = vadd.f32 %v16495_v22, %v9770_v63  ;;  %v16505_v10 = vld [vmem:[#allocation55_spill] sm:$0xff] }
 0x8ae   : > { %v9775_v52 = vadd.f32 %v11450_v60, %v9569_v37  ;;  %v9722_v8 = vpop.f32.mrf.mxu1  ;;  %v9312_v15 = vadd.f32 %v16500_v18, %v9106_v41  ;;  %v9573_v0 = vadd.f32 %v15690_v56, %v9314_v59  ;;  %v9315_v55 = vadd.f32 %v16501_v51, %v9109_v19  ;;  %v16502_v37 = vld [vmem:[#allocation48_spill] sm:$0xff]  ;;  %v9548_v56 = vpop.f32.mrf.mxu0 }
 0x8af   : > { %9996 = vst.msk [vmem:[%s15748_s17 + $0x8] sm:$0xf] %vm9993_vm1, %v11106_v58  ;;  %v11104_v3 = vpack.c.bf16 %v9913_v54, %v9913_v54  ;;  %v9916_v34 = vmax.f32 %v9884_v46, %v9900_v24  ;;  %v9898_v2 = vmul.f32 0.1, %v9882_v13  ;;  %v9773_v44 = vadd.f32 %v9722_v8, %v9567_v36  ;;  %v9864_v62 = vpop.permute.xlu1 %9863 }
 0x8b0   : > { %v9887_v16 = vadd.f32 %v9834_v43, %v9775_v52  ;;  %v11451_v21 = vpop.f32.mrf.mxu1  ;;  %v9110_v57 = vadd.f32 %v16502_v37, %v8904_v26  ;;  %v9313_v41 = vadd.f32 %v15654_v40, %v9107_v50  ;;  %v9574_v24 = vadd.f32 %v15730_v4, %v9315_v55  ;;  %v9859_v50 = vpop.permute.xlu0 %9858 }
 0x8b1   : > { %9994 = vst.msk [vmem:[%s15748_s17] sm:$0xf] %vm9993_vm1, %v11104_v3  ;;  %v11107_v9 = vpack.c.bf16 %v9916_v34, %v9916_v34  ;;  %v9914_v7 = vmax.f32 %v9882_v13, %v9898_v2  ;;  %v9885_v49 = vadd.f32 %v15674_v6, %v9773_v44  ;;  %v9776_v45 = vadd.f32 %v11451_v21, %v9570_v42  ;;  %v16503_v6 = vld [vmem:[#allocation19_spill] sm:$0xff]  ;;  %v11435_v4 = vpop.f32.mrf.mxu0  ;;  %v16504_v2 = vld [vmem:[#allocation25_spill] sm:$0xff] }
 0x8b2   : > { %v9903_v43 = vmul.f32 0.1, %v9887_v16  ;;  %v9725_v17 = vpop.f32.mrf.mxu1  ;;  %v8905_v36 = vadd.f32 %v16503_v6, %v15710_v47  ;;  %v9318_v47 = vadd.f32 %v15658_v53, %v9112_v48  ;;  %v9572_v59 = vadd.f32 %v9535_v14, %v9313_v41 }
 0x8b3   : > { %9997 = vst.msk [vmem:[%s15748_s17 + $0xc] sm:$0xf] %vm9993_vm1, %v11107_v9  ;;  %v11105_v46 = vpack.c.bf16 %v9914_v7, %v9914_v7  ;;  %v9901_v63 = vmul.f32 0.1, %v9885_v49  ;;  %v9888_v39 = vadd.f32 %v9839_v20, %v9776_v45  ;;  %v9774_v38 = vadd.f32 %v9725_v17, %v9568_v1  ;;  %v9874_v55 = vpop.permute.xlu1 %9873 }
 0x8b4   : > { %v9919_v29 = vmax.f32 %v9887_v16, %v9903_v43  ;;  %v11454_v32 = vpop.f32.mrf.mxu1  ;;  %v9571_v20 = vadd.f32 %v15717_v27, %v9312_v15  ;;  %v9113_v44 = vadd.f32 %v16504_v2, %v8907_v5  ;;  %v9111_v48 = vadd.f32 %v16505_v10, %v8905_v36  ;;  %v9869_v18 = vpop.permute.xlu0 %9868 }
 0x8b5   : > { %9995 = vst.msk [vmem:[%s15748_s17 + $0x4] sm:$0xf] %vm9993_vm1, %v11105_v46  ;;  %v9917_v19 = vmax.f32 %v9885_v49, %v9901_v63  ;;  %v9904_v60 = vmul.f32 0.1, %v9888_v39  ;;  %v9886_v58 = vadd.f32 %v15713_v61, %v9774_v38  ;;  %v9779_v54 = vadd.f32 %v11454_v32, %v9573_v0  ;;  %v9551_v15 = vpop.f32.mrf.mxu0 }
 0x8b6   : > { %v11110_v22 = vpack.c.bf16 %v9919_v29, %v9919_v29  ;;  %v9738_v40 = vpop.f32.mrf.mxu1  ;;  %v9316_v61 = vadd.f32 %v15667_v11, %v9110_v57  ;;  %v9577_v14 = vadd.f32 %v11434_v28, %v9318_v47  ;;  %v9319_v7 = vadd.f32 %v15684_v31, %v9113_v44 }
 0x8b7   : > { %v11108_v13 = vpack.c.bf16 %v9917_v19, %v9917_v19  ;;  %v9920_v33 = vmax.f32 %v9888_v39, %v9904_v60  ;;  %v9902_v26 = vmul.f32 0.1, %v9886_v58  ;;  %v9891_v42 = vadd.f32 %v9854_v12, %v9779_v54 }
 0x8b8   : > { %10000 = vst.msk [vmem:[%s15748_s17 + $0x18] sm:$0xf] %vm9993_vm1, %v11110_v22  ;;  %v9777_v27 = vadd.f32 %v9738_v40, %v9571_v20  ;;  %v11455_v52 = vpop.f32.mrf.mxu1  ;;  %v9575_v49 = vadd.f32 %v9548_v56, %v9316_v61  ;;  %v9317_v45 = vadd.f32 %v15698_v25, %v9111_v48  ;;  %v9578_v39 = vadd.f32 %v11435_v4, %v9319_v7  ;;  %v9879_v56 = vpop.permute.xlu0 %9878 }
 0x8b9   : > { %9998 = vst.msk [vmem:[%s15748_s17 + $0x10] sm:$0xf] %vm9993_vm1, %v11108_v13  ;;  %v11111_v53 = vpack.c.bf16 %v9920_v33, %v9920_v33  ;;  %v9918_v8 = vmax.f32 %v9886_v58, %v9902_v26  ;;  %v9907_v3 = vmul.f32 0.1, %v9891_v42  ;;  %v9780_v34 = vadd.f32 %v11455_v52, %v9574_v24 }
 0x8ba   : > { %v9889_v35 = vadd.f32 %v15739_v30, %v9777_v27  ;;  %v9741_v11 = vpop.f32.mrf.mxu1  ;;  %v9576_v38 = vadd.f32 %v9551_v15, %v9317_v45 }
 0x8bb   : > { %10001 = vst.msk [vmem:[%s15748_s17 + $0x1c] sm:$0xf] %vm9993_vm1, %v11111_v53  ;;  %v11109_v1 = vpack.c.bf16 %v9918_v8, %v9918_v8  ;;  %v9923_v16 = vmax.f32 %v9891_v42, %v9907_v3  ;;  %v9892_v21 = vadd.f32 %v9859_v50, %v9780_v34  ;;  %v9778_v9 = vadd.f32 %v9741_v11, %v9572_v59 }
 0x8bc   : > { %v9905_v5 = vmul.f32 0.1, %v9889_v35  ;;  %v11458_v12 = vpop.f32.mrf.mxu1 }
 0x8bd   : > { %9999 = vst.msk [vmem:[%s15748_s17 + $0x14] sm:$0xf] %vm9993_vm1, %v11109_v1  ;;  %v11114_v30 = vpack.c.bf16 %v9923_v16, %v9923_v16  ;;  %v9908_v28 = vmul.f32 0.1, %v9892_v21  ;;  %v9890_v0 = vadd.f32 %v15760_v23, %v9778_v9  ;;  %v9783_v51 = vadd.f32 %v11458_v12, %v9577_v14 }
 0x8be   : > { %v9921_v43 = vmax.f32 %v9889_v35, %v9905_v5  ;;  %v9754_v17 = vpop.f32.mrf.mxu1 }
 0x8bf   : > { %10004 = vst.msk [vmem:[%s15748_s17 + $0x28] sm:$0xf] %vm9993_vm1, %v11114_v30  ;;  %v9924_v31 = vmax.f32 %v9892_v21, %v9908_v28  ;;  %v9906_v25 = vmul.f32 0.1, %v9890_v0  ;;  %v9895_v46 = vadd.f32 %v9874_v55, %v9783_v51  ;;  %v9781_v63 = vadd.f32 %v9754_v17, %v9575_v49 }
 0x8c0   : > { %v11112_v37 = vpack.c.bf16 %v9921_v43, %v9921_v43  ;;  %v11459_v57 = vpop.f32.mrf.mxu1 }
 0x8c1   : > { %v11115_v6 = vpack.c.bf16 %v9924_v31, %v9924_v31  ;;  %v9922_v36 = vmax.f32 %v9890_v0, %v9906_v25  ;;  %v9911_v23 = vmul.f32 0.1, %v9895_v46  ;;  %v9893_v41 = vadd.f32 %v9864_v62, %v9781_v63 }
 0x8c2   : > { %10002 = vst.msk [vmem:[%s15748_s17 + $0x20] sm:$0xf] %vm9993_vm1, %v11112_v37  ;;  %v9784_v29 = vadd.f32 %v11459_v57, %v9578_v39  ;;  %v9757_v32 = vpop.f32.mrf.mxu1 }
 0x8c3   : > { %10005 = vst.msk [vmem:[%s15748_s17 + $0x2c] sm:$0xf] %vm9993_vm1, %v11115_v6  ;;  %v11113_v19 = vpack.c.bf16 %v9922_v36, %v9922_v36  ;;  %v9927_v60 = vmax.f32 %v9895_v46, %v9911_v23  ;;  %v9909_v58 = vmul.f32 0.1, %v9893_v41  ;;  %v9782_v54 = vadd.f32 %v9757_v32, %v9576_v38 }
 0x8c4   : > { %v9896_v20 = vadd.f32 %v9879_v56, %v9784_v29 }
 0x8c5   : > { %10003 = vst.msk [vmem:[%s15748_s17 + $0x24] sm:$0xf] %vm9993_vm1, %v11113_v19  ;;  %v11118_v24 = vpack.c.bf16 %v9927_v60, %v9927_v60  ;;  %v9925_v47 = vmax.f32 %v9893_v41, %v9909_v58  ;;  %v9894_v22 = vadd.f32 %v9869_v18, %v9782_v54 }
 0x8c6   : > { %v9912_v40 = vmul.f32 0.1, %v9896_v20 }
 0x8c7   : > { %10008 = vst.msk [vmem:[%s15748_s17 + $0x38] sm:$0xf] %vm9993_vm1, %v11118_v24  ;;  %v11116_v50 = vpack.c.bf16 %v9925_v47, %v9925_v47  ;;  %v9910_v13 = vmul.f32 0.1, %v9894_v22 }
 0x8c8   : > { %v9928_v33 = vmax.f32 %v9896_v20, %v9912_v40 }
 0x8c9   : > { %10006 = vst.msk [vmem:[%s15748_s17 + $0x30] sm:$0xf] %vm9993_vm1, %v11116_v50  ;;  %v9926_v26 = vmax.f32 %v9894_v22, %v9910_v13 }
 0x8ca   : > { %v11119_v42 = vpack.c.bf16 %v9928_v33, %v9928_v33 }
 0x8cb   : > { %v11117_v62 = vpack.c.bf16 %v9926_v26, %v9926_v26 }
 0x8cc   : > { %10009 = vst.msk [vmem:[%s15748_s17 + $0x3c] sm:$0xf] %vm9993_vm1, %v11119_v42 }
 0x8cd   : > { %10007 = vst.msk [vmem:[%s15748_s17 + $0x34] sm:$0xf] %vm9993_vm1, %v11117_v62 }
 0x8ce PF: > { %s20_s30 = sadd.s32 1, %s11766_s30  }
 0x8cf   : > { %p17_p1 = scmp.ge.s32.totalorder %s20_s30, 4  }
 0x8d1   :  { %19 = sbr.rel (!%p17_p1) target bundleno = 1 (0x1), region = 107 }
 0x8d6   :  { %10031 = vsyncpa [#allocation5], 1 }
 0x8d7   :  { %10033 = vsyncpa [#allocation5 + $0x1], 1 }

</bundles_post_ra>
